<compile_context>
chip_gen: v6e
topology: v6e:2x2x1
jax: 0.10.0
libtpu: 0.0.40
codegen_flags: <defaults>
</compile_context>

<pallas_src>
import functools

import jax
import jax.numpy as jnp
from jax.experimental import pallas as pl
from jax.experimental.pallas import tpu as pltpu

LOG_STD_MAX = 2.0
LOG_STD_MIN = -5.0

LANE = 128
OBS_OUT = 1000                # obs_fc1 output features (PyTorch)
OBS_PAD = 1024                # padded to a multiple of 128
ACT_OUT = 128                 # action_fc1 output features
D = OBS_OUT + ACT_OUT         # 1128 = reference residual width
D_PAD = OBS_PAD + ACT_OUT     # 1152 = 9 * 128, lane-dense residual width
HID = 256                     # fc2 output width

KT_RES = 384                  # K-tile over the residual width (1152 / 384 = 3)
KT_HEAD = 384                 # K-tile for the fc2 reduction
NK_RES = D_PAD // KT_RES
NK_HEAD = D_PAD // KT_HEAD


def _full_spec(shape):
    nd = len(shape)
    return pl.BlockSpec(shape, lambda *_: (0,) * nd)


# ----------------------------- conv matmul (small, f32) ---------------------

def _linear_kernel(x_ref, w_ref, b_ref, o_ref, *, relu):
    y = jnp.dot(x_ref[...], w_ref[...], preferred_element_type=jnp.float32)
    y = y + b_ref[...]
    if relu:
        y = jnp.maximum(y, 0.0)
    o_ref[...] = y


def conv_matmul(x, w, b, relu):
    M, K = x.shape
    N = w.shape[1]
    return pl.pallas_call(
        functools.partial(_linear_kernel, relu=relu),
        out_shape=jax.ShapeDtypeStruct((M, N), jnp.float32),
        grid=(1,),
        in_specs=[_full_spec((M, K)), _full_spec((K, N)), _full_spec((1, N))],
        out_specs=_full_spec((M, N)),
    )(x, w, b)


# ---------------- fused obs_fc1 + action_fc1 + concat (K-tiled) -------------

def _input_stage_kernel(flat_ref, xact_ref, wobs_ref, bobs_ref, wact_ref,
                        bact_ref, o_ref, acc_ref):
    k = pl.program_id(0)

    @pl.when(k == 0)
    def _():
        acc_ref[...] = jnp.zeros_like(acc_ref)

    acc_ref[...] += jnp.dot(flat_ref[...].astype(jnp.bfloat16), wobs_ref[...],
                            preferred_element_type=jnp.float32)

    @pl.when(k == pl.num_programs(0) - 1)
    def _():
        # obs_fc1 has NO activation in the reference model.
        o_ref[:, :OBS_PAD] = acc_ref[...] + bobs_ref[...]
        a = jnp.dot(xact_ref[...].astype(jnp.bfloat16), wact_ref[...],
                    preferred_element_type=jnp.float32) + bact_ref[...]
        o_ref[:, OBS_PAD:] = jnp.maximum(a, 0.0)          # relu(action_fc1)


def input_stage(flat, xact, wobs, bobs, wact, bact, kt):
    m, kdim = flat.shape
    return pl.pallas_call(
        _input_stage_kernel,
        out_shape=jax.ShapeDtypeStruct((m, D_PAD), jnp.float32),
        grid=(kdim // kt,),
        in_specs=[
            pl.BlockSpec((m, kt), lambda k: (0, k)),
            pl.BlockSpec((m, LANE), lambda k: (0, 0)),
            pl.BlockSpec((kt, OBS_PAD), lambda k: (k, 0)),
            pl.BlockSpec((1, OBS_PAD), lambda k: (0, 0)),
            pl.BlockSpec((LANE, ACT_OUT), lambda k: (0, 0)),
            pl.BlockSpec((1, ACT_OUT), lambda k: (0, 0)),
        ],
        out_specs=pl.BlockSpec((m, D_PAD), lambda k: (0, 0)),
        scratch_shapes=[pltpu.VMEM((m, OBS_PAD), jnp.float32)],
        compiler_params=pltpu.CompilerParams(dimension_semantics=("arbitrary",)),
    )(flat, xact, wobs, bobs, wact, bact)


# -------- both residual blocks fused, weights streamed in (384,1152) tiles --

def _resblocks_kernel(x_ref, w_ref, b_ref, o_ref, xres_ref, h_ref, acc_ref):
    blk = pl.program_id(0)
    s = pl.program_id(1)          # 0: fc1, 1: fc2 of the current block
    k = pl.program_id(2)
    nk = pl.num_programs(2)

    @pl.when((blk == 0) & (s == 0) & (k == 0))
    def _():
        xres_ref[...] = x_ref[...]
        h_ref[...] = jnp.zeros_like(h_ref)

    @pl.when(k == 0)
    def _():
        acc_ref[...] = jnp.zeros_like(acc_ref)

    col = pl.multiple_of(k * KT_RES, KT_RES)
    src = jnp.where(s == 0,
                    xres_ref[:, pl.ds(col, KT_RES)],
                    h_ref[:, pl.ds(col, KT_RES)]).astype(jnp.bfloat16)
    acc_ref[...] += jnp.dot(src, w_ref[0], preferred_element_type=jnp.float32)

    @pl.when((k == nk - 1) & (s == 0))
    def _():
        h_ref[...] = jnp.maximum(acc_ref[...] + b_ref[0], 0.0)

    @pl.when((k == nk - 1) & (s == 1))
    def _():
        y = jnp.maximum(acc_ref[...] + b_ref[0] + xres_ref[...], 0.0)
        xres_ref[...] = y
        o_ref[...] = y


def residual_trunk(x, w_blk, b_blk):
    m = x.shape[0]
    nblocks = w_blk.shape[0] // 2
    return pl.pallas_call(
        _resblocks_kernel,
        out_shape=jax.ShapeDtypeStruct((m, D_PAD), jnp.float32),
        grid=(nblocks, 2, NK_RES),
        in_specs=[
            pl.BlockSpec((m, D_PAD), lambda b, s, k: (0, 0)),
            pl.BlockSpec((1, KT_RES, D_PAD), lambda b, s, k: (2 * b + s, k, 0)),
            pl.BlockSpec((1, 1, D_PAD), lambda b, s, k: (2 * b + s, 0, 0)),
        ],
        out_specs=pl.BlockSpec((m, D_PAD), lambda b, s, k: (0, 0)),
        scratch_shapes=[pltpu.VMEM((m, D_PAD), jnp.float32),
                        pltpu.VMEM((m, D_PAD), jnp.float32),
                        pltpu.VMEM((m, D_PAD), jnp.float32)],
        compiler_params=pltpu.CompilerParams(
            dimension_semantics=("arbitrary", "arbitrary", "arbitrary")),
    )(x, w_blk, b_blk)


# ------------------- fused fc2 + (mean | logstd) head -----------------------

def _head_kernel(x_ref, wfc2_ref, bfc2_ref, whead_ref, bhead_ref, o_ref,
                 acc_ref, *, act_dim):
    k = pl.program_id(0)

    @pl.when(k == 0)
    def _():
        acc_ref[...] = jnp.zeros_like(acc_ref)

    acc_ref[...] += jnp.dot(x_ref[...].astype(jnp.bfloat16), wfc2_ref[...],
                            preferred_element_type=jnp.float32)

    @pl.when(k == pl.num_programs(0) - 1)
    def _():
        h = jnp.maximum(acc_ref[...] + bfc2_ref[...], 0.0)        # relu(fc2)
        z = jnp.dot(h.astype(jnp.bfloat16), whead_ref[...],
                    preferred_element_type=jnp.float32) + bhead_ref[...]
        ls = jnp.tanh(z)
        ls = LOG_STD_MIN + 0.5 * (LOG_STD_MAX - LOG_STD_MIN) * (ls + 1.0)
        cols = jax.lax.broadcasted_iota(jnp.int32, z.shape, 1)
        o_ref[...] = jnp.where(cols < act_dim, z, ls)   # [mean | transformed logstd]


def head_stage(x, wfc2, bfc2, whead, bhead, act_dim):
    m = x.shape[0]
    two_a = whead.shape[1]
    return pl.pallas_call(
        functools.partial(_head_kernel, act_dim=act_dim),
        out_shape=jax.ShapeDtypeStruct((m, two_a), jnp.float32),
        grid=(NK_HEAD,),
        in_specs=[
            pl.BlockSpec((m, KT_HEAD), lambda k: (0, k)),
            pl.BlockSpec((KT_HEAD, HID), lambda k: (k, 0)),
            pl.BlockSpec((1, HID), lambda k: (0, 0)),
            pl.BlockSpec((HID, two_a), lambda k: (0, 0)),
            pl.BlockSpec((1, two_a), lambda k: (0, 0)),
        ],
        out_specs=pl.BlockSpec((m, two_a), lambda k: (0, 0)),
        scratch_shapes=[pltpu.VMEM((m, HID), jnp.float32)],
        compiler_params=pltpu.CompilerParams(dimension_semantics=("arbitrary",)),
    )(x, wfc2, bfc2, whead, bhead)


# ------------------------------- JAX glue ----------------------------------

def im2col(x_nhwc, ksize, stride, pad):
    """Extract conv patches; returns (N*Ho*Wo, ksize*ksize*C), Ho, Wo."""
    n, h, w, c = x_nhwc.shape
    xp = jnp.pad(x_nhwc, ((0, 0), (pad, pad), (pad, pad), (0, 0)))
    ho = (h + 2 * pad - ksize) // stride + 1
    wo = (w + 2 * pad - ksize) // stride + 1
    patches = []
    for ki in range(ksize):
        for kj in range(ksize):
            patches.append(xp[:, ki:ki + stride * ho:stride,
                              kj:kj + stride * wo:stride, :])
    cols = jnp.stack(patches, axis=3)          # (N, Ho, Wo, K*K, C)
    return cols.reshape(n * ho * wo, ksize * ksize * c), ho, wo


def _uniform(key, shape, fan_in):
    bound = 1.0 / jnp.sqrt(float(fan_in))
    return jax.random.uniform(key, shape, jnp.float32, -bound, bound)


def init_params(key, obs_hw=16, act_dim=4, block_num=2):
    """Weights at reference (PyTorch) shapes, stored as (in, out)."""
    keys = iter(jax.random.split(key, 64))
    p = {}

    def linear(in_f, out_f):
        return (_uniform(next(keys), (in_f, out_f), in_f),
                _uniform(next(keys), (out_f,), in_f))

    p['conv1_w'], p['conv1_b'] = linear(5 * 5 * 3, 32)
    p['conv2_w'], p['conv2_b'] = linear(5 * 5 * 32, 64)
    p['conv3_w'], p['conv3_b'] = linear(5 * 5 * 64, 128)

    h1 = obs_hw                       # conv1: stride 1
    h2 = (h1 + 4 - 5) // 2 + 1        # conv2: stride 2
    h3 = (h2 + 4 - 5) // 2 + 1        # conv3: stride 2
    n_flatten = 128 * h3 * h3

    p['obs_fc1_w'], p['obs_fc1_b'] = linear(n_flatten, OBS_OUT)
    p['act_fc1_w'], p['act_fc1_b'] = linear(1, ACT_OUT)

    p['blocks'] = []
    for _ in range(block_num):
        w1, b1 = linear(D, D)
        w2, b2 = linear(D, D)
        p['blocks'].append((w1, b1, w2, b2))

    p['fc2_w'], p['fc2_b'] = linear(D, HID)
    p['mean_w'], p['mean_b'] = linear(HID, act_dim)
    p['logstd_w'], p['logstd_b'] = linear(HID, act_dim)
    return p


def _insert_zeros(a, axis, pos, count):
    """Insert `count` zero rows/cols at position `pos` along `axis`."""
    if count == 0:
        return a
    left = jax.lax.slice_in_dim(a, 0, pos, axis=axis)
    right = jax.lax.slice_in_dim(a, pos, a.shape[axis], axis=axis)
    zshape = list(a.shape)
    zshape[axis] = count
    return jnp.concatenate([left, jnp.zeros(zshape, a.dtype), right], axis=axis)


def prepare_inference_params(p):
    """Pad to lane-dense shapes (zeros => exact semantics) and cast weights to bf16."""
    q = {}
    for name in ('conv1', 'conv2', 'conv3'):
        q[name + '_w'] = p[name + '_w']
        q[name + '_b'] = p[name + '_b'].reshape(1, -1)

    pad = OBS_PAD - OBS_OUT   # 24 zero features inserted after the obs block

    q['w_obs'] = _insert_zeros(p['obs_fc1_w'], 1, OBS_OUT, pad).astype(jnp.bfloat16)
    q['b_obs'] = _insert_zeros(p['obs_fc1_b'], 0, OBS_OUT, pad).reshape(1, OBS_PAD)

    w_act = jnp.zeros((LANE, ACT_OUT), jnp.float32).at[0].set(p['act_fc1_w'][0])
    q['w_act'] = w_act.astype(jnp.bfloat16)        # K padded 1 -> 128 with zero rows
    q['b_act'] = p['act_fc1_b'].reshape(1, ACT_OUT)

    ws, bs = [], []
    for (w1, b1, w2, b2) in p['blocks']:
        for w, b in ((w1, b1), (w2, b2)):
            wp = _insert_zeros(_insert_zeros(w, 0, OBS_OUT, pad), 1, OBS_OUT, pad)
            ws.append(wp.astype(jnp.bfloat16))
            bs.append(_insert_zeros(b, 0, OBS_OUT, pad))
    q['w_blk'] = jnp.stack(ws)                                # (2*nb, 1152, 1152) bf16
    q['b_blk'] = jnp.stack(bs).reshape(len(bs), 1, D_PAD)     # (2*nb, 1, 1152) f32

    q['w_fc2'] = _insert_zeros(p['fc2_w'], 0, OBS_OUT, pad).astype(jnp.bfloat16)
    q['b_fc2'] = p['fc2_b'].reshape(1, HID)

    q['w_head'] = jnp.concatenate([p['mean_w'], p['logstd_w']], axis=1).astype(jnp.bfloat16)
    q['b_head'] = jnp.concatenate([p['mean_b'], p['logstd_b']]).reshape(1, -1)
    return q


def ra_actor_world_forward(q, x_obs_nchw, x_act):
    # x_obs: NCHW image, x_act: (B, 1)
    n = x_obs_nchw.shape[0]
    x = jnp.transpose(x_obs_nchw, (0, 2, 3, 1)).astype(jnp.float32) / 255.0

    # CNN: conv(3->32,s1) relu, conv(32->64,s2) relu, conv(64->128,s2) relu
    cols, ho, wo = im2col(x, 5, 1, 2)
    h = conv_matmul(cols, q['conv1_w'], q['conv1_b'], relu=True).reshape(n, ho, wo, 32)
    cols, ho, wo = im2col(h, 5, 2, 2)
    h = conv_matmul(cols, q['conv2_w'], q['conv2_b'], relu=True).reshape(n, ho, wo, 64)
    cols, ho, wo = im2col(h, 5, 2, 2)
    h = conv_matmul(cols, q['conv3_w'], q['conv3_b'], relu=True).reshape(n, ho, wo, 128)

    # Flatten in PyTorch (C, H, W) order
    flat = jnp.transpose(h, (0, 3, 1, 2)).reshape(n, -1)
    n_flatten = flat.shape[1]

    # Pad rows to a full sublane group (>=8) for the FC trunk.
    m_pad = max(8, ((n + 7) // 8) * 8)
    flat_p = jnp.zeros((m_pad, n_flatten), jnp.float32).at[:n].set(flat)
    xact_p = jnp.zeros((m_pad, LANE), jnp.float32).at[:n, 0:1].set(
        x_act.astype(jnp.float32))

    # n_flatten is always a multiple of 128 (128 * h3 * w3); pick the largest K-tile.
    if n_flatten % 512 == 0:
        kt = 512
    elif n_flatten % 256 == 0:
        kt = 256
    else:
        kt = 128
    xcat = input_stage(flat_p, xact_p, q['w_obs'], q['b_obs'],
                       q['w_act'], q['b_act'], kt)          # (m_pad, 1152)
    xcat = residual_trunk(xcat, q['w_blk'], q['b_blk'])     # (m_pad, 1152)

    act_dim = q['w_head'].shape[1] // 2
    z = head_stage(xcat, q['w_fc2'], q['b_fc2'], q['w_head'], q['b_head'], act_dim)
    mean = z[:n, :act_dim]
    log_std = z[:n, act_dim:]
    # TODO(synk): get_action (Normal rsample / log_prob / action_scale rescale)
    # is not implemented; this is the forward() pass only.
    return mean, log_std


if __name__ == "__main__":
    key = jax.random.PRNGKey(0)
    k_param, k_obs, k_act = jax.random.split(key, 3)

    B, C, HW = 2, 3, 16          # observation space: 3 x 16 x 16 image
    ACT_DIM = 4                  # suggested_reward_space.shape == (4,)

    params = init_params(k_param, obs_hw=HW, act_dim=ACT_DIM, block_num=2)
    infer_params = prepare_inference_params(params)

    x_obs = jax.random.uniform(k_obs, (B, C, HW, HW), jnp.float32, 0.0, 255.0)
    x_act = jax.random.uniform(k_act, (B, 1), jnp.float32, -1.0, 1.0)

    fwd = jax.jit(ra_actor_world_forward)
    mean, log_std = jax.block_until_ready(fwd(infer_params, x_obs, x_act))

    assert mean.shape == (B, ACT_DIM) and log_std.shape == (B, ACT_DIM)
    assert bool(jnp.all(jnp.isfinite(mean))) and bool(jnp.all(jnp.isfinite(log_std)))
    assert bool(jnp.all(log_std >= LOG_STD_MIN)) and bool(jnp.all(log_std <= LOG_STD_MAX))
    print("KERNEL_OK")
</pallas_src>

<mosaic_0001>
module attributes {stable_mosaic.version = 11 : i64} {
  func.func @_linear_kernel(%arg0: i32, %arg1: memref<512x75xf32, #tpu.memory_space<vmem>>, %arg2: memref<75x32xf32, #tpu.memory_space<vmem>>, %arg3: memref<1x32xf32, #tpu.memory_space<vmem>>, %arg4: memref<512x32xf32, #tpu.memory_space<vmem>>) attributes {dimension_semantics = [#tpu.dimension_semantics<arbitrary>], iteration_bounds = array<i64: 1>, scalar_prefetch = 0 : i64, scratch_operands = 0 : i64, tpu.core_type = #tpu.core_type<tc>, window_params = [{pipeline_mode = #tpu.pipeline_mode<synchronous>, transform_indices = @transform_0, window_bounds = array<i64: 512, 75>}, {pipeline_mode = #tpu.pipeline_mode<synchronous>, transform_indices = @transform_1, window_bounds = array<i64: 75, 32>}, {pipeline_mode = #tpu.pipeline_mode<synchronous>, transform_indices = @transform_2, window_bounds = array<i64: 1, 32>}, {pipeline_mode = #tpu.pipeline_mode<synchronous>, transform_indices = @transform_3, window_bounds = array<i64: 512, 32>}]} {
    %c0 = arith.constant 0 : index
    %c0_0 = arith.constant 0 : index
    %0 = vector.load %arg1[%c0, %c0_0] : memref<512x75xf32, #tpu.memory_space<vmem>>, vector<512x75xf32>
    %c0_1 = arith.constant 0 : index
    %c0_2 = arith.constant 0 : index
    %1 = vector.load %arg2[%c0_1, %c0_2] : memref<75x32xf32, #tpu.memory_space<vmem>>, vector<75x32xf32>
    %cst = arith.constant dense<0.000000e+00> : vector<512x32xf32>
    %2 = tpu.matmul %0, %1, %cst {dimension_numbers = #tpu.dot_dimension_numbers<[1], [0], [0], [1], [0, 0, 1, 1], [], []>} : vector<512x75xf32>, vector<75x32xf32>, vector<512x32xf32> -> vector<512x32xf32>
    %c0_3 = arith.constant 0 : index
    %c0_4 = arith.constant 0 : index
    %3 = vector.load %arg3[%c0_3, %c0_4] : memref<1x32xf32, #tpu.memory_space<vmem>>, vector<1x32xf32>
    %4 = vector.broadcast %3 : vector<1x32xf32> to vector<512x32xf32>
    %5 = arith.addf %2, %4 : vector<512x32xf32>
    %cst_5 = arith.constant 0.000000e+00 : f32
    %6 = vector.broadcast %cst_5 : f32 to vector<512x32xf32>
    %7 = arith.maximumf %5, %6 : vector<512x32xf32>
    %c0_6 = arith.constant 0 : index
    %c0_7 = arith.constant 0 : index
    %8 = vector.load %arg4[%c0_6, %c0_7] : memref<512x32xf32, #tpu.memory_space<vmem>>, vector<512x32xf32>
    tpu.vector_store %arg4[%c0_6, %c0_7], %7 {strides = array<i32>} : memref<512x32xf32, #tpu.memory_space<vmem>>, vector<512x32xf32>,
    return
  }
  func.func @transform_0(%arg0: i32) -> (i32, i32) {
    %c0_i32 = arith.constant 0 : i32
    %c0_i32_0 = arith.constant 0 : i32
    %c0_i32_1 = arith.constant 0 : i32
    return %c0_i32, %c0_i32_0 : i32, i32
  }
  func.func @transform_1(%arg0: i32) -> (i32, i32) {
    %c0_i32 = arith.constant 0 : i32
    %c0_i32_0 = arith.constant 0 : i32
    %c0_i32_1 = arith.constant 0 : i32
    return %c0_i32, %c0_i32_0 : i32, i32
  }
  func.func @transform_2(%arg0: i32) -> (i32, i32) {
    %c0_i32 = arith.constant 0 : i32
    %c0_i32_0 = arith.constant 0 : i32
    %c0_i32_1 = arith.constant 0 : i32
    return %c0_i32, %c0_i32_0 : i32, i32
  }
  func.func @transform_3(%arg0: i32) -> (i32, i32) {
    %c0_i32 = arith.constant 0 : i32
    %c0_i32_0 = arith.constant 0 : i32
    %c0_i32_1 = arith.constant 0 : i32
    return %c0_i32, %c0_i32_0 : i32, i32
  }
}

module attributes {stable_mosaic.version = 11 : i64} {
  func.func @_linear_kernel(%arg0: i32, %arg1: memref<128x800xf32, #tpu.memory_space<vmem>>, %arg2: memref<800x64xf32, #tpu.memory_space<vmem>>, %arg3: memref<1x64xf32, #tpu.memory_space<vmem>>, %arg4: memref<128x64xf32, #tpu.memory_space<vmem>>) attributes {dimension_semantics = [#tpu.dimension_semantics<arbitrary>], iteration_bounds = array<i64: 1>, scalar_prefetch = 0 : i64, scratch_operands = 0 : i64, tpu.core_type = #tpu.core_type<tc>, window_params = [{pipeline_mode = #tpu.pipeline_mode<synchronous>, transform_indices = @transform_0, window_bounds = array<i64: 128, 800>}, {pipeline_mode = #tpu.pipeline_mode<synchronous>, transform_indices = @transform_1, window_bounds = array<i64: 800, 64>}, {pipeline_mode = #tpu.pipeline_mode<synchronous>, transform_indices = @transform_2, window_bounds = array<i64: 1, 64>}, {pipeline_mode = #tpu.pipeline_mode<synchronous>, transform_indices = @transform_3, window_bounds = array<i64: 128, 64>}]} {
    %c0 = arith.constant 0 : index
    %c0_0 = arith.constant 0 : index
    %0 = vector.load %arg1[%c0, %c0_0] : memref<128x800xf32, #tpu.memory_space<vmem>>, vector<128x800xf32>
    %c0_1 = arith.constant 0 : index
    %c0_2 = arith.constant 0 : index
    %1 = vector.load %arg2[%c0_1, %c0_2] : memref<800x64xf32, #tpu.memory_space<vmem>>, vector<800x64xf32>
    %cst = arith.constant dense<0.000000e+00> : vector<128x64xf32>
    %2 = tpu.matmul %0, %1, %cst {dimension_numbers = #tpu.dot_dimension_numbers<[1], [0], [0], [1], [0, 0, 1, 1], [], []>} : vector<128x800xf32>, vector<800x64xf32>, vector<128x64xf32> -> vector<128x64xf32>
    %c0_3 = arith.constant 0 : index
    %c0_4 = arith.constant 0 : index
    %3 = vector.load %arg3[%c0_3, %c0_4] : memref<1x64xf32, #tpu.memory_space<vmem>>, vector<1x64xf32>
    %4 = vector.broadcast %3 : vector<1x64xf32> to vector<128x64xf32>
    %5 = arith.addf %2, %4 : vector<128x64xf32>
    %cst_5 = arith.constant 0.000000e+00 : f32
    %6 = vector.broadcast %cst_5 : f32 to vector<128x64xf32>
    %7 = arith.maximumf %5, %6 : vector<128x64xf32>
    %c0_6 = arith.constant 0 : index
    %c0_7 = arith.constant 0 : index
    %8 = vector.load %arg4[%c0_6, %c0_7] : memref<128x64xf32, #tpu.memory_space<vmem>>, vector<128x64xf32>
    tpu.vector_store %arg4[%c0_6, %c0_7], %7 {strides = array<i32>} : memref<128x64xf32, #tpu.memory_space<vmem>>, vector<128x64xf32>,
    return
  }
  func.func @transform_0(%arg0: i32) -> (i32, i32) {
    %c0_i32 = arith.constant 0 : i32
    %c0_i32_0 = arith.constant 0 : i32
    %c0_i32_1 = arith.constant 0 : i32
    return %c0_i32, %c0_i32_0 : i32, i32
  }
  func.func @transform_1(%arg0: i32) -> (i32, i32) {
    %c0_i32 = arith.constant 0 : i32
    %c0_i32_0 = arith.constant 0 : i32
    %c0_i32_1 = arith.constant 0 : i32
    return %c0_i32, %c0_i32_0 : i32, i32
  }
  func.func @transform_2(%arg0: i32) -> (i32, i32) {
    %c0_i32 = arith.constant 0 : i32
    %c0_i32_0 = arith.constant 0 : i32
    %c0_i32_1 = arith.constant 0 : i32
    return %c0_i32, %c0_i32_0 : i32, i32
  }
  func.func @transform_3(%arg0: i32) -> (i32, i32) {
    %c0_i32 = arith.constant 0 : i32
    %c0_i32_0 = arith.constant 0 : i32
    %c0_i32_1 = arith.constant 0 : i32
    return %c0_i32, %c0_i32_0 : i32, i32
  }
}

module attributes {stable_mosaic.version = 11 : i64} {
  func.func @_linear_kernel(%arg0: i32, %arg1: memref<32x1600xf32, #tpu.memory_space<vmem>>, %arg2: memref<1600x128xf32, #tpu.memory_space<vmem>>, %arg3: memref<1x128xf32, #tpu.memory_space<vmem>>, %arg4: memref<32x128xf32, #tpu.memory_space<vmem>>) attributes {dimension_semantics = [#tpu.dimension_semantics<arbitrary>], iteration_bounds = array<i64: 1>, scalar_prefetch = 0 : i64, scratch_operands = 0 : i64, tpu.core_type = #tpu.core_type<tc>, window_params = [{pipeline_mode = #tpu.pipeline_mode<synchronous>, transform_indices = @transform_0, window_bounds = array<i64: 32, 1600>}, {pipeline_mode = #tpu.pipeline_mode<synchronous>, transform_indices = @transform_1, window_bounds = array<i64: 1600, 128>}, {pipeline_mode = #tpu.pipeline_mode<synchronous>, transform_indices = @transform_2, window_bounds = array<i64: 1, 128>}, {pipeline_mode = #tpu.pipeline_mode<synchronous>, transform_indices = @transform_3, window_bounds = array<i64: 32, 128>}]} {
    %c0 = arith.constant 0 : index
    %c0_0 = arith.constant 0 : index
    %0 = vector.load %arg1[%c0, %c0_0] : memref<32x1600xf32, #tpu.memory_space<vmem>>, vector<32x1600xf32>
    %c0_1 = arith.constant 0 : index
    %c0_2 = arith.constant 0 : index
    %1 = vector.load %arg2[%c0_1, %c0_2] : memref<1600x128xf32, #tpu.memory_space<vmem>>, vector<1600x128xf32>
    %cst = arith.constant dense<0.000000e+00> : vector<32x128xf32>
    %2 = tpu.matmul %0, %1, %cst {dimension_numbers = #tpu.dot_dimension_numbers<[1], [0], [0], [1], [0, 0, 1, 1], [], []>} : vector<32x1600xf32>, vector<1600x128xf32>, vector<32x128xf32> -> vector<32x128xf32>
    %c0_3 = arith.constant 0 : index
    %c0_4 = arith.constant 0 : index
    %3 = vector.load %arg3[%c0_3, %c0_4] : memref<1x128xf32, #tpu.memory_space<vmem>>, vector<1x128xf32>
    %4 = vector.broadcast %3 : vector<1x128xf32> to vector<32x128xf32>
    %5 = arith.addf %2, %4 : vector<32x128xf32>
    %cst_5 = arith.constant 0.000000e+00 : f32
    %6 = vector.broadcast %cst_5 : f32 to vector<32x128xf32>
    %7 = arith.maximumf %5, %6 : vector<32x128xf32>
    %c0_6 = arith.constant 0 : index
    %c0_7 = arith.constant 0 : index
    %8 = vector.load %arg4[%c0_6, %c0_7] : memref<32x128xf32, #tpu.memory_space<vmem>>, vector<32x128xf32>
    tpu.vector_store %arg4[%c0_6, %c0_7], %7 {strides = array<i32>} : memref<32x128xf32, #tpu.memory_space<vmem>>, vector<32x128xf32>,
    return
  }
  func.func @transform_0(%arg0: i32) -> (i32, i32) {
    %c0_i32 = arith.constant 0 : i32
    %c0_i32_0 = arith.constant 0 : i32
    %c0_i32_1 = arith.constant 0 : i32
    return %c0_i32, %c0_i32_0 : i32, i32
  }
  func.func @transform_1(%arg0: i32) -> (i32, i32) {
    %c0_i32 = arith.constant 0 : i32
    %c0_i32_0 = arith.constant 0 : i32
    %c0_i32_1 = arith.constant 0 : i32
    return %c0_i32, %c0_i32_0 : i32, i32
  }
  func.func @transform_2(%arg0: i32) -> (i32, i32) {
    %c0_i32 = arith.constant 0 : i32
    %c0_i32_0 = arith.constant 0 : i32
    %c0_i32_1 = arith.constant 0 : i32
    return %c0_i32, %c0_i32_0 : i32, i32
  }
  func.func @transform_3(%arg0: i32) -> (i32, i32) {
    %c0_i32 = arith.constant 0 : i32
    %c0_i32_0 = arith.constant 0 : i32
    %c0_i32_1 = arith.constant 0 : i32
    return %c0_i32, %c0_i32_0 : i32, i32
  }
}

module attributes {stable_mosaic.version = 11 : i64} {
  func.func @_input_stage_kernel(%arg0: i32, %arg1: memref<8x512xf32, #tpu.memory_space<vmem>>, %arg2: memref<8x128xf32, #tpu.memory_space<vmem>>, %arg3: memref<512x1024xbf16, #tpu.memory_space<vmem>>, %arg4: memref<1x1024xf32, #tpu.memory_space<vmem>>, %arg5: memref<128x128xbf16, #tpu.memory_space<vmem>>, %arg6: memref<1x128xf32, #tpu.memory_space<vmem>>, %arg7: memref<8x1152xf32, #tpu.memory_space<vmem>>, %arg8: memref<8x1024xf32, #tpu.memory_space<vmem>>) attributes {dimension_semantics = [#tpu.dimension_semantics<arbitrary>], iteration_bounds = array<i64: 4>, scalar_prefetch = 0 : i64, scratch_operands = 1 : i64, tpu.core_type = #tpu.core_type<tc>, window_params = [{transform_indices = @transform_0, window_bounds = array<i64: 8, 512>}, {pipeline_mode = #tpu.pipeline_mode<synchronous>, transform_indices = @transform_1, window_bounds = array<i64: 8, 128>}, {transform_indices = @transform_2, window_bounds = array<i64: 512, 1024>}, {pipeline_mode = #tpu.pipeline_mode<synchronous>, transform_indices = @transform_3, window_bounds = array<i64: 1, 1024>}, {pipeline_mode = #tpu.pipeline_mode<synchronous>, transform_indices = @transform_4, window_bounds = array<i64: 128, 128>}, {pipeline_mode = #tpu.pipeline_mode<synchronous>, transform_indices = @transform_5, window_bounds = array<i64: 1, 128>}, {pipeline_mode = #tpu.pipeline_mode<synchronous>, transform_indices = @transform_6, window_bounds = array<i64: 8, 1152>}]} {
    %c0_i32 = arith.constant 0 : i32
    %0 = arith.cmpi eq, %arg0, %c0_i32 : i32
    %1 = arith.extui %0 : i1 to i32
    %c0_i32_0 = arith.constant 0 : i32
    %2 = arith.cmpi ne, %1, %c0_i32_0 : i32
    scf.if %2 {
      %cst_9 = arith.constant 0.000000e+00 : f32
      %13 = vector.broadcast %cst_9 : f32 to vector<8x1024xf32>
      %c0_10 = arith.constant 0 : index
      %c0_11 = arith.constant 0 : index
      %14 = vector.load %arg8[%c0_10, %c0_11] : memref<8x1024xf32, #tpu.memory_space<vmem>>, vector<8x1024xf32>
      tpu.vector_store %arg8[%c0_10, %c0_11], %13 {strides = array<i32>} : memref<8x1024xf32, #tpu.memory_space<vmem>>, vector<8x1024xf32>,
    } else {
    }
    %c0 = arith.constant 0 : index
    %c0_1 = arith.constant 0 : index
    %3 = vector.load %arg8[%c0, %c0_1] : memref<8x1024xf32, #tpu.memory_space<vmem>>, vector<8x1024xf32>
    %c0_2 = arith.constant 0 : index
    %c0_3 = arith.constant 0 : index
    %4 = vector.load %arg1[%c0_2, %c0_3] : memref<8x512xf32, #tpu.memory_space<vmem>>, vector<8x512xf32>
    %5 = arith.truncf %4 : vector<8x512xf32> to vector<8x512xbf16>
    %c0_4 = arith.constant 0 : index
    %c0_5 = arith.constant 0 : index
    %6 = vector.load %arg3[%c0_4, %c0_5] : memref<512x1024xbf16, #tpu.memory_space<vmem>>, vector<512x1024xbf16>
    %cst = arith.constant dense<0.000000e+00> : vector<8x1024xf32>
    %7 = tpu.matmul %5, %6, %cst {dimension_numbers = #tpu.dot_dimension_numbers<[1], [0], [0], [1], [0, 0, 1, 1], [], []>} : vector<8x512xbf16>, vector<512x1024xbf16>, vector<8x1024xf32> -> vector<8x1024xf32>
    %8 = arith.addf %3, %7 : vector<8x1024xf32>
    %c0_6 = arith.constant 0 : index
    %c0_7 = arith.constant 0 : index
    %9 = vector.load %arg8[%c0_6, %c0_7] : memref<8x1024xf32, #tpu.memory_space<vmem>>, vector<8x1024xf32>
    tpu.vector_store %arg8[%c0_6, %c0_7], %8 {strides = array<i32>} : memref<8x1024xf32, #tpu.memory_space<vmem>>, vector<8x1024xf32>,
    %c3_i32 = arith.constant 3 : i32
    %10 = arith.cmpi eq, %arg0, %c3_i32 : i32
    %11 = arith.extui %10 : i1 to i32
    %c0_i32_8 = arith.constant 0 : i32
    %12 = arith.cmpi ne, %11, %c0_i32_8 : i32
    scf.if %12 {
      %c0_9 = arith.constant 0 : index
      %c0_10 = arith.constant 0 : index
      %13 = vector.load %arg8[%c0_9, %c0_10] : memref<8x1024xf32, #tpu.memory_space<vmem>>, vector<8x1024xf32>
      %c0_11 = arith.constant 0 : index
      %c0_12 = arith.constant 0 : index
      %14 = vector.load %arg4[%c0_11, %c0_12] : memref<1x1024xf32, #tpu.memory_space<vmem>>, vector<1x1024xf32>
      %15 = vector.broadcast %14 : vector<1x1024xf32> to vector<8x1024xf32>
      %16 = arith.addf %13, %15 : vector<8x1024xf32>
      %c0_13 = arith.constant 0 : index
      %c0_14 = arith.constant 0 : index
      %17 = vector.load %arg7[%c0_13, %c0_14] : memref<8x1152xf32, #tpu.memory_space<vmem>>, vector<8x1024xf32>
      tpu.vector_store %arg7[%c0_13, %c0_14], %16 {strides = array<i32>} : memref<8x1152xf32, #tpu.memory_space<vmem>>, vector<8x1024xf32>,
      %c0_15 = arith.constant 0 : index
      %c0_16 = arith.constant 0 : index
      %18 = vector.load %arg2[%c0_15, %c0_16] : memref<8x128xf32, #tpu.memory_space<vmem>>, vector<8x128xf32>
      %19 = arith.truncf %18 : vector<8x128xf32> to vector<8x128xbf16>
      %c0_17 = arith.constant 0 : index
      %c0_18 = arith.constant 0 : index
      %20 = vector.load %arg5[%c0_17, %c0_18] : memref<128x128xbf16, #tpu.memory_space<vmem>>, vector<128x128xbf16>
      %cst_19 = arith.constant dense<0.000000e+00> : vector<8x128xf32>
      %21 = tpu.matmul %19, %20, %cst_19 {dimension_numbers = #tpu.dot_dimension_numbers<[1], [0], [0], [1], [0, 0, 1, 1], [], []>} : vector<8x128xbf16>, vector<128x128xbf16>, vector<8x128xf32> -> vector<8x128xf32>
      %c0_20 = arith.constant 0 : index
      %c0_21 = arith.constant 0 : index
      %22 = vector.load %arg6[%c0_20, %c0_21] : memref<1x128xf32, #tpu.memory_space<vmem>>, vector<1x128xf32>
      %23 = vector.broadcast %22 : vector<1x128xf32> to vector<8x128xf32>
      %24 = arith.addf %21, %23 : vector<8x128xf32>
      %cst_22 = arith.constant 0.000000e+00 : f32
      %25 = vector.broadcast %cst_22 : f32 to vector<8x128xf32>
      %26 = arith.maximumf %24, %25 : vector<8x128xf32>
      %c0_23 = arith.constant 0 : index
      %c1024 = arith.constant 1024 : index
      %27 = vector.load %arg7[%c0_23, %c1024] : memref<8x1152xf32, #tpu.memory_space<vmem>>, vector<8x128xf32>
      tpu.vector_store %arg7[%c0_23, %c1024], %26 {strides = array<i32>} : memref<8x1152xf32, #tpu.memory_space<vmem>>, vector<8x128xf32>,
    } else {
    }
    return
  }
  func.func @transform_0(%arg0: i32) -> (i32, i32) {
    %c0_i32 = arith.constant 0 : i32
    %c0_i32_0 = arith.constant 0 : i32
    return %c0_i32, %arg0 : i32, i32
  }
  func.func @transform_1(%arg0: i32) -> (i32, i32) {
    %c0_i32 = arith.constant 0 : i32
    %c0_i32_0 = arith.constant 0 : i32
    %c0_i32_1 = arith.constant 0 : i32
    return %c0_i32, %c0_i32_0 : i32, i32
  }
  func.func @transform_2(%arg0: i32) -> (i32, i32) {
    %c0_i32 = arith.constant 0 : i32
    %c0_i32_0 = arith.constant 0 : i32
    return %arg0, %c0_i32 : i32, i32
  }
  func.func @transform_3(%arg0: i32) -> (i32, i32) {
    %c0_i32 = arith.constant 0 : i32
    %c0_i32_0 = arith.constant 0 : i32
    %c0_i32_1 = arith.constant 0 : i32
    return %c0_i32, %c0_i32_0 : i32, i32
  }
  func.func @transform_4(%arg0: i32) -> (i32, i32) {
    %c0_i32 = arith.constant 0 : i32
    %c0_i32_0 = arith.constant 0 : i32
    %c0_i32_1 = arith.constant 0 : i32
    return %c0_i32, %c0_i32_0 : i32, i32
  }
  func.func @transform_5(%arg0: i32) -> (i32, i32) {
    %c0_i32 = arith.constant 0 : i32
    %c0_i32_0 = arith.constant 0 : i32
    %c0_i32_1 = arith.constant 0 : i32
    return %c0_i32, %c0_i32_0 : i32, i32
  }
  func.func @transform_6(%arg0: i32) -> (i32, i32) {
    %c0_i32 = arith.constant 0 : i32
    %c0_i32_0 = arith.constant 0 : i32
    %c0_i32_1 = arith.constant 0 : i32
    return %c0_i32, %c0_i32_0 : i32, i32
  }
}

module attributes {stable_mosaic.version = 11 : i64} {
  func.func @_resblocks_kernel(%arg0: i32, %arg1: i32, %arg2: i32, %arg3: memref<8x1152xf32, #tpu.memory_space<vmem>>, %arg4: memref<1x384x1152xbf16, #tpu.memory_space<vmem>>, %arg5: memref<1x1x1152xf32, #tpu.memory_space<vmem>>, %arg6: memref<8x1152xf32, #tpu.memory_space<vmem>>, %arg7: memref<8x1152xf32, #tpu.memory_space<vmem>>, %arg8: memref<8x1152xf32, #tpu.memory_space<vmem>>, %arg9: memref<8x1152xf32, #tpu.memory_space<vmem>>) attributes {dimension_semantics = [#tpu.dimension_semantics<arbitrary>, #tpu.dimension_semantics<arbitrary>, #tpu.dimension_semantics<arbitrary>], iteration_bounds = array<i64: 2, 2, 3>, scalar_prefetch = 0 : i64, scratch_operands = 3 : i64, tpu.core_type = #tpu.core_type<tc>, window_params = [{pipeline_mode = #tpu.pipeline_mode<synchronous>, transform_indices = @transform_0, window_bounds = array<i64: 8, 1152>}, {transform_indices = @transform_1, window_bounds = array<i64: 1, 384, 1152>}, {transform_indices = @transform_2, window_bounds = array<i64: 1, 1, 1152>}, {pipeline_mode = #tpu.pipeline_mode<synchronous>, transform_indices = @transform_3, window_bounds = array<i64: 8, 1152>}]} {
    %c0_i32 = arith.constant 0 : i32
    %0 = arith.cmpi eq, %arg0, %c0_i32 : i32
    %c0_i32_0 = arith.constant 0 : i32
    %1 = arith.cmpi eq, %arg1, %c0_i32_0 : i32
    %2 = arith.andi %0, %1 : i1
    %c0_i32_1 = arith.constant 0 : i32
    %3 = arith.cmpi eq, %arg2, %c0_i32_1 : i32
    %4 = arith.andi %2, %3 : i1
    %5 = arith.extui %4 : i1 to i32
    %c0_i32_2 = arith.constant 0 : i32
    %6 = arith.cmpi ne, %5, %c0_i32_2 : i32
    scf.if %6 {
      %c0_18 = arith.constant 0 : index
      %c0_19 = arith.constant 0 : index
      %35 = vector.load %arg3[%c0_18, %c0_19] : memref<8x1152xf32, #tpu.memory_space<vmem>>, vector<8x1152xf32>
      %c0_20 = arith.constant 0 : index
      %c0_21 = arith.constant 0 : index
      %36 = vector.load %arg7[%c0_20, %c0_21] : memref<8x1152xf32, #tpu.memory_space<vmem>>, vector<8x1152xf32>
      tpu.vector_store %arg7[%c0_20, %c0_21], %35 {strides = array<i32>} : memref<8x1152xf32, #tpu.memory_space<vmem>>, vector<8x1152xf32>,
      %cst_22 = arith.constant 0.000000e+00 : f32
      %37 = vector.broadcast %cst_22 : f32 to vector<8x1152xf32>
      %c0_23 = arith.constant 0 : index
      %c0_24 = arith.constant 0 : index
      %38 = vector.load %arg8[%c0_23, %c0_24] : memref<8x1152xf32, #tpu.memory_space<vmem>>, vector<8x1152xf32>
      tpu.vector_store %arg8[%c0_23, %c0_24], %37 {strides = array<i32>} : memref<8x1152xf32, #tpu.memory_space<vmem>>, vector<8x1152xf32>,
    } else {
    }
    %c0_i32_3 = arith.constant 0 : i32
    %7 = arith.cmpi eq, %arg2, %c0_i32_3 : i32
    %8 = arith.extui %7 : i1 to i32
    %c0_i32_4 = arith.constant 0 : i32
    %9 = arith.cmpi ne, %8, %c0_i32_4 : i32
    scf.if %9 {
      %cst_18 = arith.constant 0.000000e+00 : f32
      %35 = vector.broadcast %cst_18 : f32 to vector<8x1152xf32>
      %c0_19 = arith.constant 0 : index
      %c0_20 = arith.constant 0 : index
      %36 = vector.load %arg9[%c0_19, %c0_20] : memref<8x1152xf32, #tpu.memory_space<vmem>>, vector<8x1152xf32>
      tpu.vector_store %arg9[%c0_19, %c0_20], %35 {strides = array<i32>} : memref<8x1152xf32, #tpu.memory_space<vmem>>, vector<8x1152xf32>,
    } else {
    }
    %c384_i32 = arith.constant 384 : i32
    %10 = arith.muli %arg2, %c384_i32 : i32
    %11 = tpu.assume_multiple %10, 384 : i32
    %c0_i32_5 = arith.constant 0 : i32
    %12 = arith.cmpi eq, %arg1, %c0_i32_5 : i32
    %c0 = arith.constant 0 : index
    %13 = arith.index_cast %11 : i32 to index
    %14 = vector.load %arg7[%c0, %13] : memref<8x1152xf32, #tpu.memory_space<vmem>>, vector<8x384xf32>
    %c0_6 = arith.constant 0 : index
    %15 = arith.index_cast %11 : i32 to index
    %16 = vector.load %arg8[%c0_6, %15] : memref<8x1152xf32, #tpu.memory_space<vmem>>, vector<8x384xf32>
    %17 = arith.select %12, %14, %16 : vector<8x384xf32>
    %18 = arith.truncf %17 : vector<8x384xf32> to vector<8x384xbf16>
    %c0_7 = arith.constant 0 : index
    %c0_8 = arith.constant 0 : index
    %19 = vector.load %arg9[%c0_7, %c0_8] : memref<8x1152xf32, #tpu.memory_space<vmem>>, vector<8x1152xf32>
    %c0_9 = arith.constant 0 : index
    %c0_10 = arith.constant 0 : index
    %c0_11 = arith.constant 0 : index
    %20 = vector.load %arg4[%c0_9, %c0_10, %c0_11] : memref<1x384x1152xbf16, #tpu.memory_space<vmem>>, vector<1x384x1152xbf16>
    %21 = vector.shape_cast %20 : vector<1x384x1152xbf16> to vector<384x1152xbf16>
    %cst = arith.constant dense<0.000000e+00> : vector<8x1152xf32>
    %22 = tpu.matmul %18, %21, %cst {dimension_numbers = #tpu.dot_dimension_numbers<[1], [0], [0], [1], [0, 0, 1, 1], [], []>} : vector<8x384xbf16>, vector<384x1152xbf16>, vector<8x1152xf32> -> vector<8x1152xf32>
    %23 = arith.addf %19, %22 : vector<8x1152xf32>
    %c0_12 = arith.constant 0 : index
    %c0_13 = arith.constant 0 : index
    %24 = vector.load %arg9[%c0_12, %c0_13] : memref<8x1152xf32, #tpu.memory_space<vmem>>, vector<8x1152xf32>
    tpu.vector_store %arg9[%c0_12, %c0_13], %23 {strides = array<i32>} : memref<8x1152xf32, #tpu.memory_space<vmem>>, vector<8x1152xf32>,
    %c2_i32 = arith.constant 2 : i32
    %25 = arith.cmpi eq, %arg2, %c2_i32 : i32
    %c0_i32_14 = arith.constant 0 : i32
    %26 = arith.cmpi eq, %arg1, %c0_i32_14 : i32
    %27 = arith.andi %25, %26 : i1
    %28 = arith.extui %27 : i1 to i32
    %c0_i32_15 = arith.constant 0 : i32
    %29 = arith.cmpi ne, %28, %c0_i32_15 : i32
    scf.if %29 {
      %c0_18 = arith.constant 0 : index
      %c0_19 = arith.constant 0 : index
      %35 = vector.load %arg9[%c0_18, %c0_19] : memref<8x1152xf32, #tpu.memory_space<vmem>>, vector<8x1152xf32>
      %c0_20 = arith.constant 0 : index
      %c0_21 = arith.constant 0 : index
      %c0_22 = arith.constant 0 : index
      %36 = vector.load %arg5[%c0_20, %c0_21, %c0_22] : memref<1x1x1152xf32, #tpu.memory_space<vmem>>, vector<1x1x1152xf32>
      %37 = vector.shape_cast %36 : vector<1x1x1152xf32> to vector<1x1152xf32>
      %38 = vector.broadcast %37 : vector<1x1152xf32> to vector<8x1152xf32>
      %39 = arith.addf %35, %38 : vector<8x1152xf32>
      %cst_23 = arith.constant 0.000000e+00 : f32
      %40 = vector.broadcast %cst_23 : f32 to vector<8x1152xf32>
      %41 = arith.maximumf %39, %40 : vector<8x1152xf32>
      %c0_24 = arith.constant 0 : index
      %c0_25 = arith.constant 0 : index
      %42 = vector.load %arg8[%c0_24, %c0_25] : memref<8x1152xf32, #tpu.memory_space<vmem>>, vector<8x1152xf32>
      tpu.vector_store %arg8[%c0_24, %c0_25], %41 {strides = array<i32>} : memref<8x1152xf32, #tpu.memory_space<vmem>>, vector<8x1152xf32>,
    } else {
    }
    %c2_i32_16 = arith.constant 2 : i32
    %30 = arith.cmpi eq, %arg2, %c2_i32_16 : i32
    %c1_i32 = arith.constant 1 : i32
    %31 = arith.cmpi eq, %arg1, %c1_i32 : i32
    %32 = arith.andi %30, %31 : i1
    %33 = arith.extui %32 : i1 to i32
    %c0_i32_17 = arith.constant 0 : i32
    %34 = arith.cmpi ne, %33, %c0_i32_17 : i32
    scf.if %34 {
      %c0_18 = arith.constant 0 : index
      %c0_19 = arith.constant 0 : index
      %35 = vector.load %arg9[%c0_18, %c0_19] : memref<8x1152xf32, #tpu.memory_space<vmem>>, vector<8x1152xf32>
      %c0_20 = arith.constant 0 : index
      %c0_21 = arith.constant 0 : index
      %c0_22 = arith.constant 0 : index
      %36 = vector.load %arg5[%c0_20, %c0_21, %c0_22] : memref<1x1x1152xf32, #tpu.memory_space<vmem>>, vector<1x1x1152xf32>
      %37 = vector.shape_cast %36 : vector<1x1x1152xf32> to vector<1x1152xf32>
      %38 = vector.broadcast %37 : vector<1x1152xf32> to vector<8x1152xf32>
      %39 = arith.addf %35, %38 : vector<8x1152xf32>
      %c0_23 = arith.constant 0 : index
      %c0_24 = arith.constant 0 : index
      %40 = vector.load %arg7[%c0_23, %c0_24] : memref<8x1152xf32, #tpu.memory_space<vmem>>, vector<8x1152xf32>
      %41 = arith.addf %39, %40 : vector<8x1152xf32>
      %cst_25 = arith.constant 0.000000e+00 : f32
      %42 = vector.broadcast %cst_25 : f32 to vector<8x1152xf32>
      %43 = arith.maximumf %41, %42 : vector<8x1152xf32>
      %c0_26 = arith.constant 0 : index
      %c0_27 = arith.constant 0 : index
      %44 = vector.load %arg7[%c0_26, %c0_27] : memref<8x1152xf32, #tpu.memory_space<vmem>>, vector<8x1152xf32>
      tpu.vector_store %arg7[%c0_26, %c0_27], %43 {strides = array<i32>} : memref<8x1152xf32, #tpu.memory_space<vmem>>, vector<8x1152xf32>,
      %c0_28 = arith.constant 0 : index
      %c0_29 = arith.constant 0 : index
      %45 = vector.load %arg6[%c0_28, %c0_29] : memref<8x1152xf32, #tpu.memory_space<vmem>>, vector<8x1152xf32>
      tpu.vector_store %arg6[%c0_28, %c0_29], %43 {strides = array<i32>} : memref<8x1152xf32, #tpu.memory_space<vmem>>, vector<8x1152xf32>,
    } else {
    }
    return
  }
  func.func @transform_0(%arg0: i32, %arg1: i32, %arg2: i32) -> (i32, i32) {
    %c0_i32 = arith.constant 0 : i32
    %c0_i32_0 = arith.constant 0 : i32
    %c0_i32_1 = arith.constant 0 : i32
    return %c0_i32, %c0_i32_0 : i32, i32
  }
  func.func @transform_1(%arg0: i32, %arg1: i32, %arg2: i32) -> (i32, i32, i32) {
    %c2_i32 = arith.constant 2 : i32
    %0 = arith.muli %c2_i32, %arg0 : i32
    %1 = arith.addi %0, %arg1 : i32
    %c0_i32 = arith.constant 0 : i32
    %c0_i32_0 = arith.constant 0 : i32
    return %1, %arg2, %c0_i32 : i32, i32, i32
  }
  func.func @transform_2(%arg0: i32, %arg1: i32, %arg2: i32) -> (i32, i32, i32) {
    %c2_i32 = arith.constant 2 : i32
    %0 = arith.muli %c2_i32, %arg0 : i32
    %1 = arith.addi %0, %arg1 : i32
    %c0_i32 = arith.constant 0 : i32
    %c0_i32_0 = arith.constant 0 : i32
    %c0_i32_1 = arith.constant 0 : i32
    return %1, %c0_i32, %c0_i32_0 : i32, i32, i32
  }
  func.func @transform_3(%arg0: i32, %arg1: i32, %arg2: i32) -> (i32, i32) {
    %c0_i32 = arith.constant 0 : i32
    %c0_i32_0 = arith.constant 0 : i32
    %c0_i32_1 = arith.constant 0 : i32
    return %c0_i32, %c0_i32_0 : i32, i32
  }
}

module attributes {stable_mosaic.version = 11 : i64} {
  func.func @_head_kernel(%arg0: i32, %arg1: memref<8x384xf32, #tpu.memory_space<vmem>>, %arg2: memref<384x256xbf16, #tpu.memory_space<vmem>>, %arg3: memref<1x256xf32, #tpu.memory_space<vmem>>, %arg4: memref<256x8xbf16, #tpu.memory_space<vmem>>, %arg5: memref<1x8xf32, #tpu.memory_space<vmem>>, %arg6: memref<8x8xf32, #tpu.memory_space<vmem>>, %arg7: memref<8x256xf32, #tpu.memory_space<vmem>>) attributes {dimension_semantics = [#tpu.dimension_semantics<arbitrary>], iteration_bounds = array<i64: 3>, scalar_prefetch = 0 : i64, scratch_operands = 1 : i64, tpu.core_type = #tpu.core_type<tc>, window_params = [{transform_indices = @transform_0, window_bounds = array<i64: 8, 384>}, {transform_indices = @transform_1, window_bounds = array<i64: 384, 256>}, {pipeline_mode = #tpu.pipeline_mode<synchronous>, transform_indices = @transform_2, window_bounds = array<i64: 1, 256>}, {pipeline_mode = #tpu.pipeline_mode<synchronous>, transform_indices = @transform_3, window_bounds = array<i64: 256, 8>}, {pipeline_mode = #tpu.pipeline_mode<synchronous>, transform_indices = @transform_4, window_bounds = array<i64: 1, 8>}, {pipeline_mode = #tpu.pipeline_mode<synchronous>, transform_indices = @transform_5, window_bounds = array<i64: 8, 8>}]} {
    %c0_i32 = arith.constant 0 : i32
    %0 = arith.cmpi eq, %arg0, %c0_i32 : i32
    %1 = arith.extui %0 : i1 to i32
    %c0_i32_0 = arith.constant 0 : i32
    %2 = arith.cmpi ne, %1, %c0_i32_0 : i32
    scf.if %2 {
      %cst_9 = arith.constant 0.000000e+00 : f32
      %13 = vector.broadcast %cst_9 : f32 to vector<8x256xf32>
      %c0_10 = arith.constant 0 : index
      %c0_11 = arith.constant 0 : index
      %14 = vector.load %arg7[%c0_10, %c0_11] : memref<8x256xf32, #tpu.memory_space<vmem>>, vector<8x256xf32>
      tpu.vector_store %arg7[%c0_10, %c0_11], %13 {strides = array<i32>} : memref<8x256xf32, #tpu.memory_space<vmem>>, vector<8x256xf32>,
    } else {
    }
    %c0 = arith.constant 0 : index
    %c0_1 = arith.constant 0 : index
    %3 = vector.load %arg7[%c0, %c0_1] : memref<8x256xf32, #tpu.memory_space<vmem>>, vector<8x256xf32>
    %c0_2 = arith.constant 0 : index
    %c0_3 = arith.constant 0 : index
    %4 = vector.load %arg1[%c0_2, %c0_3] : memref<8x384xf32, #tpu.memory_space<vmem>>, vector<8x384xf32>
    %5 = arith.truncf %4 : vector<8x384xf32> to vector<8x384xbf16>
    %c0_4 = arith.constant 0 : index
    %c0_5 = arith.constant 0 : index
    %6 = vector.load %arg2[%c0_4, %c0_5] : memref<384x256xbf16, #tpu.memory_space<vmem>>, vector<384x256xbf16>
    %cst = arith.constant dense<0.000000e+00> : vector<8x256xf32>
    %7 = tpu.matmul %5, %6, %cst {dimension_numbers = #tpu.dot_dimension_numbers<[1], [0], [0], [1], [0, 0, 1, 1], [], []>} : vector<8x384xbf16>, vector<384x256xbf16>, vector<8x256xf32> -> vector<8x256xf32>
    %8 = arith.addf %3, %7 : vector<8x256xf32>
    %c0_6 = arith.constant 0 : index
    %c0_7 = arith.constant 0 : index
    %9 = vector.load %arg7[%c0_6, %c0_7] : memref<8x256xf32, #tpu.memory_space<vmem>>, vector<8x256xf32>
    tpu.vector_store %arg7[%c0_6, %c0_7], %8 {strides = array<i32>} : memref<8x256xf32, #tpu.memory_space<vmem>>, vector<8x256xf32>,
    %c2_i32 = arith.constant 2 : i32
    %10 = arith.cmpi eq, %arg0, %c2_i32 : i32
    %11 = arith.extui %10 : i1 to i32
    %c0_i32_8 = arith.constant 0 : i32
    %12 = arith.cmpi ne, %11, %c0_i32_8 : i32
    scf.if %12 {
      %c0_9 = arith.constant 0 : index
      %c0_10 = arith.constant 0 : index
      %13 = vector.load %arg7[%c0_9, %c0_10] : memref<8x256xf32, #tpu.memory_space<vmem>>, vector<8x256xf32>
      %c0_11 = arith.constant 0 : index
      %c0_12 = arith.constant 0 : index
      %14 = vector.load %arg3[%c0_11, %c0_12] : memref<1x256xf32, #tpu.memory_space<vmem>>, vector<1x256xf32>
      %15 = vector.broadcast %14 : vector<1x256xf32> to vector<8x256xf32>
      %16 = arith.addf %13, %15 : vector<8x256xf32>
      %cst_13 = arith.constant 0.000000e+00 : f32
      %17 = vector.broadcast %cst_13 : f32 to vector<8x256xf32>
      %18 = arith.maximumf %16, %17 : vector<8x256xf32>
      %19 = arith.truncf %18 : vector<8x256xf32> to vector<8x256xbf16>
      %c0_14 = arith.constant 0 : index
      %c0_15 = arith.constant 0 : index
      %20 = vector.load %arg4[%c0_14, %c0_15] : memref<256x8xbf16, #tpu.memory_space<vmem>>, vector<256x8xbf16>
      %cst_16 = arith.constant dense<0.000000e+00> : vector<8x8xf32>
      %21 = tpu.matmul %19, %20, %cst_16 {dimension_numbers = #tpu.dot_dimension_numbers<[1], [0], [0], [1], [0, 0, 1, 1], [], []>} : vector<8x256xbf16>, vector<256x8xbf16>, vector<8x8xf32> -> vector<8x8xf32>
      %c0_17 = arith.constant 0 : index
      %c0_18 = arith.constant 0 : index
      %22 = vector.load %arg5[%c0_17, %c0_18] : memref<1x8xf32, #tpu.memory_space<vmem>>, vector<1x8xf32>
      %23 = vector.broadcast %22 : vector<1x8xf32> to vector<8x8xf32>
      %24 = arith.addf %21, %23 : vector<8x8xf32>
      %25 = math.tanh %24 : vector<8x8xf32>
      %cst_19 = arith.constant 1.000000e+00 : f32
      %26 = vector.broadcast %cst_19 : f32 to vector<8x8xf32>
      %27 = arith.addf %25, %26 : vector<8x8xf32>
      %cst_20 = arith.constant 3.500000e+00 : f32
      %28 = vector.broadcast %cst_20 : f32 to vector<8x8xf32>
      %29 = arith.mulf %28, %27 : vector<8x8xf32>
      %cst_21 = arith.constant -5.000000e+00 : f32
      %30 = vector.broadcast %cst_21 : f32 to vector<8x8xf32>
      %31 = arith.addf %30, %29 : vector<8x8xf32>
      %32 = tpu.iota {dimensions = array<i32: 1>} : vector<8x8xi32>
      %c4_i32 = arith.constant 4 : i32
      %33 = vector.broadcast %c4_i32 : i32 to vector<8x8xi32>
      %34 = arith.cmpi slt, %32, %33 : vector<8x8xi32>
      %35 = arith.select %34, %24, %31 : vector<8x8xi1>, vector<8x8xf32>
      %c0_22 = arith.constant 0 : index
      %c0_23 = arith.constant 0 : index
      %36 = vector.load %arg6[%c0_22, %c0_23] : memref<8x8xf32, #tpu.memory_space<vmem>>, vector<8x8xf32>
      tpu.vector_store %arg6[%c0_22, %c0_23], %35 {strides = array<i32>} : memref<8x8xf32, #tpu.memory_space<vmem>>, vector<8x8xf32>,
    } else {
    }
    return
  }
  func.func @transform_0(%arg0: i32) -> (i32, i32) {
    %c0_i32 = arith.constant 0 : i32
    %c0_i32_0 = arith.constant 0 : i32
    return %c0_i32, %arg0 : i32, i32
  }
  func.func @transform_1(%arg0: i32) -> (i32, i32) {
    %c0_i32 = arith.constant 0 : i32
    %c0_i32_0 = arith.constant 0 : i32
    return %arg0, %c0_i32 : i32, i32
  }
  func.func @transform_2(%arg0: i32) -> (i32, i32) {
    %c0_i32 = arith.constant 0 : i32
    %c0_i32_0 = arith.constant 0 : i32
    %c0_i32_1 = arith.constant 0 : i32
    return %c0_i32, %c0_i32_0 : i32, i32
  }
  func.func @transform_3(%arg0: i32) -> (i32, i32) {
    %c0_i32 = arith.constant 0 : i32
    %c0_i32_0 = arith.constant 0 : i32
    %c0_i32_1 = arith.constant 0 : i32
    return %c0_i32, %c0_i32_0 : i32, i32
  }
  func.func @transform_4(%arg0: i32) -> (i32, i32) {
    %c0_i32 = arith.constant 0 : i32
    %c0_i32_0 = arith.constant 0 : i32
    %c0_i32_1 = arith.constant 0 : i32
    return %c0_i32, %c0_i32_0 : i32, i32
  }
  func.func @transform_5(%arg0: i32) -> (i32, i32) {
    %c0_i32 = arith.constant 0 : i32
    %c0_i32_0 = arith.constant 0 : i32
    %c0_i32_1 = arith.constant 0 : i32
    return %c0_i32, %c0_i32_0 : i32, i32
  }
}

</mosaic_0001>

<bundles_post_ra>
// kernel: ra_actor_world_forward.6
= control target key start
LH: loop header
LB: loop body
LE: loop exit
PB: predicated region body
PF: predicated region fallthrough
CT: control target
= control target key end

     0   :  { %vm288_vm0 = vcmask 1042432   ;;  %vm95_vm1 = vcmask 613376   ;;  %vm741_vm2 = vcmask 261120   ;;  %s1717_s1 = inlined_call_operand.vmem [shape: f32[75,32], index: 1, kind: input, shape index: {}]   ;;  %s1718_s0 = inlined_call_operand.vmem [shape: f32[512,75], index: 0, kind: input, shape index: {}]   ;;  %s1719_s2 = inlined_call_operand.vmem [shape: f32[1,32], index: 2, kind: input, shape index: {}]   ;;  %s1720_s3 = inlined_call_operand.vmem [shape: f32[512,32], index: 3, kind: output, shape index: {}]  }
   0x1   :  { %v87_v0 = vld [vmem:[%s1717_s1 + $0x48] sm:$0x7]  ;;  %v86_v1 = vld [vmem:[%s1717_s1 + $0x40] sm:$0xff]  ;;  %v85_v2 = vld [vmem:[%s1717_s1 + $0x38] sm:$0xff] }
   0x2   :  { %950 = vmatprep.subr.msk.mxu0 %vm288_vm0, %v87_v0  ;;  %1066 = vmatprep.subr.msk.mxu1 %vm288_vm0, %v87_v0  ;;  %v84_v3 = vld [vmem:[%s1717_s1 + $0x30] sm:$0xff]  ;;  %v83_v4 = vld [vmem:[%s1717_s1 + $0x28] sm:$0xff]  ;;  %v82_v5 = vld [vmem:[%s1717_s1 + $0x20] sm:$0xff] }
   0x3   :  { %951 = vmatpush3.msk.msra.mxu0 %vm288_vm0, %v87_v0  ;;  %1076 = vmatpush3.msk.msra.mxu1 %vm288_vm0, %v87_v0  ;;  %v81_v6 = vld [vmem:[%s1717_s1 + $0x18] sm:$0xff]  ;;  %v80_v7 = vld [vmem:[%s1717_s1 + $0x10] sm:$0xff]  ;;  %v79_v8 = vld [vmem:[%s1717_s1 + $0x8] sm:$0xff] }
   0x4   :  { %952 = vmatprep.subr.mxu0 %v86_v1  ;;  %1067 = vmatprep.subr.mxu1 %v86_v1  ;;  %v78_v9 = vld [vmem:[%s1717_s1] sm:$0xff]  ;;  %v15_v12 = vld [vmem:[%s1718_s0 + $0x8] sm:$0xff]  ;;  %v16_v14 = vld [vmem:[%s1718_s0 + $0x10] sm:$0xff] }
   0x5   :  { %953 = vmatpush3.msra.mxu0 %v86_v1  ;;  %1077 = vmatpush3.msra.mxu1 %v86_v1  ;;  %v14_v10 = vld [vmem:[%s1718_s0] sm:$0xff]  ;;  %v47_v13 = vld [vmem:[%s1718_s0 + $0x108] sm:$0xff]  ;;  %v48_v15 = vld [vmem:[%s1718_s0 + $0x110] sm:$0xff] }
   0x6   :  { %954 = vmatprep.subr.mxu0 %v85_v2  ;;  %1068 = vmatprep.subr.mxu1 %v85_v2  ;;  %v46_v11 = vld [vmem:[%s1718_s0 + $0x100] sm:$0xff]  ;;  %v17_v16 = vld [vmem:[%s1718_s0 + $0x18] sm:$0xff]  ;;  %v19_v20 = vld [vmem:[%s1718_s0 + $0x28] sm:$0xff] }
   0x7   :  { %955 = vmatpush3.msra.mxu0 %v85_v2  ;;  %1078 = vmatpush3.msra.mxu1 %v85_v2  ;;  %v49_v17 = vld [vmem:[%s1718_s0 + $0x118] sm:$0xff]  ;;  %v18_v18 = vld [vmem:[%s1718_s0 + $0x20] sm:$0xff]  ;;  %v51_v21 = vld [vmem:[%s1718_s0 + $0x128] sm:$0xff] }
   0x8   :  { %956 = vmatprep.subr.mxu0 %v84_v3  ;;  %1069 = vmatprep.subr.mxu1 %v84_v3  ;;  %v50_v19 = vld [vmem:[%s1718_s0 + $0x120] sm:$0xff]  ;;  %v20_v22 = vld [vmem:[%s1718_s0 + $0x30] sm:$0xff]  ;;  %v21_v24 = vld [vmem:[%s1718_s0 + $0x38] sm:$0xff] }
   0x9   :  { %957 = vmatpush3.msra.mxu0 %v84_v3  ;;  %1079 = vmatpush3.msra.mxu1 %v84_v3  ;;  %v52_v23 = vld [vmem:[%s1718_s0 + $0x130] sm:$0xff]  ;;  %v53_v25 = vld [vmem:[%s1718_s0 + $0x138] sm:$0xff]  ;;  %v22_v26 = vld [vmem:[%s1718_s0 + $0x40] sm:$0xff] }
   0xa   :  { %958 = vmatprep.subr.mxu0 %v83_v4  ;;  %1070 = vmatprep.subr.mxu1 %v83_v4  ;;  %v54_v27 = vld [vmem:[%s1718_s0 + $0x140] sm:$0xff]  ;;  %v23_v28 = vld [vmem:[%s1718_s0 + $0x48] sm:$0xff]  ;;  %v24_v30 = vld [vmem:[%s1718_s0 + $0x50] sm:$0xff] }
   0xb   :  { %959 = vmatpush3.msra.mxu0 %v83_v4  ;;  %1080 = vmatpush3.msra.mxu1 %v83_v4  ;;  %v55_v29 = vld [vmem:[%s1718_s0 + $0x148] sm:$0xff]  ;;  %v56_v31 = vld [vmem:[%s1718_s0 + $0x150] sm:$0xff]  ;;  %v25_v32 = vld [vmem:[%s1718_s0 + $0x58] sm:$0xff] }
   0xc   :  { %960 = vmatprep.subr.mxu0 %v82_v5  ;;  %1071 = vmatprep.subr.mxu1 %v82_v5  ;;  %v57_v33 = vld [vmem:[%s1718_s0 + $0x158] sm:$0xff]  ;;  %v26_v34 = vld [vmem:[%s1718_s0 + $0x60] sm:$0xff]  ;;  %v27_v36 = vld [vmem:[%s1718_s0 + $0x68] sm:$0xff] }
   0xd   :  { %961 = vmatpush3.msra.mxu0 %v82_v5  ;;  %1081 = vmatpush3.msra.mxu1 %v82_v5  ;;  %v58_v35 = vld [vmem:[%s1718_s0 + $0x160] sm:$0xff]  ;;  %v59_v37 = vld [vmem:[%s1718_s0 + $0x168] sm:$0xff]  ;;  %v28_v38 = vld [vmem:[%s1718_s0 + $0x70] sm:$0xff] }
   0xe   :  { %962 = vmatprep.subr.mxu0 %v81_v6  ;;  %1072 = vmatprep.subr.mxu1 %v81_v6  ;;  %v60_v39 = vld [vmem:[%s1718_s0 + $0x170] sm:$0xff]  ;;  %v29_v40 = vld [vmem:[%s1718_s0 + $0x78] sm:$0xff]  ;;  %v30_v42 = vld [vmem:[%s1718_s0 + $0x80] sm:$0xff] }
   0xf   :  { %963 = vmatpush3.msra.mxu0 %v81_v6  ;;  %1082 = vmatpush3.msra.mxu1 %v81_v6  ;;  %v61_v41 = vld [vmem:[%s1718_s0 + $0x178] sm:$0xff]  ;;  %v62_v43 = vld [vmem:[%s1718_s0 + $0x180] sm:$0xff]  ;;  %v31_v44 = vld [vmem:[%s1718_s0 + $0x88] sm:$0xff] }
  0x10   :  { %964 = vmatprep.subr.mxu0 %v80_v7  ;;  %1073 = vmatprep.subr.mxu1 %v80_v7  ;;  %v63_v45 = vld [vmem:[%s1718_s0 + $0x188] sm:$0xff]  ;;  %v32_v46 = vld [vmem:[%s1718_s0 + $0x90] sm:$0xff]  ;;  %v33_v48 = vld [vmem:[%s1718_s0 + $0x98] sm:$0xff] }
  0x11   :  { %965 = vmatpush3.msra.mxu0 %v80_v7  ;;  %1083 = vmatpush3.msra.mxu1 %v80_v7  ;;  %v64_v47 = vld [vmem:[%s1718_s0 + $0x190] sm:$0xff]  ;;  %v65_v49 = vld [vmem:[%s1718_s0 + $0x198] sm:$0xff]  ;;  %v34_v50 = vld [vmem:[%s1718_s0 + $0xa0] sm:$0xff] }
  0x12   :  { %966 = vmatprep.subr.mxu0 %v79_v8  ;;  %1074 = vmatprep.subr.mxu1 %v79_v8  ;;  %v66_v51 = vld [vmem:[%s1718_s0 + $0x1a0] sm:$0xff]  ;;  %v35_v52 = vld [vmem:[%s1718_s0 + $0xa8] sm:$0xff]  ;;  %v36_v54 = vld [vmem:[%s1718_s0 + $0xb0] sm:$0xff] }
  0x13   :  { %967 = vmatpush3.msra.mxu0 %v79_v8  ;;  %1084 = vmatpush3.msra.mxu1 %v79_v8  ;;  %v67_v53 = vld [vmem:[%s1718_s0 + $0x1a8] sm:$0xff]  ;;  %v68_v55 = vld [vmem:[%s1718_s0 + $0x1b0] sm:$0xff]  ;;  %v37_v56 = vld [vmem:[%s1718_s0 + $0xb8] sm:$0xff] }
  0x14   :  { %968 = vmatprep.subr.mxu0 %v78_v9  ;;  %1075 = vmatprep.subr.mxu1 %v78_v9  ;;  %v69_v57 = vld [vmem:[%s1718_s0 + $0x1b8] sm:$0xff]  ;;  %v38_v58 = vld [vmem:[%s1718_s0 + $0xc0] sm:$0xff]  ;;  %v39_v60 = vld [vmem:[%s1718_s0 + $0xc8] sm:$0xff] }
  0x15   :  { %969 = vmatpush3.msra.mxu0 %v78_v9  ;;  %1085 = vmatpush3.msra.mxu1 %v78_v9  ;;  %v70_v59 = vld [vmem:[%s1718_s0 + $0x1c0] sm:$0xff]  ;;  %v71_v61 = vld [vmem:[%s1718_s0 + $0x1c8] sm:$0xff]  ;;  %v40_v62 = vld [vmem:[%s1718_s0 + $0xd0] sm:$0xff] }
  0x16   :  { %970 = vmatprep.mubr.msk.f32.mxu0 %vm95_vm1, %v14_v10  ;;  %1018 = vmatprep.mubr.msk.f32.mxu1 %vm95_vm1, %v46_v11  ;;  %v72_v63 = vld [vmem:[%s1718_s0 + $0x1d0] sm:$0xff]  ;;  %v41_v0 = vld [vmem:[%s1718_s0 + $0xd8] sm:$0xff]  ;;  %v42_v2 = vld [vmem:[%s1718_s0 + $0xe0] sm:$0xff] }
  0x17   :  { %971 = vmatmul.mubr.msk.f32.vlgmr.msra.gmra.mxu0 %vm95_vm1, %v15_v12  ;;  %1019 = vmatmul.mubr.msk.f32.vlgmr.msra.gmra.mxu1 %vm95_vm1, %v47_v13  ;;  %v73_v1 = vld [vmem:[%s1718_s0 + $0x1d8] sm:$0xff]  ;;  %v74_v3 = vld [vmem:[%s1718_s0 + $0x1e0] sm:$0xff]  ;;  %v43_v4 = vld [vmem:[%s1718_s0 + $0xe8] sm:$0xff] }
  0x18   :  { %973 = vmatprep.mubr.msk.f32.mxu0 %vm95_vm1, %v16_v14  ;;  %1021 = vmatprep.mubr.msk.f32.mxu1 %vm95_vm1, %v48_v15  ;;  %v75_v5 = vld [vmem:[%s1718_s0 + $0x1e8] sm:$0xff]  ;;  %v44_v6 = vld [vmem:[%s1718_s0 + $0xf0] sm:$0xff]  ;;  %v45_v8 = vld [vmem:[%s1718_s0 + $0xf8] sm:$0xff] }
  0x19   :  { %v76_v7 = vld [vmem:[%s1718_s0 + $0x1f0] sm:$0xff]  ;;  %v77_v9 = vld [vmem:[%s1718_s0 + $0x1f8] sm:$0xff]  ;;  %v1395_v10 = vld [vmem:[%s1719_s2] ss:$0 sm:$0xff] }
  0x1b   :  { %974 = vmatmul.mubr.msk.f32.gmra.mxu0 %vm95_vm1, %v17_v16  ;;  %1022 = vmatmul.mubr.msk.f32.gmra.mxu1 %vm95_vm1, %v49_v17 }
  0x1c   :  { %976 = vmatprep.mubr.msk.f32.mxu0 %vm95_vm1, %v18_v18  ;;  %1024 = vmatprep.mubr.msk.f32.mxu1 %vm95_vm1, %v50_v19 }
  0x1f   :  { %977 = vmatmul.mubr.msk.f32.gmra.mxu0 %vm95_vm1, %v19_v20  ;;  %1025 = vmatmul.mubr.msk.f32.gmra.mxu1 %vm95_vm1, %v51_v21 }
  0x20   :  { %979 = vmatprep.mubr.msk.f32.mxu0 %vm95_vm1, %v20_v22  ;;  %1027 = vmatprep.mubr.msk.f32.mxu1 %vm95_vm1, %v52_v23 }
  0x23   :  { %980 = vmatmul.mubr.msk.f32.gmra.mxu0 %vm95_vm1, %v21_v24  ;;  %1028 = vmatmul.mubr.msk.f32.gmra.mxu1 %vm95_vm1, %v53_v25 }
  0x24   :  { %982 = vmatprep.mubr.msk.f32.mxu0 %vm95_vm1, %v22_v26  ;;  %1030 = vmatprep.mubr.msk.f32.mxu1 %vm95_vm1, %v54_v27 }
  0x27   :  { %983 = vmatmul.mubr.msk.f32.gmra.mxu0 %vm95_vm1, %v23_v28  ;;  %1031 = vmatmul.mubr.msk.f32.gmra.mxu1 %vm95_vm1, %v55_v29 }
  0x28   :  { %985 = vmatprep.mubr.msk.f32.mxu0 %vm95_vm1, %v24_v30  ;;  %1033 = vmatprep.mubr.msk.f32.mxu1 %vm95_vm1, %v56_v31 }
  0x2b   :  { %986 = vmatmul.mubr.msk.f32.gmra.mxu0 %vm95_vm1, %v25_v32  ;;  %1034 = vmatmul.mubr.msk.f32.gmra.mxu1 %vm95_vm1, %v57_v33 }
  0x2c   :  { %988 = vmatprep.mubr.msk.f32.mxu0 %vm95_vm1, %v26_v34  ;;  %1036 = vmatprep.mubr.msk.f32.mxu1 %vm95_vm1, %v58_v35 }
  0x2f   :  { %989 = vmatmul.mubr.msk.f32.gmra.mxu0 %vm95_vm1, %v27_v36  ;;  %1037 = vmatmul.mubr.msk.f32.gmra.mxu1 %vm95_vm1, %v59_v37 }
  0x30   :  { %991 = vmatprep.mubr.msk.f32.mxu0 %vm95_vm1, %v28_v38  ;;  %1039 = vmatprep.mubr.msk.f32.mxu1 %vm95_vm1, %v60_v39 }
  0x33   :  { %992 = vmatmul.mubr.msk.f32.gmra.mxu0 %vm95_vm1, %v29_v40  ;;  %1040 = vmatmul.mubr.msk.f32.gmra.mxu1 %vm95_vm1, %v61_v41 }
  0x34   :  { %994 = vmatprep.mubr.msk.f32.mxu0 %vm95_vm1, %v30_v42  ;;  %1042 = vmatprep.mubr.msk.f32.mxu1 %vm95_vm1, %v62_v43 }
  0x37   :  { %995 = vmatmul.mubr.msk.f32.gmra.mxu0 %vm95_vm1, %v31_v44  ;;  %1043 = vmatmul.mubr.msk.f32.gmra.mxu1 %vm95_vm1, %v63_v45 }
  0x38   :  { %997 = vmatprep.mubr.msk.f32.mxu0 %vm95_vm1, %v32_v46  ;;  %1045 = vmatprep.mubr.msk.f32.mxu1 %vm95_vm1, %v64_v47 }
  0x3b   :  { %998 = vmatmul.mubr.msk.f32.gmra.mxu0 %vm95_vm1, %v33_v48  ;;  %1046 = vmatmul.mubr.msk.f32.gmra.mxu1 %vm95_vm1, %v65_v49 }
  0x3c   :  { %1000 = vmatprep.mubr.msk.f32.mxu0 %vm95_vm1, %v34_v50  ;;  %1048 = vmatprep.mubr.msk.f32.mxu1 %vm95_vm1, %v66_v51 }
  0x3f   :  { %1001 = vmatmul.mubr.msk.f32.gmra.mxu0 %vm95_vm1, %v35_v52  ;;  %1049 = vmatmul.mubr.msk.f32.gmra.mxu1 %vm95_vm1, %v67_v53 }
  0x40   :  { %1003 = vmatprep.mubr.msk.f32.mxu0 %vm95_vm1, %v36_v54  ;;  %1051 = vmatprep.mubr.msk.f32.mxu1 %vm95_vm1, %v68_v55 }
  0x43   :  { %1004 = vmatmul.mubr.msk.f32.gmra.mxu0 %vm95_vm1, %v37_v56  ;;  %1052 = vmatmul.mubr.msk.f32.gmra.mxu1 %vm95_vm1, %v69_v57 }
  0x44   :  { %1006 = vmatprep.mubr.msk.f32.mxu0 %vm95_vm1, %v38_v58  ;;  %1054 = vmatprep.mubr.msk.f32.mxu1 %vm95_vm1, %v70_v59 }
  0x47   :  { %1007 = vmatmul.mubr.msk.f32.gmra.mxu0 %vm95_vm1, %v39_v60  ;;  %1055 = vmatmul.mubr.msk.f32.gmra.mxu1 %vm95_vm1, %v71_v61 }
  0x48   :  { %1009 = vmatprep.mubr.msk.f32.mxu0 %vm95_vm1, %v40_v62  ;;  %1057 = vmatprep.mubr.msk.f32.mxu1 %vm95_vm1, %v72_v63 }
  0x4b   :  { %1010 = vmatmul.mubr.msk.f32.gmra.mxu0 %vm95_vm1, %v41_v0  ;;  %1058 = vmatmul.mubr.msk.f32.gmra.mxu1 %vm95_vm1, %v73_v1 }
  0x4c   :  { %1012 = vmatprep.mubr.msk.f32.mxu0 %vm95_vm1, %v42_v2  ;;  %1060 = vmatprep.mubr.msk.f32.mxu1 %vm95_vm1, %v74_v3 }
  0x4f   :  { %1013 = vmatmul.mubr.msk.f32.gmra.mxu0 %vm95_vm1, %v43_v4  ;;  %1061 = vmatmul.mubr.msk.f32.gmra.mxu1 %vm95_vm1, %v75_v5 }
  0x50   :  { %1015 = vmatprep.mubr.msk.f32.mxu0 %vm95_vm1, %v44_v6  ;;  %1063 = vmatprep.mubr.msk.f32.mxu1 %vm95_vm1, %v76_v7 }
  0x53   :  { %1016 = vmatmul.mubr.msk.f32.gmra.mxu0 %vm95_vm1, %v45_v8  ;;  %1064 = vmatmul.mubr.msk.f32.gmra.mxu1 %vm95_vm1, %v77_v9 }
  0xd7   :  { %v972_v11 = vpop.f32.mrf.mxu0  ;;  %v1020_v12 = vpop.f32.mrf.mxu1 }
  0xd8   :  { %v364_v13 = vadd.f32 %v972_v11, %v1395_v10  ;;  %v524_v14 = vadd.f32 %v1020_v12, %v1395_v10 }
  0xd9   :  { %v358_v15 = vpop.f32.mrf.mxu0  ;;  %v518_v16 = vpop.f32.mrf.mxu1 }
  0xda   :  { %v678_v17 = vmax.f32 %v364_v13, 0.0  ;;  %v710_v18 = vmax.f32 %v524_v14, 0.0  ;;  %v359_v19 = vadd.f32 %v1395_v10, %v358_v15  ;;  %v519_v20 = vadd.f32 %v1395_v10, %v518_v16 }
  0xdb   :  { %v975_v21 = vpop.f32.mrf.mxu0  ;;  %v1023_v22 = vpop.f32.mrf.mxu1 }
  0xdc   :  { %743 = vst.msk [vmem:[%s1720_s3 + $0x8] sm:$0xff] %vm741_vm2, %v678_v17  ;;  %775 = vst.msk [vmem:[%s1720_s3 + $0x108] sm:$0xff] %vm741_vm2, %v710_v18  ;;  %v677_v23 = vmax.f32 %v359_v19, 0.0  ;;  %v709_v24 = vmax.f32 %v519_v20, 0.0  ;;  %v374_v25 = vadd.f32 %v975_v21, %v1395_v10  ;;  %v534_v26 = vadd.f32 %v1023_v22, %v1395_v10 }
  0xdd   :  { %v368_v27 = vpop.f32.mrf.mxu0  ;;  %v528_v28 = vpop.f32.mrf.mxu1 }
  0xde   :  { %742 = vst.msk [vmem:[%s1720_s3] sm:$0xff] %vm741_vm2, %v677_v23  ;;  %774 = vst.msk [vmem:[%s1720_s3 + $0x100] sm:$0xff] %vm741_vm2, %v709_v24  ;;  %v680_v29 = vmax.f32 %v374_v25, 0.0  ;;  %v712_v30 = vmax.f32 %v534_v26, 0.0  ;;  %v369_v31 = vadd.f32 %v1395_v10, %v368_v27  ;;  %v529_v32 = vadd.f32 %v1395_v10, %v528_v28 }
  0xdf   :  { %v978_v33 = vpop.f32.mrf.mxu0  ;;  %v1026_v34 = vpop.f32.mrf.mxu1 }
  0xe0   :  { %745 = vst.msk [vmem:[%s1720_s3 + $0x18] sm:$0xff] %vm741_vm2, %v680_v29  ;;  %777 = vst.msk [vmem:[%s1720_s3 + $0x118] sm:$0xff] %vm741_vm2, %v712_v30  ;;  %v679_v35 = vmax.f32 %v369_v31, 0.0  ;;  %v711_v36 = vmax.f32 %v529_v32, 0.0  ;;  %v384_v37 = vadd.f32 %v978_v33, %v1395_v10  ;;  %v544_v38 = vadd.f32 %v1026_v34, %v1395_v10 }
  0xe1   :  { %v378_v39 = vpop.f32.mrf.mxu0  ;;  %v538_v40 = vpop.f32.mrf.mxu1 }
  0xe2   :  { %744 = vst.msk [vmem:[%s1720_s3 + $0x10] sm:$0xff] %vm741_vm2, %v679_v35  ;;  %776 = vst.msk [vmem:[%s1720_s3 + $0x110] sm:$0xff] %vm741_vm2, %v711_v36  ;;  %v682_v41 = vmax.f32 %v384_v37, 0.0  ;;  %v714_v42 = vmax.f32 %v544_v38, 0.0  ;;  %v379_v43 = vadd.f32 %v1395_v10, %v378_v39  ;;  %v539_v44 = vadd.f32 %v1395_v10, %v538_v40 }
  0xe3   :  { %v981_v45 = vpop.f32.mrf.mxu0  ;;  %v1029_v46 = vpop.f32.mrf.mxu1 }
  0xe4   :  { %747 = vst.msk [vmem:[%s1720_s3 + $0x28] sm:$0xff] %vm741_vm2, %v682_v41  ;;  %779 = vst.msk [vmem:[%s1720_s3 + $0x128] sm:$0xff] %vm741_vm2, %v714_v42  ;;  %v681_v47 = vmax.f32 %v379_v43, 0.0  ;;  %v713_v48 = vmax.f32 %v539_v44, 0.0  ;;  %v394_v49 = vadd.f32 %v981_v45, %v1395_v10  ;;  %v554_v50 = vadd.f32 %v1029_v46, %v1395_v10 }
  0xe5   :  { %v388_v51 = vpop.f32.mrf.mxu0  ;;  %v548_v52 = vpop.f32.mrf.mxu1 }
  0xe6   :  { %746 = vst.msk [vmem:[%s1720_s3 + $0x20] sm:$0xff] %vm741_vm2, %v681_v47  ;;  %778 = vst.msk [vmem:[%s1720_s3 + $0x120] sm:$0xff] %vm741_vm2, %v713_v48  ;;  %v684_v53 = vmax.f32 %v394_v49, 0.0  ;;  %v716_v54 = vmax.f32 %v554_v50, 0.0  ;;  %v389_v55 = vadd.f32 %v1395_v10, %v388_v51  ;;  %v549_v56 = vadd.f32 %v1395_v10, %v548_v52 }
  0xe7   :  { %v984_v57 = vpop.f32.mrf.mxu0  ;;  %v1032_v58 = vpop.f32.mrf.mxu1 }
  0xe8   :  { %749 = vst.msk [vmem:[%s1720_s3 + $0x38] sm:$0xff] %vm741_vm2, %v684_v53  ;;  %781 = vst.msk [vmem:[%s1720_s3 + $0x138] sm:$0xff] %vm741_vm2, %v716_v54  ;;  %v683_v59 = vmax.f32 %v389_v55, 0.0  ;;  %v715_v60 = vmax.f32 %v549_v56, 0.0  ;;  %v404_v61 = vadd.f32 %v984_v57, %v1395_v10  ;;  %v564_v62 = vadd.f32 %v1032_v58, %v1395_v10 }
  0xe9   :  { %v398_v63 = vpop.f32.mrf.mxu0  ;;  %v558_v0 = vpop.f32.mrf.mxu1 }
  0xea   :  { %748 = vst.msk [vmem:[%s1720_s3 + $0x30] sm:$0xff] %vm741_vm2, %v683_v59  ;;  %780 = vst.msk [vmem:[%s1720_s3 + $0x130] sm:$0xff] %vm741_vm2, %v715_v60  ;;  %v686_v1 = vmax.f32 %v404_v61, 0.0  ;;  %v718_v2 = vmax.f32 %v564_v62, 0.0  ;;  %v399_v3 = vadd.f32 %v1395_v10, %v398_v63  ;;  %v559_v4 = vadd.f32 %v1395_v10, %v558_v0 }
  0xeb   :  { %v987_v5 = vpop.f32.mrf.mxu0  ;;  %v1035_v6 = vpop.f32.mrf.mxu1 }
  0xec   :  { %751 = vst.msk [vmem:[%s1720_s3 + $0x48] sm:$0xff] %vm741_vm2, %v686_v1  ;;  %783 = vst.msk [vmem:[%s1720_s3 + $0x148] sm:$0xff] %vm741_vm2, %v718_v2  ;;  %v685_v7 = vmax.f32 %v399_v3, 0.0  ;;  %v717_v8 = vmax.f32 %v559_v4, 0.0  ;;  %v414_v9 = vadd.f32 %v987_v5, %v1395_v10  ;;  %v574_v11 = vadd.f32 %v1035_v6, %v1395_v10 }
  0xed   :  { %v408_v12 = vpop.f32.mrf.mxu0  ;;  %v568_v13 = vpop.f32.mrf.mxu1 }
  0xee   :  { %750 = vst.msk [vmem:[%s1720_s3 + $0x40] sm:$0xff] %vm741_vm2, %v685_v7  ;;  %782 = vst.msk [vmem:[%s1720_s3 + $0x140] sm:$0xff] %vm741_vm2, %v717_v8  ;;  %v688_v14 = vmax.f32 %v414_v9, 0.0  ;;  %v720_v15 = vmax.f32 %v574_v11, 0.0  ;;  %v409_v16 = vadd.f32 %v1395_v10, %v408_v12  ;;  %v569_v17 = vadd.f32 %v1395_v10, %v568_v13 }
  0xef   :  { %v990_v18 = vpop.f32.mrf.mxu0  ;;  %v1038_v19 = vpop.f32.mrf.mxu1 }
  0xf0   :  { %753 = vst.msk [vmem:[%s1720_s3 + $0x58] sm:$0xff] %vm741_vm2, %v688_v14  ;;  %785 = vst.msk [vmem:[%s1720_s3 + $0x158] sm:$0xff] %vm741_vm2, %v720_v15  ;;  %v687_v20 = vmax.f32 %v409_v16, 0.0  ;;  %v719_v21 = vmax.f32 %v569_v17, 0.0  ;;  %v424_v22 = vadd.f32 %v990_v18, %v1395_v10  ;;  %v584_v23 = vadd.f32 %v1038_v19, %v1395_v10 }
  0xf1   :  { %v418_v24 = vpop.f32.mrf.mxu0  ;;  %v578_v25 = vpop.f32.mrf.mxu1 }
  0xf2   :  { %752 = vst.msk [vmem:[%s1720_s3 + $0x50] sm:$0xff] %vm741_vm2, %v687_v20  ;;  %784 = vst.msk [vmem:[%s1720_s3 + $0x150] sm:$0xff] %vm741_vm2, %v719_v21  ;;  %v690_v26 = vmax.f32 %v424_v22, 0.0  ;;  %v722_v27 = vmax.f32 %v584_v23, 0.0  ;;  %v419_v28 = vadd.f32 %v1395_v10, %v418_v24  ;;  %v579_v29 = vadd.f32 %v1395_v10, %v578_v25 }
  0xf3   :  { %v993_v30 = vpop.f32.mrf.mxu0  ;;  %v1041_v31 = vpop.f32.mrf.mxu1 }
  0xf4   :  { %755 = vst.msk [vmem:[%s1720_s3 + $0x68] sm:$0xff] %vm741_vm2, %v690_v26  ;;  %787 = vst.msk [vmem:[%s1720_s3 + $0x168] sm:$0xff] %vm741_vm2, %v722_v27  ;;  %v689_v32 = vmax.f32 %v419_v28, 0.0  ;;  %v721_v33 = vmax.f32 %v579_v29, 0.0  ;;  %v434_v34 = vadd.f32 %v993_v30, %v1395_v10  ;;  %v594_v35 = vadd.f32 %v1041_v31, %v1395_v10 }
  0xf5   :  { %v428_v36 = vpop.f32.mrf.mxu0  ;;  %v588_v37 = vpop.f32.mrf.mxu1 }
  0xf6   :  { %754 = vst.msk [vmem:[%s1720_s3 + $0x60] sm:$0xff] %vm741_vm2, %v689_v32  ;;  %786 = vst.msk [vmem:[%s1720_s3 + $0x160] sm:$0xff] %vm741_vm2, %v721_v33  ;;  %v692_v38 = vmax.f32 %v434_v34, 0.0  ;;  %v724_v39 = vmax.f32 %v594_v35, 0.0  ;;  %v429_v40 = vadd.f32 %v1395_v10, %v428_v36  ;;  %v589_v41 = vadd.f32 %v1395_v10, %v588_v37 }
  0xf7   :  { %v996_v42 = vpop.f32.mrf.mxu0  ;;  %v1044_v43 = vpop.f32.mrf.mxu1 }
  0xf8   :  { %757 = vst.msk [vmem:[%s1720_s3 + $0x78] sm:$0xff] %vm741_vm2, %v692_v38  ;;  %789 = vst.msk [vmem:[%s1720_s3 + $0x178] sm:$0xff] %vm741_vm2, %v724_v39  ;;  %v691_v44 = vmax.f32 %v429_v40, 0.0  ;;  %v723_v45 = vmax.f32 %v589_v41, 0.0  ;;  %v444_v46 = vadd.f32 %v996_v42, %v1395_v10  ;;  %v604_v47 = vadd.f32 %v1044_v43, %v1395_v10 }
  0xf9   :  { %v438_v48 = vpop.f32.mrf.mxu0  ;;  %v598_v49 = vpop.f32.mrf.mxu1 }
  0xfa   :  { %756 = vst.msk [vmem:[%s1720_s3 + $0x70] sm:$0xff] %vm741_vm2, %v691_v44  ;;  %788 = vst.msk [vmem:[%s1720_s3 + $0x170] sm:$0xff] %vm741_vm2, %v723_v45  ;;  %v694_v50 = vmax.f32 %v444_v46, 0.0  ;;  %v726_v51 = vmax.f32 %v604_v47, 0.0  ;;  %v439_v52 = vadd.f32 %v1395_v10, %v438_v48  ;;  %v599_v53 = vadd.f32 %v1395_v10, %v598_v49 }
  0xfb   :  { %v999_v54 = vpop.f32.mrf.mxu0  ;;  %v1047_v55 = vpop.f32.mrf.mxu1 }
  0xfc   :  { %759 = vst.msk [vmem:[%s1720_s3 + $0x88] sm:$0xff] %vm741_vm2, %v694_v50  ;;  %791 = vst.msk [vmem:[%s1720_s3 + $0x188] sm:$0xff] %vm741_vm2, %v726_v51  ;;  %v693_v56 = vmax.f32 %v439_v52, 0.0  ;;  %v725_v57 = vmax.f32 %v599_v53, 0.0  ;;  %v454_v58 = vadd.f32 %v999_v54, %v1395_v10  ;;  %v614_v59 = vadd.f32 %v1047_v55, %v1395_v10 }
  0xfd   :  { %v448_v60 = vpop.f32.mrf.mxu0  ;;  %v608_v61 = vpop.f32.mrf.mxu1 }
  0xfe   :  { %758 = vst.msk [vmem:[%s1720_s3 + $0x80] sm:$0xff] %vm741_vm2, %v693_v56  ;;  %790 = vst.msk [vmem:[%s1720_s3 + $0x180] sm:$0xff] %vm741_vm2, %v725_v57  ;;  %v696_v62 = vmax.f32 %v454_v58, 0.0  ;;  %v728_v63 = vmax.f32 %v614_v59, 0.0  ;;  %v449_v0 = vadd.f32 %v1395_v10, %v448_v60  ;;  %v609_v1 = vadd.f32 %v1395_v10, %v608_v61 }
  0xff   :  { %v1002_v2 = vpop.f32.mrf.mxu0  ;;  %v1050_v3 = vpop.f32.mrf.mxu1 }
 0x100   :  { %761 = vst.msk [vmem:[%s1720_s3 + $0x98] sm:$0xff] %vm741_vm2, %v696_v62  ;;  %793 = vst.msk [vmem:[%s1720_s3 + $0x198] sm:$0xff] %vm741_vm2, %v728_v63  ;;  %v695_v4 = vmax.f32 %v449_v0, 0.0  ;;  %v727_v5 = vmax.f32 %v609_v1, 0.0  ;;  %v464_v6 = vadd.f32 %v1002_v2, %v1395_v10  ;;  %v624_v7 = vadd.f32 %v1050_v3, %v1395_v10 }
 0x101   :  { %v458_v8 = vpop.f32.mrf.mxu0  ;;  %v618_v9 = vpop.f32.mrf.mxu1 }
 0x102   :  { %760 = vst.msk [vmem:[%s1720_s3 + $0x90] sm:$0xff] %vm741_vm2, %v695_v4  ;;  %792 = vst.msk [vmem:[%s1720_s3 + $0x190] sm:$0xff] %vm741_vm2, %v727_v5  ;;  %v698_v11 = vmax.f32 %v464_v6, 0.0  ;;  %v730_v12 = vmax.f32 %v624_v7, 0.0  ;;  %v459_v13 = vadd.f32 %v1395_v10, %v458_v8  ;;  %v619_v14 = vadd.f32 %v1395_v10, %v618_v9 }
 0x103   :  { %v1005_v15 = vpop.f32.mrf.mxu0  ;;  %v1053_v16 = vpop.f32.mrf.mxu1 }
 0x104   :  { %763 = vst.msk [vmem:[%s1720_s3 + $0xa8] sm:$0xff] %vm741_vm2, %v698_v11  ;;  %795 = vst.msk [vmem:[%s1720_s3 + $0x1a8] sm:$0xff] %vm741_vm2, %v730_v12  ;;  %v697_v17 = vmax.f32 %v459_v13, 0.0  ;;  %v729_v18 = vmax.f32 %v619_v14, 0.0  ;;  %v474_v19 = vadd.f32 %v1005_v15, %v1395_v10  ;;  %v634_v20 = vadd.f32 %v1053_v16, %v1395_v10 }
 0x105   :  { %v468_v21 = vpop.f32.mrf.mxu0  ;;  %v628_v22 = vpop.f32.mrf.mxu1 }
 0x106   :  { %762 = vst.msk [vmem:[%s1720_s3 + $0xa0] sm:$0xff] %vm741_vm2, %v697_v17  ;;  %794 = vst.msk [vmem:[%s1720_s3 + $0x1a0] sm:$0xff] %vm741_vm2, %v729_v18  ;;  %v700_v23 = vmax.f32 %v474_v19, 0.0  ;;  %v732_v24 = vmax.f32 %v634_v20, 0.0  ;;  %v469_v25 = vadd.f32 %v1395_v10, %v468_v21  ;;  %v629_v26 = vadd.f32 %v1395_v10, %v628_v22 }
 0x107   :  { %v1008_v27 = vpop.f32.mrf.mxu0  ;;  %v1056_v28 = vpop.f32.mrf.mxu1 }
 0x108   :  { %765 = vst.msk [vmem:[%s1720_s3 + $0xb8] sm:$0xff] %vm741_vm2, %v700_v23  ;;  %797 = vst.msk [vmem:[%s1720_s3 + $0x1b8] sm:$0xff] %vm741_vm2, %v732_v24  ;;  %v699_v29 = vmax.f32 %v469_v25, 0.0  ;;  %v731_v30 = vmax.f32 %v629_v26, 0.0  ;;  %v484_v31 = vadd.f32 %v1008_v27, %v1395_v10  ;;  %v644_v32 = vadd.f32 %v1056_v28, %v1395_v10 }
 0x109   :  { %v478_v33 = vpop.f32.mrf.mxu0  ;;  %v638_v34 = vpop.f32.mrf.mxu1 }
 0x10a   :  { %764 = vst.msk [vmem:[%s1720_s3 + $0xb0] sm:$0xff] %vm741_vm2, %v699_v29  ;;  %796 = vst.msk [vmem:[%s1720_s3 + $0x1b0] sm:$0xff] %vm741_vm2, %v731_v30  ;;  %v702_v35 = vmax.f32 %v484_v31, 0.0  ;;  %v734_v36 = vmax.f32 %v644_v32, 0.0  ;;  %v479_v37 = vadd.f32 %v1395_v10, %v478_v33  ;;  %v639_v38 = vadd.f32 %v1395_v10, %v638_v34 }
 0x10b   :  { %v1011_v39 = vpop.f32.mrf.mxu0  ;;  %v1059_v40 = vpop.f32.mrf.mxu1 }
 0x10c   :  { %767 = vst.msk [vmem:[%s1720_s3 + $0xc8] sm:$0xff] %vm741_vm2, %v702_v35  ;;  %799 = vst.msk [vmem:[%s1720_s3 + $0x1c8] sm:$0xff] %vm741_vm2, %v734_v36  ;;  %v701_v41 = vmax.f32 %v479_v37, 0.0  ;;  %v733_v42 = vmax.f32 %v639_v38, 0.0  ;;  %v494_v43 = vadd.f32 %v1011_v39, %v1395_v10  ;;  %v654_v44 = vadd.f32 %v1059_v40, %v1395_v10 }
 0x10d   :  { %v488_v45 = vpop.f32.mrf.mxu0  ;;  %v648_v46 = vpop.f32.mrf.mxu1 }
 0x10e   :  { %766 = vst.msk [vmem:[%s1720_s3 + $0xc0] sm:$0xff] %vm741_vm2, %v701_v41  ;;  %798 = vst.msk [vmem:[%s1720_s3 + $0x1c0] sm:$0xff] %vm741_vm2, %v733_v42  ;;  %v704_v47 = vmax.f32 %v494_v43, 0.0  ;;  %v736_v48 = vmax.f32 %v654_v44, 0.0  ;;  %v489_v49 = vadd.f32 %v1395_v10, %v488_v45  ;;  %v649_v50 = vadd.f32 %v1395_v10, %v648_v46 }
 0x10f   :  { %v1014_v51 = vpop.f32.mrf.mxu0  ;;  %v1062_v52 = vpop.f32.mrf.mxu1 }
 0x110   :  { %769 = vst.msk [vmem:[%s1720_s3 + $0xd8] sm:$0xff] %vm741_vm2, %v704_v47  ;;  %801 = vst.msk [vmem:[%s1720_s3 + $0x1d8] sm:$0xff] %vm741_vm2, %v736_v48  ;;  %v703_v53 = vmax.f32 %v489_v49, 0.0  ;;  %v735_v54 = vmax.f32 %v649_v50, 0.0  ;;  %v504_v55 = vadd.f32 %v1014_v51, %v1395_v10  ;;  %v664_v56 = vadd.f32 %v1062_v52, %v1395_v10 }
 0x111   :  { %v498_v57 = vpop.f32.mrf.mxu0  ;;  %v658_v58 = vpop.f32.mrf.mxu1 }
 0x112   :  { %768 = vst.msk [vmem:[%s1720_s3 + $0xd0] sm:$0xff] %vm741_vm2, %v703_v53  ;;  %800 = vst.msk [vmem:[%s1720_s3 + $0x1d0] sm:$0xff] %vm741_vm2, %v735_v54  ;;  %v706_v59 = vmax.f32 %v504_v55, 0.0  ;;  %v738_v60 = vmax.f32 %v664_v56, 0.0  ;;  %v499_v61 = vadd.f32 %v1395_v10, %v498_v57  ;;  %v659_v62 = vadd.f32 %v1395_v10, %v658_v58 }
 0x113   :  { %v1017_v63 = vpop.f32.mrf.mxu0  ;;  %v1065_v0 = vpop.f32.mrf.mxu1 }
 0x114   :  { %771 = vst.msk [vmem:[%s1720_s3 + $0xe8] sm:$0xff] %vm741_vm2, %v706_v59  ;;  %803 = vst.msk [vmem:[%s1720_s3 + $0x1e8] sm:$0xff] %vm741_vm2, %v738_v60  ;;  %v705_v1 = vmax.f32 %v499_v61, 0.0  ;;  %v737_v2 = vmax.f32 %v659_v62, 0.0  ;;  %v514_v3 = vadd.f32 %v1017_v63, %v1395_v10  ;;  %v674_v4 = vadd.f32 %v1065_v0, %v1395_v10 }
 0x115   :  { %v508_v5 = vpop.f32.mrf.mxu0  ;;  %v668_v6 = vpop.f32.mrf.mxu1 }
 0x116   :  { %770 = vst.msk [vmem:[%s1720_s3 + $0xe0] sm:$0xff] %vm741_vm2, %v705_v1  ;;  %802 = vst.msk [vmem:[%s1720_s3 + $0x1e0] sm:$0xff] %vm741_vm2, %v737_v2  ;;  %v708_v7 = vmax.f32 %v514_v3, 0.0  ;;  %v740_v8 = vmax.f32 %v674_v4, 0.0  ;;  %v509_v9 = vadd.f32 %v1395_v10, %v508_v5  ;;  %v669_v11 = vadd.f32 %v1395_v10, %v668_v6 }
 0x118   :  { %773 = vst.msk [vmem:[%s1720_s3 + $0xf8] sm:$0xff] %vm741_vm2, %v708_v7  ;;  %805 = vst.msk [vmem:[%s1720_s3 + $0x1f8] sm:$0xff] %vm741_vm2, %v740_v8  ;;  %v707_v12 = vmax.f32 %v509_v9, 0.0  ;;  %v739_v13 = vmax.f32 %v669_v11, 0.0 }
 0x11a   :  { %772 = vst.msk [vmem:[%s1720_s3 + $0xf0] sm:$0xff] %vm741_vm2, %v707_v12  ;;  %804 = vst.msk [vmem:[%s1720_s3 + $0x1f0] sm:$0xff] %vm741_vm2, %v739_v13 }

// kernel: ra_actor_world_forward.7
= control target key start
LH: loop header
LB: loop body
LE: loop exit
PB: predicated region body
PF: predicated region fallthrough
CT: control target
= control target key end

     0   :  { %vm233_vm0 = vcmask 261120   ;;  %vm878_vm1 = vcmask 523264   ;;  %s2162_s1 = inlined_call_operand.vmem [shape: f32[800,64], index: 1, kind: input, shape index: {}]   ;;  %s2163_s0 = inlined_call_operand.vmem [shape: f32[128,800], index: 0, kind: input, shape index: {}]   ;;  %s2164_s2 = inlined_call_operand.vmem [shape: f32[1,64], index: 2, kind: input, shape index: {}]   ;;  %s2165_s3 = inlined_call_operand.vmem [shape: f32[128,64], index: 3, kind: output, shape index: {}]  }
   0x1   :  { %v157_v0 = vld [vmem:[%s2162_s1 + $0xf8] sm:$0xff]  ;;  %v156_v4 = vld [vmem:[%s2162_s1 + $0xf0] sm:$0xff]  ;;  %v155_v8 = vld [vmem:[%s2162_s1 + $0xe8] sm:$0xff] }
   0x2   :  { %v189_v1 = vld [vmem:[%s2162_s1 + $0x1f8] sm:$0xff]  ;;  %916 = vmatprep.subr.mxu0 %v157_v0  ;;  %v188_v5 = vld [vmem:[%s2162_s1 + $0x1f0] sm:$0xff]  ;;  %v187_v9 = vld [vmem:[%s2162_s1 + $0x1e8] sm:$0xff] }
   0x3   :  { %v141_v2 = vld [vmem:[%s2162_s1 + $0x78] sm:$0xff]  ;;  %996 = vmatprep.subr.mxu1 %v189_v1  ;;  %v140_v6 = vld [vmem:[%s2162_s1 + $0x70] sm:$0xff]  ;;  %v139_v10 = vld [vmem:[%s2162_s1 + $0x68] sm:$0xff] }
   0x4   :  { %v173_v3 = vld [vmem:[%s2162_s1 + $0x178] sm:$0xff]  ;;  %917 = vmatpush3.msra.mxu0 %v141_v2  ;;  %v172_v7 = vld [vmem:[%s2162_s1 + $0x170] sm:$0xff]  ;;  %v171_v11 = vld [vmem:[%s2162_s1 + $0x168] sm:$0xff] }
   0x5   :  { %997 = vmatpush3.msra.mxu1 %v173_v3  ;;  %918 = vmatprep.subr.mxu0 %v156_v4  ;;  %v154_v12 = vld [vmem:[%s2162_s1 + $0xe0] sm:$0xff]  ;;  %v153_v16 = vld [vmem:[%s2162_s1 + $0xd8] sm:$0xff]  ;;  %v152_v20 = vld [vmem:[%s2162_s1 + $0xd0] sm:$0xff] }
   0x6   :  { %998 = vmatprep.subr.mxu1 %v188_v5  ;;  %919 = vmatpush3.msra.mxu0 %v140_v6  ;;  %v186_v13 = vld [vmem:[%s2162_s1 + $0x1e0] sm:$0xff]  ;;  %v185_v17 = vld [vmem:[%s2162_s1 + $0x1d8] sm:$0xff]  ;;  %v184_v21 = vld [vmem:[%s2162_s1 + $0x1d0] sm:$0xff] }
   0x7   :  { %999 = vmatpush3.msra.mxu1 %v172_v7  ;;  %920 = vmatprep.subr.mxu0 %v155_v8  ;;  %v138_v14 = vld [vmem:[%s2162_s1 + $0x60] sm:$0xff]  ;;  %v137_v18 = vld [vmem:[%s2162_s1 + $0x58] sm:$0xff]  ;;  %v136_v22 = vld [vmem:[%s2162_s1 + $0x50] sm:$0xff] }
   0x8   :  { %1000 = vmatprep.subr.mxu1 %v187_v9  ;;  %v170_v15 = vld [vmem:[%s2162_s1 + $0x160] sm:$0xff]  ;;  %921 = vmatpush3.msra.mxu0 %v139_v10  ;;  %v169_v19 = vld [vmem:[%s2162_s1 + $0x158] sm:$0xff]  ;;  %v168_v23 = vld [vmem:[%s2162_s1 + $0x150] sm:$0xff] }
   0x9   :  { %1001 = vmatpush3.msra.mxu1 %v171_v11  ;;  %922 = vmatprep.subr.mxu0 %v154_v12  ;;  %v151_v24 = vld [vmem:[%s2162_s1 + $0xc8] sm:$0xff]  ;;  %v150_v28 = vld [vmem:[%s2162_s1 + $0xc0] sm:$0xff]  ;;  %v149_v32 = vld [vmem:[%s2162_s1 + $0xb8] sm:$0xff] }
   0xa   :  { %1002 = vmatprep.subr.mxu1 %v186_v13  ;;  %923 = vmatpush3.msra.mxu0 %v138_v14  ;;  %v183_v25 = vld [vmem:[%s2162_s1 + $0x1c8] sm:$0xff]  ;;  %v182_v29 = vld [vmem:[%s2162_s1 + $0x1c0] sm:$0xff]  ;;  %v181_v33 = vld [vmem:[%s2162_s1 + $0x1b8] sm:$0xff] }
   0xb   :  { %1003 = vmatpush3.msra.mxu1 %v170_v15  ;;  %924 = vmatprep.subr.mxu0 %v153_v16  ;;  %v135_v26 = vld [vmem:[%s2162_s1 + $0x48] sm:$0xff]  ;;  %v134_v30 = vld [vmem:[%s2162_s1 + $0x40] sm:$0xff]  ;;  %v133_v34 = vld [vmem:[%s2162_s1 + $0x38] sm:$0xff] }
   0xc   :  { %1004 = vmatprep.subr.mxu1 %v185_v17  ;;  %925 = vmatpush3.msra.mxu0 %v137_v18  ;;  %v167_v27 = vld [vmem:[%s2162_s1 + $0x148] sm:$0xff]  ;;  %v166_v31 = vld [vmem:[%s2162_s1 + $0x140] sm:$0xff]  ;;  %v165_v35 = vld [vmem:[%s2162_s1 + $0x138] sm:$0xff] }
   0xd   :  { %1005 = vmatpush3.msra.mxu1 %v169_v19  ;;  %926 = vmatprep.subr.mxu0 %v152_v20  ;;  %v148_v36 = vld [vmem:[%s2162_s1 + $0xb0] sm:$0xff]  ;;  %v147_v40 = vld [vmem:[%s2162_s1 + $0xa8] sm:$0xff]  ;;  %v146_v44 = vld [vmem:[%s2162_s1 + $0xa0] sm:$0xff] }
   0xe   :  { %1006 = vmatprep.subr.mxu1 %v184_v21  ;;  %927 = vmatpush3.msra.mxu0 %v136_v22  ;;  %v180_v37 = vld [vmem:[%s2162_s1 + $0x1b0] sm:$0xff]  ;;  %v179_v41 = vld [vmem:[%s2162_s1 + $0x1a8] sm:$0xff]  ;;  %v178_v45 = vld [vmem:[%s2162_s1 + $0x1a0] sm:$0xff] }
   0xf   :  { %1007 = vmatpush3.msra.mxu1 %v168_v23  ;;  %928 = vmatprep.subr.mxu0 %v151_v24  ;;  %v132_v38 = vld [vmem:[%s2162_s1 + $0x30] sm:$0xff]  ;;  %v131_v42 = vld [vmem:[%s2162_s1 + $0x28] sm:$0xff]  ;;  %v130_v46 = vld [vmem:[%s2162_s1 + $0x20] sm:$0xff] }
  0x10   :  { %1008 = vmatprep.subr.mxu1 %v183_v25  ;;  %929 = vmatpush3.msra.mxu0 %v135_v26  ;;  %v164_v39 = vld [vmem:[%s2162_s1 + $0x130] sm:$0xff]  ;;  %v163_v43 = vld [vmem:[%s2162_s1 + $0x128] sm:$0xff]  ;;  %v162_v47 = vld [vmem:[%s2162_s1 + $0x120] sm:$0xff] }
  0x11   :  { %1009 = vmatpush3.msra.mxu1 %v167_v27  ;;  %930 = vmatprep.subr.mxu0 %v150_v28  ;;  %v145_v48 = vld [vmem:[%s2162_s1 + $0x98] sm:$0xff]  ;;  %v144_v52 = vld [vmem:[%s2162_s1 + $0x90] sm:$0xff]  ;;  %v143_v56 = vld [vmem:[%s2162_s1 + $0x88] sm:$0xff] }
  0x12   :  { %1010 = vmatprep.subr.mxu1 %v182_v29  ;;  %931 = vmatpush3.msra.mxu0 %v134_v30  ;;  %v177_v49 = vld [vmem:[%s2162_s1 + $0x198] sm:$0xff]  ;;  %v176_v53 = vld [vmem:[%s2162_s1 + $0x190] sm:$0xff]  ;;  %v175_v57 = vld [vmem:[%s2162_s1 + $0x188] sm:$0xff] }
  0x13   :  { %1011 = vmatpush3.msra.mxu1 %v166_v31  ;;  %932 = vmatprep.subr.mxu0 %v149_v32  ;;  %v129_v50 = vld [vmem:[%s2162_s1 + $0x18] sm:$0xff]  ;;  %v128_v54 = vld [vmem:[%s2162_s1 + $0x10] sm:$0xff]  ;;  %v127_v58 = vld [vmem:[%s2162_s1 + $0x8] sm:$0xff] }
  0x14   :  { %1012 = vmatprep.subr.mxu1 %v181_v33  ;;  %933 = vmatpush3.msra.mxu0 %v133_v34  ;;  %v161_v51 = vld [vmem:[%s2162_s1 + $0x118] sm:$0xff]  ;;  %v160_v55 = vld [vmem:[%s2162_s1 + $0x110] sm:$0xff]  ;;  %v159_v59 = vld [vmem:[%s2162_s1 + $0x108] sm:$0xff] }
  0x15   :  { %1013 = vmatpush3.msra.mxu1 %v165_v35  ;;  %934 = vmatprep.subr.mxu0 %v148_v36  ;;  %v142_v60 = vld [vmem:[%s2162_s1 + $0x80] sm:$0xff]  ;;  %v15_v63 = vld [vmem:[%s2163_s0 + $0x8] sm:$0xff]  ;;  %v17_v1 = vld [vmem:[%s2163_s0 + $0x18] sm:$0xff] }
  0x16   :  { %1014 = vmatprep.subr.mxu1 %v180_v37  ;;  %935 = vmatpush3.msra.mxu0 %v132_v38  ;;  %v174_v61 = vld [vmem:[%s2162_s1 + $0x180] sm:$0xff]  ;;  %v16_v3 = vld [vmem:[%s2163_s0 + $0x10] sm:$0xff]  ;;  %v221_v4 = vld [vmem:[%s2162_s1 + $0x2f8] sm:$0xff] }
  0x17   :  { %1015 = vmatpush3.msra.mxu1 %v164_v39  ;;  %936 = vmatprep.subr.mxu0 %v147_v40  ;;  %v126_v62 = vld [vmem:[%s2162_s1] sm:$0xff]  ;;  %v205_v6 = vld [vmem:[%s2162_s1 + $0x278] sm:$0xff]  ;;  %v24_v7 = vld [vmem:[%s2163_s0 + $0x50] sm:$0xff] }
  0x18   :  { %1016 = vmatprep.subr.mxu1 %v179_v41  ;;  %937 = vmatpush3.msra.mxu0 %v131_v42  ;;  %v158_v0 = vld [vmem:[%s2162_s1 + $0x100] sm:$0xff]  ;;  %v220_v8 = vld [vmem:[%s2162_s1 + $0x2f0] sm:$0xff]  ;;  %v21_v9 = vld [vmem:[%s2163_s0 + $0x38] sm:$0xff] }
  0x19   :  { %1017 = vmatpush3.msra.mxu1 %v163_v43  ;;  %938 = vmatprep.subr.mxu0 %v146_v44  ;;  %v14_v2 = vld [vmem:[%s2163_s0] sm:$0xff]  ;;  %v23_v10 = vld [vmem:[%s2163_s0 + $0x48] sm:$0xff]  ;;  %v204_v11 = vld [vmem:[%s2162_s1 + $0x270] sm:$0xff] }
  0x1a   :  { %1018 = vmatprep.subr.mxu1 %v178_v45  ;;  %939 = vmatpush3.msra.mxu0 %v130_v46  ;;  %v22_v5 = vld [vmem:[%s2163_s0 + $0x40] sm:$0xff]  ;;  %v29_v12 = vld [vmem:[%s2163_s0 + $0x78] sm:$0xff]  ;;  %v31_v13 = vld [vmem:[%s2163_s0 + $0x88] sm:$0xff] }
  0x1b   :  { %1019 = vmatpush3.msra.mxu1 %v162_v47  ;;  %940 = vmatprep.subr.mxu0 %v145_v48  ;;  %v219_v14 = vld [vmem:[%s2162_s1 + $0x2e8] sm:$0xff]  ;;  %v28_v15 = vld [vmem:[%s2163_s0 + $0x70] sm:$0xff]  ;;  %v30_v16 = vld [vmem:[%s2163_s0 + $0x80] sm:$0xff] }
  0x1c   :  { %1020 = vmatprep.subr.mxu1 %v177_v49  ;;  %941 = vmatpush3.msra.mxu0 %v129_v50  ;;  %v203_v17 = vld [vmem:[%s2162_s1 + $0x268] sm:$0xff]  ;;  %v36_v18 = vld [vmem:[%s2163_s0 + $0xb0] sm:$0xff]  ;;  %v38_v19 = vld [vmem:[%s2163_s0 + $0xc0] sm:$0xff] }
  0x1d   :  { %1021 = vmatpush3.msra.mxu1 %v161_v51  ;;  %942 = vmatprep.subr.mxu0 %v144_v52  ;;  %v218_v20 = vld [vmem:[%s2162_s1 + $0x2e0] sm:$0xff]  ;;  %v35_v21 = vld [vmem:[%s2163_s0 + $0xa8] sm:$0xff]  ;;  %v37_v22 = vld [vmem:[%s2163_s0 + $0xb8] sm:$0xff] }
  0x1e   :  { %1022 = vmatprep.subr.mxu1 %v176_v53  ;;  %943 = vmatpush3.msra.mxu0 %v128_v54  ;;  %v202_v23 = vld [vmem:[%s2162_s1 + $0x260] sm:$0xff]  ;;  %v43_v24 = vld [vmem:[%s2163_s0 + $0xe8] sm:$0xff]  ;;  %v45_v25 = vld [vmem:[%s2163_s0 + $0xf8] sm:$0xff] }
  0x1f   :  { %1023 = vmatpush3.msra.mxu1 %v160_v55  ;;  %944 = vmatprep.subr.mxu0 %v143_v56  ;;  %v217_v26 = vld [vmem:[%s2162_s1 + $0x2d8] sm:$0xff]  ;;  %v42_v27 = vld [vmem:[%s2163_s0 + $0xe0] sm:$0xff]  ;;  %v44_v28 = vld [vmem:[%s2163_s0 + $0xf0] sm:$0xff] }
  0x20   :  { %1024 = vmatprep.subr.mxu1 %v175_v57  ;;  %945 = vmatpush3.msra.mxu0 %v127_v58  ;;  %v201_v29 = vld [vmem:[%s2162_s1 + $0x258] sm:$0xff]  ;;  %v50_v30 = vld [vmem:[%s2163_s0 + $0x120] sm:$0xff]  ;;  %v52_v31 = vld [vmem:[%s2163_s0 + $0x130] sm:$0xff] }
  0x21   :  { %1025 = vmatpush3.msra.mxu1 %v159_v59  ;;  %946 = vmatprep.subr.mxu0 %v142_v60  ;;  %v216_v32 = vld [vmem:[%s2162_s1 + $0x2d0] sm:$0xff]  ;;  %v49_v33 = vld [vmem:[%s2163_s0 + $0x118] sm:$0xff]  ;;  %v51_v34 = vld [vmem:[%s2163_s0 + $0x128] sm:$0xff] }
  0x22   :  { %1026 = vmatprep.subr.mxu1 %v174_v61  ;;  %947 = vmatpush3.msra.mxu0 %v126_v62  ;;  %v200_v35 = vld [vmem:[%s2162_s1 + $0x250] sm:$0xff]  ;;  %v57_v36 = vld [vmem:[%s2163_s0 + $0x158] sm:$0xff]  ;;  %v59_v37 = vld [vmem:[%s2163_s0 + $0x168] sm:$0xff] }
  0x23   :  { %346 = vmatprep.mubr.f32.mxu0 %v15_v63  ;;  %1027 = vmatpush3.msra.mxu1 %v158_v0  ;;  %v215_v38 = vld [vmem:[%s2162_s1 + $0x2c8] sm:$0xff]  ;;  %v56_v39 = vld [vmem:[%s2163_s0 + $0x150] sm:$0xff]  ;;  %v58_v40 = vld [vmem:[%s2163_s0 + $0x160] sm:$0xff] }
  0x24   :  { %491 = vmatprep.mubr.f32.mxu1 %v17_v1  ;;  %347 = vmatmul.mubr.f32.vlgmr.msra.gmra.mxu0 %v14_v2  ;;  %v199_v41 = vld [vmem:[%s2162_s1 + $0x248] sm:$0xff]  ;;  %v64_v42 = vld [vmem:[%s2163_s0 + $0x190] sm:$0xff]  ;;  %v66_v43 = vld [vmem:[%s2163_s0 + $0x1a0] sm:$0xff] }
  0x25   :  { %492 = vmatmul.mubr.f32.vlgmr.msra.gmra.mxu1 %v16_v3  ;;  %1076 = vmatprep.subr.mxu0 %v221_v4  ;;  %v214_v44 = vld [vmem:[%s2162_s1 + $0x2c0] sm:$0xff]  ;;  %v63_v45 = vld [vmem:[%s2163_s0 + $0x188] sm:$0xff]  ;;  %v65_v46 = vld [vmem:[%s2163_s0 + $0x198] sm:$0xff] }
  0x26   :  { %351 = vmatprep.mubr.f32.mxu0 %v22_v5  ;;  %1077 = vmatpush3.msra.mxu0 %v205_v6  ;;  %v198_v47 = vld [vmem:[%s2162_s1 + $0x240] sm:$0xff]  ;;  %v71_v48 = vld [vmem:[%s2163_s0 + $0x1c8] sm:$0xff]  ;;  %v73_v49 = vld [vmem:[%s2163_s0 + $0x1d8] sm:$0xff] }
  0x27   :  { %496 = vmatprep.mubr.f32.mxu1 %v24_v7  ;;  %1208 = vmatprep.subr.mxu1 %v221_v4  ;;  %v213_v50 = vld [vmem:[%s2162_s1 + $0x2b8] sm:$0xff]  ;;  %v70_v51 = vld [vmem:[%s2163_s0 + $0x1c0] sm:$0xff]  ;;  %v72_v52 = vld [vmem:[%s2163_s0 + $0x1d0] sm:$0xff] }
  0x28   :  { %1078 = vmatprep.subr.mxu0 %v220_v8  ;;  %352 = vmatmul.mubr.f32.gmra.mxu0 %v21_v9  ;;  %v197_v53 = vld [vmem:[%s2162_s1 + $0x238] sm:$0xff]  ;;  %v78_v54 = vld [vmem:[%s2163_s0 + $0x200] sm:$0xff]  ;;  %v80_v55 = vld [vmem:[%s2163_s0 + $0x210] sm:$0xff] }
  0x29   :  { %497 = vmatmul.mubr.f32.gmra.mxu1 %v23_v10  ;;  %1079 = vmatpush3.msra.mxu0 %v204_v11  ;;  %v212_v56 = vld [vmem:[%s2162_s1 + $0x2b0] sm:$0xff]  ;;  %v77_v57 = vld [vmem:[%s2163_s0 + $0x1f8] sm:$0xff]  ;;  %v79_v58 = vld [vmem:[%s2163_s0 + $0x208] sm:$0xff] }
  0x2a   :  { %1224 = vmatpush3.msra.mxu1 %v205_v6  ;;  %356 = vmatprep.mubr.f32.mxu0 %v29_v12  ;;  %v196_v59 = vld [vmem:[%s2162_s1 + $0x230] sm:$0xff]  ;;  %v85_v60 = vld [vmem:[%s2163_s0 + $0x238] sm:$0xff]  ;;  %v87_v61 = vld [vmem:[%s2163_s0 + $0x248] sm:$0xff] }
  0x2b   :  { %501 = vmatprep.mubr.f32.mxu1 %v31_v13  ;;  %1209 = vmatprep.subr.mxu1 %v220_v8  ;;  %v211_v62 = vld [vmem:[%s2162_s1 + $0x2a8] sm:$0xff]  ;;  %v84_v63 = vld [vmem:[%s2163_s0 + $0x230] sm:$0xff]  ;;  %v86_v0 = vld [vmem:[%s2163_s0 + $0x240] sm:$0xff] }
  0x2c   :  { %1080 = vmatprep.subr.mxu0 %v219_v14  ;;  %357 = vmatmul.mubr.f32.gmra.mxu0 %v28_v15  ;;  %v195_v1 = vld [vmem:[%s2162_s1 + $0x228] sm:$0xff]  ;;  %v92_v2 = vld [vmem:[%s2163_s0 + $0x270] sm:$0xff]  ;;  %v94_v3 = vld [vmem:[%s2163_s0 + $0x280] sm:$0xff] }
  0x2d   :  { %502 = vmatmul.mubr.f32.gmra.mxu1 %v30_v16  ;;  %1081 = vmatpush3.msra.mxu0 %v203_v17  ;;  %v210_v4 = vld [vmem:[%s2162_s1 + $0x2a0] sm:$0xff]  ;;  %v91_v5 = vld [vmem:[%s2163_s0 + $0x268] sm:$0xff]  ;;  %v93_v6 = vld [vmem:[%s2163_s0 + $0x278] sm:$0xff] }
  0x2e   :  { %1225 = vmatpush3.msra.mxu1 %v204_v11  ;;  %361 = vmatprep.mubr.f32.mxu0 %v36_v18  ;;  %v194_v7 = vld [vmem:[%s2162_s1 + $0x220] sm:$0xff]  ;;  %v99_v8 = vld [vmem:[%s2163_s0 + $0x2a8] sm:$0xff]  ;;  %v101_v9 = vld [vmem:[%s2163_s0 + $0x2b8] sm:$0xff] }
  0x2f   :  { %506 = vmatprep.mubr.f32.mxu1 %v38_v19  ;;  %1210 = vmatprep.subr.mxu1 %v219_v14  ;;  %v209_v10 = vld [vmem:[%s2162_s1 + $0x298] sm:$0xff]  ;;  %v98_v11 = vld [vmem:[%s2163_s0 + $0x2a0] sm:$0xff]  ;;  %v100_v12 = vld [vmem:[%s2163_s0 + $0x2b0] sm:$0xff] }
  0x30   :  { %1082 = vmatprep.subr.mxu0 %v218_v20  ;;  %362 = vmatmul.mubr.f32.gmra.mxu0 %v35_v21  ;;  %v193_v13 = vld [vmem:[%s2162_s1 + $0x218] sm:$0xff]  ;;  %v106_v14 = vld [vmem:[%s2163_s0 + $0x2e0] sm:$0xff]  ;;  %v108_v15 = vld [vmem:[%s2163_s0 + $0x2f0] sm:$0xff] }
  0x31   :  { %507 = vmatmul.mubr.f32.gmra.mxu1 %v37_v22  ;;  %1083 = vmatpush3.msra.mxu0 %v202_v23  ;;  %v208_v16 = vld [vmem:[%s2162_s1 + $0x290] sm:$0xff]  ;;  %v107_v18 = vld [vmem:[%s2163_s0 + $0x2e8] sm:$0xff] }
  0x32   :  { %1226 = vmatpush3.msra.mxu1 %v203_v17  ;;  %366 = vmatprep.mubr.f32.mxu0 %v43_v24  ;;  %v105_v17 = vld [vmem:[%s2163_s0 + $0x2d8] sm:$0xff]  ;;  %v192_v19 = vld [vmem:[%s2162_s1 + $0x210] sm:$0xff]  ;;  %v115_v21 = vld [vmem:[%s2163_s0 + $0x328] sm:$0xff] }
  0x33   :  { %511 = vmatprep.mubr.f32.mxu1 %v45_v25  ;;  %1211 = vmatprep.subr.mxu1 %v218_v20  ;;  %v113_v20 = vld [vmem:[%s2163_s0 + $0x318] sm:$0xff]  ;;  %v207_v22 = vld [vmem:[%s2162_s1 + $0x288] sm:$0xff]  ;;  %v114_v24 = vld [vmem:[%s2163_s0 + $0x320] sm:$0xff] }
  0x34   :  { %1084 = vmatprep.subr.mxu0 %v217_v26  ;;  %367 = vmatmul.mubr.f32.gmra.mxu0 %v42_v27  ;;  %v191_v25 = vld [vmem:[%s2162_s1 + $0x208] sm:$0xff]  ;;  %v122_v27 = vld [vmem:[%s2163_s0 + $0x360] sm:$0xff] }
  0x35   :  { %512 = vmatmul.mubr.f32.gmra.mxu1 %v44_v28  ;;  %1085 = vmatpush3.msra.mxu0 %v201_v29  ;;  %v206_v28 = vld [vmem:[%s2162_s1 + $0x280] sm:$0xff] }
  0x36   :  { %1227 = vmatpush3.msra.mxu1 %v202_v23  ;;  %371 = vmatprep.mubr.f32.mxu0 %v50_v30  ;;  %v112_v23 = vld [vmem:[%s2163_s0 + $0x310] sm:$0xff]  ;;  %v121_v30 = vld [vmem:[%s2163_s0 + $0x358] sm:$0xff] }
  0x37   :  { %516 = vmatprep.mubr.f32.mxu1 %v52_v31  ;;  %1212 = vmatprep.subr.mxu1 %v217_v26  ;;  %v120_v26 = vld [vmem:[%s2163_s0 + $0x350] sm:$0xff]  ;;  %v190_v31 = vld [vmem:[%s2162_s1 + $0x200] sm:$0xff] }
  0x38   :  { %1086 = vmatprep.subr.mxu0 %v216_v32  ;;  %372 = vmatmul.mubr.f32.gmra.mxu0 %v49_v33  ;;  %v103_v33 = vld [vmem:[%s2163_s0 + $0x2c8] sm:$0xff] }
  0x39   :  { %517 = vmatmul.mubr.f32.gmra.mxu1 %v51_v34  ;;  %1087 = vmatpush3.msra.mxu0 %v200_v35  ;;  %v18_v34 = vld [vmem:[%s2163_s0 + $0x20] sm:$0xff] }
  0x3a   :  { %1228 = vmatpush3.msra.mxu1 %v201_v29  ;;  %376 = vmatprep.mubr.f32.mxu0 %v57_v36  ;;  %v119_v29 = vld [vmem:[%s2163_s0 + $0x348] sm:$0xff]  ;;  %v26_v36 = vld [vmem:[%s2163_s0 + $0x60] sm:$0xff] }
  0x3b   :  { %521 = vmatprep.mubr.f32.mxu1 %v59_v37  ;;  %1213 = vmatprep.subr.mxu1 %v216_v32  ;;  %v19_v32 = vld [vmem:[%s2163_s0 + $0x28] sm:$0xff]  ;;  %v110_v37 = vld [vmem:[%s2163_s0 + $0x300] sm:$0xff] }
  0x3c   :  { %1088 = vmatprep.subr.mxu0 %v215_v38  ;;  %377 = vmatmul.mubr.f32.gmra.mxu0 %v56_v39  ;;  %v25_v39 = vld [vmem:[%s2163_s0 + $0x58] sm:$0xff] }
  0x3d   :  { %522 = vmatmul.mubr.f32.gmra.mxu1 %v58_v40  ;;  %1089 = vmatpush3.msra.mxu0 %v199_v41  ;;  %v109_v40 = vld [vmem:[%s2163_s0 + $0x2f8] sm:$0xff] }
  0x3e   :  { %1229 = vmatpush3.msra.mxu1 %v200_v35  ;;  %381 = vmatprep.mubr.f32.mxu0 %v64_v42  ;;  %v102_v35 = vld [vmem:[%s2163_s0 + $0x2c0] sm:$0xff]  ;;  %v117_v42 = vld [vmem:[%s2163_s0 + $0x338] sm:$0xff] }
  0x3f   :  { %526 = vmatprep.mubr.f32.mxu1 %v66_v43  ;;  %1214 = vmatprep.subr.mxu1 %v215_v38  ;;  %v225_v38 = vld [vmem:[%s2162_s1 + $0x318] sm:$0xff]  ;;  %v224_v43 = vld [vmem:[%s2162_s1 + $0x310] sm:$0xff] }
  0x40   :  { %1090 = vmatprep.subr.mxu0 %v214_v44  ;;  %382 = vmatmul.mubr.f32.gmra.mxu0 %v63_v45  ;;  %v116_v45 = vld [vmem:[%s2163_s0 + $0x330] sm:$0xff] }
  0x41   :  { %527 = vmatmul.mubr.f32.gmra.mxu1 %v65_v46  ;;  %1091 = vmatpush3.msra.mxu0 %v198_v47  ;;  %v40_v46 = vld [vmem:[%s2163_s0 + $0xd0] sm:$0xff] }
  0x42   :  { %1230 = vmatpush3.msra.mxu1 %v199_v41  ;;  %386 = vmatprep.mubr.f32.mxu0 %v71_v48  ;;  %v33_v41 = vld [vmem:[%s2163_s0 + $0x98] sm:$0xff]  ;;  %v223_v48 = vld [vmem:[%s2162_s1 + $0x308] sm:$0xff] }
  0x43   :  { %531 = vmatprep.mubr.f32.mxu1 %v73_v49  ;;  %1215 = vmatprep.subr.mxu1 %v214_v44  ;;  %v32_v44 = vld [vmem:[%s2163_s0 + $0x90] sm:$0xff]  ;;  %v39_v49 = vld [vmem:[%s2163_s0 + $0xc8] sm:$0xff] }
  0x44   :  { %1092 = vmatprep.subr.mxu0 %v213_v50  ;;  %387 = vmatmul.mubr.f32.gmra.mxu0 %v70_v51  ;;  %v222_v51 = vld [vmem:[%s2162_s1 + $0x300] sm:$0xff] }
  0x45   :  { %532 = vmatmul.mubr.f32.gmra.mxu1 %v72_v52  ;;  %1093 = vmatpush3.msra.mxu0 %v197_v53  ;;  %v47_v52 = vld [vmem:[%s2163_s0 + $0x108] sm:$0xff] }
  0x46   :  { %1231 = vmatpush3.msra.mxu1 %v198_v47  ;;  %391 = vmatprep.mubr.f32.mxu0 %v78_v54  ;;  %v124_v47 = vld [vmem:[%s2163_s0 + $0x370] sm:$0xff]  ;;  %v46_v54 = vld [vmem:[%s2163_s0 + $0x100] sm:$0xff] }
  0x47   :  { %536 = vmatprep.mubr.f32.mxu1 %v80_v55  ;;  %1216 = vmatprep.subr.mxu1 %v213_v50  ;;  %v123_v50 = vld [vmem:[%s2163_s0 + $0x368] sm:$0xff] }
  0x48   :  { %1094 = vmatprep.subr.mxu0 %v212_v56  ;;  %392 = vmatmul.mubr.f32.gmra.mxu0 %v77_v57  ;;  %v27_v55 = vld [vmem:[%s2163_s0 + $0x68] sm:$0xff]  ;;  %v34_v57 = vld [vmem:[%s2163_s0 + $0xa0] sm:$0xff] }
  0x49   :  { %537 = vmatmul.mubr.f32.gmra.mxu1 %v79_v58  ;;  %1095 = vmatpush3.msra.mxu0 %v196_v59  ;;  %v53_v58 = vld [vmem:[%s2163_s0 + $0x138] sm:$0xff] }
  0x4a   :  { %1232 = vmatpush3.msra.mxu1 %v197_v53  ;;  %396 = vmatprep.mubr.f32.mxu0 %v85_v60  ;;  %v20_v53 = vld [vmem:[%s2163_s0 + $0x30] sm:$0xff]  ;;  %v61_v60 = vld [vmem:[%s2163_s0 + $0x178] sm:$0xff] }
  0x4b   :  { %541 = vmatprep.mubr.f32.mxu1 %v87_v61  ;;  %1217 = vmatprep.subr.mxu1 %v212_v56  ;;  %v54_v56 = vld [vmem:[%s2163_s0 + $0x140] sm:$0xff]  ;;  %v48_v61 = vld [vmem:[%s2163_s0 + $0x110] sm:$0xff] }
  0x4c   :  { %1096 = vmatprep.subr.mxu0 %v211_v62  ;;  %397 = vmatmul.mubr.f32.gmra.mxu0 %v84_v63  ;;  %v55_v63 = vld [vmem:[%s2163_s0 + $0x148] sm:$0xff] }
  0x4d   :  { %542 = vmatmul.mubr.f32.gmra.mxu1 %v86_v0  ;;  %1097 = vmatpush3.msra.mxu0 %v195_v1  ;;  %v68_v0 = vld [vmem:[%s2163_s0 + $0x1b0] sm:$0xff] }
  0x4e   :  { %1233 = vmatpush3.msra.mxu1 %v196_v59  ;;  %401 = vmatprep.mubr.f32.mxu0 %v92_v2  ;;  %v41_v59 = vld [vmem:[%s2163_s0 + $0xd8] sm:$0xff]  ;;  %v67_v2 = vld [vmem:[%s2163_s0 + $0x1a8] sm:$0xff] }
  0x4f   :  { %546 = vmatprep.mubr.f32.mxu1 %v94_v3  ;;  %1218 = vmatprep.subr.mxu1 %v211_v62  ;;  %v60_v62 = vld [vmem:[%s2163_s0 + $0x170] sm:$0xff]  ;;  %v69_v3 = vld [vmem:[%s2163_s0 + $0x1b8] sm:$0xff] }
  0x50   :  { %1098 = vmatprep.subr.mxu0 %v210_v4  ;;  %402 = vmatmul.mubr.f32.gmra.mxu0 %v91_v5  ;;  %v76_v5 = vld [vmem:[%s2163_s0 + $0x1f0] sm:$0xff] }
  0x51   :  { %547 = vmatmul.mubr.f32.gmra.mxu1 %v93_v6  ;;  %1099 = vmatpush3.msra.mxu0 %v194_v7  ;;  %v74_v6 = vld [vmem:[%s2163_s0 + $0x1e0] sm:$0xff] }
  0x52   :  { %1234 = vmatpush3.msra.mxu1 %v195_v1  ;;  %406 = vmatprep.mubr.f32.mxu0 %v99_v8  ;;  %v62_v1 = vld [vmem:[%s2163_s0 + $0x180] sm:$0xff] }
  0x53   :  { %551 = vmatprep.mubr.f32.mxu1 %v101_v9  ;;  %1219 = vmatprep.subr.mxu1 %v210_v4  ;;  %v75_v4 = vld [vmem:[%s2163_s0 + $0x1e8] sm:$0xff]  ;;  %v82_v8 = vld [vmem:[%s2163_s0 + $0x220] sm:$0xff] }
  0x54   :  { %1100 = vmatprep.subr.mxu0 %v209_v10  ;;  %407 = vmatmul.mubr.f32.gmra.mxu0 %v98_v11  ;;  %v90_v9 = vld [vmem:[%s2163_s0 + $0x260] sm:$0xff]  ;;  %v97_v11 = vld [vmem:[%s2163_s0 + $0x298] sm:$0xff] }
  0x55   :  { %552 = vmatmul.mubr.f32.gmra.mxu1 %v100_v12  ;;  %1101 = vmatpush3.msra.mxu0 %v193_v13  ;;  %v89_v12 = vld [vmem:[%s2163_s0 + $0x258] sm:$0xff] }
  0x56   :  { %1235 = vmatpush3.msra.mxu1 %v194_v7  ;;  %411 = vmatprep.mubr.f32.mxu0 %v106_v14  ;;  %v83_v7 = vld [vmem:[%s2163_s0 + $0x228] sm:$0xff]  ;;  %v88_v14 = vld [vmem:[%s2163_s0 + $0x250] sm:$0xff] }
  0x57   :  { %556 = vmatprep.mubr.f32.mxu1 %v108_v15  ;;  %1220 = vmatprep.subr.mxu1 %v209_v10  ;;  %v81_v10 = vld [vmem:[%s2163_s0 + $0x218] sm:$0xff]  ;;  %v111_v15 = vld [vmem:[%s2163_s0 + $0x308] sm:$0xff] }
  0x58   :  { %1102 = vmatprep.subr.mxu0 %v208_v16  ;;  %412 = vmatmul.mubr.f32.gmra.mxu0 %v105_v17  ;;  %v118_v17 = vld [vmem:[%s2163_s0 + $0x340] sm:$0xff] }
  0x59   :  { %557 = vmatmul.mubr.f32.gmra.mxu1 %v107_v18  ;;  %1103 = vmatpush3.msra.mxu0 %v192_v19  ;;  %v95_v18 = vld [vmem:[%s2163_s0 + $0x288] sm:$0xff] }
  0x5a   :  { %1236 = vmatpush3.msra.mxu1 %v193_v13  ;;  %416 = vmatprep.mubr.f32.mxu0 %v113_v20  ;;  %v104_v13 = vld [vmem:[%s2163_s0 + $0x2d0] sm:$0xff] }
  0x5b   :  { %561 = vmatprep.mubr.f32.mxu1 %v115_v21  ;;  %1221 = vmatprep.subr.mxu1 %v208_v16  ;;  %v96_v16 = vld [vmem:[%s2163_s0 + $0x290] sm:$0xff] }
  0x5c   :  { %1104 = vmatprep.subr.mxu0 %v207_v22  ;;  %417 = vmatmul.mubr.f32.gmra.mxu0 %v112_v23 }
  0x5d   :  { %562 = vmatmul.mubr.f32.gmra.mxu1 %v114_v24  ;;  %1105 = vmatpush3.msra.mxu0 %v191_v25 }
  0x5e   :  { %1237 = vmatpush3.msra.mxu1 %v192_v19  ;;  %421 = vmatprep.mubr.f32.mxu0 %v120_v26  ;;  %v125_v19 = vld [vmem:[%s2163_s0 + $0x378] sm:$0xff] }
  0x5f   :  { %566 = vmatprep.mubr.f32.mxu1 %v122_v27  ;;  %1222 = vmatprep.subr.mxu1 %v207_v22  ;;  %v1915_v22 = vld [vmem:[%s2164_s2] ss:$0 sm:$0xff] }
  0x60   :  { %1106 = vmatprep.subr.mxu0 %v206_v28  ;;  %422 = vmatmul.mubr.f32.gmra.mxu0 %v119_v29 }
  0x61   :  { %567 = vmatmul.mubr.f32.gmra.mxu1 %v121_v30  ;;  %1107 = vmatpush3.msra.mxu0 %v190_v31 }
  0x62   :  { %1238 = vmatpush3.msra.mxu1 %v191_v25  ;;  %636 = vmatprep.mubr.f32.mxu0 %v19_v32 }
  0x63   :  { %1223 = vmatprep.subr.mxu1 %v206_v28  ;;  %696 = vmatprep.mubr.f32.mxu1 %v103_v33 }
  0x64   :  { %1239 = vmatpush3.msra.mxu1 %v190_v31  ;;  %637 = vmatmul.mubr.f32.vlgmr.msra.gmra.mxu0 %v18_v34 }
  0x65   :  { %697 = vmatmul.mubr.f32.vlgmr.msra.gmra.mxu1 %v102_v35  ;;  %641 = vmatprep.mubr.f32.mxu0 %v26_v36 }
  0x66   :  { %701 = vmatprep.mubr.f32.mxu1 %v110_v37  ;;  %1176 = vmatprep.subr.mxu1 %v225_v38 }
  0x67   :  { %1177 = vmatpush3.msra.mxu1 %v225_v38 }
  0x68   :  { %642 = vmatmul.mubr.f32.gmra.mxu0 %v25_v39  ;;  %1178 = vmatprep.subr.mxu1 %v224_v43 }
  0x69   :  { %702 = vmatmul.mubr.f32.gmra.mxu1 %v109_v40  ;;  %646 = vmatprep.mubr.f32.mxu0 %v33_v41 }
  0x6a   :  { %706 = vmatprep.mubr.f32.mxu1 %v117_v42  ;;  %1179 = vmatpush3.msra.mxu1 %v224_v43 }
  0x6b   :  { %1180 = vmatprep.subr.mxu1 %v223_v48 }
  0x6c   :  { %647 = vmatmul.mubr.f32.gmra.mxu0 %v32_v44  ;;  %1181 = vmatpush3.msra.mxu1 %v223_v48 }
  0x6d   :  { %707 = vmatmul.mubr.f32.gmra.mxu1 %v116_v45  ;;  %651 = vmatprep.mubr.f32.mxu0 %v40_v46 }
  0x6e   :  { %711 = vmatprep.mubr.f32.mxu1 %v124_v47  ;;  %1182 = vmatprep.subr.mxu1 %v222_v51 }
  0x6f   :  { %1183 = vmatpush3.msra.mxu1 %v222_v51 }
  0x70   :  { %652 = vmatmul.mubr.f32.gmra.mxu0 %v39_v49 }
  0x71   :  { %712 = vmatmul.mubr.f32.gmra.mxu1 %v123_v50  ;;  %656 = vmatprep.mubr.f32.mxu0 %v47_v52 }
  0x72   :  { %1184 = vmatprep.mubr.msk.f32.mxu1 %vm233_vm0, %v20_v53 }
  0x74   :  { %657 = vmatmul.mubr.f32.gmra.mxu0 %v46_v54 }
  0x75   :  { %1185 = vmatmul.mubr.msk.f32.vlgmr.msra.gmra.mxu1 %vm233_vm0, %v27_v55  ;;  %661 = vmatprep.mubr.f32.mxu0 %v54_v56 }
  0x76   :  { %1187 = vmatprep.mubr.msk.f32.mxu1 %vm233_vm0, %v34_v57 }
  0x78   :  { %662 = vmatmul.mubr.f32.gmra.mxu0 %v53_v58 }
  0x79   :  { %1188 = vmatmul.mubr.msk.f32.gmra.mxu1 %vm233_vm0, %v41_v59  ;;  %666 = vmatprep.mubr.f32.mxu0 %v61_v60 }
  0x7a   :  { %1190 = vmatprep.mubr.msk.f32.mxu1 %vm233_vm0, %v48_v61 }
  0x7c   :  { %667 = vmatmul.mubr.f32.gmra.mxu0 %v60_v62 }
  0x7d   :  { %1191 = vmatmul.mubr.msk.f32.gmra.mxu1 %vm233_vm0, %v55_v63  ;;  %671 = vmatprep.mubr.f32.mxu0 %v68_v0 }
  0x7e   :  { %1193 = vmatprep.mubr.msk.f32.mxu1 %vm233_vm0, %v62_v1 }
  0x80   :  { %672 = vmatmul.mubr.f32.gmra.mxu0 %v67_v2 }
  0x81   :  { %1194 = vmatmul.mubr.msk.f32.gmra.mxu1 %vm233_vm0, %v69_v3  ;;  %676 = vmatprep.mubr.f32.mxu0 %v75_v4 }
  0x82   :  { %1196 = vmatprep.mubr.msk.f32.mxu1 %vm233_vm0, %v76_v5 }
  0x84   :  { %677 = vmatmul.mubr.f32.gmra.mxu0 %v74_v6 }
  0x85   :  { %1197 = vmatmul.mubr.msk.f32.gmra.mxu1 %vm233_vm0, %v83_v7  ;;  %681 = vmatprep.mubr.f32.mxu0 %v82_v8 }
  0x86   :  { %1199 = vmatprep.mubr.msk.f32.mxu1 %vm233_vm0, %v90_v9 }
  0x88   :  { %682 = vmatmul.mubr.f32.gmra.mxu0 %v81_v10 }
  0x89   :  { %1200 = vmatmul.mubr.msk.f32.gmra.mxu1 %vm233_vm0, %v97_v11  ;;  %686 = vmatprep.mubr.f32.mxu0 %v89_v12 }
  0x8a   :  { %1202 = vmatprep.mubr.msk.f32.mxu1 %vm233_vm0, %v104_v13 }
  0x8c   :  { %687 = vmatmul.mubr.f32.gmra.mxu0 %v88_v14 }
  0x8d   :  { %1203 = vmatmul.mubr.msk.f32.gmra.mxu1 %vm233_vm0, %v111_v15  ;;  %691 = vmatprep.mubr.f32.mxu0 %v96_v16 }
  0x8e   :  { %1205 = vmatprep.mubr.msk.f32.mxu1 %vm233_vm0, %v118_v17 }
  0x90   :  { %692 = vmatmul.mubr.f32.gmra.mxu0 %v95_v18 }
  0x91   :  { %1206 = vmatmul.mubr.msk.f32.gmra.mxu1 %vm233_vm0, %v125_v19 }
  0xe4   :  { %v948_v20 = vpop.f32.mrf.mxu0 }
  0xe5   :  { %v1028_v21 = vpop.f32.mrf.mxu1 }
  0xe6   :  { %v949_v23 = vpop.f32.mrf.mxu0 }
  0xe7   :  { %v1029_v24 = vpop.f32.mrf.mxu1  ;;  %v950_v25 = vadd.f32 %v949_v23, %v948_v20 }
  0xe8   :  { %v1030_v26 = vadd.f32 %v1029_v24, %v1028_v21  ;;  %v951_v27 = vpop.f32.mrf.mxu0 }
  0xe9   :  { %v1031_v28 = vpop.f32.mrf.mxu1  ;;  %v349_v29 = vadd.f32 %v950_v25, %v1915_v22 }
  0xea   :  { %v952_v30 = vpop.f32.mrf.mxu0 }
  0xeb   :  { %v1032_v31 = vpop.f32.mrf.mxu1  ;;  %v1918_v32 = vadd.f32 %v1030_v26, %v349_v29  ;;  %v953_v33 = vadd.f32 %v952_v30, %v951_v27 }
  0xec   :  { %v1033_v34 = vadd.f32 %v1032_v31, %v1031_v28  ;;  %v954_v35 = vpop.f32.mrf.mxu0 }
  0xed   :  { %v1034_v36 = vpop.f32.mrf.mxu1  ;;  %v354_v37 = vadd.f32 %v953_v33, %v1915_v22 }
  0xee   :  { %v955_v38 = vpop.f32.mrf.mxu0 }
  0xef   :  { %v1035_v39 = vpop.f32.mrf.mxu1  ;;  %v1921_v40 = vadd.f32 %v1033_v34, %v354_v37  ;;  %v956_v41 = vadd.f32 %v955_v38, %v954_v35 }
  0xf0   :  { %v1036_v42 = vadd.f32 %v1035_v39, %v1034_v36  ;;  %v957_v43 = vpop.f32.mrf.mxu0 }
  0xf1   :  { %v1037_v44 = vpop.f32.mrf.mxu1  ;;  %v359_v45 = vadd.f32 %v956_v41, %v1915_v22 }
  0xf2   :  { %v958_v46 = vpop.f32.mrf.mxu0 }
  0xf3   :  { %v1038_v47 = vpop.f32.mrf.mxu1  ;;  %v1924_v48 = vadd.f32 %v1036_v42, %v359_v45  ;;  %v959_v49 = vadd.f32 %v958_v46, %v957_v43 }
  0xf4   :  { %v1039_v50 = vadd.f32 %v1038_v47, %v1037_v44  ;;  %v960_v51 = vpop.f32.mrf.mxu0 }
  0xf5   :  { %v1040_v52 = vpop.f32.mrf.mxu1  ;;  %v364_v53 = vadd.f32 %v959_v49, %v1915_v22 }
  0xf6   :  { %v961_v54 = vpop.f32.mrf.mxu0 }
  0xf7   :  { %v1041_v55 = vpop.f32.mrf.mxu1  ;;  %v1927_v56 = vadd.f32 %v1039_v50, %v364_v53  ;;  %v962_v57 = vadd.f32 %v961_v54, %v960_v51 }
  0xf8   :  { %v1042_v58 = vadd.f32 %v1041_v55, %v1040_v52  ;;  %v963_v59 = vpop.f32.mrf.mxu0 }
  0xf9   :  { %v1929_v60 = vpop.f32.mrf.mxu1  ;;  %v369_v61 = vadd.f32 %v962_v57, %v1915_v22 }
  0xfa   :  { %v964_v62 = vpop.f32.mrf.mxu0 }
  0xfb   :  { %v1932_v63 = vpop.f32.mrf.mxu1  ;;  %v1934_v0 = vadd.f32 %v1042_v58, %v369_v61 }
  0xfc   :  { %v1936_v1 = vpop.f32.mrf.mxu0 }
  0xfd   :  { %v1938_v2 = vpop.f32.mrf.mxu1 }
  0xfe   :  { %v1940_v3 = vpop.f32.mrf.mxu0 }
  0xff   :  { %v1942_v4 = vpop.f32.mrf.mxu1 }
 0x100   :  { %v1944_v5 = vpop.f32.mrf.mxu0 }
 0x101   :  { %v1946_v6 = vpop.f32.mrf.mxu1 }
 0x102   :  { %v1948_v7 = vpop.f32.mrf.mxu0 }
 0x103   :  { %v1950_v8 = vpop.f32.mrf.mxu1 }
 0x104   :  { %v1952_v9 = vpop.f32.mrf.mxu0 }
 0x105   :  { %v1954_v10 = vpop.f32.mrf.mxu1 }
 0x106   :  { %v1956_v11 = vpop.f32.mrf.mxu0 }
 0x107   :  { %v1958_v12 = vpop.f32.mrf.mxu1 }
 0x108   :  { %v1960_v13 = vpop.f32.mrf.mxu0 }
 0x109   :  { %v1962_v14 = vpop.f32.mrf.mxu1 }
 0x10a   :  { %v1964_v15 = vpop.f32.mrf.mxu0 }
 0x10b   :  { %v1966_v16 = vpop.f32.mrf.mxu1 }
 0x10c   :  { %v1968_v17 = vpop.f32.mrf.mxu0 }
 0x10d   :  { %v1970_v18 = vpop.f32.mrf.mxu1 }
 0x10e   :  { %v1972_v19 = vpop.f32.mrf.mxu0 }
 0x10f   :  { %v1974_v20 = vpop.f32.mrf.mxu1 }
 0x110   :  { %2166 = vst [vmem:[#allocation2_spill] sm:$0xff] %v1974_v20  ;;  %v1976_v21 = vpop.f32.mrf.mxu0 }
 0x111   :  { %2167 = vst [vmem:[#allocation3_spill] sm:$0xff] %v1976_v21  ;;  %v1978_v23 = vpop.f32.mrf.mxu1 }
 0x112   :  { %2168 = vst [vmem:[#allocation4_spill] sm:$0xff] %v1978_v23  ;;  %v1980_v24 = vpop.f32.mrf.mxu0 }
 0x113   :  { %2169 = vst [vmem:[#allocation5_spill] sm:$0xff] %v1980_v24  ;;  %v1982_v25 = vpop.f32.mrf.mxu1 }
 0x114   :  { %2170 = vst [vmem:[#allocation6_spill] sm:$0xff] %v1982_v25  ;;  %v1984_v26 = vpop.f32.mrf.mxu0 }
 0x115   :  { %v1986_v27 = vpop.f32.mrf.mxu1 }
 0x116   :  { %v1988_v28 = vpop.f32.mrf.mxu0 }
 0x117   :  { %v1990_v29 = vpop.f32.mrf.mxu1 }
 0x118   :  { %v1992_v30 = vpop.f32.mrf.mxu0 }
 0x119   :  { %v1994_v31 = vpop.f32.mrf.mxu1 }
 0x11a   :  { %v1996_v33 = vpop.f32.mrf.mxu0 }
 0x11b   :  { %v1998_v34 = vpop.f32.mrf.mxu1 }
 0x11c   :  { %v2000_v35 = vpop.f32.mrf.mxu0 }
 0x11d   :  { %v2002_v36 = vpop.f32.mrf.mxu1 }
 0x11e   :  { %2171 = vst [vmem:[#allocation7_spill] sm:$0xff] %v2002_v36  ;;  %v2004_v37 = vpop.f32.mrf.mxu0 }
 0x11f   :  { %v2006_v38 = vpop.f32.mrf.mxu1 }
 0x120   :  { %2172 = vst [vmem:[#allocation8_spill] sm:$0xff] %v2006_v38  ;;  %v2008_v39 = vpop.f32.mrf.mxu0  ;;  %v965_v38 = vadd.f32 %v964_v62, %v963_v59  ;;  %v968_v59 = vadd.f32 %v1940_v3, %v1936_v1 }
 0x121   :  { %v2010_v41 = vpop.f32.mrf.mxu1 }
 0x122   :  { %2173 = vst [vmem:[#allocation9_spill] sm:$0xff] %v2010_v41  ;;  %v2012_v42 = vpop.f32.mrf.mxu0  ;;  %v379_v3 = vadd.f32 %v968_v59, %v1915_v22 }
 0x123   :  { %v2014_v43 = vpop.f32.mrf.mxu1 }
 0x124   :  { %2174 = vst [vmem:[#allocation10_spill] sm:$0xff] %v2014_v43  ;;  %v1108_v44 = vpop.f32.mrf.mxu0 }
 0x125   :  { %v2016_v45 = vpop.f32.mrf.mxu1 }
 0x126   :  { %2175 = vst [vmem:[#allocation11_spill] sm:$0xff] %v2016_v45  ;;  %v1109_v46 = vpop.f32.mrf.mxu0 }
 0x127   :  { %v2018_v47 = vpop.f32.mrf.mxu1  ;;  %v1110_v23 = vadd.f32 %v1109_v46, %v1108_v44 }
 0x128   :  { %2176 = vst [vmem:[#allocation12_spill] sm:$0xff] %v2018_v47  ;;  %v1111_v49 = vpop.f32.mrf.mxu0 }
 0x129   :  { %v2020_v50 = vpop.f32.mrf.mxu1 }
 0x12a   :  { %v1112_v51 = vpop.f32.mrf.mxu0 }
 0x12b   :  { %v2022_v52 = vpop.f32.mrf.mxu1  ;;  %v1113_v58 = vadd.f32 %v1112_v51, %v1111_v49  ;;  %v1045_v49 = vadd.f32 %v1932_v63, %v1929_v60 }
 0x12c   :  { %v1114_v53 = vpop.f32.mrf.mxu0 }
 0x12d   :  { %v2024_v54 = vpop.f32.mrf.mxu1  ;;  %v644_v47 = vadd.f32 %v1113_v58, %v1921_v40 }
 0x12e   :  { %2177 = vst [vmem:[#allocation13_spill] sm:$0xff] %v2024_v54  ;;  %v1115_v55 = vpop.f32.mrf.mxu0  ;;  %v639_v54 = vadd.f32 %v1110_v23, %v1918_v32 }
 0x12f   :  { %v2026_v57 = vpop.f32.mrf.mxu1  ;;  %v1116_v41 = vadd.f32 %v1115_v55, %v1114_v53  ;;  %v974_v55 = vadd.f32 %v1956_v11, %v1952_v9 }
 0x130   :  { %2178 = vst [vmem:[#allocation14_spill] sm:$0xff] %v2026_v57  ;;  %v1117_v61 = vpop.f32.mrf.mxu0  ;;  %v374_v57 = vadd.f32 %v965_v38, %v1915_v22 }
 0x131   :  { %v2028_v25 = vpop.f32.mrf.mxu1  ;;  %v649_v63 = vadd.f32 %v1116_v41, %v1924_v48 }
 0x132   :  { %v1118_v36 = vpop.f32.mrf.mxu0  ;;  %v519_v1 = vadd.f32 %v1045_v49, %v374_v57  ;;  %v977_v57 = vadd.f32 %v1964_v15, %v1960_v13  ;;  %v389_v15 = vadd.f32 %v974_v55, %v1915_v22 }
 0x133   :  { %v2030_v24 = vpop.f32.mrf.mxu1  ;;  %v1119_v21 = vadd.f32 %v1118_v36, %v1117_v61 }
 0x134   :  { %v1120_v45 = vpop.f32.mrf.mxu0 }
 0x135   :  { %v1186_v43 = vpop.f32.mrf.mxu1  ;;  %v654_v40 = vadd.f32 %v1119_v21, %v1927_v56  ;;  %v971_v21 = vadd.f32 %v1948_v7, %v1944_v5  ;;  %v1051_v7 = vadd.f32 %v1950_v8, %v1946_v6  ;;  %v989_v8 = vadd.f32 %v1996_v33, %v1992_v30 }
 0x136   :  { %v789_v20 = vadd.f32 %v1186_v43, %v644_v47  ;;  %v1121_v62 = vpop.f32.mrf.mxu0  ;;  %v1069_v33 = vadd.f32 %v1998_v34, %v1994_v31 }
 0x137   :  { %v783_v44 = vpop.f32.mrf.mxu1  ;;  %v1122_v32 = vadd.f32 %v1121_v62, %v1120_v45  ;;  %v384_v49 = vadd.f32 %v971_v21, %v1915_v22  ;;  %v2181_v21 = vld [vmem:[#allocation10_spill] sm:$0xff] }
 0x138   :  { %v863_v36 = vmax.f32 %v789_v20, 0.0  ;;  %v784_v46 = vadd.f32 %v783_v44, %v639_v54  ;;  %v1123_v51 = vpop.f32.mrf.mxu0  ;;  %v1048_v20 = vadd.f32 %v1942_v4, %v1938_v2 }
 0x139   :  { %v1189_v53 = vpop.f32.mrf.mxu1  ;;  %v659_v54 = vadd.f32 %v1122_v32, %v1934_v0  ;;  %v529_v32 = vadd.f32 %v1051_v7, %v384_v49 }
 0x13a   :  { %880 = vst.msk [vmem:[%s2165_s3 + $0x8] sm:$0xff] %vm878_vm1, %v863_v36  ;;  %v862_v23 = vmax.f32 %v784_v46, 0.0  ;;  %v799_v60 = vadd.f32 %v1189_v53, %v654_v40  ;;  %v1124_v38 = vpop.f32.mrf.mxu0  ;;  %v524_v5 = vadd.f32 %v1048_v20, %v379_v3  ;;  %v1054_v36 = vadd.f32 %v1958_v12, %v1954_v10 }
 0x13b   :  { %v793_v56 = vpop.f32.mrf.mxu1  ;;  %v1125_v45 = vadd.f32 %v1124_v38, %v1123_v51  ;;  %v394_v46 = vadd.f32 %v977_v57, %v1915_v22  ;;  %v1057_v40 = vadd.f32 %v1966_v16, %v1962_v14  ;;  %v980_v14 = vadd.f32 %v1972_v19, %v1968_v17  ;;  %v2186_v57 = vld [vmem:[#allocation7_spill] sm:$0xff] }
 0x13c   :  { %879 = vst.msk [vmem:[%s2165_s3] sm:$0xff] %vm878_vm1, %v862_v23  ;;  %v865_v43 = vmax.f32 %v799_v60, 0.0  ;;  %v794_v47 = vadd.f32 %v793_v56, %v649_v63  ;;  %v1126_v48 = vpop.f32.mrf.mxu0  ;;  %v986_v23 = vadd.f32 %v1988_v28, %v1984_v26  ;;  %v995_v16 = vadd.f32 %v2012_v42, %v2008_v39 }
 0x13d   :  { %v1192_v41 = vpop.f32.mrf.mxu1  ;;  %v664_v4 = vadd.f32 %v1125_v45, %v519_v1  ;;  %v414_v28 = vadd.f32 %v989_v8, %v1915_v22  ;;  %v534_v1 = vadd.f32 %v1054_v36, %v389_v15  ;;  %v539_v3 = vadd.f32 %v1057_v40, %v394_v46 }
 0x13e   :  { %882 = vst.msk [vmem:[%s2165_s3 + $0x18] sm:$0xff] %vm878_vm1, %v865_v43  ;;  %v864_v2 = vmax.f32 %v794_v47, 0.0  ;;  %v1127_v58 = vpop.f32.mrf.mxu0  ;;  %v1066_v20 = vadd.f32 %v1990_v29, %v1986_v27  ;;  %v992_v17 = vadd.f32 %v2004_v37, %v2000_v35  ;;  %v409_v39 = vadd.f32 %v986_v23, %v1915_v22  ;;  %v2179_v27 = vld [vmem:[#allocation2_spill] sm:$0xff]  ;;  %v2180_v37 = vld [vmem:[#allocation9_spill] sm:$0xff] }
 0x13f   :  { %v803_v61 = vpop.f32.mrf.mxu1  ;;  %v809_v0 = vadd.f32 %v1192_v41, %v664_v4  ;;  %v1128_v59 = vadd.f32 %v1127_v58, %v1126_v48  ;;  %v1149_v42 = vadd.f32 %v2022_v52, %v2020_v50  ;;  %v399_v34 = vadd.f32 %v980_v14, %v1915_v22  ;;  %v2182_v52 = vld [vmem:[#allocation11_spill] sm:$0xff]  ;;  %v2183_v48 = vld [vmem:[#allocation12_spill] sm:$0xff]  ;;  %v2191_v23 = vld [vmem:[#allocation6_spill] sm:$0xff] }
 0x140   :  { %881 = vst.msk [vmem:[%s2165_s3 + $0x10] sm:$0xff] %vm878_vm1, %v864_v2  ;;  %v804_v62 = vadd.f32 %v803_v61, %v659_v54  ;;  %v1129_v44 = vpop.f32.mrf.mxu0  ;;  %v1060_v29 = vadd.f32 %v2179_v27, %v1970_v18  ;;  %v424_v35 = vadd.f32 %v995_v16, %v1915_v22  ;;  %v1075_v43 = vadd.f32 %v2181_v21, %v2180_v37  ;;  %v2184_v54 = vld [vmem:[#allocation3_spill] sm:$0xff]  ;;  %v2187_v18 = vld [vmem:[#allocation8_spill] sm:$0xff] }
 0x141   :  { %v1195_v6 = vpop.f32.mrf.mxu1  ;;  %v867_v9 = vmax.f32 %v809_v0, 0.0  ;;  %v669_v13 = vadd.f32 %v1128_v59, %v524_v5  ;;  %v559_v50 = vadd.f32 %v1069_v33, %v414_v28  ;;  %v1146_v41 = vadd.f32 %v2183_v48, %v2182_v52  ;;  %v2185_v5 = vld [vmem:[#allocation5_spill] sm:$0xff] }
 0x142   :  { %v866_v11 = vmax.f32 %v804_v62, 0.0  ;;  %v1130_v51 = vpop.f32.mrf.mxu0  ;;  %v983_v7 = vadd.f32 %v2185_v5, %v2184_v54  ;;  %v419_v55 = vadd.f32 %v992_v17, %v1915_v22  ;;  %v1072_v58 = vadd.f32 %v2187_v18, %v2186_v57 }
 0x143   :  { %v813_v53 = vpop.f32.mrf.mxu1  ;;  %884 = vst.msk [vmem:[%s2165_s3 + $0x28] sm:$0xff] %vm878_vm1, %v867_v9  ;;  %v1131_v10 = vadd.f32 %v1130_v51, %v1129_v44  ;;  %v1155_v61 = vadd.f32 %v2030_v24, %v2028_v25  ;;  %v554_v59 = vadd.f32 %v1066_v20, %v409_v39  ;;  %v544_v8 = vadd.f32 %v1060_v29, %v399_v34 }
 0x144   :  { %883 = vst.msk [vmem:[%s2165_s3 + $0x20] sm:$0xff] %vm878_vm1, %v866_v11  ;;  %v814_v12 = vadd.f32 %v813_v53, %v669_v13  ;;  %v1132_v30 = vpop.f32.mrf.mxu0  ;;  %v569_v9 = vadd.f32 %v1075_v43, %v424_v35  ;;  %v2188_v11 = vld [vmem:[#allocation13_spill] sm:$0xff]  ;;  %v2189_v13 = vld [vmem:[#allocation14_spill] sm:$0xff]  ;;  %v404_v53 = vadd.f32 %v983_v7, %v1915_v22 }
 0x145   :  { %v1198_v26 = vpop.f32.mrf.mxu1  ;;  %v674_v60 = vadd.f32 %v1131_v10, %v529_v32  ;;  %v1152_v15 = vadd.f32 %v2189_v13, %v2188_v11  ;;  %v699_v51 = vadd.f32 %v1146_v41, %v554_v59  ;;  %v2190_v32 = vld [vmem:[#allocation4_spill] sm:$0xff] }
 0x146   :  { %v868_v63 = vmax.f32 %v814_v12, 0.0  ;;  %v1133_v19 = vpop.f32.mrf.mxu0  ;;  %v1063_v10 = vadd.f32 %v2191_v23, %v2190_v32  ;;  %v564_v12 = vadd.f32 %v1072_v58, %v419_v55 }
 0x147   :  { %v823_v38 = vpop.f32.mrf.mxu1  ;;  %v819_v56 = vadd.f32 %v1195_v6, %v674_v60  ;;  %v1134_v31 = vadd.f32 %v1133_v19, %v1132_v30  ;;  %v704_v6 = vadd.f32 %v1149_v42, %v559_v50  ;;  %v714_v30 = vadd.f32 %v1155_v61, %v569_v9 }
 0x148   :  { %885 = vst.msk [vmem:[%s2165_s3 + $0x30] sm:$0xff] %vm878_vm1, %v868_v63  ;;  %v1135_v45 = vpop.f32.mrf.mxu0  ;;  %v709_v20 = vadd.f32 %v1152_v15, %v564_v12  ;;  %v549_v39 = vadd.f32 %v1063_v10, %v404_v53 }
 0x149   :  { %v1201_v47 = vpop.f32.mrf.mxu1  ;;  %v869_v2 = vmax.f32 %v819_v56, 0.0  ;;  %v679_v4 = vadd.f32 %v1134_v31, %v534_v1 }
 0x14a   :  { %v1136_v49 = vpop.f32.mrf.mxu0 }
 0x14b   :  { %v833_v0 = vpop.f32.mrf.mxu1  ;;  %886 = vst.msk [vmem:[%s2165_s3 + $0x38] sm:$0xff] %vm878_vm1, %v869_v2  ;;  %v824_v62 = vadd.f32 %v823_v38, %v679_v4  ;;  %v1137_v44 = vadd.f32 %v1136_v49, %v1135_v45 }
 0x14c   :  { %v1138_v36 = vpop.f32.mrf.mxu0 }
 0x14d   :  { %v1204_v46 = vpop.f32.mrf.mxu1  ;;  %v870_v40 = vmax.f32 %v824_v62, 0.0  ;;  %v684_v24 = vadd.f32 %v1137_v44, %v539_v3 }
 0x14e   :  { %v849_v25 = vadd.f32 %v1204_v46, %v704_v6  ;;  %v1139_v14 = vpop.f32.mrf.mxu0 }
 0x14f   :  { %v843_v16 = vpop.f32.mrf.mxu1  ;;  %887 = vst.msk [vmem:[%s2165_s3 + $0x40] sm:$0xff] %vm878_vm1, %v870_v40  ;;  %v829_v28 = vadd.f32 %v1198_v26, %v684_v24  ;;  %v1140_v60 = vadd.f32 %v1139_v14, %v1138_v36 }
 0x150   :  { %v875_v33 = vmax.f32 %v849_v25, 0.0  ;;  %v844_v63 = vadd.f32 %v843_v16, %v699_v51  ;;  %v1141_v1 = vpop.f32.mrf.mxu0 }
 0x151   :  { %v1207_v3 = vpop.f32.mrf.mxu1  ;;  %v871_v22 = vmax.f32 %v829_v28, 0.0  ;;  %v689_v17 = vadd.f32 %v1140_v60, %v544_v8 }
 0x152   :  { %892 = vst.msk [vmem:[%s2165_s3 + $0x68] sm:$0xff] %vm878_vm1, %v875_v33  ;;  %v874_v19 = vmax.f32 %v844_v63, 0.0  ;;  %v859_v38 = vadd.f32 %v1207_v3, %v714_v30  ;;  %v1142_v42 = vpop.f32.mrf.mxu0 }
 0x153   :  { %v853_v56 = vpop.f32.mrf.mxu1  ;;  %888 = vst.msk [vmem:[%s2165_s3 + $0x48] sm:$0xff] %vm878_vm1, %v871_v22  ;;  %v834_v26 = vadd.f32 %v833_v0, %v689_v17  ;;  %v1143_v34 = vadd.f32 %v1142_v42, %v1141_v1 }
 0x154   :  { %891 = vst.msk [vmem:[%s2165_s3 + $0x60] sm:$0xff] %vm878_vm1, %v874_v19  ;;  %v877_v31 = vmax.f32 %v859_v38, 0.0  ;;  %v854_v27 = vadd.f32 %v853_v56, %v709_v20 }
 0x155   :  { %v872_v29 = vmax.f32 %v834_v26, 0.0  ;;  %v694_v35 = vadd.f32 %v1143_v34, %v549_v39 }
 0x156   :  { %894 = vst.msk [vmem:[%s2165_s3 + $0x78] sm:$0xff] %vm878_vm1, %v877_v31  ;;  %v876_v37 = vmax.f32 %v854_v27, 0.0 }
 0x157   :  { %889 = vst.msk [vmem:[%s2165_s3 + $0x50] sm:$0xff] %vm878_vm1, %v872_v29  ;;  %v839_v21 = vadd.f32 %v1201_v47, %v694_v35 }
 0x158   :  { %893 = vst.msk [vmem:[%s2165_s3 + $0x70] sm:$0xff] %vm878_vm1, %v876_v37 }
 0x159   :  { %v873_v43 = vmax.f32 %v839_v21, 0.0 }
 0x15b   :  { %890 = vst.msk [vmem:[%s2165_s3 + $0x58] sm:$0xff] %vm878_vm1, %v873_v43 }

// kernel: ra_actor_world_forward.8
= control target key start
LH: loop header
LB: loop body
LE: loop exit
PB: predicated region body
PF: predicated region fallthrough
CT: control target
= control target key end

     0   :  { %vm273_vm0 = vcmask 523264   ;;  %s2003_s1 = inlined_call_operand.vmem [shape: f32[1600,128], index: 1, kind: input, shape index: {}]   ;;  %s2004_s0 = inlined_call_operand.vmem [shape: f32[32,1600], index: 0, kind: input, shape index: {}]   ;;  %s2005_s2 = inlined_call_operand.vmem [shape: f32[1,128], index: 2, kind: input, shape index: {}]   ;;  %s2006_s3 = inlined_call_operand.vmem [shape: f32[32,128], index: 3, kind: output, shape index: {}]  }
   0x1   :  { %v97_v0 = vld [vmem:[%s2003_s1 + $0xf8] sm:$0xff]  ;;  %v96_v4 = vld [vmem:[%s2003_s1 + $0xf0] sm:$0xff]  ;;  %v95_v8 = vld [vmem:[%s2003_s1 + $0xe8] sm:$0xff] }
   0x2   :  { %v129_v1 = vld [vmem:[%s2003_s1 + $0x1f8] sm:$0xff]  ;;  %898 = vmatprep.subr.mxu0 %v97_v0  ;;  %v128_v5 = vld [vmem:[%s2003_s1 + $0x1f0] sm:$0xff]  ;;  %v127_v9 = vld [vmem:[%s2003_s1 + $0x1e8] sm:$0xff] }
   0x3   :  { %v81_v2 = vld [vmem:[%s2003_s1 + $0x78] sm:$0xff]  ;;  %942 = vmatprep.subr.mxu1 %v129_v1  ;;  %v80_v6 = vld [vmem:[%s2003_s1 + $0x70] sm:$0xff]  ;;  %v79_v10 = vld [vmem:[%s2003_s1 + $0x68] sm:$0xff] }
   0x4   :  { %v113_v3 = vld [vmem:[%s2003_s1 + $0x178] sm:$0xff]  ;;  %899 = vmatpush3.msra.mxu0 %v81_v2  ;;  %v112_v7 = vld [vmem:[%s2003_s1 + $0x170] sm:$0xff]  ;;  %v111_v11 = vld [vmem:[%s2003_s1 + $0x168] sm:$0xff] }
   0x5   :  { %943 = vmatpush3.msra.mxu1 %v113_v3  ;;  %900 = vmatprep.subr.mxu0 %v96_v4  ;;  %v94_v12 = vld [vmem:[%s2003_s1 + $0xe0] sm:$0xff]  ;;  %v93_v16 = vld [vmem:[%s2003_s1 + $0xd8] sm:$0xff]  ;;  %v92_v20 = vld [vmem:[%s2003_s1 + $0xd0] sm:$0xff] }
   0x6   :  { %944 = vmatprep.subr.mxu1 %v128_v5  ;;  %901 = vmatpush3.msra.mxu0 %v80_v6  ;;  %v126_v13 = vld [vmem:[%s2003_s1 + $0x1e0] sm:$0xff]  ;;  %v125_v17 = vld [vmem:[%s2003_s1 + $0x1d8] sm:$0xff]  ;;  %v124_v21 = vld [vmem:[%s2003_s1 + $0x1d0] sm:$0xff] }
   0x7   :  { %945 = vmatpush3.msra.mxu1 %v112_v7  ;;  %902 = vmatprep.subr.mxu0 %v95_v8  ;;  %v78_v14 = vld [vmem:[%s2003_s1 + $0x60] sm:$0xff]  ;;  %v77_v18 = vld [vmem:[%s2003_s1 + $0x58] sm:$0xff]  ;;  %v76_v22 = vld [vmem:[%s2003_s1 + $0x50] sm:$0xff] }
   0x8   :  { %946 = vmatprep.subr.mxu1 %v127_v9  ;;  %v110_v15 = vld [vmem:[%s2003_s1 + $0x160] sm:$0xff]  ;;  %903 = vmatpush3.msra.mxu0 %v79_v10  ;;  %v109_v19 = vld [vmem:[%s2003_s1 + $0x158] sm:$0xff]  ;;  %v108_v23 = vld [vmem:[%s2003_s1 + $0x150] sm:$0xff] }
   0x9   :  { %947 = vmatpush3.msra.mxu1 %v111_v11  ;;  %904 = vmatprep.subr.mxu0 %v94_v12  ;;  %v91_v24 = vld [vmem:[%s2003_s1 + $0xc8] sm:$0xff]  ;;  %v90_v28 = vld [vmem:[%s2003_s1 + $0xc0] sm:$0xff]  ;;  %v89_v32 = vld [vmem:[%s2003_s1 + $0xb8] sm:$0xff] }
   0xa   :  { %948 = vmatprep.subr.mxu1 %v126_v13  ;;  %905 = vmatpush3.msra.mxu0 %v78_v14  ;;  %v123_v25 = vld [vmem:[%s2003_s1 + $0x1c8] sm:$0xff]  ;;  %v122_v29 = vld [vmem:[%s2003_s1 + $0x1c0] sm:$0xff]  ;;  %v121_v33 = vld [vmem:[%s2003_s1 + $0x1b8] sm:$0xff] }
   0xb   :  { %949 = vmatpush3.msra.mxu1 %v110_v15  ;;  %906 = vmatprep.subr.mxu0 %v93_v16  ;;  %v75_v26 = vld [vmem:[%s2003_s1 + $0x48] sm:$0xff]  ;;  %v74_v30 = vld [vmem:[%s2003_s1 + $0x40] sm:$0xff]  ;;  %v73_v34 = vld [vmem:[%s2003_s1 + $0x38] sm:$0xff] }
   0xc   :  { %950 = vmatprep.subr.mxu1 %v125_v17  ;;  %907 = vmatpush3.msra.mxu0 %v77_v18  ;;  %v107_v27 = vld [vmem:[%s2003_s1 + $0x148] sm:$0xff]  ;;  %v106_v31 = vld [vmem:[%s2003_s1 + $0x140] sm:$0xff]  ;;  %v105_v35 = vld [vmem:[%s2003_s1 + $0x138] sm:$0xff] }
   0xd   :  { %951 = vmatpush3.msra.mxu1 %v109_v19  ;;  %908 = vmatprep.subr.mxu0 %v92_v20  ;;  %v88_v36 = vld [vmem:[%s2003_s1 + $0xb0] sm:$0xff]  ;;  %v87_v40 = vld [vmem:[%s2003_s1 + $0xa8] sm:$0xff]  ;;  %v86_v44 = vld [vmem:[%s2003_s1 + $0xa0] sm:$0xff] }
   0xe   :  { %952 = vmatprep.subr.mxu1 %v124_v21  ;;  %909 = vmatpush3.msra.mxu0 %v76_v22  ;;  %v120_v37 = vld [vmem:[%s2003_s1 + $0x1b0] sm:$0xff]  ;;  %v119_v41 = vld [vmem:[%s2003_s1 + $0x1a8] sm:$0xff]  ;;  %v118_v45 = vld [vmem:[%s2003_s1 + $0x1a0] sm:$0xff] }
   0xf   :  { %953 = vmatpush3.msra.mxu1 %v108_v23  ;;  %910 = vmatprep.subr.mxu0 %v91_v24  ;;  %v72_v38 = vld [vmem:[%s2003_s1 + $0x30] sm:$0xff]  ;;  %v71_v42 = vld [vmem:[%s2003_s1 + $0x28] sm:$0xff]  ;;  %v70_v46 = vld [vmem:[%s2003_s1 + $0x20] sm:$0xff] }
  0x10   :  { %954 = vmatprep.subr.mxu1 %v123_v25  ;;  %911 = vmatpush3.msra.mxu0 %v75_v26  ;;  %v104_v39 = vld [vmem:[%s2003_s1 + $0x130] sm:$0xff]  ;;  %v103_v43 = vld [vmem:[%s2003_s1 + $0x128] sm:$0xff]  ;;  %v102_v47 = vld [vmem:[%s2003_s1 + $0x120] sm:$0xff] }
  0x11   :  { %955 = vmatpush3.msra.mxu1 %v107_v27  ;;  %912 = vmatprep.subr.mxu0 %v90_v28  ;;  %v85_v48 = vld [vmem:[%s2003_s1 + $0x98] sm:$0xff]  ;;  %v84_v52 = vld [vmem:[%s2003_s1 + $0x90] sm:$0xff]  ;;  %v83_v56 = vld [vmem:[%s2003_s1 + $0x88] sm:$0xff] }
  0x12   :  { %956 = vmatprep.subr.mxu1 %v122_v29  ;;  %913 = vmatpush3.msra.mxu0 %v74_v30  ;;  %v117_v49 = vld [vmem:[%s2003_s1 + $0x198] sm:$0xff]  ;;  %v116_v53 = vld [vmem:[%s2003_s1 + $0x190] sm:$0xff]  ;;  %v115_v57 = vld [vmem:[%s2003_s1 + $0x188] sm:$0xff] }
  0x13   :  { %957 = vmatpush3.msra.mxu1 %v106_v31  ;;  %914 = vmatprep.subr.mxu0 %v89_v32  ;;  %v69_v50 = vld [vmem:[%s2003_s1 + $0x18] sm:$0xff]  ;;  %v68_v54 = vld [vmem:[%s2003_s1 + $0x10] sm:$0xff]  ;;  %v67_v58 = vld [vmem:[%s2003_s1 + $0x8] sm:$0xff] }
  0x14   :  { %958 = vmatprep.subr.mxu1 %v121_v33  ;;  %915 = vmatpush3.msra.mxu0 %v73_v34  ;;  %v101_v51 = vld [vmem:[%s2003_s1 + $0x118] sm:$0xff]  ;;  %v100_v55 = vld [vmem:[%s2003_s1 + $0x110] sm:$0xff]  ;;  %v99_v59 = vld [vmem:[%s2003_s1 + $0x108] sm:$0xff] }
  0x15   :  { %959 = vmatpush3.msra.mxu1 %v105_v35  ;;  %916 = vmatprep.subr.mxu0 %v88_v36  ;;  %v82_v60 = vld [vmem:[%s2003_s1 + $0x80] sm:$0xff]  ;;  %v15_v63 = vld [vmem:[%s2004_s0 + $0x8] sm:$0xff]  ;;  %v17_v1 = vld [vmem:[%s2004_s0 + $0x18] sm:$0xff] }
  0x16   :  { %960 = vmatprep.subr.mxu1 %v120_v37  ;;  %917 = vmatpush3.msra.mxu0 %v72_v38  ;;  %v114_v61 = vld [vmem:[%s2003_s1 + $0x180] sm:$0xff]  ;;  %v16_v3 = vld [vmem:[%s2004_s0 + $0x10] sm:$0xff]  ;;  %v161_v4 = vld [vmem:[%s2003_s1 + $0x2f8] sm:$0xff] }
  0x17   :  { %961 = vmatpush3.msra.mxu1 %v104_v39  ;;  %918 = vmatprep.subr.mxu0 %v87_v40  ;;  %v66_v62 = vld [vmem:[%s2003_s1] sm:$0xff]  ;;  %v193_v5 = vld [vmem:[%s2003_s1 + $0x3f8] sm:$0xff]  ;;  %v160_v8 = vld [vmem:[%s2003_s1 + $0x2f0] sm:$0xff] }
  0x18   :  { %962 = vmatprep.subr.mxu1 %v119_v41  ;;  %919 = vmatpush3.msra.mxu0 %v71_v42  ;;  %v98_v0 = vld [vmem:[%s2003_s1 + $0x100] sm:$0xff]  ;;  %v145_v6 = vld [vmem:[%s2003_s1 + $0x278] sm:$0xff]  ;;  %v192_v9 = vld [vmem:[%s2003_s1 + $0x3f0] sm:$0xff] }
  0x19   :  { %963 = vmatpush3.msra.mxu1 %v103_v43  ;;  %920 = vmatprep.subr.mxu0 %v86_v44  ;;  %v14_v2 = vld [vmem:[%s2004_s0] sm:$0xff]  ;;  %v177_v7 = vld [vmem:[%s2003_s1 + $0x378] sm:$0xff]  ;;  %v144_v10 = vld [vmem:[%s2003_s1 + $0x270] sm:$0xff] }
  0x1a   :  { %964 = vmatprep.subr.mxu1 %v118_v45  ;;  %921 = vmatpush3.msra.mxu0 %v70_v46  ;;  %v176_v11 = vld [vmem:[%s2003_s1 + $0x370] sm:$0xff]  ;;  %v159_v12 = vld [vmem:[%s2003_s1 + $0x2e8] sm:$0xff]  ;;  %v158_v16 = vld [vmem:[%s2003_s1 + $0x2e0] sm:$0xff] }
  0x1b   :  { %965 = vmatpush3.msra.mxu1 %v102_v47  ;;  %922 = vmatprep.subr.mxu0 %v85_v48  ;;  %v191_v13 = vld [vmem:[%s2003_s1 + $0x3e8] sm:$0xff]  ;;  %v190_v17 = vld [vmem:[%s2003_s1 + $0x3e0] sm:$0xff]  ;;  %v157_v20 = vld [vmem:[%s2003_s1 + $0x2d8] sm:$0xff] }
  0x1c   :  { %966 = vmatprep.subr.mxu1 %v117_v49  ;;  %923 = vmatpush3.msra.mxu0 %v69_v50  ;;  %v143_v14 = vld [vmem:[%s2003_s1 + $0x268] sm:$0xff]  ;;  %v142_v18 = vld [vmem:[%s2003_s1 + $0x260] sm:$0xff]  ;;  %v189_v21 = vld [vmem:[%s2003_s1 + $0x3d8] sm:$0xff] }
  0x1d   :  { %967 = vmatpush3.msra.mxu1 %v101_v51  ;;  %924 = vmatprep.subr.mxu0 %v84_v52  ;;  %v175_v15 = vld [vmem:[%s2003_s1 + $0x368] sm:$0xff]  ;;  %v174_v19 = vld [vmem:[%s2003_s1 + $0x360] sm:$0xff]  ;;  %v141_v22 = vld [vmem:[%s2003_s1 + $0x258] sm:$0xff] }
  0x1e   :  { %968 = vmatprep.subr.mxu1 %v116_v53  ;;  %925 = vmatpush3.msra.mxu0 %v68_v54  ;;  %v173_v23 = vld [vmem:[%s2003_s1 + $0x358] sm:$0xff]  ;;  %v156_v24 = vld [vmem:[%s2003_s1 + $0x2d0] sm:$0xff]  ;;  %v155_v28 = vld [vmem:[%s2003_s1 + $0x2c8] sm:$0xff] }
  0x1f   :  { %969 = vmatpush3.msra.mxu1 %v100_v55  ;;  %926 = vmatprep.subr.mxu0 %v83_v56  ;;  %v188_v25 = vld [vmem:[%s2003_s1 + $0x3d0] sm:$0xff]  ;;  %v187_v29 = vld [vmem:[%s2003_s1 + $0x3c8] sm:$0xff]  ;;  %v154_v32 = vld [vmem:[%s2003_s1 + $0x2c0] sm:$0xff] }
  0x20   :  { %970 = vmatprep.subr.mxu1 %v115_v57  ;;  %927 = vmatpush3.msra.mxu0 %v67_v58  ;;  %v140_v26 = vld [vmem:[%s2003_s1 + $0x250] sm:$0xff]  ;;  %v139_v30 = vld [vmem:[%s2003_s1 + $0x248] sm:$0xff]  ;;  %v186_v33 = vld [vmem:[%s2003_s1 + $0x3c0] sm:$0xff] }
  0x21   :  { %971 = vmatpush3.msra.mxu1 %v99_v59  ;;  %928 = vmatprep.subr.mxu0 %v82_v60  ;;  %v172_v27 = vld [vmem:[%s2003_s1 + $0x350] sm:$0xff]  ;;  %v171_v31 = vld [vmem:[%s2003_s1 + $0x348] sm:$0xff]  ;;  %v138_v34 = vld [vmem:[%s2003_s1 + $0x240] sm:$0xff] }
  0x22   :  { %972 = vmatprep.subr.mxu1 %v114_v61  ;;  %929 = vmatpush3.msra.mxu0 %v66_v62  ;;  %v170_v35 = vld [vmem:[%s2003_s1 + $0x340] sm:$0xff]  ;;  %v153_v36 = vld [vmem:[%s2003_s1 + $0x2b8] sm:$0xff]  ;;  %v28_v38 = vld [vmem:[%s2004_s0 + $0x70] sm:$0xff] }
  0x23   :  { %350 = vmatprep.mubr.f32.mxu0 %v15_v63  ;;  %973 = vmatpush3.msra.mxu1 %v98_v0  ;;  %v185_v37 = vld [vmem:[%s2003_s1 + $0x3b8] sm:$0xff]  ;;  %v27_v41 = vld [vmem:[%s2004_s0 + $0x68] sm:$0xff]  ;;  %v152_v42 = vld [vmem:[%s2003_s1 + $0x2b0] sm:$0xff] }
  0x24   :  { %435 = vmatprep.mubr.f32.mxu1 %v17_v1  ;;  %351 = vmatmul.mubr.f32.vlgmr.msra.gmra.mxu0 %v14_v2  ;;  %v137_v39 = vld [vmem:[%s2003_s1 + $0x238] sm:$0xff]  ;;  %v184_v43 = vld [vmem:[%s2003_s1 + $0x3b0] sm:$0xff]  ;;  %v30_v44 = vld [vmem:[%s2004_s0 + $0x80] sm:$0xff] }
  0x25   :  { %436 = vmatmul.mubr.f32.vlgmr.msra.gmra.mxu1 %v16_v3  ;;  %986 = vmatprep.subr.mxu0 %v161_v4  ;;  %v169_v40 = vld [vmem:[%s2003_s1 + $0x338] sm:$0xff]  ;;  %v136_v45 = vld [vmem:[%s2003_s1 + $0x230] sm:$0xff]  ;;  %v151_v47 = vld [vmem:[%s2003_s1 + $0x2a8] sm:$0xff] }
  0x26   :  { %1030 = vmatprep.subr.mxu1 %v193_v5  ;;  %987 = vmatpush3.msra.mxu0 %v145_v6  ;;  %v168_v46 = vld [vmem:[%s2003_s1 + $0x330] sm:$0xff]  ;;  %v29_v48 = vld [vmem:[%s2004_s0 + $0x78] sm:$0xff]  ;;  %v183_v49 = vld [vmem:[%s2003_s1 + $0x3a8] sm:$0xff] }
  0x27   :  { %1031 = vmatpush3.msra.mxu1 %v177_v7  ;;  %988 = vmatprep.subr.mxu0 %v160_v8  ;;  %v41_v50 = vld [vmem:[%s2004_s0 + $0xd8] sm:$0xff]  ;;  %v135_v51 = vld [vmem:[%s2003_s1 + $0x228] sm:$0xff]  ;;  %v40_v53 = vld [vmem:[%s2004_s0 + $0xd0] sm:$0xff] }
  0x28   :  { %1032 = vmatprep.subr.mxu1 %v192_v9  ;;  %989 = vmatpush3.msra.mxu0 %v144_v10  ;;  %v167_v52 = vld [vmem:[%s2003_s1 + $0x328] sm:$0xff]  ;;  %v150_v54 = vld [vmem:[%s2003_s1 + $0x2a0] sm:$0xff]  ;;  %v149_v59 = vld [vmem:[%s2003_s1 + $0x298] sm:$0xff] }
  0x29   :  { %1033 = vmatpush3.msra.mxu1 %v176_v11  ;;  %990 = vmatprep.subr.mxu0 %v159_v12  ;;  %v182_v55 = vld [vmem:[%s2003_s1 + $0x3a0] sm:$0xff]  ;;  %v43_v56 = vld [vmem:[%s2004_s0 + $0xe8] sm:$0xff]  ;;  %v181_v61 = vld [vmem:[%s2003_s1 + $0x398] sm:$0xff] }
  0x2a   :  { %1034 = vmatprep.subr.mxu1 %v191_v13  ;;  %991 = vmatpush3.msra.mxu0 %v143_v14  ;;  %v134_v57 = vld [vmem:[%s2003_s1 + $0x220] sm:$0xff]  ;;  %v133_v63 = vld [vmem:[%s2003_s1 + $0x218] sm:$0xff]  ;;  %v148_v2 = vld [vmem:[%s2003_s1 + $0x290] sm:$0xff] }
  0x2b   :  { %1035 = vmatpush3.msra.mxu1 %v175_v15  ;;  %992 = vmatprep.subr.mxu0 %v158_v16  ;;  %v166_v58 = vld [vmem:[%s2003_s1 + $0x320] sm:$0xff]  ;;  %v165_v0 = vld [vmem:[%s2003_s1 + $0x318] sm:$0xff]  ;;  %v180_v3 = vld [vmem:[%s2003_s1 + $0x390] sm:$0xff] }
  0x2c   :  { %1036 = vmatprep.subr.mxu1 %v190_v17  ;;  %993 = vmatpush3.msra.mxu0 %v142_v18  ;;  %v42_v60 = vld [vmem:[%s2004_s0 + $0xe0] sm:$0xff]  ;;  %v53_v1 = vld [vmem:[%s2004_s0 + $0x138] sm:$0xff]  ;;  %v56_v4 = vld [vmem:[%s2004_s0 + $0x150] sm:$0xff] }
  0x2d   :  { %1037 = vmatpush3.msra.mxu1 %v174_v19  ;;  %994 = vmatprep.subr.mxu0 %v157_v20  ;;  %v54_v62 = vld [vmem:[%s2004_s0 + $0x140] sm:$0xff]  ;;  %v132_v5 = vld [vmem:[%s2003_s1 + $0x210] sm:$0xff]  ;;  %v147_v7 = vld [vmem:[%s2003_s1 + $0x288] sm:$0xff] }
  0x2e   :  { %1038 = vmatprep.subr.mxu1 %v189_v21  ;;  %995 = vmatpush3.msra.mxu0 %v141_v22  ;;  %v164_v6 = vld [vmem:[%s2003_s1 + $0x310] sm:$0xff]  ;;  %v55_v8 = vld [vmem:[%s2004_s0 + $0x148] sm:$0xff]  ;;  %v146_v12 = vld [vmem:[%s2003_s1 + $0x280] sm:$0xff] }
  0x2f   :  { %1039 = vmatpush3.msra.mxu1 %v173_v23  ;;  %996 = vmatprep.subr.mxu0 %v156_v24  ;;  %v179_v9 = vld [vmem:[%s2003_s1 + $0x388] sm:$0xff]  ;;  %v178_v13 = vld [vmem:[%s2003_s1 + $0x380] sm:$0xff]  ;;  %v21_v17 = vld [vmem:[%s2004_s0 + $0x38] sm:$0xff] }
  0x30   :  { %1040 = vmatprep.subr.mxu1 %v188_v25  ;;  %997 = vmatpush3.msra.mxu0 %v140_v26  ;;  %v131_v10 = vld [vmem:[%s2003_s1 + $0x208] sm:$0xff]  ;;  %v130_v14 = vld [vmem:[%s2003_s1 + $0x200] sm:$0xff]  ;;  %v20_v19 = vld [vmem:[%s2004_s0 + $0x30] sm:$0xff] }
  0x31   :  { %1041 = vmatpush3.msra.mxu1 %v172_v27  ;;  %998 = vmatprep.subr.mxu0 %v155_v28  ;;  %v163_v11 = vld [vmem:[%s2003_s1 + $0x308] sm:$0xff]  ;;  %v162_v16 = vld [vmem:[%s2003_s1 + $0x300] sm:$0xff]  ;;  %v225_v20 = vld [vmem:[%s2003_s1 + $0x4f8] sm:$0xff] }
  0x32   :  { %1042 = vmatprep.subr.mxu1 %v187_v29  ;;  %999 = vmatpush3.msra.mxu0 %v139_v30  ;;  %v19_v15 = vld [vmem:[%s2004_s0 + $0x28] sm:$0xff]  ;;  %v18_v18 = vld [vmem:[%s2004_s0 + $0x20] sm:$0xff]  ;;  %v257_v21 = vld [vmem:[%s2003_s1 + $0x5f8] sm:$0xff] }
  0x33   :  { %1043 = vmatpush3.msra.mxu1 %v171_v31  ;;  %1000 = vmatprep.subr.mxu0 %v154_v32  ;;  %v209_v22 = vld [vmem:[%s2003_s1 + $0x478] sm:$0xff]  ;;  %v224_v24 = vld [vmem:[%s2003_s1 + $0x4f0] sm:$0xff]  ;;  %v31_v29 = vld [vmem:[%s2004_s0 + $0x88] sm:$0xff] }
  0x34   :  { %1044 = vmatprep.subr.mxu1 %v186_v33  ;;  %1001 = vmatpush3.msra.mxu0 %v138_v34  ;;  %v241_v23 = vld [vmem:[%s2003_s1 + $0x578] sm:$0xff]  ;;  %v256_v25 = vld [vmem:[%s2003_s1 + $0x5f0] sm:$0xff]  ;;  %v223_v30 = vld [vmem:[%s2003_s1 + $0x4e8] sm:$0xff] }
  0x35   :  { %1045 = vmatpush3.msra.mxu1 %v170_v35  ;;  %1002 = vmatprep.subr.mxu0 %v153_v36  ;;  %v32_v26 = vld [vmem:[%s2004_s0 + $0x90] sm:$0xff]  ;;  %v255_v31 = vld [vmem:[%s2003_s1 + $0x5e8] sm:$0xff]  ;;  %v34_v32 = vld [vmem:[%s2004_s0 + $0xa0] sm:$0xff] }
  0x36   :  { %1046 = vmatprep.subr.mxu1 %v185_v37  ;;  %355 = vmatprep.mubr.f32.mxu0 %v28_v38  ;;  %v208_v27 = vld [vmem:[%s2003_s1 + $0x470] sm:$0xff]  ;;  %v207_v33 = vld [vmem:[%s2003_s1 + $0x468] sm:$0xff]  ;;  %v222_v35 = vld [vmem:[%s2003_s1 + $0x4e0] sm:$0xff] }
  0x37   :  { %1003 = vmatpush3.msra.mxu0 %v137_v39  ;;  %1047 = vmatpush3.msra.mxu1 %v169_v40  ;;  %v240_v28 = vld [vmem:[%s2003_s1 + $0x570] sm:$0xff]  ;;  %v239_v34 = vld [vmem:[%s2003_s1 + $0x568] sm:$0xff]  ;;  %v33_v36 = vld [vmem:[%s2004_s0 + $0x98] sm:$0xff] }
  0x38   :  { %356 = vmatmul.mubr.f32.gmra.mxu0 %v27_v41  ;;  %1004 = vmatprep.subr.mxu0 %v152_v42  ;;  %v254_v37 = vld [vmem:[%s2003_s1 + $0x5e0] sm:$0xff]  ;;  %v45_v38 = vld [vmem:[%s2004_s0 + $0xf8] sm:$0xff]  ;;  %v44_v41 = vld [vmem:[%s2004_s0 + $0xf0] sm:$0xff] }
  0x39   :  { %1048 = vmatprep.subr.mxu1 %v184_v43  ;;  %440 = vmatprep.mubr.f32.mxu1 %v30_v44  ;;  %v206_v39 = vld [vmem:[%s2003_s1 + $0x460] sm:$0xff]  ;;  %v221_v42 = vld [vmem:[%s2003_s1 + $0x4d8] sm:$0xff]  ;;  %v47_v44 = vld [vmem:[%s2004_s0 + $0x108] sm:$0xff] }
  0x3a   :  { %1005 = vmatpush3.msra.mxu0 %v136_v45  ;;  %1049 = vmatpush3.msra.mxu1 %v168_v46  ;;  %v238_v40 = vld [vmem:[%s2003_s1 + $0x560] sm:$0xff]  ;;  %v253_v43 = vld [vmem:[%s2003_s1 + $0x5d8] sm:$0xff] }
  0x3b   :  { %1006 = vmatprep.subr.mxu0 %v151_v47  ;;  %441 = vmatmul.mubr.f32.gmra.mxu1 %v29_v48  ;;  %v205_v45 = vld [vmem:[%s2003_s1 + $0x458] sm:$0xff]  ;;  %v220_v47 = vld [vmem:[%s2003_s1 + $0x4d0] sm:$0xff]  ;;  %v46_v48 = vld [vmem:[%s2004_s0 + $0x100] sm:$0xff] }
  0x3c   :  { %1050 = vmatprep.subr.mxu1 %v183_v49  ;;  %360 = vmatprep.mubr.f32.mxu0 %v41_v50  ;;  %v237_v46 = vld [vmem:[%s2003_s1 + $0x558] sm:$0xff]  ;;  %v252_v49 = vld [vmem:[%s2003_s1 + $0x5d0] sm:$0xff]  ;;  %v58_v50 = vld [vmem:[%s2004_s0 + $0x160] sm:$0xff] }
  0x3d   :  { %1007 = vmatpush3.msra.mxu0 %v135_v51  ;;  %1051 = vmatpush3.msra.mxu1 %v167_v52  ;;  %v204_v51 = vld [vmem:[%s2003_s1 + $0x450] sm:$0xff] }
  0x3e   :  { %361 = vmatmul.mubr.f32.gmra.mxu0 %v40_v53  ;;  %1008 = vmatprep.subr.mxu0 %v150_v54  ;;  %v236_v52 = vld [vmem:[%s2003_s1 + $0x550] sm:$0xff]  ;;  %v57_v53 = vld [vmem:[%s2004_s0 + $0x158] sm:$0xff]  ;;  %v219_v54 = vld [vmem:[%s2003_s1 + $0x4c8] sm:$0xff] }
  0x3f   :  { %1052 = vmatprep.subr.mxu1 %v182_v55  ;;  %445 = vmatprep.mubr.f32.mxu1 %v43_v56  ;;  %v251_v55 = vld [vmem:[%s2003_s1 + $0x5c8] sm:$0xff]  ;;  %v60_v56 = vld [vmem:[%s2004_s0 + $0x170] sm:$0xff] }
  0x40   :  { %1009 = vmatpush3.msra.mxu0 %v134_v57  ;;  %1053 = vmatpush3.msra.mxu1 %v166_v58  ;;  %v203_v57 = vld [vmem:[%s2003_s1 + $0x448] sm:$0xff] }
  0x41   :  { %1010 = vmatprep.subr.mxu0 %v149_v59  ;;  %446 = vmatmul.mubr.f32.gmra.mxu1 %v42_v60  ;;  %v235_v58 = vld [vmem:[%s2003_s1 + $0x548] sm:$0xff]  ;;  %v218_v59 = vld [vmem:[%s2003_s1 + $0x4c0] sm:$0xff] }
  0x42   :  { %1054 = vmatprep.subr.mxu1 %v181_v61  ;;  %365 = vmatprep.mubr.f32.mxu0 %v54_v62  ;;  %v59_v60 = vld [vmem:[%s2004_s0 + $0x168] sm:$0xff]  ;;  %v250_v61 = vld [vmem:[%s2003_s1 + $0x5c0] sm:$0xff] }
  0x43   :  { %1011 = vmatpush3.msra.mxu0 %v133_v63  ;;  %1055 = vmatpush3.msra.mxu1 %v165_v0  ;;  %v202_v62 = vld [vmem:[%s2003_s1 + $0x440] sm:$0xff]  ;;  %v217_v0 = vld [vmem:[%s2003_s1 + $0x4b8] sm:$0xff] }
  0x44   :  { %366 = vmatmul.mubr.f32.gmra.mxu0 %v53_v1  ;;  %1012 = vmatprep.subr.mxu0 %v148_v2  ;;  %v234_v63 = vld [vmem:[%s2003_s1 + $0x540] sm:$0xff]  ;;  %v249_v1 = vld [vmem:[%s2003_s1 + $0x5b8] sm:$0xff] }
  0x45   :  { %1056 = vmatprep.subr.mxu1 %v180_v3  ;;  %450 = vmatprep.mubr.f32.mxu1 %v56_v4  ;;  %v201_v2 = vld [vmem:[%s2003_s1 + $0x438] sm:$0xff]  ;;  %v216_v4 = vld [vmem:[%s2003_s1 + $0x4b0] sm:$0xff] }
  0x46   :  { %1013 = vmatpush3.msra.mxu0 %v132_v5  ;;  %1057 = vmatpush3.msra.mxu1 %v164_v6  ;;  %v233_v3 = vld [vmem:[%s2003_s1 + $0x538] sm:$0xff]  ;;  %v248_v5 = vld [vmem:[%s2003_s1 + $0x5b0] sm:$0xff] }
  0x47   :  { %1014 = vmatprep.subr.mxu0 %v147_v7  ;;  %451 = vmatmul.mubr.f32.gmra.mxu1 %v55_v8  ;;  %v200_v6 = vld [vmem:[%s2003_s1 + $0x430] sm:$0xff]  ;;  %v215_v8 = vld [vmem:[%s2003_s1 + $0x4a8] sm:$0xff] }
  0x48   :  { %1058 = vmatprep.subr.mxu1 %v179_v9  ;;  %1015 = vmatpush3.msra.mxu0 %v131_v10  ;;  %v232_v7 = vld [vmem:[%s2003_s1 + $0x530] sm:$0xff]  ;;  %v247_v9 = vld [vmem:[%s2003_s1 + $0x5a8] sm:$0xff] }
  0x49   :  { %1059 = vmatpush3.msra.mxu1 %v163_v11  ;;  %1016 = vmatprep.subr.mxu0 %v146_v12  ;;  %v199_v10 = vld [vmem:[%s2003_s1 + $0x428] sm:$0xff]  ;;  %v214_v12 = vld [vmem:[%s2003_s1 + $0x4a0] sm:$0xff] }
  0x4a   :  { %1060 = vmatprep.subr.mxu1 %v178_v13  ;;  %1017 = vmatpush3.msra.mxu0 %v130_v14  ;;  %v231_v11 = vld [vmem:[%s2003_s1 + $0x528] sm:$0xff]  ;;  %v246_v13 = vld [vmem:[%s2003_s1 + $0x5a0] sm:$0xff] }
  0x4b   :  { %520 = vmatprep.mubr.f32.mxu0 %v19_v15  ;;  %1061 = vmatpush3.msra.mxu1 %v162_v16  ;;  %v198_v14 = vld [vmem:[%s2003_s1 + $0x420] sm:$0xff]  ;;  %v213_v16 = vld [vmem:[%s2003_s1 + $0x498] sm:$0xff] }
  0x4c   :  { %605 = vmatprep.mubr.f32.mxu1 %v21_v17  ;;  %521 = vmatmul.mubr.f32.vlgmr.msra.gmra.mxu0 %v18_v18  ;;  %v230_v15 = vld [vmem:[%s2003_s1 + $0x520] sm:$0xff]  ;;  %v245_v17 = vld [vmem:[%s2003_s1 + $0x598] sm:$0xff] }
  0x4d   :  { %606 = vmatmul.mubr.f32.vlgmr.msra.gmra.mxu1 %v20_v19  ;;  %1074 = vmatprep.subr.mxu0 %v225_v20  ;;  %v197_v18 = vld [vmem:[%s2003_s1 + $0x418] sm:$0xff]  ;;  %v212_v20 = vld [vmem:[%s2003_s1 + $0x490] sm:$0xff] }
  0x4e   :  { %1118 = vmatprep.subr.mxu1 %v257_v21  ;;  %1075 = vmatpush3.msra.mxu0 %v209_v22  ;;  %v229_v19 = vld [vmem:[%s2003_s1 + $0x518] sm:$0xff]  ;;  %v244_v21 = vld [vmem:[%s2003_s1 + $0x590] sm:$0xff] }
  0x4f   :  { %1119 = vmatpush3.msra.mxu1 %v241_v23  ;;  %1076 = vmatprep.subr.mxu0 %v224_v24  ;;  %v196_v22 = vld [vmem:[%s2003_s1 + $0x410] sm:$0xff]  ;;  %v211_v24 = vld [vmem:[%s2003_s1 + $0x488] sm:$0xff] }
  0x50   :  { %1120 = vmatprep.subr.mxu1 %v256_v25  ;;  %525 = vmatprep.mubr.f32.mxu0 %v32_v26  ;;  %v228_v23 = vld [vmem:[%s2003_s1 + $0x510] sm:$0xff]  ;;  %v243_v25 = vld [vmem:[%s2003_s1 + $0x588] sm:$0xff] }
  0x51   :  { %1077 = vmatpush3.msra.mxu0 %v208_v27  ;;  %1121 = vmatpush3.msra.mxu1 %v240_v28  ;;  %v195_v26 = vld [vmem:[%s2003_s1 + $0x408] sm:$0xff]  ;;  %v210_v28 = vld [vmem:[%s2003_s1 + $0x480] sm:$0xff] }
  0x52   :  { %526 = vmatmul.mubr.f32.gmra.mxu0 %v31_v29  ;;  %1078 = vmatprep.subr.mxu0 %v223_v30  ;;  %v227_v27 = vld [vmem:[%s2003_s1 + $0x508] sm:$0xff]  ;;  %v242_v29 = vld [vmem:[%s2003_s1 + $0x580] sm:$0xff] }
  0x53   :  { %1122 = vmatprep.subr.mxu1 %v255_v31  ;;  %610 = vmatprep.mubr.f32.mxu1 %v34_v32  ;;  %v194_v30 = vld [vmem:[%s2003_s1 + $0x400] sm:$0xff]  ;;  %v23_v31 = vld [vmem:[%s2004_s0 + $0x48] sm:$0xff] }
  0x54   :  { %1079 = vmatpush3.msra.mxu0 %v207_v33  ;;  %1123 = vmatpush3.msra.mxu1 %v239_v34  ;;  %v226_v32 = vld [vmem:[%s2003_s1 + $0x500] sm:$0xff]  ;;  %v25_v33 = vld [vmem:[%s2004_s0 + $0x58] sm:$0xff] }
  0x55   :  { %1080 = vmatprep.subr.mxu0 %v222_v35  ;;  %611 = vmatmul.mubr.f32.gmra.mxu1 %v33_v36  ;;  %v22_v34 = vld [vmem:[%s2004_s0 + $0x40] sm:$0xff]  ;;  %v24_v35 = vld [vmem:[%s2004_s0 + $0x50] sm:$0xff]  ;;  %v265_v36 = vld [vmem:[%s2003_s1 + $0x638] sm:$0xff] }
  0x56   :  { %1124 = vmatprep.subr.mxu1 %v254_v37  ;;  %530 = vmatprep.mubr.f32.mxu0 %v45_v38  ;;  %v264_v37 = vld [vmem:[%s2003_s1 + $0x630] sm:$0xff] }
  0x57   :  { %1081 = vmatpush3.msra.mxu0 %v206_v39  ;;  %1125 = vmatpush3.msra.mxu1 %v238_v40  ;;  %v36_v38 = vld [vmem:[%s2004_s0 + $0xb0] sm:$0xff]  ;;  %v38_v39 = vld [vmem:[%s2004_s0 + $0xc0] sm:$0xff]  ;;  %v35_v40 = vld [vmem:[%s2004_s0 + $0xa8] sm:$0xff] }
  0x58   :  { %531 = vmatmul.mubr.f32.gmra.mxu0 %v44_v41  ;;  %1082 = vmatprep.subr.mxu0 %v221_v42  ;;  %v37_v41 = vld [vmem:[%s2004_s0 + $0xb8] sm:$0xff]  ;;  %v263_v42 = vld [vmem:[%s2003_s1 + $0x628] sm:$0xff] }
  0x59   :  { %1126 = vmatprep.subr.mxu1 %v253_v43  ;;  %615 = vmatprep.mubr.f32.mxu1 %v47_v44  ;;  %v262_v43 = vld [vmem:[%s2003_s1 + $0x620] sm:$0xff]  ;;  %v49_v44 = vld [vmem:[%s2004_s0 + $0x118] sm:$0xff] }
  0x5a   :  { %1083 = vmatpush3.msra.mxu0 %v205_v45  ;;  %1127 = vmatpush3.msra.mxu1 %v237_v46  ;;  %v51_v45 = vld [vmem:[%s2004_s0 + $0x128] sm:$0xff]  ;;  %v48_v46 = vld [vmem:[%s2004_s0 + $0x110] sm:$0xff] }
  0x5b   :  { %1084 = vmatprep.subr.mxu0 %v220_v47  ;;  %616 = vmatmul.mubr.f32.gmra.mxu1 %v46_v48  ;;  %v50_v47 = vld [vmem:[%s2004_s0 + $0x120] sm:$0xff]  ;;  %v261_v48 = vld [vmem:[%s2003_s1 + $0x618] sm:$0xff] }
  0x5c   :  { %1128 = vmatprep.subr.mxu1 %v252_v49  ;;  %535 = vmatprep.mubr.f32.mxu0 %v58_v50  ;;  %v260_v49 = vld [vmem:[%s2003_s1 + $0x610] sm:$0xff]  ;;  %v62_v50 = vld [vmem:[%s2004_s0 + $0x180] sm:$0xff] }
  0x5d   :  { %1085 = vmatpush3.msra.mxu0 %v204_v51  ;;  %1129 = vmatpush3.msra.mxu1 %v236_v52  ;;  %v64_v51 = vld [vmem:[%s2004_s0 + $0x190] sm:$0xff]  ;;  %v61_v52 = vld [vmem:[%s2004_s0 + $0x178] sm:$0xff] }
  0x5e   :  { %536 = vmatmul.mubr.f32.gmra.mxu0 %v57_v53  ;;  %1086 = vmatprep.subr.mxu0 %v219_v54  ;;  %v63_v53 = vld [vmem:[%s2004_s0 + $0x188] sm:$0xff] }
  0x5f   :  { %1130 = vmatprep.subr.mxu1 %v251_v55  ;;  %620 = vmatprep.mubr.f32.mxu1 %v60_v56  ;;  %v259_v54 = vld [vmem:[%s2003_s1 + $0x608] sm:$0xff]  ;;  %v258_v55 = vld [vmem:[%s2003_s1 + $0x600] sm:$0xff] }
  0x60   :  { %1087 = vmatpush3.msra.mxu0 %v203_v57  ;;  %1131 = vmatpush3.msra.mxu1 %v235_v58  ;;  %v26_v56 = vld [vmem:[%s2004_s0 + $0x60] sm:$0xff]  ;;  %v52_v57 = vld [vmem:[%s2004_s0 + $0x130] sm:$0xff]  ;;  %v39_v58 = vld [vmem:[%s2004_s0 + $0xc8] sm:$0xff] }
  0x61   :  { %1088 = vmatprep.subr.mxu0 %v218_v59  ;;  %621 = vmatmul.mubr.f32.gmra.mxu1 %v59_v60  ;;  %v65_v59 = vld [vmem:[%s2004_s0 + $0x198] sm:$0xff] }
  0x62   :  { %1132 = vmatprep.subr.mxu1 %v250_v61  ;;  %1089 = vmatpush3.msra.mxu0 %v202_v62 }
  0x63   :  { %1133 = vmatpush3.msra.mxu1 %v234_v63  ;;  %1090 = vmatprep.subr.mxu0 %v217_v0 }
  0x64   :  { %1134 = vmatprep.subr.mxu1 %v249_v1  ;;  %1091 = vmatpush3.msra.mxu0 %v201_v2 }
  0x65   :  { %1135 = vmatpush3.msra.mxu1 %v233_v3  ;;  %1092 = vmatprep.subr.mxu0 %v216_v4 }
  0x66   :  { %1136 = vmatprep.subr.mxu1 %v248_v5  ;;  %1093 = vmatpush3.msra.mxu0 %v200_v6 }
  0x67   :  { %1137 = vmatpush3.msra.mxu1 %v232_v7  ;;  %1094 = vmatprep.subr.mxu0 %v215_v8 }
  0x68   :  { %1138 = vmatprep.subr.mxu1 %v247_v9  ;;  %1095 = vmatpush3.msra.mxu0 %v199_v10 }
  0x69   :  { %1139 = vmatpush3.msra.mxu1 %v231_v11  ;;  %1096 = vmatprep.subr.mxu0 %v214_v12 }
  0x6a   :  { %1140 = vmatprep.subr.mxu1 %v246_v13  ;;  %1097 = vmatpush3.msra.mxu0 %v198_v14 }
  0x6b   :  { %1141 = vmatpush3.msra.mxu1 %v230_v15  ;;  %1098 = vmatprep.subr.mxu0 %v213_v16 }
  0x6c   :  { %1142 = vmatprep.subr.mxu1 %v245_v17  ;;  %1099 = vmatpush3.msra.mxu0 %v197_v18 }
  0x6d   :  { %1143 = vmatpush3.msra.mxu1 %v229_v19  ;;  %1100 = vmatprep.subr.mxu0 %v212_v20 }
  0x6e   :  { %1144 = vmatprep.subr.mxu1 %v244_v21  ;;  %1101 = vmatpush3.msra.mxu0 %v196_v22 }
  0x6f   :  { %1145 = vmatpush3.msra.mxu1 %v228_v23  ;;  %1102 = vmatprep.subr.mxu0 %v211_v24 }
  0x70   :  { %1146 = vmatprep.subr.mxu1 %v243_v25  ;;  %1103 = vmatpush3.msra.mxu0 %v195_v26 }
  0x71   :  { %1147 = vmatpush3.msra.mxu1 %v227_v27  ;;  %1104 = vmatprep.subr.mxu0 %v210_v28 }
  0x72   :  { %1148 = vmatprep.subr.mxu1 %v242_v29  ;;  %1105 = vmatpush3.msra.mxu0 %v194_v30 }
  0x73   :  { %690 = vmatprep.mubr.f32.mxu0 %v23_v31  ;;  %1149 = vmatpush3.msra.mxu1 %v226_v32 }
  0x74   :  { %775 = vmatprep.mubr.f32.mxu1 %v25_v33  ;;  %691 = vmatmul.mubr.f32.vlgmr.msra.gmra.mxu0 %v22_v34 }
  0x75   :  { %776 = vmatmul.mubr.f32.vlgmr.msra.gmra.mxu1 %v24_v35  ;;  %1174 = vmatprep.subr.mxu0 %v265_v36  ;;  %v893_v35 = vld [vmem:[%s2005_s2] ss:$0 sm:$0xff] }
  0x76   :  { %1196 = vmatprep.subr.mxu1 %v265_v36  ;;  %1175 = vmatpush3.msra.mxu0 %v265_v36 }
  0x77   :  { %1204 = vmatpush3.msra.mxu1 %v265_v36  ;;  %1176 = vmatprep.subr.mxu0 %v264_v37 }
  0x78   :  { %1197 = vmatprep.subr.mxu1 %v264_v37  ;;  %695 = vmatprep.mubr.f32.mxu0 %v36_v38 }
  0x79   :  { %780 = vmatprep.mubr.f32.mxu1 %v38_v39  ;;  %1177 = vmatpush3.msra.mxu0 %v264_v37 }
  0x7a   :  { %1205 = vmatpush3.msra.mxu1 %v264_v37  ;;  %696 = vmatmul.mubr.f32.gmra.mxu0 %v35_v40 }
  0x7b   :  { %781 = vmatmul.mubr.f32.gmra.mxu1 %v37_v41  ;;  %1178 = vmatprep.subr.mxu0 %v263_v42 }
  0x7c   :  { %1198 = vmatprep.subr.mxu1 %v263_v42  ;;  %1179 = vmatpush3.msra.mxu0 %v263_v42 }
  0x7d   :  { %1206 = vmatpush3.msra.mxu1 %v263_v42  ;;  %1180 = vmatprep.subr.mxu0 %v262_v43 }
  0x7e   :  { %1199 = vmatprep.subr.mxu1 %v262_v43  ;;  %700 = vmatprep.mubr.f32.mxu0 %v49_v44 }
  0x7f   :  { %785 = vmatprep.mubr.f32.mxu1 %v51_v45  ;;  %1181 = vmatpush3.msra.mxu0 %v262_v43 }
  0x80   :  { %1207 = vmatpush3.msra.mxu1 %v262_v43  ;;  %701 = vmatmul.mubr.f32.gmra.mxu0 %v48_v46 }
  0x81   :  { %786 = vmatmul.mubr.f32.gmra.mxu1 %v50_v47  ;;  %1182 = vmatprep.subr.mxu0 %v261_v48 }
  0x82   :  { %1200 = vmatprep.subr.mxu1 %v261_v48  ;;  %1183 = vmatpush3.msra.mxu0 %v261_v48 }
  0x83   :  { %1208 = vmatpush3.msra.mxu1 %v261_v48  ;;  %1184 = vmatprep.subr.mxu0 %v260_v49 }
  0x84   :  { %1201 = vmatprep.subr.mxu1 %v260_v49  ;;  %705 = vmatprep.mubr.f32.mxu0 %v62_v50 }
  0x85   :  { %790 = vmatprep.mubr.f32.mxu1 %v64_v51  ;;  %1185 = vmatpush3.msra.mxu0 %v260_v49 }
  0x86   :  { %1209 = vmatpush3.msra.mxu1 %v260_v49  ;;  %706 = vmatmul.mubr.f32.gmra.mxu0 %v61_v52 }
  0x87   :  { %791 = vmatmul.mubr.f32.gmra.mxu1 %v63_v53  ;;  %1186 = vmatprep.subr.mxu0 %v259_v54 }
  0x88   :  { %1202 = vmatprep.subr.mxu1 %v259_v54  ;;  %1187 = vmatpush3.msra.mxu0 %v259_v54 }
  0x89   :  { %1210 = vmatpush3.msra.mxu1 %v259_v54  ;;  %1188 = vmatprep.subr.mxu0 %v258_v55 }
  0x8a   :  { %1203 = vmatprep.subr.mxu1 %v258_v55  ;;  %1189 = vmatpush3.msra.mxu0 %v258_v55 }
  0x8b   :  { %1211 = vmatpush3.msra.mxu1 %v258_v55  ;;  %1190 = vmatprep.mubr.msk.f32.mxu0 %vm273_vm0, %v26_v56 }
  0x8c   :  { %1193 = vmatprep.mubr.msk.f32.mxu1 %vm273_vm0, %v52_v57  ;;  %1191 = vmatmul.mubr.msk.f32.vlgmr.msra.gmra.mxu0 %vm273_vm0, %v39_v58 }
  0x8d   :  { %1194 = vmatmul.mubr.msk.f32.vlgmr.msra.gmra.mxu1 %vm273_vm0, %v65_v59 }
  0xe4   :  { %v930_v60 = vpop.f32.mrf.mxu0 }
  0xe5   :  { %v974_v61 = vpop.f32.mrf.mxu1 }
  0xe6   :  { %v931_v62 = vpop.f32.mrf.mxu0 }
  0xe7   :  { %v975_v63 = vpop.f32.mrf.mxu1  ;;  %v932_v33 = vadd.f32 %v931_v62, %v930_v60 }
  0xe8   :  { %v976_v41 = vadd.f32 %v975_v63, %v974_v61 }
  0xe9   :  { %v353_v44 = vadd.f32 %v932_v33, %v893_v35 }
  0xeb   :  { %v438_v56 = vadd.f32 %v976_v41, %v353_v44 }
  0xf8   :  { %v933_v0 = vpop.f32.mrf.mxu0 }
  0xfa   :  { %v934_v2 = vpop.f32.mrf.mxu0 }
  0xfb   :  { %v977_v1 = vpop.f32.mrf.mxu1  ;;  %v935_v32 = vadd.f32 %v934_v2, %v933_v0 }
  0xfd   :  { %v978_v3 = vpop.f32.mrf.mxu1  ;;  %v358_v39 = vadd.f32 %v935_v32, %v893_v35 }
  0xfe   :  { %v936_v4 = vpop.f32.mrf.mxu0  ;;  %v979_v40 = vadd.f32 %v978_v3, %v977_v1 }
 0x100   :  { %v937_v6 = vpop.f32.mrf.mxu0  ;;  %v443_v50 = vadd.f32 %v979_v40, %v358_v39 }
 0x101   :  { %v980_v5 = vpop.f32.mrf.mxu1  ;;  %v938_v34 = vadd.f32 %v937_v6, %v936_v4 }
 0x103   :  { %v981_v7 = vpop.f32.mrf.mxu1  ;;  %v363_v45 = vadd.f32 %v938_v34, %v893_v35 }
 0x104   :  { %v939_v8 = vpop.f32.mrf.mxu0  ;;  %v982_v46 = vadd.f32 %v981_v7, %v980_v5 }
 0x106   :  { %v940_v10 = vpop.f32.mrf.mxu0  ;;  %v448_v57 = vadd.f32 %v982_v46, %v363_v45 }
 0x107   :  { %v983_v9 = vpop.f32.mrf.mxu1  ;;  %v941_v36 = vadd.f32 %v940_v10, %v939_v8 }
 0x109   :  { %v984_v11 = vpop.f32.mrf.mxu1  ;;  %v368_v48 = vadd.f32 %v941_v36, %v893_v35 }
 0x10a   :  { %v985_v49 = vadd.f32 %v984_v11, %v983_v9 }
 0x10c   :  { %v1018_v12 = vpop.f32.mrf.mxu0  ;;  %v453_v60 = vadd.f32 %v985_v49, %v368_v48 }
 0x10d   :  { %v1062_v13 = vpop.f32.mrf.mxu1 }
 0x10e   :  { %v1019_v14 = vpop.f32.mrf.mxu0 }
 0x10f   :  { %v1063_v15 = vpop.f32.mrf.mxu1  ;;  %v1020_v51 = vadd.f32 %v1019_v14, %v1018_v12 }
 0x110   :  { %v1064_v61 = vadd.f32 %v1063_v15, %v1062_v13 }
 0x111   :  { %v523_v0 = vadd.f32 %v1020_v51, %v438_v56 }
 0x112   :  { %v1021_v16 = vpop.f32.mrf.mxu0 }
 0x113   :  { %v608_v11 = vadd.f32 %v1064_v61, %v523_v0 }
 0x114   :  { %v1022_v18 = vpop.f32.mrf.mxu0 }
 0x115   :  { %v1065_v17 = vpop.f32.mrf.mxu1  ;;  %v1023_v47 = vadd.f32 %v1022_v18, %v1021_v16 }
 0x117   :  { %v1066_v19 = vpop.f32.mrf.mxu1  ;;  %v528_v58 = vadd.f32 %v1023_v47, %v443_v50 }
 0x118   :  { %v1024_v20 = vpop.f32.mrf.mxu0  ;;  %v1067_v59 = vadd.f32 %v1066_v19, %v1065_v17 }
 0x11a   :  { %v1025_v22 = vpop.f32.mrf.mxu0  ;;  %v613_v6 = vadd.f32 %v1067_v59, %v528_v58 }
 0x11b   :  { %v1068_v21 = vpop.f32.mrf.mxu1  ;;  %v1026_v52 = vadd.f32 %v1025_v22, %v1024_v20 }
 0x11d   :  { %v1069_v23 = vpop.f32.mrf.mxu1  ;;  %v533_v1 = vadd.f32 %v1026_v52, %v448_v57 }
 0x11e   :  { %v1027_v24 = vpop.f32.mrf.mxu0  ;;  %v1070_v2 = vadd.f32 %v1069_v23, %v1068_v21 }
 0x120   :  { %v1028_v26 = vpop.f32.mrf.mxu0  ;;  %v618_v12 = vadd.f32 %v1070_v2, %v533_v1 }
 0x121   :  { %v1071_v25 = vpop.f32.mrf.mxu1  ;;  %v1029_v53 = vadd.f32 %v1028_v26, %v1027_v24 }
 0x123   :  { %v1072_v27 = vpop.f32.mrf.mxu1  ;;  %v538_v4 = vadd.f32 %v1029_v53, %v453_v60 }
 0x124   :  { %v1073_v5 = vadd.f32 %v1072_v27, %v1071_v25 }
 0x126   :  { %v623_v16 = vadd.f32 %v1073_v5, %v538_v4 }
 0x134   :  { %v1106_v28 = vpop.f32.mrf.mxu0 }
 0x135   :  { %v1150_v29 = vpop.f32.mrf.mxu1 }
 0x136   :  { %v1107_v30 = vpop.f32.mrf.mxu0 }
 0x137   :  { %v1151_v31 = vpop.f32.mrf.mxu1  ;;  %v1108_v7 = vadd.f32 %v1107_v30, %v1106_v28 }
 0x138   :  { %v1152_v22 = vadd.f32 %v1151_v31, %v1150_v29 }
 0x139   :  { %v693_v13 = vadd.f32 %v1108_v7, %v608_v11 }
 0x13a   :  { %v1109_v37 = vpop.f32.mrf.mxu0 }
 0x13b   :  { %v1153_v38 = vpop.f32.mrf.mxu1  ;;  %v778_v32 = vadd.f32 %v1152_v22, %v693_v13 }
 0x13c   :  { %v1110_v42 = vpop.f32.mrf.mxu0 }
 0x13d   :  { %v1154_v43 = vpop.f32.mrf.mxu1  ;;  %v1111_v3 = vadd.f32 %v1110_v42, %v1109_v37 }
 0x13e   :  { %v1155_v15 = vadd.f32 %v1154_v43, %v1153_v38 }
 0x13f   :  { %v698_v14 = vadd.f32 %v1111_v3, %v613_v6 }
 0x140   :  { %v1112_v54 = vpop.f32.mrf.mxu0 }
 0x141   :  { %v1156_v55 = vpop.f32.mrf.mxu1  ;;  %v783_v25 = vadd.f32 %v1155_v15, %v698_v14 }
 0x142   :  { %v1113_v62 = vpop.f32.mrf.mxu0 }
 0x143   :  { %v1157_v63 = vpop.f32.mrf.mxu1  ;;  %v1114_v8 = vadd.f32 %v1113_v62, %v1112_v54 }
 0x144   :  { %v1158_v21 = vadd.f32 %v1157_v63, %v1156_v55 }
 0x145   :  { %v703_v19 = vadd.f32 %v1114_v8, %v618_v12 }
 0x146   :  { %v1115_v9 = vpop.f32.mrf.mxu0 }
 0x147   :  { %v1159_v10 = vpop.f32.mrf.mxu1  ;;  %v788_v33 = vadd.f32 %v1158_v21, %v703_v19 }
 0x148   :  { %v1116_v17 = vpop.f32.mrf.mxu0 }
 0x149   :  { %v1160_v18 = vpop.f32.mrf.mxu1  ;;  %v1117_v20 = vadd.f32 %v1116_v17, %v1115_v9 }
 0x14a   :  { %v1161_v24 = vadd.f32 %v1160_v18, %v1159_v10 }
 0x14b   :  { %v708_v23 = vadd.f32 %v1117_v20, %v623_v16 }
 0x14c   :  { %v1192_v26 = vpop.f32.mrf.mxu0 }
 0x14d   :  { %v1195_v27 = vpop.f32.mrf.mxu1  ;;  %v868_v28 = vadd.f32 %v1192_v26, %v783_v25  ;;  %v793_v30 = vadd.f32 %v1161_v24, %v708_v23 }
 0x14e   :  { %v862_v34 = vpop.f32.mrf.mxu0 }
 0x14f   :  { %v872_v35 = vpop.f32.mrf.mxu1  ;;  %v882_v36 = vmax.f32 %v868_v28, 0.0  ;;  %v878_v37 = vadd.f32 %v1195_v27, %v793_v30  ;;  %v863_v39 = vadd.f32 %v862_v34, %v778_v32 }
 0x150   :  { %v873_v40 = vadd.f32 %v872_v35, %v788_v33 }
 0x151   :  { %886 = vst [vmem:[%s2006_s3 + $0x8] sm:$0xff] %v882_v36  ;;  %v884_v29 = vmax.f32 %v878_v37, 0.0  ;;  %v881_v31 = vmax.f32 %v863_v39, 0.0 }
 0x152   :  { %v883_v38 = vmax.f32 %v873_v40, 0.0 }
 0x153   :  { %888 = vst [vmem:[%s2006_s3 + $0x18] sm:$0xff] %v884_v29  ;;  %885 = vst [vmem:[%s2006_s3] sm:$0xff] %v881_v31 }
 0x154   :  { %887 = vst [vmem:[%s2006_s3 + $0x10] sm:$0xff] %v883_v38 }

// kernel: ra_actor_world_forward.11
= control target key start
LH: loop header
LB: loop body
LE: loop exit
PB: predicated region body
PF: predicated region fallthrough
CT: control target
= control target key end

     0   :  { %s1114_s18 = smov 0   ;;  %s1249_s0 = inlined_call_operand.vmem [shape: f32[8,1152], index: 0, kind: input, shape index: {}]   ;;  %s1250_s1 = inlined_call_operand.vmem [shape: bf16[1152,256], index: 1, kind: input, shape index: {}]   ;;  %s1251_s2 = inlined_call_operand.vmem [shape: f32[1,256], index: 2, kind: input, shape index: {}]   ;;  %s1252_s3 = inlined_call_operand.vmem [shape: bf16[256,8], index: 3, kind: input, shape index: {}]   ;;  %s1253_s4 = inlined_call_operand.vmem [shape: f32[1,8], index: 4, kind: input, shape index: {}]   ;;  %s1254_s5 = inlined_call_operand.vmem [shape: f32[8,8], index: 5, kind: output, shape index: {}]  }
   0x1 LB: > { %s1120_s19 = sadd.s32 4294967295, %s1080_s18   ;;  %p878_p0 = scmp.ge.s32.totalorder %s1080_s18, 1  ;;  %s1080_s18 = sphi %s1114_s18, %s15_s18  }
   0x2   : > { %p195_p1 = scmp.lt.s32.totalorder %s1080_s18, 4 }
   0x4   : > { %p196_p2 = pnand %p878_p0, %p195_p1 }
   0x5   : > { %s224_s20 = smul.u32 (!%p196_p2), 3, %s1120_s19  ;;  %p882_p5 = scmp.ne.s32.totalorder (!%p196_p2), %s1120_s19, 0 }
   0x6   : > { %199 = sbr.rel (%p196_p2) target bundleno = 540 (0x21c), region = 40 }
   0x7   : > { %s230_s21 = smul.u32 (!%p196_p2), 48, %s1120_s19  ;;  %p225_p3 = scmp.lt.s32.totalorder (!%p196_p2), %s224_s20, 8 }
   0x9   : > { %p231_p4 = scmp.lt.s32.totalorder (!%p196_p2), %s230_s21, 143 }
   0xb   : > { %s1256_s20 = smov (!%p225_p3, %s224_s20), 8  ;;  %s1258_s21 = smov (!%p231_p4, %s230_s21), 143 }
   0xc   : > { %s879_s22 = sshll.u32 %s1256_s20, 3  ;;  %s951_s26 = sshll.u32 %s1258_s21, 3 }
   0xd   : > { %s1129_s25 = scalar_lea.vmem %s1249_s0, %s879_s22  ;;  %s1134_s29 = scalar_lea.vmem %s1250_s1, %s951_s26 }
   0xe   : > { %241 = sbr.rel (%p882_p5) target bundleno = 21 (0x15), region = 44 }
  0x13   : > { %v1082_v0 = vmov 0.0  }
  0x14   : > { %242 = vst [vmem:[#allocation2] sm:$0xff] %v1082_v0  ;;  %243 = vst [vmem:[#allocation2 + $0x8] sm:$0xff] %v1082_v0 }
  0x15 PF: > { %v984_v1 = vld [vmem:[%s1134_s29 + $0x74] ss:$8 sps:$4 sm:$0xff]   ;;  %v986_v2 = vld [vmem:[%s1134_s29 + $0x70] ss:$8 sps:$4 sm:$0xff]   ;;  %v1083_v3 = vmov 0   ;;  %v247_v34 = vld [vmem:[%s1129_s25 + $0x8] sm:$0xff] }
  0x16   : > { %613 = vmatprep.mubr.bf16.mxu1 %v1083_v3  ;;  %540 = vmatprep.subr.bf16.mxu0 %v984_v1  ;;  %v987_v4 = vld [vmem:[%s1134_s29 + $0x64] ss:$8 sps:$4 sm:$0xff]   ;;  %v989_v5 = vld [vmem:[%s1134_s29 + $0x60] ss:$8 sps:$4 sm:$0xff]   ;;  %v990_v6 = vld [vmem:[%s1134_s29 + $0x54] ss:$8 sps:$4 sm:$0xff]   ;;  %v250_v36 = vpack.c.bf16 %v247_v34, %v247_v34 }
  0x17   : > { %541 = vmatpush1.bf16.msra.mxu0 %v986_v2  ;;  %v992_v7 = vld [vmem:[%s1134_s29 + $0x50] ss:$8 sps:$4 sm:$0xff]   ;;  %v993_v8 = vld [vmem:[%s1134_s29 + $0x44] ss:$8 sps:$4 sm:$0xff]   ;;  %v1005_v9 = vld [vmem:[%s1134_s29 + $0x174] ss:$8 sps:$4 sm:$0xff]  }
  0x18   : > { %542 = vmatprep.subr.bf16.mxu0 %v987_v4  ;;  %v1007_v10 = vld [vmem:[%s1134_s29 + $0x170] ss:$8 sps:$4 sm:$0xff]   ;;  %v995_v11 = vld [vmem:[%s1134_s29 + $0x40] ss:$8 sps:$4 sm:$0xff]   ;;  %v996_v12 = vld [vmem:[%s1134_s29 + $0x34] ss:$8 sps:$4 sm:$0xff]   ;;  %581 = vmatprep.subr.bf16.mxu1 %v1005_v9 }
  0x19   : > { %v1011_v13 = vld [vmem:[%s1134_s29 + $0x164] ss:$8 sps:$4 sm:$0xff]   ;;  %582 = vmatpush1.bf16.msra.mxu1 %v1007_v10  ;;  %v1013_v14 = vld [vmem:[%s1134_s29 + $0x160] ss:$8 sps:$4 sm:$0xff]   ;;  %v998_v15 = vld [vmem:[%s1134_s29 + $0x30] ss:$8 sps:$4 sm:$0xff]   ;;  %572 = vmatprep.mubr.bf16.mxu0 %v250_v36 }
  0x1a   : > { %583 = vmatprep.subr.bf16.mxu1 %v1011_v13  ;;  %v1017_v16 = vld [vmem:[%s1134_s29 + $0x154] ss:$8 sps:$4 sm:$0xff]   ;;  %v999_v17 = vld [vmem:[%s1134_s29 + $0x24] ss:$8 sps:$4 sm:$0xff]   ;;  %v1019_v18 = vld [vmem:[%s1134_s29 + $0x150] ss:$8 sps:$4 sm:$0xff]  }
  0x1b   : > { %543 = vmatpush1.bf16.msra.mxu0 %v989_v5  ;;  %v1023_v19 = vld [vmem:[%s1134_s29 + $0x144] ss:$8 sps:$4 sm:$0xff]   ;;  %v1001_v20 = vld [vmem:[%s1134_s29 + $0x20] ss:$8 sps:$4 sm:$0xff]   ;;  %v1002_v21 = vld [vmem:[%s1134_s29 + $0x14] ss:$8 sps:$4 sm:$0xff]  }
  0x1c   : > { %544 = vmatprep.subr.bf16.mxu0 %v990_v6  ;;  %v1025_v22 = vld [vmem:[%s1134_s29 + $0x140] ss:$8 sps:$4 sm:$0xff]   ;;  %v1029_v23 = vld [vmem:[%s1134_s29 + $0x134] ss:$8 sps:$4 sm:$0xff]   ;;  %v1004_v24 = vld [vmem:[%s1134_s29 + $0x10] ss:$8 sps:$4 sm:$0xff]  }
  0x1d   : > { %584 = vmatpush1.bf16.msra.mxu1 %v1013_v14  ;;  %v1008_v25 = vld [vmem:[%s1134_s29 + $0x4] ss:$8 sps:$4 sm:$0xff]   ;;  %v1031_v26 = vld [vmem:[%s1134_s29 + $0x130] ss:$8 sps:$4 sm:$0xff]   ;;  %v1010_v28 = vld [vmem:[%s1134_s29] ss:$8 sps:$4 sm:$0xff]  }
  0x1e   : > { %585 = vmatprep.subr.bf16.mxu1 %v1017_v16  ;;  %v1035_v27 = vld [vmem:[%s1134_s29 + $0x124] ss:$8 sps:$4 sm:$0xff]   ;;  %v1014_v29 = vld [vmem:[%s1134_s29 + $0xf4] ss:$8 sps:$4 sm:$0xff]   ;;  %v1037_v30 = vld [vmem:[%s1134_s29 + $0x120] ss:$8 sps:$4 sm:$0xff]  }
  0x1f   : > { %545 = vmatpush1.bf16.msra.mxu0 %v992_v7  ;;  %v1041_v31 = vld [vmem:[%s1134_s29 + $0x114] ss:$8 sps:$4 sm:$0xff]   ;;  %v1016_v32 = vld [vmem:[%s1134_s29 + $0xf0] ss:$8 sps:$4 sm:$0xff]   ;;  %v1020_v33 = vld [vmem:[%s1134_s29 + $0xe4] ss:$8 sps:$4 sm:$0xff]  }
  0x20   : > { %546 = vmatprep.subr.bf16.mxu0 %v993_v8  ;;  %v1043_v35 = vld [vmem:[%s1134_s29 + $0x110] ss:$8 sps:$4 sm:$0xff]   ;;  %v1047_v37 = vld [vmem:[%s1134_s29 + $0x104] ss:$8 sps:$4 sm:$0xff]   ;;  %v1022_v38 = vld [vmem:[%s1134_s29 + $0xe0] ss:$8 sps:$4 sm:$0xff]  }
  0x21   : > { %586 = vmatpush1.bf16.msra.mxu1 %v1019_v18  ;;  %v1026_v39 = vld [vmem:[%s1134_s29 + $0xd4] ss:$8 sps:$4 sm:$0xff]   ;;  %v1049_v40 = vld [vmem:[%s1134_s29 + $0x100] ss:$8 sps:$4 sm:$0xff]   ;;  %v1028_v42 = vld [vmem:[%s1134_s29 + $0xd0] ss:$8 sps:$4 sm:$0xff]  }
  0x22   : > { %587 = vmatprep.subr.bf16.mxu1 %v1023_v19  ;;  %v248_v41 = vld [vmem:[%s1129_s25 + $0x10] sm:$0xff]  ;;  %v1032_v43 = vld [vmem:[%s1134_s29 + $0xc4] ss:$8 sps:$4 sm:$0xff]   ;;  %v1034_v45 = vld [vmem:[%s1134_s29 + $0xc0] ss:$8 sps:$4 sm:$0xff]   ;;  %p931_p6 = scmp.ne.s32.totalorder %s1120_s19, 2 }
  0x23   : > { %547 = vmatpush1.bf16.msra.mxu0 %v995_v11  ;;  %v251_v44 = vpack.c.bf16 %v248_v41, %v248_v41  ;;  %v1038_v46 = vld [vmem:[%s1134_s29 + $0xb4] ss:$8 sps:$4 sm:$0xff]   ;;  %v1040_v47 = vld [vmem:[%s1134_s29 + $0xb0] ss:$8 sps:$4 sm:$0xff]   ;;  %v1044_v48 = vld [vmem:[%s1134_s29 + $0xa4] ss:$8 sps:$4 sm:$0xff]  }
  0x24   : > { %548 = vmatprep.subr.bf16.mxu0 %v996_v12  ;;  %v1046_v49 = vld [vmem:[%s1134_s29 + $0xa0] ss:$8 sps:$4 sm:$0xff]   ;;  %v1050_v50 = vld [vmem:[%s1134_s29 + $0x94] ss:$8 sps:$4 sm:$0xff]   ;;  %v1052_v51 = vld [vmem:[%s1134_s29 + $0x90] ss:$8 sps:$4 sm:$0xff]  }
  0x25   : > { %588 = vmatpush1.bf16.msra.mxu1 %v1025_v22  ;;  %v1053_v52 = vld [vmem:[%s1134_s29 + $0x84] ss:$8 sps:$4 sm:$0xff]   ;;  %v1055_v53 = vld [vmem:[%s1134_s29 + $0x80] ss:$8 sps:$4 sm:$0xff]  }
  0x26   : > { %589 = vmatprep.subr.bf16.mxu1 %v1029_v23  ;;  %v246_v54 = vld [vmem:[%s1129_s25] sm:$0xff]  ;;  %v245_v63 = vld [vmem:[#allocation2 + $0x8] sm:$0xff] }
  0x27   : > { %549 = vmatpush1.bf16.msra.mxu0 %v998_v15  ;;  %v249_v55 = vpack.c.bf16 %v246_v54, %v246_v54  ;;  %v244_v60 = vld [vmem:[#allocation2] sm:$0xff] }
  0x28   : > { %550 = vmatprep.subr.bf16.mxu0 %v999_v17 }
  0x29   : > { %590 = vmatpush1.bf16.msra.mxu1 %v1031_v26 }
  0x2a   : > { %591 = vmatprep.subr.bf16.mxu1 %v1035_v27 }
  0x2b   : > { %551 = vmatpush1.bf16.msra.mxu0 %v1001_v20 }
  0x2c   : > { %552 = vmatprep.subr.bf16.mxu0 %v1002_v21 }
  0x2d   : > { %592 = vmatpush1.bf16.msra.mxu1 %v1037_v30 }
  0x2e   : > { %593 = vmatprep.subr.bf16.mxu1 %v1041_v31 }
  0x2f   : > { %553 = vmatpush1.bf16.msra.mxu0 %v1004_v24 }
  0x30   : > { %554 = vmatprep.subr.bf16.mxu0 %v1008_v25 }
  0x31   : > { %594 = vmatpush1.bf16.msra.mxu1 %v1043_v35 }
  0x32   : > { %595 = vmatprep.subr.bf16.mxu1 %v1047_v37 }
  0x33   : > { %555 = vmatpush1.bf16.msra.mxu0 %v1010_v28 }
  0x34   : > { %556 = vmatprep.subr.bf16.mxu0 %v1014_v29 }
  0x35   : > { %596 = vmatpush1.bf16.msra.mxu1 %v1049_v40 }
  0x37   : > { %557 = vmatpush2.bf16.msra.mxu0 %v1016_v32 }
  0x38   : > { %558 = vmatprep.subr.bf16.mxu0 %v1020_v33  ;;  %614 = vmatmul.mubr.bf16.vlgmr.msra.gmra.mxu1 %v251_v44 }
  0x3b   : > { %559 = vmatpush2.bf16.msra.mxu0 %v1022_v38 }
  0x3c   : > { %560 = vmatprep.subr.bf16.mxu0 %v1026_v39 }
  0x3f   : > { %561 = vmatpush2.bf16.msra.mxu0 %v1028_v42 }
  0x40   : > { %562 = vmatprep.subr.bf16.mxu0 %v1032_v43 }
  0x43   : > { %563 = vmatpush2.bf16.msra.mxu0 %v1034_v45 }
  0x44   : > { %564 = vmatprep.subr.bf16.mxu0 %v1038_v46 }
  0x47   : > { %565 = vmatpush2.bf16.msra.mxu0 %v1040_v47 }
  0x48   : > { %566 = vmatprep.subr.bf16.mxu0 %v1044_v48 }
  0x4b   : > { %567 = vmatpush2.bf16.msra.mxu0 %v1046_v49 }
  0x4c   : > { %568 = vmatprep.subr.bf16.mxu0 %v1050_v50 }
  0x4f   : > { %569 = vmatpush2.bf16.msra.mxu0 %v1052_v51 }
  0x50   : > { %570 = vmatprep.subr.bf16.mxu0 %v1053_v52 }
  0x53   : > { %571 = vmatpush2.bf16.msra.mxu0 %v1055_v53 }
  0x56   : > { %573 = vmatmul.mubr.bf16.vlgmr.msra.gmra.mxu0 %v249_v55 }
  0xf8   : > { %v615_v56 = vpop.f32.mrf.mxu1 }
  0xfa   : > { %v617_v57 = vpop.f32.mrf.mxu1 }
  0xfc   : > { %v619_v58 = vpop.f32.mrf.mxu1 }
  0xfe   : > { %v620_v59 = vpop.f32.mrf.mxu1 }
 0x116   : > { %v574_v61 = vpop.f32.mrf.mxu0 }
 0x117   : > { %v616_v62 = vadd.f32 %v615_v56, %v574_v61 }
 0x118   : > { %v576_v0 = vpop.f32.mrf.mxu0 }
 0x119   : > { %v622_v1 = vadd.f32 %v616_v62, %v244_v60  ;;  %v618_v2 = vadd.f32 %v617_v57, %v576_v0  ;;  %629 = sbr.rel (%p931_p6) target bundleno = 540 (0x21c), region = 48 }
 0x11a   : > { %v578_v3 = vpop.f32.mrf.mxu0 }
 0x11b   : > { %624 = vst [vmem:[#allocation2] sm:$0xff] %v622_v1  ;;  %v623_v4 = vadd.f32 %v618_v2, %v245_v63 }
 0x11c   : > { %v579_v5 = vpop.f32.mrf.mxu0 }
 0x11d   : > { %625 = vst [vmem:[#allocation2 + $0x8] sm:$0xff] %v623_v4 }
 0x11e   : > { %v1056_v6 = vld [vmem:[%s1252_s3 + $0x78] sm:$0xff]   ;;  %v1058_v8 = vld [vmem:[%s1252_s3 + $0x70] sm:$0xff]   ;;  %v1060_v10 = vld [vmem:[%s1252_s3 + $0x68] sm:$0xff]   ;;  %v634_v11 = vlaneseq  ;;  %vm833_vm1 = vcmask 64512  }
 0x11f   : > { %v1057_v7 = vld [vmem:[%s1252_s3 + $0x38] sm:$0xff]   ;;  %952 = vmatprep.subr.bf16.mxu0 %v1056_v6  ;;  %v1059_v9 = vld [vmem:[%s1252_s3 + $0x30] sm:$0xff]   ;;  %v1061_v12 = vld [vmem:[%s1252_s3 + $0x28] sm:$0xff]  }
 0x120   : > { %953 = vmatpush3.bf16.msra.mxu0 %v1057_v7  ;;  %v1062_v13 = vld [vmem:[%s1252_s3 + $0x60] sm:$0xff]   ;;  %v635_v14 = vshrl.u32 %v634_v11, 7  ;;  %v1064_v16 = vld [vmem:[%s1252_s3 + $0x58] sm:$0xff]   ;;  %v1066_v20 = vld [vmem:[%s1252_s3 + $0x50] sm:$0xff]   ;;  %v830_v45 = vand.u32 127, %v634_v11 }
 0x121   : > { %954 = vmatprep.subr.bf16.mxu0 %v1058_v8  ;;  %v1063_v15 = vld [vmem:[%s1252_s3 + $0x20] sm:$0xff]   ;;  %v1065_v19 = vld [vmem:[%s1252_s3 + $0x18] sm:$0xff]   ;;  %v1067_v25 = vld [vmem:[%s1252_s3 + $0x10] sm:$0xff]  }
 0x122   : > { %v640_v17 = vsub.s32 1, %v635_v14  ;;  %v636_v18 = vsub.s32 0, %v635_v14  ;;  %v632_v22 = vld [vmem:[%s1251_s2] sm:$0x3]  ;;  %v1068_v28 = vld [vmem:[%s1252_s3 + $0x48] sm:$0xff]   ;;  %vm831_vm0 = vcmp.lt.s32.totalorder %v830_v45, 4 }
 0x123   : > { %v630_v27 = vld [vmem:[#allocation2] sm:$0xff]  ;;  %v1069_v31 = vld [vmem:[%s1252_s3 + $0x8] sm:$0xff]  }
 0x124   : > { %955 = vmatpush3.bf16.msra.mxu0 %v1059_v9  ;;  %v631_v21 = vld [vmem:[#allocation2 + $0x8] sm:$0xff]  ;;  %v641_v23 = vrot.slane %v632_v22, %v640_v17  ;;  %v637_v24 = vrot.slane %v632_v22, %v636_v18  ;;  %v1070_v33 = vld [vmem:[%s1252_s3 + $0x40] sm:$0xff]  }
 0x125   : > { %956 = vmatprep.subr.bf16.mxu0 %v1060_v10  ;;  %v1071_v35 = vld [vmem:[%s1252_s3] sm:$0xff]  }
 0x126   : > { %v645_v26 = vadd.f32 %v641_v23, %v631_v21  ;;  %v644_v30 = vadd.f32 %v637_v24, %v630_v27  ;;  %v932_v38 = vld [vmem:[%s1253_s4] ss:$0 sm:$0xff] }
 0x128   : > { %957 = vmatpush3.bf16.msra.mxu0 %v1061_v12  ;;  %v647_v29 = vmax.f32 %v645_v26, 0.0  ;;  %v646_v34 = vmax.f32 %v644_v30, 0.0 }
 0x129   : > { %958 = vmatprep.subr.bf16.mxu0 %v1062_v13 }
 0x12a   : > { %v649_v32 = vpack.c.bf16 %v647_v29, %v647_v29  ;;  %v648_v36 = vpack.c.bf16 %v646_v34, %v646_v34 }
 0x12c   : > { %959 = vmatpush3.bf16.msra.mxu0 %v1063_v15  ;;  %817 = vmatprep.mubr.bf16.mxu0 %v649_v32 }
 0x12d   : > { %960 = vmatprep.subr.bf16.mxu0 %v1064_v16 }
 0x130   : > { %961 = vmatpush3.bf16.msra.mxu0 %v1065_v19 }
 0x131   : > { %962 = vmatprep.subr.bf16.mxu0 %v1066_v20 }
 0x134   : > { %963 = vmatpush3.bf16.msra.mxu0 %v1067_v25 }
 0x135   : > { %964 = vmatprep.subr.bf16.mxu0 %v1068_v28 }
 0x138   : > { %965 = vmatpush3.bf16.msra.mxu0 %v1069_v31 }
 0x139   : > { %966 = vmatprep.subr.bf16.mxu0 %v1070_v33 }
 0x13c   : > { %967 = vmatpush3.bf16.msra.mxu0 %v1071_v35 }
 0x13f   : > { %818 = vmatmul.mubr.bf16.vlgmr.msra.gmra.mxu0 %v648_v36 }
 0x1ff   : > { %v968_v37 = vpop.f32.mrf.mxu0 }
 0x201   : > { %v969_v39 = vpop.f32.mrf.mxu0 }
 0x202   : > { %v970_v40 = vadd.f32 %v969_v39, %v968_v37 }
 0x203   : > { %v971_v41 = vpop.f32.mrf.mxu0 }
 0x204   : > { %v820_v42 = vadd.f32 %v970_v40, %v932_v38 }
 0x205   : > { %v972_v43 = vpop.f32.mrf.mxu0 }
 0x206   : > { %1072 = vtanh.f32 %v820_v42 }
 0x213   : > { %v1073_v44 = vpop.eup %1072 }
 0x214   : > { %v826_v46 = vadd.f32 1.0, %v1073_v44 }
 0x216   : > { %v827_v47 = vmul.f32 3.5, %v826_v46 }
 0x218   : > { %v828_v48 = vadd.f32 -5.0, %v827_v47 }
 0x21a   : > { %v832_v49 = vsel %vm831_vm0, %v820_v42, %v828_v48 }
 0x21b   : > { %834 = vst.msk [vmem:[%s1254_s5] sm:$0xff] %vm833_vm1, %v832_v49 }
 0x21c PF: > { %s15_s18 = sadd.s32 1, %s1080_s18  }
 0x21d   : > { %p12_p7 = scmp.ge.s32.totalorder %s15_s18, 5  }
 0x21f   :  { %14 = sbr.rel (!%p12_p7) target bundleno = 1 (0x1), region = 77 }

// kernel: ra_actor_world_forward.10
= control target key start
LH: loop header
LB: loop body
LE: loop exit
PB: predicated region body
PF: predicated region fallthrough
CT: control target
= control target key end

     0   :  { %s3108_s12 = smov 0   ;;  %s3110_s13 = smov 0   ;;  %s3532_s0 = inlined_call_operand.vmem [shape: f32[8,1152], index: 0, kind: input, shape index: {}]   ;;  %s3533_s1 = inlined_call_operand.vmem [shape: bf16[4,1152,1152], index: 1, kind: input, shape index: {}]   ;;  %s3534_s2 = inlined_call_operand.vmem [shape: f32[4,1,1152], index: 2, kind: input, shape index: {}]   ;;  %s3535_s3 = inlined_call_operand.vmem [shape: f32[8,1152], index: 3, kind: output, shape index: {}]  }
   0x1   :  { %s3112_s14 = smov 0   ;;  %s3114_s15 = smov 0  }
   0x2   :  { %s3116_s16 = smov 0   ;;  %s3118_s17 = smov 0  }
   0x3   :  { %s3120_s18 = smov 0  }
   0x4 LB: > { %s25_s19 = sadd.s32 1, %s3069_s15  ;;  %s28_s20 = sadd.s32 1, %s3073_s16  ;;  %s3081_s18 = sphi %s3120_s18, %s13_s18   ;;  %s3077_s17 = sphi %s3118_s17, %s3544_s17   ;;  %s3073_s16 = sphi %s3116_s16, %s3543_s16   ;;  %s3069_s15 = sphi %s3114_s15, %s3542_s15   ;;  %s3065_s14 = sphi %s3112_s14, %s3541_s14   ;;  %s3061_s13 = sphi %s3110_s13, %s3540_s13   ;;  %s3057_s12 = sphi %s3108_s12, %s3539_s12  }
   0x5   : > { %p26_p0 = scmp.ge.s32.totalorder %s25_s19, 3  ;;  %p2373_p1 = scmp.ge.s32.totalorder %s3081_s18, 1 }
   0x6   : > { %p184_p2 = scmp.lt.s32.totalorder %s3081_s18, 13  ;;  %s32_s21 = sadd.s32 1, %s3077_s17 }
   0x7   : > { %s3546_s19 = smov (%p26_p0, %s25_s19), 0  ;;  %s3548_s20 = smov (!%p26_p0, %s28_s20), %s3073_s16 }
   0x8   : > { %p185_p3 = pnand %p2373_p1, %p184_p2  ;;  %p30_p4 = scmp.ge.s32.totalorder %s3548_s20, 2 }
   0x9   : > { %s2374_s22 = sshll.u32 (!%p185_p3), %s3065_s14, 1  ;;  %s218_s23 = smul.u32 (!%p185_p3), 48, %s3057_s12 }
   0xa   : > { %s3550_s20 = smov (%p30_p4, %s3548_s20), 0  ;;  %s3552_s21 = smov (!%p30_p4, %s32_s21), %s3077_s17 }
   0xb   : > { %p34_p5 = scmp.ge.s32.totalorder %s3552_s21, 2  ;;  %188 = sbr.rel (%p185_p3) target bundleno = 529 (0x211), region = 32 }
   0xc   : > { %s217_s24 = sadd.s32 (!%p185_p3), %s3061_s13, %s2374_s22  ;;  %p240_p6 = scmp.eq.s32.totalorder (!%p185_p3), %s3065_s14, 0 }
   0xd   : > { %s3554_s21 = smov (%p34_p5, %s3552_s21), 0  ;;  %p219_p7 = scmp.lt.s32.totalorder (!%p185_p3), %s217_s24, 3 }
   0xe   : > { %p221_p8 = scmp.lt.s32.totalorder (!%p185_p3), %s218_s23, 143  ;;  %p241_p9 = scmp.eq.s32.totalorder (!%p185_p3), %s3061_s13, 0 }
   0xf   : > { %p244_p11 = scmp.eq.s32.totalorder (!%p185_p3), %s3057_s12, 0 }
  0x10   : > { %s3556_s24 = smov (!%p219_p7, %s217_s24), 3  ;;  %s3558_s23 = smov (!%p221_p8, %s218_s23), 143 }
  0x11   : > { %s2652_s25 = smul.u32 1296, %s3556_s24  ;;  %p242_p10 = pnand %p241_p9, %p240_p6 }
  0x12   : > { %s2651_s26 = smul.u32 9, %s3558_s23 }
  0x13   : > { %s2653_s27 = smul.u32 9, %s3556_s24  ;;  %p243_p12 = pneg %p242_p10 }
  0x14   : > { %s225_s28 = sadd.s32 %s2652_s25, %s2651_s26 }
  0x15   : > { %s2375_s29 = sshll.u32 %s225_s28, 2  ;;  %s3167_s5 = scalar_lea.vmem %s3534_s2, %s2653_s27 }
  0x16   : > { %s3172_s8 = scalar_lea.vmem %s3533_s1, %s2375_s29  ;;  %p245_p13 = pnand %p244_p11, %p243_p12 }
  0x18   : > { %248 = sbr.rel (%p245_p13) target bundleno = 39 (0x27), region = 36 }
  0x1d   : > { %v249_v0 = vld [vmem:[%s3532_s0] sm:$0xff]  ;;  %v250_v1 = vld [vmem:[%s3532_s0 + $0x8] sm:$0xff]  ;;  %v251_v2 = vld [vmem:[%s3532_s0 + $0x10] sm:$0xff]  ;;  %v3083_v6 = vmov 0.0  }
  0x1e   : > { %258 = vst [vmem:[#allocation2] sm:$0xff] %v249_v0  ;;  %259 = vst [vmem:[#allocation2 + $0x8] sm:$0xff] %v250_v1  ;;  %v252_v3 = vld [vmem:[%s3532_s0 + $0x18] sm:$0xff]  ;;  %v253_v4 = vld [vmem:[%s3532_s0 + $0x20] sm:$0xff] }
  0x1f   : > { %260 = vst [vmem:[#allocation2 + $0x10] sm:$0xff] %v251_v2  ;;  %v254_v5 = vld [vmem:[%s3532_s0 + $0x28] sm:$0xff]  ;;  %267 = vst [vmem:[#allocation3] sm:$0xff] %v3083_v6  ;;  %v255_v7 = vld [vmem:[%s3532_s0 + $0x30] sm:$0xff] }
  0x20   : > { %268 = vst [vmem:[#allocation3 + $0x8] sm:$0xff] %v3083_v6  ;;  %269 = vst [vmem:[#allocation3 + $0x10] sm:$0xff] %v3083_v6  ;;  %v256_v8 = vld [vmem:[%s3532_s0 + $0x38] sm:$0xff]  ;;  %v257_v9 = vld [vmem:[%s3532_s0 + $0x40] sm:$0xff] }
  0x21   : > { %270 = vst [vmem:[#allocation3 + $0x18] sm:$0xff] %v3083_v6  ;;  %271 = vst [vmem:[#allocation3 + $0x20] sm:$0xff] %v3083_v6 }
  0x22   : > { %272 = vst [vmem:[#allocation3 + $0x28] sm:$0xff] %v3083_v6  ;;  %273 = vst [vmem:[#allocation3 + $0x30] sm:$0xff] %v3083_v6 }
  0x23   : > { %274 = vst [vmem:[#allocation3 + $0x38] sm:$0xff] %v3083_v6  ;;  %275 = vst [vmem:[#allocation3 + $0x40] sm:$0xff] %v3083_v6 }
  0x24   : > { %261 = vst [vmem:[#allocation2 + $0x18] sm:$0xff] %v252_v3  ;;  %262 = vst [vmem:[#allocation2 + $0x20] sm:$0xff] %v253_v4 }
  0x25   : > { %263 = vst [vmem:[#allocation2 + $0x28] sm:$0xff] %v254_v5  ;;  %264 = vst [vmem:[#allocation2 + $0x30] sm:$0xff] %v255_v7 }
  0x26   : > { %265 = vst [vmem:[#allocation2 + $0x38] sm:$0xff] %v256_v8  ;;  %266 = vst [vmem:[#allocation2 + $0x40] sm:$0xff] %v257_v9 }
  0x27 PF: > { %p2377_p0 = scmp.ne.s32.totalorder %s3057_s12, 0 }
  0x29   : > { %278 = sbr.rel (%p2377_p0) target bundleno = 52 (0x34), region = 40 }
  0x2e   : > { %v3084_v10 = vmov 0.0  }
  0x2f   : > { %279 = vst [vmem:[#allocation4 + $0x30] sm:$0xff] %v3084_v10  ;;  %280 = vst [vmem:[#allocation4] sm:$0xff] %v3084_v10 }
  0x30   : > { %281 = vst [vmem:[#allocation4 + $0x18] sm:$0xff] %v3084_v10  ;;  %282 = vst [vmem:[#allocation4 + $0x10] sm:$0xff] %v3084_v10 }
  0x31   : > { %283 = vst [vmem:[#allocation4 + $0x20] sm:$0xff] %v3084_v10  ;;  %284 = vst [vmem:[#allocation4 + $0x28] sm:$0xff] %v3084_v10 }
  0x32   : > { %285 = vst [vmem:[#allocation4 + $0x40] sm:$0xff] %v3084_v10  ;;  %286 = vst [vmem:[#allocation4 + $0x38] sm:$0xff] %v3084_v10 }
  0x33   : > { %287 = vst [vmem:[#allocation4 + $0x8] sm:$0xff] %v3084_v10 }
  0x34 PF: > { %v2715_v11 = vld [vmem:[%s3172_s8 + $0x1fc] ss:$36 sps:$4 sm:$0xff]   ;;  %v3085_v13 = vmov 0   ;;  %v2721_v16 = vld [vmem:[%s3172_s8 + $0x1b4] ss:$36 sps:$4 sm:$0xff]   ;;  %s288_s11 = smul.u32 384, %s3057_s12 }
  0x35   : > { %v2717_v12 = vld [vmem:[%s3172_s8 + $0x67c] ss:$36 sps:$4 sm:$0xff]   ;;  %1736 = vmatprep.mubr.bf16.mxu1 %v3085_v13  ;;  %1663 = vmatprep.subr.bf16.mxu0 %v2715_v11  ;;  %v2723_v17 = vld [vmem:[%s3172_s8 + $0x634] ss:$36 sps:$4 sm:$0xff]   ;;  %v2727_v20 = vld [vmem:[%s3172_s8 + $0x16c] ss:$36 sps:$4 sm:$0xff]  }
  0x36   : > { %v2719_v14 = vld [vmem:[%s3172_s8 + $0x1f8] ss:$36 sps:$4 sm:$0xff]   ;;  %1704 = vmatprep.subr.bf16.mxu1 %v2717_v12  ;;  %v2725_v18 = vld [vmem:[%s3172_s8 + $0x1b0] ss:$36 sps:$4 sm:$0xff]   ;;  %v2731_v22 = vld [vmem:[%s3172_s8 + $0x168] ss:$36 sps:$4 sm:$0xff]  }
  0x37   : > { %v2720_v15 = vld [vmem:[%s3172_s8 + $0x678] ss:$36 sps:$4 sm:$0xff]   ;;  %1664 = vmatpush1.bf16.msra.mxu0 %v2719_v14  ;;  %v2726_v19 = vld [vmem:[%s3172_s8 + $0x630] ss:$36 sps:$4 sm:$0xff]   ;;  %v2732_v23 = vld [vmem:[%s3172_s8 + $0x5e8] ss:$36 sps:$4 sm:$0xff]  }
  0x38   : > { %1705 = vmatpush1.bf16.msra.mxu1 %v2720_v15  ;;  %1665 = vmatprep.subr.bf16.mxu0 %v2721_v16  ;;  %v2729_v21 = vld [vmem:[%s3172_s8 + $0x5ec] ss:$36 sps:$4 sm:$0xff]   ;;  %v2733_v24 = vld [vmem:[%s3172_s8 + $0x124] ss:$36 sps:$4 sm:$0xff]   ;;  %v2739_v28 = vld [vmem:[%s3172_s8 + $0xdc] ss:$36 sps:$4 sm:$0xff]  }
  0x39   : > { %1706 = vmatprep.subr.bf16.mxu1 %v2723_v17  ;;  %v2735_v25 = vld [vmem:[%s3172_s8 + $0x5a4] ss:$36 sps:$4 sm:$0xff]   ;;  %v2741_v29 = vld [vmem:[%s3172_s8 + $0x55c] ss:$36 sps:$4 sm:$0xff]   ;;  %s289_s14 = sshra.s32 %s288_s11, 7  ;;  %vm3087_vm1 = vmmov 0  }
  0x3a   : > { %v2737_v26 = vld [vmem:[%s3172_s8 + $0x120] ss:$36 sps:$4 sm:$0xff]   ;;  %v2743_v30 = vld [vmem:[%s3172_s8 + $0xd8] ss:$36 sps:$4 sm:$0xff]   ;;  %s301_s22 = scalar_select %p241_p9, 1, 0 }
  0x3b   : > { %1666 = vmatpush1.bf16.msra.mxu0 %v2725_v18  ;;  %v2738_v27 = vld [vmem:[%s3172_s8 + $0x5a0] ss:$36 sps:$4 sm:$0xff]   ;;  %v2744_v31 = vld [vmem:[%s3172_s8 + $0x558] ss:$36 sps:$4 sm:$0xff]   ;;  %s2378_s23 = sshll.u32 %s289_s14, 3  ;;  %p2089_p1 = scmp.eq.s32.totalorder %s3057_s12, 2 }
  0x3c   : > { %1707 = vmatpush1.bf16.msra.mxu1 %v2726_v19  ;;  %1667 = vmatprep.subr.bf16.mxu0 %v2727_v20  ;;  %v2745_v32 = vld [vmem:[%s3172_s8 + $0x94] ss:$36 sps:$4 sm:$0xff]   ;;  %v2751_v36 = vld [vmem:[%s3172_s8 + $0x4c] ss:$36 sps:$4 sm:$0xff]   ;;  %v302_v40 = vstv %s301_s22  ;;  %v2757_v41 = vld [vmem:[%s3172_s8 + $0x4] ss:$36 sps:$4 sm:$0xff]  }
  0x3d   : > { %1708 = vmatprep.subr.bf16.mxu1 %v2729_v21  ;;  %v2747_v33 = vld [vmem:[%s3172_s8 + $0x514] ss:$36 sps:$4 sm:$0xff]   ;;  %v2753_v37 = vld [vmem:[%s3172_s8 + $0x4cc] ss:$36 sps:$4 sm:$0xff]   ;;  %v2759_v42 = vld [vmem:[%s3172_s8 + $0x484] ss:$36 sps:$4 sm:$0xff]   ;;  %p3471_p2 = pnand %p2089_p1, %p241_p9 }
  0x3e   : > { %v2749_v34 = vld [vmem:[%s3172_s8 + $0x90] ss:$36 sps:$4 sm:$0xff]   ;;  %v2755_v38 = vld [vmem:[%s3172_s8 + $0x48] ss:$36 sps:$4 sm:$0xff]   ;;  %s3236_s24 = scalar_lea.vmem [#allocation2], %s2378_s23  ;;  %s3239_s25 = scalar_lea.vmem [#allocation3], %s2378_s23 }
  0x3f   : > { %1668 = vmatpush1.bf16.msra.mxu0 %v2731_v22  ;;  %v2750_v35 = vld [vmem:[%s3172_s8 + $0x510] ss:$36 sps:$4 sm:$0xff]   ;;  %v2756_v39 = vld [vmem:[%s3172_s8 + $0x4c8] ss:$36 sps:$4 sm:$0xff]   ;;  %vm3242_vm0 = vcmp.eq.s32.totalorder %v302_v40, 1  ;;  %v293_v21 = vld [vmem:[%s3236_s24] sm:$0xff] }
  0x40   : > { %1709 = vmatpush1.bf16.msra.mxu1 %v2732_v23  ;;  %1669 = vmatprep.subr.bf16.mxu0 %v2733_v24  ;;  %v295_v43 = vld [vmem:[%s3236_s24 + $0x10] sm:$0xff]  ;;  %v2761_v46 = vld [vmem:[%s3172_s8] ss:$36 sps:$4 sm:$0xff]   ;;  %v2768_v53 = vld [vmem:[%s3172_s8 + $0x438] ss:$36 sps:$4 sm:$0xff]  }
  0x41   : > { %1710 = vmatprep.subr.bf16.mxu1 %v2735_v25  ;;  %v300_v44 = vld [vmem:[%s3239_s25 + $0x10] sm:$0xff]  ;;  %v2762_v47 = vld [vmem:[%s3172_s8 + $0x480] ss:$36 sps:$4 sm:$0xff]   ;;  %v2771_v56 = vld [vmem:[%s3172_s8 + $0x1b8] ss:$36 sps:$4 sm:$0xff]  }
  0x42   : > { %v306_v48 = vsel %vm3242_vm0, %v295_v43, %v300_v44  ;;  %v2763_v49 = vld [vmem:[%s3172_s8 + $0x43c] ss:$36 sps:$4 sm:$0xff]   ;;  %v2767_v50 = vld [vmem:[%s3172_s8 + $0x204] ss:$36 sps:$4 sm:$0xff]   ;;  %v2769_v54 = vld [vmem:[%s3172_s8 + $0x3f4] ss:$36 sps:$4 sm:$0xff]  }
  0x43   : > { %1670 = vmatpush1.bf16.msra.mxu0 %v2737_v26  ;;  %v3252_v51 = vpack.c.bf16 %v306_v48, %v306_v48  ;;  %v2765_v52 = vld [vmem:[%s3172_s8 + $0x200] ss:$36 sps:$4 sm:$0xff]   ;;  %v2774_v57 = vld [vmem:[%s3172_s8 + $0x3f0] ss:$36 sps:$4 sm:$0xff]   ;;  %v2780_v61 = vld [vmem:[%s3172_s8 + $0x3a8] ss:$36 sps:$4 sm:$0xff]  }
  0x44   : > { %1711 = vmatpush1.bf16.msra.mxu1 %v2738_v27  ;;  %1671 = vmatprep.subr.bf16.mxu0 %v2739_v28  ;;  %v2773_v55 = vld [vmem:[%s3172_s8 + $0x1bc] ss:$36 sps:$4 sm:$0xff]   ;;  %v2775_v58 = vld [vmem:[%s3172_s8 + $0x3ac] ss:$36 sps:$4 sm:$0xff]   ;;  %v2779_v59 = vld [vmem:[%s3172_s8 + $0x174] ss:$36 sps:$4 sm:$0xff]  }
  0x45   : > { %1712 = vmatprep.subr.bf16.mxu1 %v2741_v29  ;;  %v2777_v60 = vld [vmem:[%s3172_s8 + $0x170] ss:$36 sps:$4 sm:$0xff]   ;;  %v2781_v62 = vld [vmem:[%s3172_s8 + $0x364] ss:$36 sps:$4 sm:$0xff]   ;;  %v2787_v5 = vld [vmem:[%s3172_s8 + $0x31c] ss:$36 sps:$4 sm:$0xff]  }
  0x46   : > { %v2785_v63 = vld [vmem:[%s3172_s8 + $0x12c] ss:$36 sps:$4 sm:$0xff]   ;;  %v2786_v3 = vld [vmem:[%s3172_s8 + $0x360] ss:$36 sps:$4 sm:$0xff]   ;;  %v2792_v9 = vld [vmem:[%s3172_s8 + $0x318] ss:$36 sps:$4 sm:$0xff]  }
  0x47   : > { %1672 = vmatpush1.bf16.msra.mxu0 %v2743_v30  ;;  %v294_v0 = vld [vmem:[%s3236_s24 + $0x8] sm:$0xff]  ;;  %v2789_v8 = vld [vmem:[%s3172_s8 + $0xe0] ss:$36 sps:$4 sm:$0xff]   ;;  %v2793_v10 = vld [vmem:[%s3172_s8 + $0x2d4] ss:$36 sps:$4 sm:$0xff]  }
  0x48   : > { %1713 = vmatpush1.bf16.msra.mxu1 %v2744_v31  ;;  %1673 = vmatprep.subr.bf16.mxu0 %v2745_v32  ;;  %v299_v1 = vld [vmem:[%s3239_s25 + $0x8] sm:$0xff]  ;;  %v2797_v11 = vld [vmem:[%s3172_s8 + $0x9c] ss:$36 sps:$4 sm:$0xff]   ;;  %v2798_v14 = vld [vmem:[%s3172_s8 + $0x2d0] ss:$36 sps:$4 sm:$0xff]  }
  0x49   : > { %1714 = vmatprep.subr.bf16.mxu1 %v2747_v33  ;;  %v2783_v2 = vld [vmem:[%s3172_s8 + $0x128] ss:$36 sps:$4 sm:$0xff]   ;;  %v305_v4 = vsel %vm3242_vm0, %v294_v0, %v299_v1  ;;  %v2795_v12 = vld [vmem:[%s3172_s8 + $0x98] ss:$36 sps:$4 sm:$0xff]   ;;  %v2801_v17 = vld [vmem:[%s3172_s8 + $0x50] ss:$36 sps:$4 sm:$0xff]  }
  0x4a   : > { %v2791_v6 = vld [vmem:[%s3172_s8 + $0xe4] ss:$36 sps:$4 sm:$0xff]   ;;  %v3275_v7 = vpack.c.bf16 %v305_v4, %v305_v4  ;;  %v2799_v15 = vld [vmem:[%s3172_s8 + $0x28c] ss:$36 sps:$4 sm:$0xff]   ;;  %v2803_v16 = vld [vmem:[%s3172_s8 + $0x54] ss:$36 sps:$4 sm:$0xff]  }
  0x4b   : > { %1674 = vmatpush1.bf16.msra.mxu0 %v2749_v34  ;;  %v2804_v18 = vld [vmem:[%s3172_s8 + $0x288] ss:$36 sps:$4 sm:$0xff]   ;;  %v298_v22 = vld [vmem:[%s3239_s25] sm:$0xff]  ;;  %v2817_v33 = vld [vmem:[%s3172_s8 + $0x3f8] ss:$36 sps:$4 sm:$0xff]  }
  0x4c   : > { %1715 = vmatpush1.bf16.msra.mxu1 %v2750_v35  ;;  %1675 = vmatprep.subr.bf16.mxu0 %v2751_v36  ;;  %v2805_v19 = vld [vmem:[%s3172_s8 + $0x244] ss:$36 sps:$4 sm:$0xff]   ;;  %v2809_v20 = vld [vmem:[%s3172_s8 + $0xc] ss:$36 sps:$4 sm:$0xff]   ;;  %v304_v25 = vsel %vm3242_vm0, %v293_v21, %v298_v22  ;;  %v2819_v31 = vld [vmem:[%s3172_s8 + $0x3fc] ss:$36 sps:$4 sm:$0xff]  }
  0x4d   : > { %1716 = vmatprep.subr.bf16.mxu1 %v2753_v37  ;;  %1695 = vmatprep.mubr.bf16.mxu0 %v3275_v7  ;;  %v2807_v23 = vld [vmem:[%s3172_s8 + $0x8] ss:$36 sps:$4 sm:$0xff]   ;;  %v2810_v24 = vld [vmem:[%s3172_s8 + $0x240] ss:$36 sps:$4 sm:$0xff]   ;;  %v3299_v28 = vpack.c.bf16 %v304_v25, %v304_v25  ;;  %v2820_v34 = vld [vmem:[%s3172_s8 + $0x638] ss:$36 sps:$4 sm:$0xff]  }
  0x4e   : > { %v2813_v26 = vld [vmem:[%s3172_s8 + $0x444] ss:$36 sps:$4 sm:$0xff]   ;;  %v2822_v32 = vld [vmem:[%s3172_s8 + $0x63c] ss:$36 sps:$4 sm:$0xff]   ;;  %v2825_v35 = vld [vmem:[%s3172_s8 + $0x3b4] ss:$36 sps:$4 sm:$0xff]  }
  0x4f   : > { %1676 = vmatpush1.bf16.msra.mxu0 %v2755_v38  ;;  %v2816_v27 = vld [vmem:[%s3172_s8 + $0x684] ss:$36 sps:$4 sm:$0xff]   ;;  %v2828_v36 = vld [vmem:[%s3172_s8 + $0x5f4] ss:$36 sps:$4 sm:$0xff]   ;;  %v2834_v40 = vld [vmem:[%s3172_s8 + $0x5ac] ss:$36 sps:$4 sm:$0xff]  }
  0x50   : > { %1717 = vmatpush1.bf16.msra.mxu1 %v2756_v39  ;;  %1677 = vmatprep.subr.bf16.mxu0 %v2757_v41  ;;  %v2811_v29 = vld [vmem:[%s3172_s8 + $0x440] ss:$36 sps:$4 sm:$0xff]   ;;  %v2823_v37 = vld [vmem:[%s3172_s8 + $0x3b0] ss:$36 sps:$4 sm:$0xff]   ;;  %v2829_v41 = vld [vmem:[%s3172_s8 + $0x368] ss:$36 sps:$4 sm:$0xff]  }
  0x51   : > { %1718 = vmatprep.subr.bf16.mxu1 %v2759_v42  ;;  %v2814_v30 = vld [vmem:[%s3172_s8 + $0x680] ss:$36 sps:$4 sm:$0xff]   ;;  %v2826_v38 = vld [vmem:[%s3172_s8 + $0x5f0] ss:$36 sps:$4 sm:$0xff]   ;;  %v2832_v42 = vld [vmem:[%s3172_s8 + $0x5a8] ss:$36 sps:$4 sm:$0xff]  }
  0x52   : > { %v2831_v39 = vld [vmem:[%s3172_s8 + $0x36c] ss:$36 sps:$4 sm:$0xff]   ;;  %v2837_v43 = vld [vmem:[%s3172_s8 + $0x324] ss:$36 sps:$4 sm:$0xff]   ;;  %v2846_v48 = vld [vmem:[%s3172_s8 + $0x51c] ss:$36 sps:$4 sm:$0xff]  }
  0x53   : > { %1678 = vmatpush1.bf16.msra.mxu0 %v2761_v46  ;;  %v2840_v44 = vld [vmem:[%s3172_s8 + $0x564] ss:$36 sps:$4 sm:$0xff]   ;;  %v2873_v4 = vld [vmem:[%s3172_s8 + $0x17c] ss:$36 sps:$4 sm:$0xff]  }
  0x54   : > { %1719 = vmatpush1.bf16.msra.mxu1 %v2762_v47  ;;  %1679 = vmatprep.subr.bf16.mxu0 %v2763_v49  ;;  %v2835_v45 = vld [vmem:[%s3172_s8 + $0x320] ss:$36 sps:$4 sm:$0xff]   ;;  %v2841_v49 = vld [vmem:[%s3172_s8 + $0x2d8] ss:$36 sps:$4 sm:$0xff]  }
  0x55   : > { %1745 = vmatprep.subr.bf16.mxu1 %v2767_v50  ;;  %v2838_v46 = vld [vmem:[%s3172_s8 + $0x560] ss:$36 sps:$4 sm:$0xff]   ;;  %v2844_v50 = vld [vmem:[%s3172_s8 + $0x518] ss:$36 sps:$4 sm:$0xff]  }
  0x56   : > { %v2843_v47 = vld [vmem:[%s3172_s8 + $0x2dc] ss:$36 sps:$4 sm:$0xff]   ;;  %v2867_v0 = vld [vmem:[%s3172_s8 + $0x1c4] ss:$36 sps:$4 sm:$0xff]  }
  0x57   : > { %1737 = vmatmul.mubr.bf16.vlgmr.msra.gmra.mxu1 %v3252_v51  ;;  %1680 = vmatpush2.bf16.msra.mxu0 %v2768_v53  ;;  %v2852_v53 = vld [vmem:[%s3172_s8 + $0x4d4] ss:$36 sps:$4 sm:$0xff]   ;;  %v2870_v1 = vld [vmem:[%s3172_s8 + $0x644] ss:$36 sps:$4 sm:$0xff]   ;;  %v2897_v22 = vld [vmem:[%s3172_s8 + $0x5c] ss:$36 sps:$4 sm:$0xff]  }
  0x58   : > { %1746 = vmatpush1.bf16.msra.mxu1 %v2765_v52  ;;  %1681 = vmatprep.subr.bf16.mxu0 %v2769_v54  ;;  %v2849_v52 = vld [vmem:[%s3172_s8 + $0x294] ss:$36 sps:$4 sm:$0xff]   ;;  %v2892_v21 = vld [vmem:[%s3172_s8 + $0x520] ss:$36 sps:$4 sm:$0xff]  }
  0x59   : > { %1747 = vmatprep.subr.bf16.mxu1 %v2773_v55  ;;  %1777 = vmatprep.mubr.bf16.mxu1 %v3275_v7  ;;  %v2847_v54 = vld [vmem:[%s3172_s8 + $0x290] ss:$36 sps:$4 sm:$0xff]   ;;  %v2898_v25 = vld [vmem:[%s3172_s8 + $0x4d8] ss:$36 sps:$4 sm:$0xff]  }
  0x5a   : > { %v2850_v55 = vld [vmem:[%s3172_s8 + $0x4d0] ss:$36 sps:$4 sm:$0xff]  }
  0x5b   : > { %1682 = vmatpush2.bf16.msra.mxu0 %v2774_v57  ;;  %v2858_v57 = vld [vmem:[%s3172_s8 + $0x48c] ss:$36 sps:$4 sm:$0xff]  }
  0x5c   : > { %1748 = vmatpush1.bf16.msra.mxu1 %v2771_v56  ;;  %1683 = vmatprep.subr.bf16.mxu0 %v2775_v58  ;;  %v2855_v56 = vld [vmem:[%s3172_s8 + $0x24c] ss:$36 sps:$4 sm:$0xff]  }
  0x5d   : > { %1749 = vmatprep.subr.bf16.mxu1 %v2779_v59  ;;  %v2853_v58 = vld [vmem:[%s3172_s8 + $0x248] ss:$36 sps:$4 sm:$0xff]  }
  0x5e   : > { %v2856_v59 = vld [vmem:[%s3172_s8 + $0x488] ss:$36 sps:$4 sm:$0xff]  }
  0x5f   : > { %1684 = vmatpush2.bf16.msra.mxu0 %v2780_v61  ;;  %v2864_v61 = vld [vmem:[%s3172_s8 + $0x68c] ss:$36 sps:$4 sm:$0xff]  }
  0x60   : > { %1750 = vmatpush1.bf16.msra.mxu1 %v2777_v60  ;;  %1685 = vmatprep.subr.bf16.mxu0 %v2781_v62  ;;  %v2861_v60 = vld [vmem:[%s3172_s8 + $0x20c] ss:$36 sps:$4 sm:$0xff]  }
  0x61   : > { %1751 = vmatprep.subr.bf16.mxu1 %v2785_v63  ;;  %v2859_v62 = vld [vmem:[%s3172_s8 + $0x208] ss:$36 sps:$4 sm:$0xff]  }
  0x62   : > { %v2862_v63 = vld [vmem:[%s3172_s8 + $0x688] ss:$36 sps:$4 sm:$0xff]  }
  0x63   : > { %1686 = vmatpush2.bf16.msra.mxu0 %v2786_v3  ;;  %v2868_v3 = vld [vmem:[%s3172_s8 + $0x640] ss:$36 sps:$4 sm:$0xff]  }
  0x64   : > { %1752 = vmatpush1.bf16.msra.mxu1 %v2783_v2  ;;  %1687 = vmatprep.subr.bf16.mxu0 %v2787_v5  ;;  %v2865_v2 = vld [vmem:[%s3172_s8 + $0x1c0] ss:$36 sps:$4 sm:$0xff]  }
  0x65   : > { %1753 = vmatprep.subr.bf16.mxu1 %v2791_v6  ;;  %v2876_v5 = vld [vmem:[%s3172_s8 + $0x5fc] ss:$36 sps:$4 sm:$0xff]  }
  0x66   : > { %v2871_v6 = vld [vmem:[%s3172_s8 + $0x178] ss:$36 sps:$4 sm:$0xff]  }
  0x67   : > { %1688 = vmatpush2.bf16.msra.mxu0 %v2792_v9  ;;  %v2879_v9 = vld [vmem:[%s3172_s8 + $0x134] ss:$36 sps:$4 sm:$0xff]  }
  0x68   : > { %1754 = vmatpush1.bf16.msra.mxu1 %v2789_v8  ;;  %1689 = vmatprep.subr.bf16.mxu0 %v2793_v10  ;;  %v2874_v8 = vld [vmem:[%s3172_s8 + $0x5f8] ss:$36 sps:$4 sm:$0xff]  }
  0x69   : > { %1755 = vmatprep.subr.bf16.mxu1 %v2797_v11  ;;  %v2882_v10 = vld [vmem:[%s3172_s8 + $0x5b4] ss:$36 sps:$4 sm:$0xff]  }
  0x6a   : > { %v2877_v11 = vld [vmem:[%s3172_s8 + $0x130] ss:$36 sps:$4 sm:$0xff]  }
  0x6b   : > { %1690 = vmatpush2.bf16.msra.mxu0 %v2798_v14  ;;  %v2885_v14 = vld [vmem:[%s3172_s8 + $0xec] ss:$36 sps:$4 sm:$0xff]  }
  0x6c   : > { %1756 = vmatpush1.bf16.msra.mxu1 %v2795_v12  ;;  %1691 = vmatprep.subr.bf16.mxu0 %v2799_v15  ;;  %v2880_v12 = vld [vmem:[%s3172_s8 + $0x5b0] ss:$36 sps:$4 sm:$0xff]  }
  0x6d   : > { %1757 = vmatprep.subr.bf16.mxu1 %v2803_v16  ;;  %v2888_v15 = vld [vmem:[%s3172_s8 + $0x56c] ss:$36 sps:$4 sm:$0xff]  }
  0x6e   : > { %v2883_v16 = vld [vmem:[%s3172_s8 + $0xe8] ss:$36 sps:$4 sm:$0xff]  }
  0x6f   : > { %1692 = vmatpush2.bf16.msra.mxu0 %v2804_v18  ;;  %v2891_v18 = vld [vmem:[%s3172_s8 + $0xa4] ss:$36 sps:$4 sm:$0xff]  }
  0x70   : > { %1758 = vmatpush1.bf16.msra.mxu1 %v2801_v17  ;;  %1693 = vmatprep.subr.bf16.mxu0 %v2805_v19  ;;  %v2886_v17 = vld [vmem:[%s3172_s8 + $0x568] ss:$36 sps:$4 sm:$0xff]  }
  0x71   : > { %1759 = vmatprep.subr.bf16.mxu1 %v2809_v20  ;;  %v2894_v19 = vld [vmem:[%s3172_s8 + $0x524] ss:$36 sps:$4 sm:$0xff]  }
  0x72   : > { %v2889_v20 = vld [vmem:[%s3172_s8 + $0xa0] ss:$36 sps:$4 sm:$0xff]  }
  0x73   : > { %1694 = vmatpush2.bf16.msra.mxu0 %v2810_v24  ;;  %v2895_v24 = vld [vmem:[%s3172_s8 + $0x58] ss:$36 sps:$4 sm:$0xff]  }
  0x74   : > { %1760 = vmatpush1.bf16.msra.mxu1 %v2807_v23  ;;  %1786 = vmatprep.subr.bf16.mxu0 %v2816_v27  ;;  %v2900_v23 = vld [vmem:[%s3172_s8 + $0x4dc] ss:$36 sps:$4 sm:$0xff]   ;;  %v2906_v27 = vld [vmem:[%s3172_s8 + $0x494] ss:$36 sps:$4 sm:$0xff]  }
  0x75   : > { %1761 = vmatprep.subr.bf16.mxu1 %v2813_v26  ;;  %v2903_v26 = vld [vmem:[%s3172_s8 + $0x14] ss:$36 sps:$4 sm:$0xff]  }
  0x76   : > { %1696 = vmatmul.mubr.bf16.vlgmr.msra.gmra.mxu0 %v3299_v28 }
  0x77   : > { %1787 = vmatpush1.bf16.msra.mxu0 %v2814_v30  ;;  %1818 = vmatprep.mubr.bf16.mxu0 %v3085_v13  ;;  %v2904_v30 = vld [vmem:[%s3172_s8 + $0x490] ss:$36 sps:$4 sm:$0xff]  }
  0x78   : > { %1762 = vmatpush2.bf16.msra.mxu1 %v2811_v29  ;;  %1788 = vmatprep.subr.bf16.mxu0 %v2822_v32  ;;  %v2901_v29 = vld [vmem:[%s3172_s8 + $0x10] ss:$36 sps:$4 sm:$0xff]  }
  0x79   : > { %1763 = vmatprep.subr.bf16.mxu1 %v2819_v31  ;;  %v2909_v31 = vld [vmem:[%s3172_s8 + $0x44c] ss:$36 sps:$4 sm:$0xff]   ;;  %v2912_v32 = vld [vmem:[%s3172_s8 + $0x214] ss:$36 sps:$4 sm:$0xff]  }
  0x7b   : > { %1789 = vmatpush1.bf16.msra.mxu0 %v2820_v34  ;;  %v2910_v34 = vld [vmem:[%s3172_s8 + $0x210] ss:$36 sps:$4 sm:$0xff]  }
  0x7c   : > { %1764 = vmatpush2.bf16.msra.mxu1 %v2817_v33  ;;  %1790 = vmatprep.subr.bf16.mxu0 %v2828_v36  ;;  %v2907_v33 = vld [vmem:[%s3172_s8 + $0x448] ss:$36 sps:$4 sm:$0xff]  }
  0x7d   : > { %1765 = vmatprep.subr.bf16.mxu1 %v2825_v35  ;;  %v2915_v35 = vld [vmem:[%s3172_s8 + $0x404] ss:$36 sps:$4 sm:$0xff]   ;;  %v2918_v36 = vld [vmem:[%s3172_s8 + $0x1cc] ss:$36 sps:$4 sm:$0xff]  }
  0x7f   : > { %1791 = vmatpush1.bf16.msra.mxu0 %v2826_v38  ;;  %v2916_v38 = vld [vmem:[%s3172_s8 + $0x1c8] ss:$36 sps:$4 sm:$0xff]  }
  0x80   : > { %1766 = vmatpush2.bf16.msra.mxu1 %v2823_v37  ;;  %1792 = vmatprep.subr.bf16.mxu0 %v2834_v40  ;;  %v2913_v37 = vld [vmem:[%s3172_s8 + $0x400] ss:$36 sps:$4 sm:$0xff]  }
  0x81   : > { %1767 = vmatprep.subr.bf16.mxu1 %v2831_v39  ;;  %v2921_v39 = vld [vmem:[%s3172_s8 + $0x3bc] ss:$36 sps:$4 sm:$0xff]   ;;  %v2924_v40 = vld [vmem:[%s3172_s8 + $0x184] ss:$36 sps:$4 sm:$0xff]  }
  0x83   : > { %1793 = vmatpush1.bf16.msra.mxu0 %v2832_v42  ;;  %v2922_v42 = vld [vmem:[%s3172_s8 + $0x180] ss:$36 sps:$4 sm:$0xff]  }
  0x84   : > { %1768 = vmatpush2.bf16.msra.mxu1 %v2829_v41  ;;  %1794 = vmatprep.subr.bf16.mxu0 %v2840_v44  ;;  %v2919_v41 = vld [vmem:[%s3172_s8 + $0x3b8] ss:$36 sps:$4 sm:$0xff]  }
  0x85   : > { %1769 = vmatprep.subr.bf16.mxu1 %v2837_v43  ;;  %v2927_v43 = vld [vmem:[%s3172_s8 + $0x374] ss:$36 sps:$4 sm:$0xff]   ;;  %v2930_v44 = vld [vmem:[%s3172_s8 + $0x13c] ss:$36 sps:$4 sm:$0xff]  }
  0x87   : > { %1795 = vmatpush1.bf16.msra.mxu0 %v2838_v46  ;;  %v2928_v46 = vld [vmem:[%s3172_s8 + $0x138] ss:$36 sps:$4 sm:$0xff]  }
  0x88   : > { %1770 = vmatpush2.bf16.msra.mxu1 %v2835_v45  ;;  %1796 = vmatprep.subr.bf16.mxu0 %v2846_v48  ;;  %v2925_v45 = vld [vmem:[%s3172_s8 + $0x370] ss:$36 sps:$4 sm:$0xff]  }
  0x89   : > { %1771 = vmatprep.subr.bf16.mxu1 %v2843_v47  ;;  %v2933_v47 = vld [vmem:[%s3172_s8 + $0x32c] ss:$36 sps:$4 sm:$0xff]   ;;  %v2936_v48 = vld [vmem:[%s3172_s8 + $0xf4] ss:$36 sps:$4 sm:$0xff]  }
  0x8b   : > { %1797 = vmatpush1.bf16.msra.mxu0 %v2844_v50  ;;  %v2934_v50 = vld [vmem:[%s3172_s8 + $0xf0] ss:$36 sps:$4 sm:$0xff]  }
  0x8c   : > { %1772 = vmatpush2.bf16.msra.mxu1 %v2841_v49  ;;  %1798 = vmatprep.subr.bf16.mxu0 %v2852_v53  ;;  %v2931_v49 = vld [vmem:[%s3172_s8 + $0x328] ss:$36 sps:$4 sm:$0xff]  }
  0x8d   : > { %1773 = vmatprep.subr.bf16.mxu1 %v2849_v52  ;;  %v2939_v52 = vld [vmem:[%s3172_s8 + $0x2e4] ss:$36 sps:$4 sm:$0xff]   ;;  %v2942_v53 = vld [vmem:[%s3172_s8 + $0xac] ss:$36 sps:$4 sm:$0xff]  }
  0x8f   : > { %1799 = vmatpush1.bf16.msra.mxu0 %v2850_v55  ;;  %v2940_v55 = vld [vmem:[%s3172_s8 + $0xa8] ss:$36 sps:$4 sm:$0xff]  }
  0x90   : > { %1774 = vmatpush2.bf16.msra.mxu1 %v2847_v54  ;;  %1800 = vmatprep.subr.bf16.mxu0 %v2858_v57  ;;  %v2937_v54 = vld [vmem:[%s3172_s8 + $0x2e0] ss:$36 sps:$4 sm:$0xff]  }
  0x91   : > { %1775 = vmatprep.subr.bf16.mxu1 %v2855_v56  ;;  %v2945_v56 = vld [vmem:[%s3172_s8 + $0x29c] ss:$36 sps:$4 sm:$0xff]   ;;  %v2948_v57 = vld [vmem:[%s3172_s8 + $0x64] ss:$36 sps:$4 sm:$0xff]  }
  0x93   : > { %1801 = vmatpush1.bf16.msra.mxu0 %v2856_v59  ;;  %v2946_v59 = vld [vmem:[%s3172_s8 + $0x60] ss:$36 sps:$4 sm:$0xff]  }
  0x94   : > { %1776 = vmatpush2.bf16.msra.mxu1 %v2853_v58  ;;  %1827 = vmatprep.subr.bf16.mxu0 %v2861_v60  ;;  %v2943_v58 = vld [vmem:[%s3172_s8 + $0x298] ss:$36 sps:$4 sm:$0xff]  }
  0x95   : > { %1868 = vmatprep.subr.bf16.mxu1 %v2864_v61  ;;  %v2951_v60 = vld [vmem:[%s3172_s8 + $0x254] ss:$36 sps:$4 sm:$0xff]   ;;  %v2954_v61 = vld [vmem:[%s3172_s8 + $0x1c] ss:$36 sps:$4 sm:$0xff]  }
  0x96   : > { %1819 = vmatmul.mubr.bf16.vlgmr.msra.gmra.mxu0 %v3252_v51 }
  0x97   : > { %1778 = vmatmul.mubr.bf16.vlgmr.msra.gmra.mxu1 %v3299_v28  ;;  %1828 = vmatpush1.bf16.msra.mxu0 %v2859_v62  ;;  %v2949_v62 = vld [vmem:[%s3172_s8 + $0x250] ss:$36 sps:$4 sm:$0xff]  }
  0x98   : > { %1869 = vmatpush1.bf16.msra.mxu1 %v2862_v63  ;;  %1829 = vmatprep.subr.bf16.mxu0 %v2867_v0  ;;  %v2952_v63 = vld [vmem:[%s3172_s8 + $0x18] ss:$36 sps:$4 sm:$0xff]  }
  0x99   : > { %1870 = vmatprep.subr.bf16.mxu1 %v2870_v1  ;;  %1900 = vmatprep.mubr.bf16.mxu1 %v3085_v13  ;;  %v2957_v0 = vld [vmem:[%s3172_s8 + $0x454] ss:$36 sps:$4 sm:$0xff]  }
  0x9a   : > { %1859 = vmatprep.mubr.bf16.mxu0 %v3275_v7  ;;  %v2960_v1 = vld [vmem:[%s3172_s8 + $0x694] ss:$36 sps:$4 sm:$0xff]  }
  0x9b   : > { %1830 = vmatpush1.bf16.msra.mxu0 %v2865_v2  ;;  %v2955_v2 = vld [vmem:[%s3172_s8 + $0x450] ss:$36 sps:$4 sm:$0xff]  }
  0x9c   : > { %1871 = vmatpush1.bf16.msra.mxu1 %v2868_v3  ;;  %1831 = vmatprep.subr.bf16.mxu0 %v2873_v4  ;;  %v2958_v3 = vld [vmem:[%s3172_s8 + $0x690] ss:$36 sps:$4 sm:$0xff]  }
  0x9d   : > { %1872 = vmatprep.subr.bf16.mxu1 %v2876_v5  ;;  %v2963_v4 = vld [vmem:[%s3172_s8 + $0x40c] ss:$36 sps:$4 sm:$0xff]  }
  0x9e   : > { %v2966_v5 = vld [vmem:[%s3172_s8 + $0x64c] ss:$36 sps:$4 sm:$0xff]  }
  0x9f   : > { %1832 = vmatpush1.bf16.msra.mxu0 %v2871_v6  ;;  %v2961_v6 = vld [vmem:[%s3172_s8 + $0x408] ss:$36 sps:$4 sm:$0xff]  }
  0xa0   : > { %1873 = vmatpush1.bf16.msra.mxu1 %v2874_v8  ;;  %1833 = vmatprep.subr.bf16.mxu0 %v2879_v9  ;;  %v2964_v8 = vld [vmem:[%s3172_s8 + $0x648] ss:$36 sps:$4 sm:$0xff]  }
  0xa1   : > { %1874 = vmatprep.subr.bf16.mxu1 %v2882_v10  ;;  %v2969_v9 = vld [vmem:[%s3172_s8 + $0x3c4] ss:$36 sps:$4 sm:$0xff]  }
  0xa2   : > { %v2972_v10 = vld [vmem:[%s3172_s8 + $0x604] ss:$36 sps:$4 sm:$0xff]  }
  0xa3   : > { %1834 = vmatpush1.bf16.msra.mxu0 %v2877_v11  ;;  %v2967_v11 = vld [vmem:[%s3172_s8 + $0x3c0] ss:$36 sps:$4 sm:$0xff]  }
  0xa4   : > { %1875 = vmatpush1.bf16.msra.mxu1 %v2880_v12  ;;  %1835 = vmatprep.subr.bf16.mxu0 %v2885_v14  ;;  %v2970_v12 = vld [vmem:[%s3172_s8 + $0x600] ss:$36 sps:$4 sm:$0xff]  }
  0xa5   : > { %1876 = vmatprep.subr.bf16.mxu1 %v2888_v15  ;;  %v2975_v14 = vld [vmem:[%s3172_s8 + $0x37c] ss:$36 sps:$4 sm:$0xff]  }
  0xa6   : > { %v2978_v15 = vld [vmem:[%s3172_s8 + $0x5bc] ss:$36 sps:$4 sm:$0xff]  }
  0xa7   : > { %1836 = vmatpush1.bf16.msra.mxu0 %v2883_v16  ;;  %v2973_v16 = vld [vmem:[%s3172_s8 + $0x378] ss:$36 sps:$4 sm:$0xff]  }
  0xa8   : > { %1877 = vmatpush1.bf16.msra.mxu1 %v2886_v17  ;;  %1837 = vmatprep.subr.bf16.mxu0 %v2891_v18  ;;  %v2976_v17 = vld [vmem:[%s3172_s8 + $0x5b8] ss:$36 sps:$4 sm:$0xff]  }
  0xa9   : > { %1878 = vmatprep.subr.bf16.mxu1 %v2894_v19  ;;  %v2984_v18 = vld [vmem:[%s3172_s8 + $0x574] ss:$36 sps:$4 sm:$0xff]  }
  0xaa   : > { %v2979_v19 = vld [vmem:[%s3172_s8 + $0x330] ss:$36 sps:$4 sm:$0xff]  }
  0xab   : > { %1838 = vmatpush1.bf16.msra.mxu0 %v2889_v20  ;;  %v2982_v20 = vld [vmem:[%s3172_s8 + $0x570] ss:$36 sps:$4 sm:$0xff]  }
  0xac   : > { %1879 = vmatpush1.bf16.msra.mxu1 %v2892_v21  ;;  %1839 = vmatprep.subr.bf16.mxu0 %v2897_v22  ;;  %v2987_v21 = vld [vmem:[%s3172_s8 + $0x2ec] ss:$36 sps:$4 sm:$0xff]  }
  0xad   : > { %1880 = vmatprep.subr.bf16.mxu1 %v2900_v23  ;;  %v2990_v22 = vld [vmem:[%s3172_s8 + $0x52c] ss:$36 sps:$4 sm:$0xff]  }
  0xae   : > { %v2985_v23 = vld [vmem:[%s3172_s8 + $0x2e8] ss:$36 sps:$4 sm:$0xff]  }
  0xaf   : > { %1840 = vmatpush1.bf16.msra.mxu0 %v2895_v24  ;;  %v2988_v24 = vld [vmem:[%s3172_s8 + $0x528] ss:$36 sps:$4 sm:$0xff]  }
  0xb0   : > { %1881 = vmatpush1.bf16.msra.mxu1 %v2898_v25  ;;  %1841 = vmatprep.subr.bf16.mxu0 %v2903_v26  ;;  %v2993_v25 = vld [vmem:[%s3172_s8 + $0x2a4] ss:$36 sps:$4 sm:$0xff]  }
  0xb1   : > { %1882 = vmatprep.subr.bf16.mxu1 %v2906_v27  ;;  %v2996_v26 = vld [vmem:[%s3172_s8 + $0x4e4] ss:$36 sps:$4 sm:$0xff]  }
  0xb2   : > { %v2991_v27 = vld [vmem:[%s3172_s8 + $0x2a0] ss:$36 sps:$4 sm:$0xff]  }
  0xb3   : > { %1842 = vmatpush1.bf16.msra.mxu0 %v2901_v29  ;;  %v2994_v29 = vld [vmem:[%s3172_s8 + $0x4e0] ss:$36 sps:$4 sm:$0xff]  }
  0xb4   : > { %1883 = vmatpush1.bf16.msra.mxu1 %v2904_v30  ;;  %1843 = vmatprep.subr.bf16.mxu0 %v2909_v31  ;;  %v2999_v30 = vld [vmem:[%s3172_s8 + $0x25c] ss:$36 sps:$4 sm:$0xff]  }
  0xb5   : > { %1909 = vmatprep.subr.bf16.mxu1 %v2912_v32  ;;  %v3002_v31 = vld [vmem:[%s3172_s8 + $0x49c] ss:$36 sps:$4 sm:$0xff]  }
  0xb6   : > { %v2997_v32 = vld [vmem:[%s3172_s8 + $0x258] ss:$36 sps:$4 sm:$0xff]  }
  0xb7   : > { %1901 = vmatmul.mubr.bf16.vlgmr.msra.gmra.mxu1 %v3252_v51  ;;  %1844 = vmatpush2.bf16.msra.mxu0 %v2907_v33  ;;  %v3000_v33 = vld [vmem:[%s3172_s8 + $0x498] ss:$36 sps:$4 sm:$0xff]  }
  0xb8   : > { %1910 = vmatpush1.bf16.msra.mxu1 %v2910_v34  ;;  %1845 = vmatprep.subr.bf16.mxu0 %v2915_v35  ;;  %v3003_v34 = vld [vmem:[%s3172_s8 + $0x458] ss:$36 sps:$4 sm:$0xff]  }
  0xb9   : > { %1911 = vmatprep.subr.bf16.mxu1 %v2918_v36  ;;  %1941 = vmatprep.mubr.bf16.mxu1 %v3275_v7  ;;  %v3004_v35 = vld [vmem:[%s3172_s8 + $0x218] ss:$36 sps:$4 sm:$0xff]  }
  0xba   : > { %v3005_v36 = vld [vmem:[%s3172_s8 + $0x698] ss:$36 sps:$4 sm:$0xff]  }
  0xbb   : > { %1846 = vmatpush2.bf16.msra.mxu0 %v2913_v37  ;;  %v3086_v37 = vmov 0.0  }
  0xbc   : > { %1912 = vmatpush1.bf16.msra.mxu1 %v2916_v38  ;;  %1847 = vmatprep.subr.bf16.mxu0 %v2921_v39  ;;  %v3006_v38 = vld [vmem:[%s3172_s8 + $0x410] ss:$36 sps:$4 sm:$0xff]  }
  0xbd   : > { %1913 = vmatprep.subr.bf16.mxu1 %v2924_v40  ;;  %v3007_v39 = vld [vmem:[%s3172_s8 + $0x1d0] ss:$36 sps:$4 sm:$0xff]  }
  0xbe   : > { %v3008_v40 = vld [vmem:[%s3172_s8 + $0x650] ss:$36 sps:$4 sm:$0xff]  }
  0xbf   : > { %1848 = vmatpush2.bf16.msra.mxu0 %v2919_v41  ;;  %v3009_v41 = vld [vmem:[%s3172_s8 + $0x3c8] ss:$36 sps:$4 sm:$0xff]  }
  0xc0   : > { %1914 = vmatpush1.bf16.msra.mxu1 %v2922_v42  ;;  %1849 = vmatprep.subr.bf16.mxu0 %v2927_v43  ;;  %v3010_v42 = vld [vmem:[%s3172_s8 + $0x188] ss:$36 sps:$4 sm:$0xff]  }
  0xc1   : > { %1915 = vmatprep.subr.bf16.mxu1 %v2930_v44  ;;  %v3011_v43 = vld [vmem:[%s3172_s8 + $0x608] ss:$36 sps:$4 sm:$0xff]   ;;  %v3012_v44 = vld [vmem:[%s3172_s8 + $0x380] ss:$36 sps:$4 sm:$0xff]  }
  0xc3   : > { %1850 = vmatpush2.bf16.msra.mxu0 %v2925_v45  ;;  %v3013_v45 = vld [vmem:[%s3172_s8 + $0x140] ss:$36 sps:$4 sm:$0xff]  }
  0xc4   : > { %1916 = vmatpush1.bf16.msra.mxu1 %v2928_v46  ;;  %1851 = vmatprep.subr.bf16.mxu0 %v2933_v47  ;;  %v3014_v46 = vld [vmem:[%s3172_s8 + $0x5c0] ss:$36 sps:$4 sm:$0xff]   ;;  %v3016_v47 = vld [vmem:[%s3172_s8 + $0xf8] ss:$36 sps:$4 sm:$0xff]  }
  0xc5   : > { %1917 = vmatprep.subr.bf16.mxu1 %v2936_v48  ;;  %v3017_v48 = vld [vmem:[%s3172_s8 + $0x578] ss:$36 sps:$4 sm:$0xff]  }
  0xc7   : > { %1852 = vmatpush2.bf16.msra.mxu0 %v2931_v49  ;;  %v3018_v49 = vld [vmem:[%s3172_s8 + $0x2f0] ss:$36 sps:$4 sm:$0xff]  }
  0xc8   : > { %1918 = vmatpush1.bf16.msra.mxu1 %v2934_v50  ;;  %1853 = vmatprep.subr.bf16.mxu0 %v2939_v52  ;;  %v3019_v50 = vld [vmem:[%s3172_s8 + $0xb0] ss:$36 sps:$4 sm:$0xff]  }
  0xc9   : > { %1919 = vmatprep.subr.bf16.mxu1 %v2942_v53  ;;  %v3020_v52 = vld [vmem:[%s3172_s8 + $0x530] ss:$36 sps:$4 sm:$0xff]   ;;  %v3021_v53 = vld [vmem:[%s3172_s8 + $0x2a8] ss:$36 sps:$4 sm:$0xff]  }
  0xcb   : > { %1854 = vmatpush2.bf16.msra.mxu0 %v2937_v54  ;;  %v3022_v54 = vld [vmem:[%s3172_s8 + $0x68] ss:$36 sps:$4 sm:$0xff]  }
  0xcc   : > { %1920 = vmatpush1.bf16.msra.mxu1 %v2940_v55  ;;  %1855 = vmatprep.subr.bf16.mxu0 %v2945_v56  ;;  %v3023_v55 = vld [vmem:[%s3172_s8 + $0x4e8] ss:$36 sps:$4 sm:$0xff]   ;;  %v3024_v56 = vld [vmem:[%s3172_s8 + $0x260] ss:$36 sps:$4 sm:$0xff]  }
  0xcd   : > { %1921 = vmatprep.subr.bf16.mxu1 %v2948_v57  ;;  %v3025_v57 = vld [vmem:[%s3172_s8 + $0x20] ss:$36 sps:$4 sm:$0xff]  }
  0xcf   : > { %1856 = vmatpush2.bf16.msra.mxu0 %v2943_v58  ;;  %v3026_v58 = vld [vmem:[%s3172_s8 + $0x4a0] ss:$36 sps:$4 sm:$0xff]  }
  0xd0   : > { %1922 = vmatpush1.bf16.msra.mxu1 %v2946_v59  ;;  %1857 = vmatprep.subr.bf16.mxu0 %v2951_v60 }
  0xd1   : > { %1923 = vmatprep.subr.bf16.mxu1 %v2954_v61 }
  0xd3   : > { %1858 = vmatpush2.bf16.msra.mxu0 %v2949_v62 }
  0xd4   : > { %1924 = vmatpush1.bf16.msra.mxu1 %v2952_v63  ;;  %1950 = vmatprep.subr.bf16.mxu0 %v2960_v1  ;;  %v310_v63 = vld [vmem:[#allocation4 + $0x30] sm:$0xff] }
  0xd5   : > { %1925 = vmatprep.subr.bf16.mxu1 %v2957_v0 }
  0xd6   : > { %1860 = vmatmul.mubr.bf16.vlgmr.msra.gmra.mxu0 %v3299_v28 }
  0xd7   : > { %1951 = vmatpush1.bf16.msra.mxu0 %v2958_v3  ;;  %1982 = vmatprep.mubr.bf16.mxu0 %v3085_v13  ;;  %v2981_v13 = vld [vmem:[%s3172_s8 + $0x334] ss:$36 sps:$4 sm:$0xff]  }
  0xd8   : > { %1926 = vmatpush2.bf16.msra.mxu1 %v2955_v2  ;;  %1952 = vmatprep.subr.bf16.mxu0 %v2966_v5  ;;  %v311_v2 = vld [vmem:[#allocation4] sm:$0xff] }
  0xd9   : > { %1927 = vmatprep.subr.bf16.mxu1 %v2963_v4 }
  0xdb   : > { %1953 = vmatpush1.bf16.msra.mxu0 %v2964_v8 }
  0xdc   : > { %1928 = vmatpush2.bf16.msra.mxu1 %v2961_v6  ;;  %1954 = vmatprep.subr.bf16.mxu0 %v2972_v10 }
  0xdd   : > { %1929 = vmatprep.subr.bf16.mxu1 %v2969_v9 }
  0xdf   : > { %1955 = vmatpush1.bf16.msra.mxu0 %v2970_v12 }
  0xe0   : > { %1930 = vmatpush2.bf16.msra.mxu1 %v2967_v11  ;;  %1956 = vmatprep.subr.bf16.mxu0 %v2978_v15 }
  0xe1   : > { %1931 = vmatprep.subr.bf16.mxu1 %v2975_v14  ;;  %v313_v14 = vld [vmem:[#allocation4 + $0x10] sm:$0xff] }
  0xe3   : > { %1957 = vmatpush1.bf16.msra.mxu0 %v2976_v17 }
  0xe4   : > { %1932 = vmatpush2.bf16.msra.mxu1 %v2973_v16  ;;  %1958 = vmatprep.subr.bf16.mxu0 %v2984_v18 }
  0xe5   : > { %1933 = vmatprep.subr.bf16.mxu1 %v2981_v13 }
  0xe7   : > { %1959 = vmatpush1.bf16.msra.mxu0 %v2982_v20 }
  0xe8   : > { %1934 = vmatpush2.bf16.msra.mxu1 %v2979_v19  ;;  %1960 = vmatprep.subr.bf16.mxu0 %v2990_v22 }
  0xe9   : > { %1935 = vmatprep.subr.bf16.mxu1 %v2987_v21 }
  0xeb   : > { %1961 = vmatpush1.bf16.msra.mxu0 %v2988_v24 }
  0xec   : > { %1936 = vmatpush2.bf16.msra.mxu1 %v2985_v23  ;;  %1962 = vmatprep.subr.bf16.mxu0 %v2996_v26  ;;  %v314_v26 = vld [vmem:[#allocation4 + $0x20] sm:$0xff] }
  0xed   : > { %1937 = vmatprep.subr.bf16.mxu1 %v2993_v25 }
  0xef   : > { %1963 = vmatpush1.bf16.msra.mxu0 %v2994_v29 }
  0xf0   : > { %1938 = vmatpush2.bf16.msra.mxu1 %v2991_v27  ;;  %1964 = vmatprep.subr.bf16.mxu0 %v3002_v31 }
  0xf1   : > { %1939 = vmatprep.subr.bf16.mxu1 %v2999_v30  ;;  %v315_v30 = vld [vmem:[#allocation4 + $0x28] sm:$0xff] }
  0xf3   : > { %1965 = vmatpush1.bf16.msra.mxu0 %v3000_v33 }
  0xf4   : > { %1940 = vmatpush2.bf16.msra.mxu1 %v2997_v32  ;;  %2600 = vmatprep.subr.bf16.mxu0 %v3003_v34 }
  0xf5   : > { %2631 = vmatprep.subr.bf16.mxu1 %v3086_v37 }
  0xf6   : > { %1983 = vmatmul.mubr.bf16.vlgmr.msra.gmra.mxu0 %v3252_v51 }
  0xf7   : > { %1942 = vmatmul.mubr.bf16.vlgmr.msra.gmra.mxu1 %v3299_v28  ;;  %2601 = vmatpush3.bf16.msra.mxu0 %v3004_v35 }
  0xf8   : > { %2632 = vmatpush3.bf16.msra.mxu1 %v3005_v36  ;;  %2602 = vmatprep.subr.bf16.mxu0 %v3006_v38  ;;  %v316_v38 = vld [vmem:[#allocation4 + $0x40] sm:$0xff] }
  0xf9   : > { %2633 = vmatprep.subr.bf16.mxu1 %v3086_v37  ;;  %2023 = vmatprep.mubr.bf16.mxu0 %v3275_v7  ;;  %v3015_v7 = vld [vmem:[%s3172_s8 + $0x338] ss:$36 sps:$4 sm:$0xff]  }
  0xfa   : > { %2647 = vmatprep.mubr.msk.bf16.mxu1 %vm3087_vm1, %v3086_v37 }
  0xfb   : > { %2603 = vmatpush3.bf16.msra.mxu0 %v3007_v39 }
  0xfc   : > { %2634 = vmatpush3.bf16.msra.mxu1 %v3008_v40  ;;  %2604 = vmatprep.subr.bf16.mxu0 %v3009_v41 }
  0xfd   : > { %2635 = vmatprep.subr.bf16.mxu1 %v3086_v37 }
  0xff   : > { %2605 = vmatpush3.bf16.msra.mxu0 %v3010_v42  ;;  %v317_v42 = vld [vmem:[#allocation4 + $0x38] sm:$0xff] }
 0x100   : > { %2636 = vmatpush3.bf16.msra.mxu1 %v3011_v43  ;;  %2606 = vmatprep.subr.bf16.mxu0 %v3012_v44 }
 0x101   : > { %2637 = vmatprep.subr.bf16.mxu1 %v3086_v37 }
 0x103   : > { %2607 = vmatpush3.bf16.msra.mxu0 %v3013_v45 }
 0x104   : > { %2638 = vmatpush3.bf16.msra.mxu1 %v3014_v46  ;;  %2608 = vmatprep.subr.bf16.mxu0 %v3015_v7 }
 0x105   : > { %2639 = vmatprep.subr.bf16.mxu1 %v3086_v37 }
 0x107   : > { %2609 = vmatpush3.bf16.msra.mxu0 %v3016_v47 }
 0x108   : > { %2640 = vmatpush3.bf16.msra.mxu1 %v3017_v48  ;;  %2610 = vmatprep.subr.bf16.mxu0 %v3018_v49 }
 0x109   : > { %2641 = vmatprep.subr.bf16.mxu1 %v3086_v37 }
 0x10b   : > { %2611 = vmatpush3.bf16.msra.mxu0 %v3019_v50 }
 0x10c   : > { %2642 = vmatpush3.bf16.msra.mxu1 %v3020_v52  ;;  %2612 = vmatprep.subr.bf16.mxu0 %v3021_v53 }
 0x10d   : > { %2643 = vmatprep.subr.bf16.mxu1 %v3086_v37 }
 0x10f   : > { %2613 = vmatpush3.bf16.msra.mxu0 %v3022_v54 }
 0x110   : > { %2644 = vmatpush3.bf16.msra.mxu1 %v3023_v55  ;;  %2614 = vmatprep.subr.bf16.mxu0 %v3024_v56  ;;  %v318_v56 = vld [vmem:[#allocation4 + $0x8] sm:$0xff] }
 0x111   : > { %2645 = vmatprep.subr.bf16.mxu1 %v3086_v37 }
 0x113   : > { %2615 = vmatpush3.bf16.msra.mxu0 %v3025_v57 }
 0x114   : > { %2646 = vmatpush3.bf16.msra.mxu1 %v3026_v58 }
 0x116   : > { %2024 = vmatmul.mubr.bf16.vlgmr.msra.gmra.mxu0 %v3299_v28  ;;  %v312_v28 = vld [vmem:[#allocation4 + $0x18] sm:$0xff] }
 0x117   : > { %v1738_v59 = vpop.f32.mrf.mxu1  ;;  %2648 = vmatmul.mubr.bf16.vlgmr.msra.gmra.mxu1 %v3252_v51 }
 0x119   : > { %v1740_v60 = vpop.f32.mrf.mxu1 }
 0x11b   : > { %v1742_v61 = vpop.f32.mrf.mxu1 }
 0x11d   : > { %v1743_v62 = vpop.f32.mrf.mxu1 }
 0x136   : > { %v1697_v0 = vpop.f32.mrf.mxu0 }
 0x137   : > { %v1739_v1 = vadd.f32 %v1738_v59, %v1697_v0 }
 0x138   : > { %v1699_v3 = vpop.f32.mrf.mxu0 }
 0x139   : > { %v2071_v4 = vadd.f32 %v1739_v1, %v310_v63  ;;  %v1741_v5 = vadd.f32 %v1740_v60, %v1699_v3 }
 0x13a   : > { %v1701_v6 = vpop.f32.mrf.mxu0 }
 0x13b   : > { %2080 = vst [vmem:[#allocation4 + $0x30] sm:$0xff] %v2071_v4  ;;  %v2072_v8 = vadd.f32 %v1741_v5, %v311_v2 }
 0x13c   : > { %v1702_v9 = vpop.f32.mrf.mxu0 }
 0x13d   : > { %2081 = vst [vmem:[#allocation4] sm:$0xff] %v2072_v8 }
 0x156   : > { %v1820_v51 = vpop.f32.mrf.mxu0 }
 0x157   : > { %v1779_v10 = vpop.f32.mrf.mxu1 }
 0x158   : > { %v1821_v11 = vadd.f32 %v1820_v51, %v1779_v10  ;;  %v1822_v15 = vpop.f32.mrf.mxu0 }
 0x159   : > { %v1781_v12 = vpop.f32.mrf.mxu1 }
 0x15a   : > { %v2073_v16 = vadd.f32 %v1821_v11, %v312_v28  ;;  %v1823_v17 = vadd.f32 %v1822_v15, %v1781_v12  ;;  %v1824_v18 = vpop.f32.mrf.mxu0 }
 0x15b   : > { %v1783_v13 = vpop.f32.mrf.mxu1 }
 0x15c   : > { %2082 = vst [vmem:[#allocation4 + $0x18] sm:$0xff] %v2073_v16  ;;  %v2074_v19 = vadd.f32 %v1823_v17, %v313_v14  ;;  %v1825_v21 = vpop.f32.mrf.mxu0 }
 0x15d   : > { %v1784_v20 = vpop.f32.mrf.mxu1 }
 0x15e   : > { %2083 = vst [vmem:[#allocation4 + $0x10] sm:$0xff] %v2074_v19 }
 0x177   : > { %v1902_v22 = vpop.f32.mrf.mxu1 }
 0x179   : > { %v1904_v23 = vpop.f32.mrf.mxu1 }
 0x17b   : > { %v1906_v24 = vpop.f32.mrf.mxu1 }
 0x17d   : > { %v1907_v25 = vpop.f32.mrf.mxu1 }
 0x196   : > { %v1861_v27 = vpop.f32.mrf.mxu0 }
 0x197   : > { %v1903_v29 = vadd.f32 %v1902_v22, %v1861_v27 }
 0x198   : > { %v1863_v31 = vpop.f32.mrf.mxu0 }
 0x199   : > { %v2075_v32 = vadd.f32 %v1903_v29, %v314_v26  ;;  %v1905_v33 = vadd.f32 %v1904_v23, %v1863_v31 }
 0x19a   : > { %v1865_v34 = vpop.f32.mrf.mxu0 }
 0x19b   : > { %2084 = vst [vmem:[#allocation4 + $0x20] sm:$0xff] %v2075_v32  ;;  %v2076_v35 = vadd.f32 %v1905_v33, %v315_v30 }
 0x19c   : > { %v1866_v36 = vpop.f32.mrf.mxu0 }
 0x19d   : > { %2085 = vst [vmem:[#allocation4 + $0x28] sm:$0xff] %v2076_v35 }
 0x1b6   : > { %v1984_v39 = vpop.f32.mrf.mxu0 }
 0x1b7   : > { %v1943_v37 = vpop.f32.mrf.mxu1 }
 0x1b8   : > { %v1985_v40 = vadd.f32 %v1984_v39, %v1943_v37  ;;  %v1986_v43 = vpop.f32.mrf.mxu0 }
 0x1b9   : > { %v1945_v41 = vpop.f32.mrf.mxu1 }
 0x1ba   : > { %v2077_v44 = vadd.f32 %v1985_v40, %v316_v38  ;;  %v1987_v45 = vadd.f32 %v1986_v43, %v1945_v41  ;;  %v1988_v7 = vpop.f32.mrf.mxu0 }
 0x1bb   : > { %v1947_v46 = vpop.f32.mrf.mxu1 }
 0x1bc   : > { %2086 = vst [vmem:[#allocation4 + $0x40] sm:$0xff] %v2077_v44  ;;  %v2078_v47 = vadd.f32 %v1987_v45, %v317_v42  ;;  %v1989_v49 = vpop.f32.mrf.mxu0 }
 0x1bd   : > { %v1948_v48 = vpop.f32.mrf.mxu1 }
 0x1be   : > { %2087 = vst [vmem:[#allocation4 + $0x38] sm:$0xff] %v2078_v47 }
 0x1d6   : > { %v2616_v50 = vpop.f32.mrf.mxu0 }
 0x1d7   : > { %v2065_v52 = vpop.f32.mrf.mxu1 }
 0x1d8   : > { %v2617_v53 = vpop.f32.mrf.mxu0 }
 0x1d9   : > { %v2649_v54 = vpop.f32.mrf.mxu1  ;;  %v2618_v55 = vadd.f32 %v2617_v53, %v2616_v50 }
 0x1da   : > { %v2619_v57 = vpop.f32.mrf.mxu0 }
 0x1db   : > { %v2068_v58 = vpop.f32.mrf.mxu1  ;;  %v2066_v59 = vadd.f32 %v2618_v55, %v2065_v52  ;;  %2093 = sbr.rel (%p3471_p2) target bundleno = 497 (0x1f1), region = 44 }
 0x1dc   : > { %v2620_v60 = vpop.f32.mrf.mxu0 }
 0x1dd   : > { %v2650_v61 = vpop.f32.mrf.mxu1  ;;  %v2079_v62 = vadd.f32 %v2066_v59, %v318_v56 }
 0x1df   : > { %2088 = vst [vmem:[#allocation4 + $0x8] sm:$0xff] %v2079_v62 }
 0x1e0   : > { %v2107_v63 = vlaneseq  ;;  %v2094_v1 = vld [vmem:[#allocation4 + $0x30] sm:$0xff]  ;;  %v2095_v4 = vld [vmem:[#allocation4] sm:$0xff]  ;;  %v2096_v6 = vld [vmem:[#allocation4 + $0x18] sm:$0xff] }
 0x1e1   : > { %v2103_v2 = vld [vmem:[%s3167_s5] sm:$0xff]  ;;  %v2098_v28 = vld [vmem:[#allocation4 + $0x20] sm:$0xff]  ;;  %v2099_v18 = vld [vmem:[#allocation4 + $0x28] sm:$0xff] }
 0x1e2   : > { %v2108_v0 = vshrl.u32 %v2107_v63, 7  ;;  %v2097_v10 = vld [vmem:[#allocation4 + $0x10] sm:$0xff]  ;;  %v2100_v19 = vld [vmem:[#allocation4 + $0x40] sm:$0xff]  ;;  %v2101_v20 = vld [vmem:[#allocation4 + $0x38] sm:$0xff] }
 0x1e3   : > { %v2596_v35 = vld [vmem:[%s3167_s5 + $0x8] ss:$0 sm:$0xff] }
 0x1e4   : > { %v2109_v3 = vsub.s32 0, %v2108_v0  ;;  %v2113_v5 = vsub.s32 1, %v2108_v0  ;;  %v2117_v8 = vsub.s32 2, %v2108_v0  ;;  %v2121_v9 = vsub.s32 3, %v2108_v0 }
 0x1e5   : > { %v2125_v51 = vsub.s32 4, %v2108_v0  ;;  %v2129_v11 = vsub.s32 5, %v2108_v0  ;;  %v2133_v12 = vsub.s32 6, %v2108_v0  ;;  %v2137_v14 = vsub.s32 7, %v2108_v0 }
 0x1e6   : > { %v2110_v15 = vrot.slane %v2103_v2, %v2109_v3  ;;  %v2114_v16 = vrot.slane %v2103_v2, %v2113_v5  ;;  %v2118_v17 = vrot.slane %v2103_v2, %v2117_v8  ;;  %v2122_v13 = vrot.slane %v2103_v2, %v2121_v9  ;;  %v2102_v34 = vld [vmem:[#allocation4 + $0x8] sm:$0xff] }
 0x1e7   : > { %v2126_v21 = vrot.slane %v2103_v2, %v2125_v51  ;;  %v2130_v22 = vrot.slane %v2103_v2, %v2129_v11  ;;  %v2134_v23 = vrot.slane %v2103_v2, %v2133_v12  ;;  %v2138_v24 = vrot.slane %v2103_v2, %v2137_v14 }
 0x1e8   : > { %v2152_v25 = vadd.f32 %v2110_v15, %v2094_v1  ;;  %v2153_v26 = vadd.f32 %v2114_v16, %v2095_v4  ;;  %v2154_v27 = vadd.f32 %v2118_v17, %v2096_v6  ;;  %v2155_v29 = vadd.f32 %v2122_v13, %v2097_v10 }
 0x1e9   : > { %v2156_v30 = vadd.f32 %v2126_v21, %v2098_v28  ;;  %v2157_v31 = vadd.f32 %v2130_v22, %v2099_v18  ;;  %v2158_v32 = vadd.f32 %v2134_v23, %v2100_v19  ;;  %v2159_v33 = vadd.f32 %v2138_v24, %v2101_v20 }
 0x1ea   : > { %v2161_v36 = vmax.f32 %v2152_v25, 0.0  ;;  %v2162_v37 = vmax.f32 %v2153_v26, 0.0  ;;  %v2163_v38 = vmax.f32 %v2154_v27, 0.0  ;;  %v2164_v39 = vmax.f32 %v2155_v29, 0.0 }
 0x1eb   : > { %v2165_v40 = vmax.f32 %v2156_v30, 0.0  ;;  %v2166_v41 = vmax.f32 %v2157_v31, 0.0  ;;  %v2167_v42 = vmax.f32 %v2158_v32, 0.0  ;;  %v2168_v43 = vmax.f32 %v2159_v33, 0.0 }
 0x1ec   : > { %2170 = vst [vmem:[#allocation3] sm:$0xff] %v2161_v36  ;;  %2171 = vst [vmem:[#allocation3 + $0x8] sm:$0xff] %v2162_v37  ;;  %v2160_v44 = vadd.f32 %v2596_v35, %v2102_v34 }
 0x1ed   : > { %2172 = vst [vmem:[#allocation3 + $0x10] sm:$0xff] %v2163_v38  ;;  %2173 = vst [vmem:[#allocation3 + $0x18] sm:$0xff] %v2164_v39 }
 0x1ee   : > { %2174 = vst [vmem:[#allocation3 + $0x20] sm:$0xff] %v2165_v40  ;;  %2175 = vst [vmem:[#allocation3 + $0x28] sm:$0xff] %v2166_v41  ;;  %v2169_v45 = vmax.f32 %v2160_v44, 0.0 }
 0x1ef   : > { %2176 = vst [vmem:[#allocation3 + $0x30] sm:$0xff] %v2167_v42  ;;  %2177 = vst [vmem:[#allocation3 + $0x38] sm:$0xff] %v2168_v43 }
 0x1f0   : > { %2178 = vst [vmem:[#allocation3 + $0x40] sm:$0xff] %v2169_v45 }
 0x1f1 PF: > { %p2179_p3 = scmp.eq.s32.totalorder %s3061_s13, 1 }
 0x1f3   : > { %p2180_p4 = pnand %p2179_p3, %p2089_p1 }
 0x1f5   : > { %2183 = sbr.rel (%p2180_p4) target bundleno = 529 (0x211), region = 48 }
 0x1fa   : > { %v2197_v46 = vlaneseq  ;;  %v2184_v47 = vld [vmem:[#allocation4 + $0x30] sm:$0xff]  ;;  %v2185_v50 = vld [vmem:[#allocation4] sm:$0xff]  ;;  %v2186_v53 = vld [vmem:[#allocation4 + $0x18] sm:$0xff] }
 0x1fb   : > { %v2193_v48 = vld [vmem:[%s3167_s5] sm:$0xff]  ;;  %v2252_v57 = vld [vmem:[#allocation2 + $0x8] sm:$0xff]  ;;  %v2188_v59 = vld [vmem:[#allocation4 + $0x20] sm:$0xff] }
 0x1fc   : > { %v2198_v7 = vshrl.u32 %v2197_v46, 7  ;;  %v2251_v56 = vld [vmem:[#allocation2] sm:$0xff]  ;;  %v2189_v4 = vld [vmem:[#allocation4 + $0x28] sm:$0xff]  ;;  %v2190_v5 = vld [vmem:[#allocation4 + $0x40] sm:$0xff] }
 0x1fd   : > { %v2187_v58 = vld [vmem:[#allocation4 + $0x10] sm:$0xff]  ;;  %v2191_v6 = vld [vmem:[#allocation4 + $0x38] sm:$0xff]  ;;  %v2253_v8 = vld [vmem:[#allocation2 + $0x10] sm:$0xff] }
 0x1fe   : > { %v2199_v49 = vsub.s32 0, %v2198_v7  ;;  %v2203_v52 = vsub.s32 1, %v2198_v7  ;;  %v2207_v54 = vsub.s32 2, %v2198_v7  ;;  %v2211_v55 = vsub.s32 3, %v2198_v7  ;;  %v2254_v9 = vld [vmem:[#allocation2 + $0x18] sm:$0xff]  ;;  %v2255_v28 = vld [vmem:[#allocation2 + $0x20] sm:$0xff] }
 0x1ff   : > { %v2215_v60 = vsub.s32 4, %v2198_v7  ;;  %v2219_v61 = vsub.s32 5, %v2198_v7  ;;  %v2223_v62 = vsub.s32 6, %v2198_v7  ;;  %v2227_v63 = vsub.s32 7, %v2198_v7  ;;  %v2256_v13 = vld [vmem:[#allocation2 + $0x28] sm:$0xff]  ;;  %v2257_v18 = vld [vmem:[#allocation2 + $0x30] sm:$0xff] }
 0x200   : > { %v2200_v0 = vrot.slane %v2193_v48, %v2199_v49  ;;  %v2204_v1 = vrot.slane %v2193_v48, %v2203_v52  ;;  %v2208_v2 = vrot.slane %v2193_v48, %v2207_v54  ;;  %v2212_v3 = vrot.slane %v2193_v48, %v2211_v55  ;;  %v2258_v19 = vld [vmem:[#allocation2 + $0x38] sm:$0xff]  ;;  %v2597_v34 = vld [vmem:[%s3167_s5 + $0x8] ss:$0 sm:$0xff]  ;;  %v2259_v43 = vld [vmem:[#allocation2 + $0x40] sm:$0xff] }
 0x201   : > { %v2216_v10 = vrot.slane %v2193_v48, %v2215_v60  ;;  %v2220_v51 = vrot.slane %v2193_v48, %v2219_v61  ;;  %v2224_v11 = vrot.slane %v2193_v48, %v2223_v62  ;;  %v2228_v12 = vrot.slane %v2193_v48, %v2227_v63  ;;  %v2192_v33 = vld [vmem:[#allocation4 + $0x8] sm:$0xff] }
 0x202   : > { %v2242_v14 = vadd.f32 %v2200_v0, %v2184_v47  ;;  %v2243_v15 = vadd.f32 %v2204_v1, %v2185_v50  ;;  %v2244_v16 = vadd.f32 %v2208_v2, %v2186_v53  ;;  %v2245_v17 = vadd.f32 %v2212_v3, %v2187_v58 }
 0x203   : > { %v2246_v20 = vadd.f32 %v2216_v10, %v2188_v59  ;;  %v2247_v21 = vadd.f32 %v2220_v51, %v2189_v4  ;;  %v2248_v22 = vadd.f32 %v2224_v11, %v2190_v5  ;;  %v2249_v23 = vadd.f32 %v2228_v12, %v2191_v6 }
 0x204   : > { %v2260_v24 = vadd.f32 %v2251_v56, %v2242_v14  ;;  %v2261_v25 = vadd.f32 %v2252_v57, %v2243_v15  ;;  %v2262_v26 = vadd.f32 %v2253_v8, %v2244_v16  ;;  %v2263_v27 = vadd.f32 %v2254_v9, %v2245_v17 }
 0x205   : > { %v2264_v29 = vadd.f32 %v2255_v28, %v2246_v20  ;;  %v2265_v30 = vadd.f32 %v2256_v13, %v2247_v21  ;;  %v2266_v31 = vadd.f32 %v2257_v18, %v2248_v22  ;;  %v2267_v32 = vadd.f32 %v2258_v19, %v2249_v23 }
 0x206   : > { %v2269_v35 = vmax.f32 %v2260_v24, 0.0  ;;  %v2270_v36 = vmax.f32 %v2261_v25, 0.0  ;;  %v2271_v37 = vmax.f32 %v2262_v26, 0.0  ;;  %v2272_v38 = vmax.f32 %v2263_v27, 0.0 }
 0x207   : > { %v2273_v39 = vmax.f32 %v2264_v29, 0.0  ;;  %v2274_v40 = vmax.f32 %v2265_v30, 0.0  ;;  %v2275_v41 = vmax.f32 %v2266_v31, 0.0  ;;  %v2276_v42 = vmax.f32 %v2267_v32, 0.0 }
 0x208   : > { %2278 = vst [vmem:[#allocation2] sm:$0xff] %v2269_v35  ;;  %2287 = vst [vmem:[%s3535_s3] sm:$0xff] %v2269_v35  ;;  %v2250_v44 = vadd.f32 %v2597_v34, %v2192_v33 }
 0x209   : > { %2279 = vst [vmem:[#allocation2 + $0x8] sm:$0xff] %v2270_v36  ;;  %2288 = vst [vmem:[%s3535_s3 + $0x8] sm:$0xff] %v2270_v36 }
 0x20a   : > { %2280 = vst [vmem:[#allocation2 + $0x10] sm:$0xff] %v2271_v37  ;;  %2289 = vst [vmem:[%s3535_s3 + $0x10] sm:$0xff] %v2271_v37  ;;  %v2268_v45 = vadd.f32 %v2259_v43, %v2250_v44 }
 0x20b   : > { %2281 = vst [vmem:[#allocation2 + $0x18] sm:$0xff] %v2272_v38  ;;  %2290 = vst [vmem:[%s3535_s3 + $0x18] sm:$0xff] %v2272_v38 }
 0x20c   : > { %2282 = vst [vmem:[#allocation2 + $0x20] sm:$0xff] %v2273_v39  ;;  %2291 = vst [vmem:[%s3535_s3 + $0x20] sm:$0xff] %v2273_v39  ;;  %v2277_v46 = vmax.f32 %v2268_v45, 0.0 }
 0x20d   : > { %2283 = vst [vmem:[#allocation2 + $0x28] sm:$0xff] %v2274_v40  ;;  %2292 = vst [vmem:[%s3535_s3 + $0x28] sm:$0xff] %v2274_v40 }
 0x20e   : > { %2284 = vst [vmem:[#allocation2 + $0x30] sm:$0xff] %v2275_v41  ;;  %2293 = vst [vmem:[%s3535_s3 + $0x30] sm:$0xff] %v2275_v41 }
 0x20f   : > { %2285 = vst [vmem:[#allocation2 + $0x38] sm:$0xff] %v2276_v42  ;;  %2294 = vst [vmem:[%s3535_s3 + $0x38] sm:$0xff] %v2276_v42 }
 0x210   : > { %2286 = vst [vmem:[#allocation2 + $0x40] sm:$0xff] %v2277_v46  ;;  %2295 = vst [vmem:[%s3535_s3 + $0x40] sm:$0xff] %v2277_v46 }
 0x211 PF: > { %s13_s18 = sadd.s32 1, %s3081_s18   ;;  %s3539_s12 = smov %s3069_s15 }
 0x212   : > { %p10_p5 = scmp.ge.s32.totalorder %s13_s18, 14   ;;  %s3540_s13 = smov %s3073_s16 }
 0x213   : > { %s3541_s14 = smov %s3077_s17  ;;  %s3542_s15 = smov %s3546_s19 }
 0x214   : > { %s3543_s16 = smov %s3550_s20  ;;  %s3544_s17 = smov %s3554_s21 }
 0x215   :  { %12 = sbr.rel (!%p10_p5) target bundleno = 4 (0x4), region = 79 }

// kernel: ra_actor_world_forward.9
= control target key start
LH: loop header
LB: loop body
LE: loop exit
PB: predicated region body
PF: predicated region fallthrough
CT: control target
= control target key end

     0   :  { %s2771_s21 = smov 0   ;;  %s3151_s0 = inlined_call_operand.vmem [shape: f32[8,2048], index: 0, kind: input, shape index: {}]   ;;  %s3152_s1 = inlined_call_operand.vmem [shape: f32[8,128], index: 1, kind: input, shape index: {}]   ;;  %s3153_s2 = inlined_call_operand.vmem [shape: bf16[2048,1024], index: 2, kind: input, shape index: {}]   ;;  %s3154_s3 = inlined_call_operand.vmem [shape: f32[1,1024], index: 3, kind: input, shape index: {}]   ;;  %s3155_s4 = inlined_call_operand.vmem [shape: bf16[128,128], index: 4, kind: input, shape index: {}]   ;;  %s3156_s5 = inlined_call_operand.vmem [shape: f32[1,128], index: 5, kind: input, shape index: {}]   ;;  %s3157_s6 = inlined_call_operand.vmem [shape: f32[8,1152], index: 6, kind: output, shape index: {}]  }
   0x1 LB: > { %s2777_s22 = sadd.s32 4294967295, %s2731_s21   ;;  %p2401_p0 = scmp.ge.s32.totalorder %s2731_s21, 1  ;;  %s2731_s21 = sphi %s2771_s21, %s16_s21  }
   0x2   : > { %p220_p1 = scmp.lt.s32.totalorder %s2731_s21, 5 }
   0x4   : > { %p221_p2 = pnand %p2401_p0, %p220_p1 }
   0x5   : > { %s2402_s23 = sshll.u32 (!%p221_p2), %s2777_s22, 2  ;;  %s2404_s24 = sshll.u32 (!%p221_p2), %s2777_s22, 6 }
   0x6   : > { %224 = sbr.rel (%p221_p2) target bundleno = 718 (0x2ce), region = 44  ;;  %p252_p3 = scmp.lt.s32.totalorder (!%p221_p2), %s2402_s23, 15 }
   0x7   : > { %p258_p4 = scmp.lt.s32.totalorder (!%p221_p2), %s2404_s24, 255  ;;  %p2407_p5 = scmp.ne.s32.totalorder (!%p221_p2), %s2777_s22, 0 }
   0xb   : > { %s3159_s23 = smov (!%p252_p3, %s2402_s23), 15  ;;  %s3161_s24 = smov (!%p258_p4, %s2404_s24), 255 }
   0xc   : > { %s2403_s25 = sshll.u32 %s3159_s23, 3  ;;  %s2676_s29 = sshll.u32 %s3161_s24, 5 }
   0xd   : > { %s2786_s28 = scalar_lea.vmem %s3151_s0, %s2403_s25  ;;  %s2791_s8 = scalar_lea.vmem %s3153_s2, %s2676_s29 }
   0xe   : > { %268 = sbr.rel (%p2407_p5) target bundleno = 24 (0x18), region = 48 }
  0x13   : > { %v2733_v0 = vmov 0.0  }
  0x14   : > { %269 = vst [vmem:[#allocation2 + $0x30] sm:$0xff] %v2733_v0  ;;  %270 = vst [vmem:[#allocation2] sm:$0xff] %v2733_v0 }
  0x15   : > { %271 = vst [vmem:[#allocation2 + $0x18] sm:$0xff] %v2733_v0  ;;  %272 = vst [vmem:[#allocation2 + $0x10] sm:$0xff] %v2733_v0 }
  0x16   : > { %273 = vst [vmem:[#allocation2 + $0x8] sm:$0xff] %v2733_v0  ;;  %274 = vst [vmem:[#allocation2 + $0x20] sm:$0xff] %v2733_v0 }
  0x17   : > { %275 = vst [vmem:[#allocation2 + $0x28] sm:$0xff] %v2733_v0  ;;  %276 = vst [vmem:[#allocation2 + $0x38] sm:$0xff] %v2733_v0 }
  0x18 PF: > { %v349_v1 = vld [vmem:[%s2791_s8 + $0x1c0] sm:$0xff]  ;;  %v286_v54 = vld [vmem:[%s2786_s28 + $0x8] sm:$0xff]  ;;  %v288_v55 = vld [vmem:[%s2786_s28 + $0x18] sm:$0xff]  ;;  %p2664_p6 = scmp.ne.s32.totalorder %s2777_s22, 3 }
  0x19   : > { %v353_v2 = vld [vmem:[%s2791_s8 + $0x1e0] sm:$0xff]  ;;  %v2826_v59 = vpack.c.bf16 %v286_v54, %v286_v54  ;;  %v2828_v60 = vpack.c.bf16 %v288_v55, %v288_v55 }
  0x1a   : > { %v477_v3 = vld [vmem:[%s2791_s8 + $0x5c0] sm:$0xff]  ;;  %v2465_v4 = vcombine.high %v349_v1, %v353_v2  ;;  %v2464_v6 = vcombine.low %v349_v1, %v353_v2 }
  0x1b   : > { %v481_v5 = vld [vmem:[%s2791_s8 + $0x5e0] sm:$0xff]  ;;  %1861 = vmatprep.mubr.bf16.mxu0 %v2826_v59  ;;  %1902 = vmatprep.mubr.bf16.mxu1 %v2828_v60 }
  0x1c   : > { %v341_v7 = vld [vmem:[%s2791_s8 + $0x180] sm:$0xff]  ;;  %v2593_v9 = vcombine.high %v477_v3, %v481_v5  ;;  %v2592_v10 = vcombine.low %v477_v3, %v481_v5  ;;  %1829 = vmatprep.subr.bf16.mxu0 %v2465_v4 }
  0x1d   : > { %v345_v8 = vld [vmem:[%s2791_s8 + $0x1a0] sm:$0xff]  ;;  %1830 = vmatpush1.bf16.msra.mxu0 %v2464_v6 }
  0x1e   : > { %v2457_v11 = vcombine.high %v341_v7, %v345_v8  ;;  %v469_v12 = vld [vmem:[%s2791_s8 + $0x580] sm:$0xff]  ;;  %1870 = vmatprep.subr.bf16.mxu1 %v2593_v9  ;;  %v2456_v19 = vcombine.low %v341_v7, %v345_v8 }
  0x1f   : > { %v473_v13 = vld [vmem:[%s2791_s8 + $0x5a0] sm:$0xff]  ;;  %1871 = vmatpush1.bf16.msra.mxu1 %v2592_v10 }
  0x20   : > { %v333_v14 = vld [vmem:[%s2791_s8 + $0x140] sm:$0xff]  ;;  %v2585_v15 = vcombine.high %v469_v12, %v473_v13  ;;  %1831 = vmatprep.subr.bf16.mxu0 %v2457_v11  ;;  %v2584_v20 = vcombine.low %v469_v12, %v473_v13 }
  0x21   : > { %v337_v16 = vld [vmem:[%s2791_s8 + $0x160] sm:$0xff]  ;;  %1832 = vmatpush1.bf16.msra.mxu0 %v2456_v19 }
  0x22   : > { %v461_v17 = vld [vmem:[%s2791_s8 + $0x540] sm:$0xff]  ;;  %v2449_v21 = vcombine.high %v333_v14, %v337_v16  ;;  %1872 = vmatprep.subr.bf16.mxu1 %v2585_v15  ;;  %v2448_v27 = vcombine.low %v333_v14, %v337_v16 }
  0x23   : > { %v465_v18 = vld [vmem:[%s2791_s8 + $0x560] sm:$0xff]  ;;  %1873 = vmatpush1.bf16.msra.mxu1 %v2584_v20 }
  0x24   : > { %v2577_v22 = vcombine.high %v461_v17, %v465_v18  ;;  %v325_v23 = vld [vmem:[%s2791_s8 + $0x100] sm:$0xff]  ;;  %1833 = vmatprep.subr.bf16.mxu0 %v2449_v21  ;;  %v2576_v28 = vcombine.low %v461_v17, %v465_v18 }
  0x25   : > { %v329_v24 = vld [vmem:[%s2791_s8 + $0x120] sm:$0xff]  ;;  %1834 = vmatpush1.bf16.msra.mxu0 %v2448_v27 }
  0x26   : > { %v453_v25 = vld [vmem:[%s2791_s8 + $0x500] sm:$0xff]  ;;  %v2441_v29 = vcombine.high %v325_v23, %v329_v24  ;;  %1874 = vmatprep.subr.bf16.mxu1 %v2577_v22  ;;  %v2440_v35 = vcombine.low %v325_v23, %v329_v24 }
  0x27   : > { %v457_v26 = vld [vmem:[%s2791_s8 + $0x520] sm:$0xff]  ;;  %1875 = vmatpush1.bf16.msra.mxu1 %v2576_v28 }
  0x28   : > { %v2569_v30 = vcombine.high %v453_v25, %v457_v26  ;;  %v317_v31 = vld [vmem:[%s2791_s8 + $0xc0] sm:$0xff]  ;;  %1835 = vmatprep.subr.bf16.mxu0 %v2441_v29  ;;  %v2568_v36 = vcombine.low %v453_v25, %v457_v26 }
  0x29   : > { %v321_v32 = vld [vmem:[%s2791_s8 + $0xe0] sm:$0xff]  ;;  %1836 = vmatpush1.bf16.msra.mxu0 %v2440_v35 }
  0x2a   : > { %v445_v33 = vld [vmem:[%s2791_s8 + $0x4c0] sm:$0xff]  ;;  %v2433_v37 = vcombine.high %v317_v31, %v321_v32  ;;  %1876 = vmatprep.subr.bf16.mxu1 %v2569_v30  ;;  %v2432_v43 = vcombine.low %v317_v31, %v321_v32 }
  0x2b   : > { %v449_v34 = vld [vmem:[%s2791_s8 + $0x4e0] sm:$0xff]  ;;  %1877 = vmatpush1.bf16.msra.mxu1 %v2568_v36 }
  0x2c   : > { %v2561_v38 = vcombine.high %v445_v33, %v449_v34  ;;  %v309_v39 = vld [vmem:[%s2791_s8 + $0x80] sm:$0xff]  ;;  %1837 = vmatprep.subr.bf16.mxu0 %v2433_v37  ;;  %v2560_v44 = vcombine.low %v445_v33, %v449_v34 }
  0x2d   : > { %v313_v40 = vld [vmem:[%s2791_s8 + $0xa0] sm:$0xff]  ;;  %1838 = vmatpush1.bf16.msra.mxu0 %v2432_v43 }
  0x2e   : > { %v437_v41 = vld [vmem:[%s2791_s8 + $0x480] sm:$0xff]  ;;  %v2425_v45 = vcombine.high %v309_v39, %v313_v40  ;;  %1878 = vmatprep.subr.bf16.mxu1 %v2561_v38  ;;  %v2424_v51 = vcombine.low %v309_v39, %v313_v40 }
  0x2f   : > { %v441_v42 = vld [vmem:[%s2791_s8 + $0x4a0] sm:$0xff]  ;;  %1879 = vmatpush1.bf16.msra.mxu1 %v2560_v44 }
  0x30   : > { %v2553_v46 = vcombine.high %v437_v41, %v441_v42  ;;  %v301_v47 = vld [vmem:[%s2791_s8 + $0x40] sm:$0xff]  ;;  %1839 = vmatprep.subr.bf16.mxu0 %v2425_v45  ;;  %v2552_v52 = vcombine.low %v437_v41, %v441_v42 }
  0x31   : > { %v305_v48 = vld [vmem:[%s2791_s8 + $0x60] sm:$0xff]  ;;  %1840 = vmatpush1.bf16.msra.mxu0 %v2424_v51 }
  0x32   : > { %v429_v49 = vld [vmem:[%s2791_s8 + $0x440] sm:$0xff]  ;;  %v2417_v53 = vcombine.high %v301_v47, %v305_v48  ;;  %1880 = vmatprep.subr.bf16.mxu1 %v2553_v46  ;;  %v2416_v63 = vcombine.low %v301_v47, %v305_v48 }
  0x33   : > { %v433_v50 = vld [vmem:[%s2791_s8 + $0x460] sm:$0xff]  ;;  %1881 = vmatpush1.bf16.msra.mxu1 %v2552_v52 }
  0x34   : > { %v2545_v56 = vcombine.high %v429_v49, %v433_v50  ;;  %v293_v57 = vld [vmem:[%s2791_s8] sm:$0xff]  ;;  %1841 = vmatprep.subr.bf16.mxu0 %v2417_v53  ;;  %v2544_v0 = vcombine.low %v429_v49, %v433_v50 }
  0x35   : > { %v297_v58 = vld [vmem:[%s2791_s8 + $0x20] sm:$0xff]  ;;  %1842 = vmatpush1.bf16.msra.mxu0 %v2416_v63 }
  0x36   : > { %v421_v61 = vld [vmem:[%s2791_s8 + $0x400] sm:$0xff]  ;;  %v2409_v1 = vcombine.high %v293_v57, %v297_v58  ;;  %1882 = vmatprep.subr.bf16.mxu1 %v2545_v56  ;;  %v2408_v7 = vcombine.low %v293_v57, %v297_v58 }
  0x37   : > { %v425_v62 = vld [vmem:[%s2791_s8 + $0x420] sm:$0xff]  ;;  %1883 = vmatpush1.bf16.msra.mxu1 %v2544_v0 }
  0x38   : > { %v2537_v2 = vcombine.high %v421_v61, %v425_v62  ;;  %v413_v3 = vld [vmem:[%s2791_s8 + $0x3c0] sm:$0xff]  ;;  %1843 = vmatprep.subr.bf16.mxu0 %v2409_v1  ;;  %v2536_v8 = vcombine.low %v421_v61, %v425_v62 }
  0x39   : > { %v417_v4 = vld [vmem:[%s2791_s8 + $0x3e0] sm:$0xff]  ;;  %1844 = vmatpush1.bf16.msra.mxu0 %v2408_v7  ;;  %v478_v7 = vld [vmem:[%s2791_s8 + $0x5c8] sm:$0xff] }
  0x3a   : > { %v541_v5 = vld [vmem:[%s2791_s8 + $0x7c0] sm:$0xff]  ;;  %v2529_v9 = vcombine.high %v413_v3, %v417_v4  ;;  %1884 = vmatprep.subr.bf16.mxu1 %v2537_v2  ;;  %v2528_v15 = vcombine.low %v413_v3, %v417_v4 }
  0x3b   : > { %v545_v6 = vld [vmem:[%s2791_s8 + $0x7e0] sm:$0xff]  ;;  %1885 = vmatpush1.bf16.msra.mxu1 %v2536_v8  ;;  %v482_v8 = vld [vmem:[%s2791_s8 + $0x5e8] sm:$0xff] }
  0x3c   : > { %v2657_v10 = vcombine.high %v541_v5, %v545_v6  ;;  %v405_v11 = vld [vmem:[%s2791_s8 + $0x380] sm:$0xff]  ;;  %1845 = vmatprep.subr.bf16.mxu0 %v2529_v9  ;;  %v2656_v16 = vcombine.low %v541_v5, %v545_v6  ;;  %v350_v5 = vld [vmem:[%s2791_s8 + $0x1c8] sm:$0xff] }
  0x3d   : > { %v409_v12 = vld [vmem:[%s2791_s8 + $0x3a0] sm:$0xff]  ;;  %1846 = vmatpush2.bf16.msra.mxu0 %v2528_v15  ;;  %v354_v6 = vld [vmem:[%s2791_s8 + $0x1e8] sm:$0xff] }
  0x3e   : > { %v533_v13 = vld [vmem:[%s2791_s8 + $0x780] sm:$0xff]  ;;  %v2521_v17 = vcombine.high %v405_v11, %v409_v12  ;;  %1886 = vmatprep.subr.bf16.mxu1 %v2657_v10  ;;  %v2520_v23 = vcombine.low %v405_v11, %v409_v12  ;;  %v287_v12 = vld [vmem:[%s2786_s28 + $0x10] sm:$0xff]  ;;  %v342_v15 = vld [vmem:[%s2791_s8 + $0x188] sm:$0xff] }
  0x3f   : > { %v537_v14 = vld [vmem:[%s2791_s8 + $0x7a0] sm:$0xff]  ;;  %1887 = vmatpush2.bf16.msra.mxu1 %v2656_v16  ;;  %v346_v16 = vld [vmem:[%s2791_s8 + $0x1a8] sm:$0xff] }
  0x40   : > { %v2649_v18 = vcombine.high %v533_v13, %v537_v14  ;;  %v397_v19 = vld [vmem:[%s2791_s8 + $0x340] sm:$0xff]  ;;  %1847 = vmatprep.subr.bf16.mxu0 %v2521_v17  ;;  %v2648_v24 = vcombine.low %v533_v13, %v537_v14  ;;  %v2467_v13 = vcombine.high %v350_v5, %v354_v6  ;;  %v2595_v14 = vcombine.high %v478_v7, %v482_v8 }
  0x41   : > { %v401_v20 = vld [vmem:[%s2791_s8 + $0x360] sm:$0xff]  ;;  %1848 = vmatpush2.bf16.msra.mxu0 %v2520_v23  ;;  %v2459_v23 = vcombine.high %v342_v15, %v346_v16 }
  0x42   : > { %v525_v21 = vld [vmem:[%s2791_s8 + $0x740] sm:$0xff]  ;;  %v2513_v25 = vcombine.high %v397_v19, %v401_v20  ;;  %1888 = vmatprep.subr.bf16.mxu1 %v2649_v18  ;;  %v2512_v31 = vcombine.low %v397_v19, %v401_v20  ;;  %v470_v18 = vld [vmem:[%s2791_s8 + $0x588] sm:$0xff]  ;;  %v2878_v20 = vpack.c.bf16 %v287_v12, %v287_v12 }
  0x43   : > { %v529_v22 = vld [vmem:[%s2791_s8 + $0x760] sm:$0xff]  ;;  %1889 = vmatpush2.bf16.msra.mxu1 %v2648_v24  ;;  %v474_v19 = vld [vmem:[%s2791_s8 + $0x5a8] sm:$0xff] }
  0x44   : > { %v2641_v26 = vcombine.high %v525_v21, %v529_v22  ;;  %v389_v27 = vld [vmem:[%s2791_s8 + $0x300] sm:$0xff]  ;;  %1849 = vmatprep.subr.bf16.mxu0 %v2513_v25  ;;  %v2640_v32 = vcombine.low %v525_v21, %v529_v22  ;;  %v2466_v21 = vcombine.low %v350_v5, %v354_v6  ;;  %v2594_v22 = vcombine.low %v478_v7, %v482_v8  ;;  %v334_v25 = vld [vmem:[%s2791_s8 + $0x148] sm:$0xff] }
  0x45   : > { %v393_v28 = vld [vmem:[%s2791_s8 + $0x320] sm:$0xff]  ;;  %1850 = vmatpush2.bf16.msra.mxu0 %v2512_v31  ;;  %v2587_v24 = vcombine.high %v470_v18, %v474_v19  ;;  %v422_v5 = vld [vmem:[%s2791_s8 + $0x408] sm:$0xff] }
  0x46   : > { %v517_v29 = vld [vmem:[%s2791_s8 + $0x700] sm:$0xff]  ;;  %v2505_v33 = vcombine.high %v389_v27, %v393_v28  ;;  %1890 = vmatprep.subr.bf16.mxu1 %v2641_v26  ;;  %v2504_v39 = vcombine.low %v389_v27, %v393_v28  ;;  %v338_v26 = vld [vmem:[%s2791_s8 + $0x168] sm:$0xff] }
  0x47   : > { %v521_v30 = vld [vmem:[%s2791_s8 + $0x720] sm:$0xff]  ;;  %1891 = vmatpush2.bf16.msra.mxu1 %v2640_v32  ;;  %v462_v27 = vld [vmem:[%s2791_s8 + $0x548] sm:$0xff]  ;;  %v2451_v31 = vcombine.high %v334_v25, %v338_v26 }
  0x48   : > { %v2633_v34 = vcombine.high %v517_v29, %v521_v30  ;;  %v381_v35 = vld [vmem:[%s2791_s8 + $0x2c0] sm:$0xff]  ;;  %1851 = vmatprep.subr.bf16.mxu0 %v2505_v33  ;;  %v2632_v40 = vcombine.low %v517_v29, %v521_v30  ;;  %v466_v28 = vld [vmem:[%s2791_s8 + $0x568] sm:$0xff]  ;;  %v2458_v29 = vcombine.low %v342_v15, %v346_v16  ;;  %v2586_v30 = vcombine.low %v470_v18, %v474_v19 }
  0x49   : > { %v385_v36 = vld [vmem:[%s2791_s8 + $0x2e0] sm:$0xff]  ;;  %1852 = vmatpush2.bf16.msra.mxu0 %v2504_v39  ;;  %v2579_v32 = vcombine.high %v462_v27, %v466_v28  ;;  %v326_v33 = vld [vmem:[%s2791_s8 + $0x108] sm:$0xff] }
  0x4a   : > { %v509_v37 = vld [vmem:[%s2791_s8 + $0x6c0] sm:$0xff]  ;;  %v2497_v41 = vcombine.high %v381_v35, %v385_v36  ;;  %1892 = vmatprep.subr.bf16.mxu1 %v2633_v34  ;;  %v2496_v47 = vcombine.low %v381_v35, %v385_v36  ;;  %v330_v34 = vld [vmem:[%s2791_s8 + $0x128] sm:$0xff] }
  0x4b   : > { %v513_v38 = vld [vmem:[%s2791_s8 + $0x6e0] sm:$0xff]  ;;  %1893 = vmatpush2.bf16.msra.mxu1 %v2632_v40  ;;  %v454_v35 = vld [vmem:[%s2791_s8 + $0x508] sm:$0xff]  ;;  %v2443_v39 = vcombine.high %v326_v33, %v330_v34 }
  0x4c   : > { %v2625_v42 = vcombine.high %v509_v37, %v513_v38  ;;  %v373_v43 = vld [vmem:[%s2791_s8 + $0x280] sm:$0xff]  ;;  %1853 = vmatprep.subr.bf16.mxu0 %v2497_v41  ;;  %v2624_v48 = vcombine.low %v509_v37, %v513_v38  ;;  %v458_v36 = vld [vmem:[%s2791_s8 + $0x528] sm:$0xff]  ;;  %v2450_v37 = vcombine.low %v334_v25, %v338_v26  ;;  %v2578_v38 = vcombine.low %v462_v27, %v466_v28 }
  0x4d   : > { %v377_v44 = vld [vmem:[%s2791_s8 + $0x2a0] sm:$0xff]  ;;  %1854 = vmatpush2.bf16.msra.mxu0 %v2496_v47  ;;  %v2571_v40 = vcombine.high %v454_v35, %v458_v36  ;;  %v318_v41 = vld [vmem:[%s2791_s8 + $0xc8] sm:$0xff] }
  0x4e   : > { %v501_v45 = vld [vmem:[%s2791_s8 + $0x680] sm:$0xff]  ;;  %v2489_v49 = vcombine.high %v373_v43, %v377_v44  ;;  %1894 = vmatprep.subr.bf16.mxu1 %v2625_v42  ;;  %v2488_v55 = vcombine.low %v373_v43, %v377_v44  ;;  %v322_v42 = vld [vmem:[%s2791_s8 + $0xe8] sm:$0xff] }
  0x4f   : > { %v505_v46 = vld [vmem:[%s2791_s8 + $0x6a0] sm:$0xff]  ;;  %1895 = vmatpush2.bf16.msra.mxu1 %v2624_v48  ;;  %v446_v43 = vld [vmem:[%s2791_s8 + $0x4c8] sm:$0xff]  ;;  %v2435_v47 = vcombine.high %v318_v41, %v322_v42 }
  0x50   : > { %v2617_v50 = vcombine.high %v501_v45, %v505_v46  ;;  %v365_v51 = vld [vmem:[%s2791_s8 + $0x240] sm:$0xff]  ;;  %1855 = vmatprep.subr.bf16.mxu0 %v2489_v49  ;;  %v2616_v56 = vcombine.low %v501_v45, %v505_v46  ;;  %v450_v44 = vld [vmem:[%s2791_s8 + $0x4e8] sm:$0xff]  ;;  %v2442_v45 = vcombine.low %v326_v33, %v330_v34  ;;  %v2570_v46 = vcombine.low %v454_v35, %v458_v36 }
  0x51   : > { %v369_v52 = vld [vmem:[%s2791_s8 + $0x260] sm:$0xff]  ;;  %1856 = vmatpush2.bf16.msra.mxu0 %v2488_v55  ;;  %v2563_v48 = vcombine.high %v446_v43, %v450_v44  ;;  %v310_v49 = vld [vmem:[%s2791_s8 + $0x88] sm:$0xff] }
  0x52   : > { %v493_v53 = vld [vmem:[%s2791_s8 + $0x640] sm:$0xff]  ;;  %v2481_v57 = vcombine.high %v365_v51, %v369_v52  ;;  %1896 = vmatprep.subr.bf16.mxu1 %v2617_v50  ;;  %v2480_v1 = vcombine.low %v365_v51, %v369_v52  ;;  %v314_v50 = vld [vmem:[%s2791_s8 + $0xa8] sm:$0xff] }
  0x53   : > { %v497_v54 = vld [vmem:[%s2791_s8 + $0x660] sm:$0xff]  ;;  %1897 = vmatpush2.bf16.msra.mxu1 %v2616_v56  ;;  %v438_v51 = vld [vmem:[%s2791_s8 + $0x488] sm:$0xff]  ;;  %v2427_v55 = vcombine.high %v310_v49, %v314_v50 }
  0x54   : > { %v2609_v58 = vcombine.high %v493_v53, %v497_v54  ;;  %v357_v61 = vld [vmem:[%s2791_s8 + $0x200] sm:$0xff]  ;;  %1857 = vmatprep.subr.bf16.mxu0 %v2481_v57  ;;  %v2608_v2 = vcombine.low %v493_v53, %v497_v54  ;;  %v442_v52 = vld [vmem:[%s2791_s8 + $0x4a8] sm:$0xff]  ;;  %v2434_v53 = vcombine.low %v318_v41, %v322_v42  ;;  %v2562_v54 = vcombine.low %v446_v43, %v450_v44 }
  0x55   : > { %v361_v62 = vld [vmem:[%s2791_s8 + $0x220] sm:$0xff]  ;;  %1858 = vmatpush2.bf16.msra.mxu0 %v2480_v1  ;;  %v2555_v56 = vcombine.high %v438_v51, %v442_v52  ;;  %v302_v57 = vld [vmem:[%s2791_s8 + $0x48] sm:$0xff] }
  0x56   : > { %v485_v63 = vld [vmem:[%s2791_s8 + $0x600] sm:$0xff]  ;;  %v2473_v3 = vcombine.high %v357_v61, %v361_v62  ;;  %1898 = vmatprep.subr.bf16.mxu1 %v2609_v58  ;;  %v2472_v9 = vcombine.low %v357_v61, %v361_v62  ;;  %v306_v58 = vld [vmem:[%s2791_s8 + $0x68] sm:$0xff] }
  0x57   : > { %v489_v0 = vld [vmem:[%s2791_s8 + $0x620] sm:$0xff]  ;;  %1899 = vmatpush2.bf16.msra.mxu1 %v2608_v2  ;;  %v430_v61 = vld [vmem:[%s2791_s8 + $0x448] sm:$0xff]  ;;  %v2419_v1 = vcombine.high %v302_v57, %v306_v58  ;;  %v2418_v7 = vcombine.low %v302_v57, %v306_v58 }
  0x58   : > { %v2601_v4 = vcombine.high %v485_v63, %v489_v0  ;;  %v285_v10 = vld [vmem:[%s2786_s28] sm:$0xff]  ;;  %1859 = vmatprep.subr.bf16.mxu0 %v2473_v3  ;;  %v2600_v11 = vcombine.low %v485_v63, %v489_v0  ;;  %v434_v62 = vld [vmem:[%s2791_s8 + $0x468] sm:$0xff]  ;;  %v2426_v63 = vcombine.low %v310_v49, %v314_v50  ;;  %v2554_v0 = vcombine.low %v438_v51, %v442_v52 }
  0x59   : > { %v2874_v17 = vpack.c.bf16 %v285_v10, %v285_v10  ;;  %1860 = vmatpush2.bf16.msra.mxu0 %v2472_v9  ;;  %v2547_v2 = vcombine.high %v430_v61, %v434_v62  ;;  %v294_v3 = vld [vmem:[%s2791_s8 + $0x8] sm:$0xff]  ;;  %v2546_v8 = vcombine.low %v430_v61, %v434_v62 }
  0x5a   : > { %1900 = vmatprep.subr.bf16.mxu1 %v2601_v4  ;;  %1911 = vmatprep.subr.bf16.mxu0 %v2467_v13  ;;  %v298_v4 = vld [vmem:[%s2791_s8 + $0x28] sm:$0xff] }
  0x5b   : > { %1901 = vmatpush2.bf16.msra.mxu1 %v2600_v11  ;;  %v426_v6 = vld [vmem:[%s2791_s8 + $0x428] sm:$0xff]  ;;  %v2411_v9 = vcombine.high %v294_v3, %v298_v4  ;;  %v2410_v15 = vcombine.low %v294_v3, %v298_v4 }
  0x5c   : > { %1952 = vmatprep.subr.bf16.mxu1 %v2595_v14  ;;  %1862 = vmatmul.mubr.bf16.vlgmr.msra.gmra.mxu0 %v2874_v17  ;;  %v2539_v10 = vcombine.high %v422_v5, %v426_v6  ;;  %v414_v11 = vld [vmem:[%s2791_s8 + $0x3c8] sm:$0xff]  ;;  %v2538_v16 = vcombine.low %v422_v5, %v426_v6 }
  0x5d   : > { %1912 = vmatpush1.bf16.msra.mxu0 %v2466_v21  ;;  %1943 = vmatprep.mubr.bf16.mxu0 %v2826_v59  ;;  %v418_v12 = vld [vmem:[%s2791_s8 + $0x3e8] sm:$0xff] }
  0x5e   : > { %1903 = vmatmul.mubr.bf16.vlgmr.msra.gmra.mxu1 %v2878_v20  ;;  %1913 = vmatprep.subr.bf16.mxu0 %v2459_v23  ;;  %v542_v13 = vld [vmem:[%s2791_s8 + $0x7c8] sm:$0xff]  ;;  %v2531_v18 = vcombine.high %v414_v11, %v418_v12  ;;  %v2530_v25 = vcombine.low %v414_v11, %v418_v12 }
  0x5f   : > { %1953 = vmatpush1.bf16.msra.mxu1 %v2594_v22  ;;  %1984 = vmatprep.mubr.bf16.mxu1 %v2828_v60  ;;  %v546_v14 = vld [vmem:[%s2791_s8 + $0x7e8] sm:$0xff] }
  0x60   : > { %1954 = vmatprep.subr.bf16.mxu1 %v2587_v24  ;;  %v2659_v19 = vcombine.high %v542_v13, %v546_v14  ;;  %v406_v21 = vld [vmem:[%s2791_s8 + $0x388] sm:$0xff]  ;;  %v2658_v26 = vcombine.low %v542_v13, %v546_v14 }
  0x61   : > { %1914 = vmatpush1.bf16.msra.mxu0 %v2458_v29  ;;  %v410_v22 = vld [vmem:[%s2791_s8 + $0x3a8] sm:$0xff] }
  0x62   : > { %1915 = vmatprep.subr.bf16.mxu0 %v2451_v31  ;;  %v534_v23 = vld [vmem:[%s2791_s8 + $0x788] sm:$0xff]  ;;  %v2523_v27 = vcombine.high %v406_v21, %v410_v22  ;;  %v2522_v33 = vcombine.low %v406_v21, %v410_v22 }
  0x63   : > { %1955 = vmatpush1.bf16.msra.mxu1 %v2586_v30  ;;  %v538_v24 = vld [vmem:[%s2791_s8 + $0x7a8] sm:$0xff] }
  0x64   : > { %1956 = vmatprep.subr.bf16.mxu1 %v2579_v32  ;;  %v2651_v28 = vcombine.high %v534_v23, %v538_v24  ;;  %v398_v29 = vld [vmem:[%s2791_s8 + $0x348] sm:$0xff]  ;;  %v2650_v34 = vcombine.low %v534_v23, %v538_v24 }
  0x65   : > { %1916 = vmatpush1.bf16.msra.mxu0 %v2450_v37  ;;  %v402_v30 = vld [vmem:[%s2791_s8 + $0x368] sm:$0xff] }
  0x66   : > { %1917 = vmatprep.subr.bf16.mxu0 %v2443_v39  ;;  %v526_v31 = vld [vmem:[%s2791_s8 + $0x748] sm:$0xff]  ;;  %v2515_v35 = vcombine.high %v398_v29, %v402_v30  ;;  %v2514_v41 = vcombine.low %v398_v29, %v402_v30 }
  0x67   : > { %1957 = vmatpush1.bf16.msra.mxu1 %v2578_v38  ;;  %v530_v32 = vld [vmem:[%s2791_s8 + $0x768] sm:$0xff] }
  0x68   : > { %1958 = vmatprep.subr.bf16.mxu1 %v2571_v40  ;;  %v2643_v36 = vcombine.high %v526_v31, %v530_v32  ;;  %v390_v37 = vld [vmem:[%s2791_s8 + $0x308] sm:$0xff]  ;;  %v2642_v42 = vcombine.low %v526_v31, %v530_v32 }
  0x69   : > { %1918 = vmatpush1.bf16.msra.mxu0 %v2442_v45  ;;  %v394_v38 = vld [vmem:[%s2791_s8 + $0x328] sm:$0xff] }
  0x6a   : > { %1919 = vmatprep.subr.bf16.mxu0 %v2435_v47  ;;  %v518_v39 = vld [vmem:[%s2791_s8 + $0x708] sm:$0xff]  ;;  %v2507_v43 = vcombine.high %v390_v37, %v394_v38  ;;  %v2506_v49 = vcombine.low %v390_v37, %v394_v38 }
  0x6b   : > { %1959 = vmatpush1.bf16.msra.mxu1 %v2570_v46  ;;  %v522_v40 = vld [vmem:[%s2791_s8 + $0x728] sm:$0xff] }
  0x6c   : > { %1960 = vmatprep.subr.bf16.mxu1 %v2563_v48  ;;  %v2635_v44 = vcombine.high %v518_v39, %v522_v40  ;;  %v382_v45 = vld [vmem:[%s2791_s8 + $0x2c8] sm:$0xff]  ;;  %v2634_v50 = vcombine.low %v518_v39, %v522_v40 }
  0x6d   : > { %1920 = vmatpush1.bf16.msra.mxu0 %v2434_v53  ;;  %v386_v46 = vld [vmem:[%s2791_s8 + $0x2e8] sm:$0xff] }
  0x6e   : > { %1921 = vmatprep.subr.bf16.mxu0 %v2427_v55  ;;  %v510_v47 = vld [vmem:[%s2791_s8 + $0x6c8] sm:$0xff]  ;;  %v2499_v51 = vcombine.high %v382_v45, %v386_v46  ;;  %v2498_v57 = vcombine.low %v382_v45, %v386_v46 }
  0x6f   : > { %1961 = vmatpush1.bf16.msra.mxu1 %v2562_v54  ;;  %v514_v48 = vld [vmem:[%s2791_s8 + $0x6e8] sm:$0xff] }
  0x70   : > { %1962 = vmatprep.subr.bf16.mxu1 %v2555_v56  ;;  %v2627_v52 = vcombine.high %v510_v47, %v514_v48  ;;  %v374_v53 = vld [vmem:[%s2791_s8 + $0x288] sm:$0xff]  ;;  %v2626_v58 = vcombine.low %v510_v47, %v514_v48 }
  0x71   : > { %1922 = vmatpush1.bf16.msra.mxu0 %v2426_v63  ;;  %v378_v54 = vld [vmem:[%s2791_s8 + $0x2a8] sm:$0xff] }
  0x72   : > { %1923 = vmatprep.subr.bf16.mxu0 %v2419_v1  ;;  %v502_v55 = vld [vmem:[%s2791_s8 + $0x688] sm:$0xff]  ;;  %v2491_v61 = vcombine.high %v374_v53, %v378_v54  ;;  %v2490_v3 = vcombine.low %v374_v53, %v378_v54 }
  0x73   : > { %1963 = vmatpush1.bf16.msra.mxu1 %v2554_v0  ;;  %v506_v56 = vld [vmem:[%s2791_s8 + $0x6a8] sm:$0xff] }
  0x74   : > { %1964 = vmatprep.subr.bf16.mxu1 %v2547_v2  ;;  %v2619_v62 = vcombine.high %v502_v55, %v506_v56  ;;  %v366_v63 = vld [vmem:[%s2791_s8 + $0x248] sm:$0xff]  ;;  %v2618_v4 = vcombine.low %v502_v55, %v506_v56 }
  0x75   : > { %1924 = vmatpush1.bf16.msra.mxu0 %v2418_v7  ;;  %v370_v0 = vld [vmem:[%s2791_s8 + $0x268] sm:$0xff] }
  0x76   : > { %1925 = vmatprep.subr.bf16.mxu0 %v2411_v9  ;;  %v494_v1 = vld [vmem:[%s2791_s8 + $0x648] sm:$0xff]  ;;  %v2483_v5 = vcombine.high %v366_v63, %v370_v0  ;;  %v2482_v11 = vcombine.low %v366_v63, %v370_v0 }
  0x77   : > { %1965 = vmatpush1.bf16.msra.mxu1 %v2546_v8  ;;  %v498_v2 = vld [vmem:[%s2791_s8 + $0x668] sm:$0xff] }
  0x78   : > { %1966 = vmatprep.subr.bf16.mxu1 %v2539_v10  ;;  %v2611_v6 = vcombine.high %v494_v1, %v498_v2  ;;  %v358_v7 = vld [vmem:[%s2791_s8 + $0x208] sm:$0xff]  ;;  %v2610_v12 = vcombine.low %v494_v1, %v498_v2 }
  0x79   : > { %1926 = vmatpush1.bf16.msra.mxu0 %v2410_v15  ;;  %v362_v8 = vld [vmem:[%s2791_s8 + $0x228] sm:$0xff]  ;;  %v351_v15 = vld [vmem:[%s2791_s8 + $0x1d0] sm:$0xff] }
  0x7a   : > { %1927 = vmatprep.subr.bf16.mxu0 %v2531_v18  ;;  %v486_v9 = vld [vmem:[%s2791_s8 + $0x608] sm:$0xff]  ;;  %v2475_v13 = vcombine.high %v358_v7, %v362_v8  ;;  %v479_v18 = vld [vmem:[%s2791_s8 + $0x5d0] sm:$0xff]  ;;  %v2474_v21 = vcombine.low %v358_v7, %v362_v8 }
  0x7b   : > { %1967 = vmatpush1.bf16.msra.mxu1 %v2538_v16  ;;  %v490_v10 = vld [vmem:[%s2791_s8 + $0x628] sm:$0xff]  ;;  %v355_v16 = vld [vmem:[%s2791_s8 + $0x1f0] sm:$0xff] }
  0x7c   : > { %1968 = vmatprep.subr.bf16.mxu1 %v2659_v19  ;;  %v2603_v14 = vcombine.high %v486_v9, %v490_v10  ;;  %v483_v19 = vld [vmem:[%s2791_s8 + $0x5f0] sm:$0xff]  ;;  %v2602_v22 = vcombine.low %v486_v9, %v490_v10  ;;  %v2469_v23 = vcombine.high %v351_v15, %v355_v16  ;;  %v2468_v29 = vcombine.low %v351_v15, %v355_v16 }
  0x7d   : > { %1928 = vmatpush2.bf16.msra.mxu0 %v2530_v25  ;;  %v2597_v24 = vcombine.high %v479_v18, %v483_v19  ;;  %v343_v25 = vld [vmem:[%s2791_s8 + $0x190] sm:$0xff]  ;;  %v2596_v30 = vcombine.low %v479_v18, %v483_v19 }
  0x7e   : > { %1929 = vmatprep.subr.bf16.mxu0 %v2523_v27  ;;  %v471_v27 = vld [vmem:[%s2791_s8 + $0x590] sm:$0xff] }
  0x7f   : > { %1969 = vmatpush2.bf16.msra.mxu1 %v2658_v26  ;;  %v347_v26 = vld [vmem:[%s2791_s8 + $0x1b0] sm:$0xff] }
  0x80   : > { %1970 = vmatprep.subr.bf16.mxu1 %v2651_v28  ;;  %v475_v28 = vld [vmem:[%s2791_s8 + $0x5b0] sm:$0xff]  ;;  %v2461_v31 = vcombine.high %v343_v25, %v347_v26  ;;  %v2460_v37 = vcombine.low %v343_v25, %v347_v26 }
  0x81   : > { %1930 = vmatpush2.bf16.msra.mxu0 %v2522_v33  ;;  %v2589_v32 = vcombine.high %v471_v27, %v475_v28  ;;  %v335_v33 = vld [vmem:[%s2791_s8 + $0x150] sm:$0xff]  ;;  %v2588_v38 = vcombine.low %v471_v27, %v475_v28 }
  0x82   : > { %1931 = vmatprep.subr.bf16.mxu0 %v2515_v35  ;;  %v463_v35 = vld [vmem:[%s2791_s8 + $0x550] sm:$0xff] }
  0x83   : > { %1971 = vmatpush2.bf16.msra.mxu1 %v2650_v34  ;;  %v339_v34 = vld [vmem:[%s2791_s8 + $0x170] sm:$0xff] }
  0x84   : > { %1972 = vmatprep.subr.bf16.mxu1 %v2643_v36  ;;  %v467_v36 = vld [vmem:[%s2791_s8 + $0x570] sm:$0xff]  ;;  %v2453_v39 = vcombine.high %v335_v33, %v339_v34  ;;  %v2452_v45 = vcombine.low %v335_v33, %v339_v34 }
  0x85   : > { %1932 = vmatpush2.bf16.msra.mxu0 %v2514_v41  ;;  %v2581_v40 = vcombine.high %v463_v35, %v467_v36  ;;  %v327_v41 = vld [vmem:[%s2791_s8 + $0x110] sm:$0xff]  ;;  %v2580_v46 = vcombine.low %v463_v35, %v467_v36 }
  0x86   : > { %1933 = vmatprep.subr.bf16.mxu0 %v2507_v43  ;;  %v455_v43 = vld [vmem:[%s2791_s8 + $0x510] sm:$0xff] }
  0x87   : > { %1973 = vmatpush2.bf16.msra.mxu1 %v2642_v42  ;;  %v331_v42 = vld [vmem:[%s2791_s8 + $0x130] sm:$0xff] }
  0x88   : > { %1974 = vmatprep.subr.bf16.mxu1 %v2635_v44  ;;  %v459_v44 = vld [vmem:[%s2791_s8 + $0x530] sm:$0xff]  ;;  %v2445_v47 = vcombine.high %v327_v41, %v331_v42  ;;  %v2444_v53 = vcombine.low %v327_v41, %v331_v42 }
  0x89   : > { %1934 = vmatpush2.bf16.msra.mxu0 %v2506_v49  ;;  %v2573_v48 = vcombine.high %v455_v43, %v459_v44  ;;  %v319_v49 = vld [vmem:[%s2791_s8 + $0xd0] sm:$0xff]  ;;  %v2572_v54 = vcombine.low %v455_v43, %v459_v44 }
  0x8a   : > { %1935 = vmatprep.subr.bf16.mxu0 %v2499_v51  ;;  %v447_v51 = vld [vmem:[%s2791_s8 + $0x4d0] sm:$0xff] }
  0x8b   : > { %1975 = vmatpush2.bf16.msra.mxu1 %v2634_v50  ;;  %v323_v50 = vld [vmem:[%s2791_s8 + $0xf0] sm:$0xff] }
  0x8c   : > { %1976 = vmatprep.subr.bf16.mxu1 %v2627_v52  ;;  %v451_v52 = vld [vmem:[%s2791_s8 + $0x4f0] sm:$0xff]  ;;  %v2437_v55 = vcombine.high %v319_v49, %v323_v50  ;;  %v2436_v63 = vcombine.low %v319_v49, %v323_v50 }
  0x8d   : > { %1936 = vmatpush2.bf16.msra.mxu0 %v2498_v57  ;;  %v2565_v56 = vcombine.high %v447_v51, %v451_v52  ;;  %v311_v57 = vld [vmem:[%s2791_s8 + $0x90] sm:$0xff]  ;;  %v2564_v0 = vcombine.low %v447_v51, %v451_v52 }
  0x8e   : > { %1937 = vmatprep.subr.bf16.mxu0 %v2491_v61  ;;  %v439_v61 = vld [vmem:[%s2791_s8 + $0x490] sm:$0xff] }
  0x8f   : > { %1977 = vmatpush2.bf16.msra.mxu1 %v2626_v58  ;;  %v315_v58 = vld [vmem:[%s2791_s8 + $0xb0] sm:$0xff] }
  0x90   : > { %1978 = vmatprep.subr.bf16.mxu1 %v2619_v62  ;;  %v443_v62 = vld [vmem:[%s2791_s8 + $0x4b0] sm:$0xff]  ;;  %v2429_v1 = vcombine.high %v311_v57, %v315_v58  ;;  %v2428_v7 = vcombine.low %v311_v57, %v315_v58 }
  0x91   : > { %1938 = vmatpush2.bf16.msra.mxu0 %v2490_v3  ;;  %v2557_v2 = vcombine.high %v439_v61, %v443_v62  ;;  %v303_v3 = vld [vmem:[%s2791_s8 + $0x50] sm:$0xff]  ;;  %v2556_v8 = vcombine.low %v439_v61, %v443_v62 }
  0x92   : > { %1939 = vmatprep.subr.bf16.mxu0 %v2483_v5  ;;  %v431_v5 = vld [vmem:[%s2791_s8 + $0x450] sm:$0xff] }
  0x93   : > { %1979 = vmatpush2.bf16.msra.mxu1 %v2618_v4  ;;  %v307_v4 = vld [vmem:[%s2791_s8 + $0x70] sm:$0xff] }
  0x94   : > { %1980 = vmatprep.subr.bf16.mxu1 %v2611_v6  ;;  %v435_v6 = vld [vmem:[%s2791_s8 + $0x470] sm:$0xff]  ;;  %v2421_v9 = vcombine.high %v303_v3, %v307_v4  ;;  %v2420_v15 = vcombine.low %v303_v3, %v307_v4 }
  0x95   : > { %1940 = vmatpush2.bf16.msra.mxu0 %v2482_v11  ;;  %v2549_v10 = vcombine.high %v431_v5, %v435_v6  ;;  %v295_v11 = vld [vmem:[%s2791_s8 + $0x10] sm:$0xff]  ;;  %v2548_v16 = vcombine.low %v431_v5, %v435_v6 }
  0x96   : > { %1941 = vmatprep.subr.bf16.mxu0 %v2475_v13  ;;  %v423_v13 = vld [vmem:[%s2791_s8 + $0x410] sm:$0xff] }
  0x97   : > { %1981 = vmatpush2.bf16.msra.mxu1 %v2610_v12  ;;  %v299_v12 = vld [vmem:[%s2791_s8 + $0x30] sm:$0xff] }
  0x98   : > { %1982 = vmatprep.subr.bf16.mxu1 %v2603_v14  ;;  %v427_v14 = vld [vmem:[%s2791_s8 + $0x430] sm:$0xff]  ;;  %v2413_v18 = vcombine.high %v295_v11, %v299_v12  ;;  %v2412_v25 = vcombine.low %v295_v11, %v299_v12 }
  0x99   : > { %1942 = vmatpush2.bf16.msra.mxu0 %v2474_v21  ;;  %v2541_v19 = vcombine.high %v423_v13, %v427_v14  ;;  %v415_v21 = vld [vmem:[%s2791_s8 + $0x3d0] sm:$0xff]  ;;  %v2540_v26 = vcombine.low %v423_v13, %v427_v14 }
  0x9a   : > { %1993 = vmatprep.subr.bf16.mxu0 %v2469_v23  ;;  %v543_v23 = vld [vmem:[%s2791_s8 + $0x7d0] sm:$0xff] }
  0x9b   : > { %1983 = vmatpush2.bf16.msra.mxu1 %v2602_v22  ;;  %v419_v22 = vld [vmem:[%s2791_s8 + $0x3f0] sm:$0xff] }
  0x9c   : > { %2034 = vmatprep.subr.bf16.mxu1 %v2597_v24  ;;  %1944 = vmatmul.mubr.bf16.vlgmr.msra.gmra.mxu0 %v2874_v17  ;;  %v547_v24 = vld [vmem:[%s2791_s8 + $0x7f0] sm:$0xff]  ;;  %v2533_v27 = vcombine.high %v415_v21, %v419_v22  ;;  %v2532_v33 = vcombine.low %v415_v21, %v419_v22 }
  0x9d   : > { %1994 = vmatpush1.bf16.msra.mxu0 %v2468_v29  ;;  %2025 = vmatprep.mubr.bf16.mxu0 %v2826_v59  ;;  %v2661_v28 = vcombine.high %v543_v23, %v547_v24  ;;  %v407_v29 = vld [vmem:[%s2791_s8 + $0x390] sm:$0xff]  ;;  %v2660_v34 = vcombine.low %v543_v23, %v547_v24 }
  0x9e   : > { %1985 = vmatmul.mubr.bf16.vlgmr.msra.gmra.mxu1 %v2878_v20  ;;  %1995 = vmatprep.subr.bf16.mxu0 %v2461_v31  ;;  %v535_v31 = vld [vmem:[%s2791_s8 + $0x790] sm:$0xff] }
  0x9f   : > { %2035 = vmatpush1.bf16.msra.mxu1 %v2596_v30  ;;  %2066 = vmatprep.mubr.bf16.mxu1 %v2828_v60  ;;  %v411_v30 = vld [vmem:[%s2791_s8 + $0x3b0] sm:$0xff] }
  0xa0   : > { %2036 = vmatprep.subr.bf16.mxu1 %v2589_v32  ;;  %v539_v32 = vld [vmem:[%s2791_s8 + $0x7b0] sm:$0xff]  ;;  %v2525_v35 = vcombine.high %v407_v29, %v411_v30  ;;  %v2524_v41 = vcombine.low %v407_v29, %v411_v30 }
  0xa1   : > { %1996 = vmatpush1.bf16.msra.mxu0 %v2460_v37  ;;  %v2653_v36 = vcombine.high %v535_v31, %v539_v32  ;;  %v399_v37 = vld [vmem:[%s2791_s8 + $0x350] sm:$0xff]  ;;  %v2652_v42 = vcombine.low %v535_v31, %v539_v32 }
  0xa2   : > { %1997 = vmatprep.subr.bf16.mxu0 %v2453_v39  ;;  %v527_v39 = vld [vmem:[%s2791_s8 + $0x750] sm:$0xff] }
  0xa3   : > { %2037 = vmatpush1.bf16.msra.mxu1 %v2588_v38  ;;  %v403_v38 = vld [vmem:[%s2791_s8 + $0x370] sm:$0xff] }
  0xa4   : > { %2038 = vmatprep.subr.bf16.mxu1 %v2581_v40  ;;  %v531_v40 = vld [vmem:[%s2791_s8 + $0x770] sm:$0xff]  ;;  %v2517_v43 = vcombine.high %v399_v37, %v403_v38  ;;  %v2516_v49 = vcombine.low %v399_v37, %v403_v38 }
  0xa5   : > { %1998 = vmatpush1.bf16.msra.mxu0 %v2452_v45  ;;  %v2645_v44 = vcombine.high %v527_v39, %v531_v40  ;;  %v391_v45 = vld [vmem:[%s2791_s8 + $0x310] sm:$0xff]  ;;  %v2644_v50 = vcombine.low %v527_v39, %v531_v40 }
  0xa6   : > { %1999 = vmatprep.subr.bf16.mxu0 %v2445_v47  ;;  %v519_v47 = vld [vmem:[%s2791_s8 + $0x710] sm:$0xff] }
  0xa7   : > { %2039 = vmatpush1.bf16.msra.mxu1 %v2580_v46  ;;  %v395_v46 = vld [vmem:[%s2791_s8 + $0x330] sm:$0xff] }
  0xa8   : > { %2040 = vmatprep.subr.bf16.mxu1 %v2573_v48  ;;  %v523_v48 = vld [vmem:[%s2791_s8 + $0x730] sm:$0xff]  ;;  %v2509_v51 = vcombine.high %v391_v45, %v395_v46  ;;  %v2508_v57 = vcombine.low %v391_v45, %v395_v46 }
  0xa9   : > { %2000 = vmatpush1.bf16.msra.mxu0 %v2444_v53  ;;  %v2637_v52 = vcombine.high %v519_v47, %v523_v48  ;;  %v383_v53 = vld [vmem:[%s2791_s8 + $0x2d0] sm:$0xff]  ;;  %v2636_v58 = vcombine.low %v519_v47, %v523_v48 }
  0xaa   : > { %2001 = vmatprep.subr.bf16.mxu0 %v2437_v55  ;;  %v511_v55 = vld [vmem:[%s2791_s8 + $0x6d0] sm:$0xff] }
  0xab   : > { %2041 = vmatpush1.bf16.msra.mxu1 %v2572_v54  ;;  %v387_v54 = vld [vmem:[%s2791_s8 + $0x2f0] sm:$0xff] }
  0xac   : > { %2042 = vmatprep.subr.bf16.mxu1 %v2565_v56  ;;  %v515_v56 = vld [vmem:[%s2791_s8 + $0x6f0] sm:$0xff]  ;;  %v2501_v61 = vcombine.high %v383_v53, %v387_v54  ;;  %v2500_v3 = vcombine.low %v383_v53, %v387_v54 }
  0xad   : > { %2002 = vmatpush1.bf16.msra.mxu0 %v2436_v63  ;;  %v2629_v62 = vcombine.high %v511_v55, %v515_v56  ;;  %v375_v63 = vld [vmem:[%s2791_s8 + $0x290] sm:$0xff]  ;;  %v2628_v4 = vcombine.low %v511_v55, %v515_v56 }
  0xae   : > { %2003 = vmatprep.subr.bf16.mxu0 %v2429_v1  ;;  %v503_v1 = vld [vmem:[%s2791_s8 + $0x690] sm:$0xff] }
  0xaf   : > { %2043 = vmatpush1.bf16.msra.mxu1 %v2564_v0  ;;  %v379_v0 = vld [vmem:[%s2791_s8 + $0x2b0] sm:$0xff] }
  0xb0   : > { %2044 = vmatprep.subr.bf16.mxu1 %v2557_v2  ;;  %v507_v2 = vld [vmem:[%s2791_s8 + $0x6b0] sm:$0xff]  ;;  %v2493_v5 = vcombine.high %v375_v63, %v379_v0  ;;  %v2492_v11 = vcombine.low %v375_v63, %v379_v0 }
  0xb1   : > { %2004 = vmatpush1.bf16.msra.mxu0 %v2428_v7  ;;  %v2621_v6 = vcombine.high %v503_v1, %v507_v2  ;;  %v367_v7 = vld [vmem:[%s2791_s8 + $0x250] sm:$0xff]  ;;  %v2620_v12 = vcombine.low %v503_v1, %v507_v2  ;;  %v312_v1 = vld [vmem:[%s2791_s8 + $0x98] sm:$0xff] }
  0xb2   : > { %2005 = vmatprep.subr.bf16.mxu0 %v2421_v9  ;;  %v495_v9 = vld [vmem:[%s2791_s8 + $0x650] sm:$0xff]  ;;  %v316_v2 = vld [vmem:[%s2791_s8 + $0xb8] sm:$0xff] }
  0xb3   : > { %2045 = vmatpush1.bf16.msra.mxu1 %v2556_v8  ;;  %v371_v8 = vld [vmem:[%s2791_s8 + $0x270] sm:$0xff] }
  0xb4   : > { %2046 = vmatprep.subr.bf16.mxu1 %v2549_v10  ;;  %v499_v10 = vld [vmem:[%s2791_s8 + $0x670] sm:$0xff]  ;;  %v2485_v13 = vcombine.high %v367_v7, %v371_v8  ;;  %v2484_v21 = vcombine.low %v367_v7, %v371_v8  ;;  %v2431_v7 = vcombine.high %v312_v1, %v316_v2 }
  0xb5   : > { %2006 = vmatpush1.bf16.msra.mxu0 %v2420_v15  ;;  %v2613_v14 = vcombine.high %v495_v9, %v499_v10  ;;  %v359_v15 = vld [vmem:[%s2791_s8 + $0x210] sm:$0xff]  ;;  %v2612_v22 = vcombine.low %v495_v9, %v499_v10  ;;  %v304_v9 = vld [vmem:[%s2791_s8 + $0x58] sm:$0xff] }
  0xb6   : > { %2007 = vmatprep.subr.bf16.mxu0 %v2413_v18  ;;  %v487_v18 = vld [vmem:[%s2791_s8 + $0x610] sm:$0xff]  ;;  %v308_v10 = vld [vmem:[%s2791_s8 + $0x78] sm:$0xff] }
  0xb7   : > { %2047 = vmatpush1.bf16.msra.mxu1 %v2548_v16  ;;  %v363_v16 = vld [vmem:[%s2791_s8 + $0x230] sm:$0xff] }
  0xb8   : > { %2048 = vmatprep.subr.bf16.mxu1 %v2541_v19  ;;  %v491_v19 = vld [vmem:[%s2791_s8 + $0x630] sm:$0xff]  ;;  %v2477_v23 = vcombine.high %v359_v15, %v363_v16  ;;  %v2476_v29 = vcombine.low %v359_v15, %v363_v16  ;;  %v2423_v15 = vcombine.high %v304_v9, %v308_v10 }
  0xb9   : > { %2008 = vmatpush1.bf16.msra.mxu0 %v2412_v25  ;;  %v2605_v24 = vcombine.high %v487_v18, %v491_v19  ;;  %v352_v25 = vld [vmem:[%s2791_s8 + $0x1d8] sm:$0xff]  ;;  %v2604_v30 = vcombine.low %v487_v18, %v491_v19 }
  0xba   : > { %2009 = vmatprep.subr.bf16.mxu0 %v2533_v27  ;;  %v480_v27 = vld [vmem:[%s2791_s8 + $0x5d8] sm:$0xff] }
  0xbb   : > { %2049 = vmatpush1.bf16.msra.mxu1 %v2540_v26  ;;  %v356_v26 = vld [vmem:[%s2791_s8 + $0x1f8] sm:$0xff] }
  0xbc   : > { %2050 = vmatprep.subr.bf16.mxu1 %v2661_v28  ;;  %v484_v28 = vld [vmem:[%s2791_s8 + $0x5f8] sm:$0xff]  ;;  %v2471_v31 = vcombine.high %v352_v25, %v356_v26  ;;  %v2470_v37 = vcombine.low %v352_v25, %v356_v26 }
  0xbd   : > { %2010 = vmatpush2.bf16.msra.mxu0 %v2532_v33  ;;  %v2599_v32 = vcombine.high %v480_v27, %v484_v28  ;;  %v344_v33 = vld [vmem:[%s2791_s8 + $0x198] sm:$0xff]  ;;  %v2598_v38 = vcombine.low %v480_v27, %v484_v28 }
  0xbe   : > { %2011 = vmatprep.subr.bf16.mxu0 %v2525_v35  ;;  %v472_v35 = vld [vmem:[%s2791_s8 + $0x598] sm:$0xff] }
  0xbf   : > { %2051 = vmatpush2.bf16.msra.mxu1 %v2660_v34  ;;  %v348_v34 = vld [vmem:[%s2791_s8 + $0x1b8] sm:$0xff] }
  0xc0   : > { %2052 = vmatprep.subr.bf16.mxu1 %v2653_v36  ;;  %v476_v36 = vld [vmem:[%s2791_s8 + $0x5b8] sm:$0xff]  ;;  %v2463_v39 = vcombine.high %v344_v33, %v348_v34  ;;  %v2462_v45 = vcombine.low %v344_v33, %v348_v34 }
  0xc1   : > { %2012 = vmatpush2.bf16.msra.mxu0 %v2524_v41  ;;  %v2591_v40 = vcombine.high %v472_v35, %v476_v36  ;;  %v336_v41 = vld [vmem:[%s2791_s8 + $0x158] sm:$0xff]  ;;  %v2590_v46 = vcombine.low %v472_v35, %v476_v36 }
  0xc2   : > { %2013 = vmatprep.subr.bf16.mxu0 %v2517_v43  ;;  %v464_v43 = vld [vmem:[%s2791_s8 + $0x558] sm:$0xff] }
  0xc3   : > { %2053 = vmatpush2.bf16.msra.mxu1 %v2652_v42  ;;  %v340_v42 = vld [vmem:[%s2791_s8 + $0x178] sm:$0xff] }
  0xc4   : > { %2054 = vmatprep.subr.bf16.mxu1 %v2645_v44  ;;  %v468_v44 = vld [vmem:[%s2791_s8 + $0x578] sm:$0xff]  ;;  %v2455_v47 = vcombine.high %v336_v41, %v340_v42  ;;  %v2454_v53 = vcombine.low %v336_v41, %v340_v42 }
  0xc5   : > { %2014 = vmatpush2.bf16.msra.mxu0 %v2516_v49  ;;  %v2583_v48 = vcombine.high %v464_v43, %v468_v44  ;;  %v328_v49 = vld [vmem:[%s2791_s8 + $0x118] sm:$0xff]  ;;  %v2582_v54 = vcombine.low %v464_v43, %v468_v44 }
  0xc6   : > { %2015 = vmatprep.subr.bf16.mxu0 %v2509_v51  ;;  %v456_v51 = vld [vmem:[%s2791_s8 + $0x518] sm:$0xff] }
  0xc7   : > { %2055 = vmatpush2.bf16.msra.mxu1 %v2644_v50  ;;  %v332_v50 = vld [vmem:[%s2791_s8 + $0x138] sm:$0xff] }
  0xc8   : > { %2056 = vmatprep.subr.bf16.mxu1 %v2637_v52  ;;  %v460_v52 = vld [vmem:[%s2791_s8 + $0x538] sm:$0xff]  ;;  %v2447_v55 = vcombine.high %v328_v49, %v332_v50 }
  0xc9   : > { %2016 = vmatpush2.bf16.msra.mxu0 %v2508_v57  ;;  %v2575_v56 = vcombine.high %v456_v51, %v460_v52  ;;  %v320_v57 = vld [vmem:[%s2791_s8 + $0xd8] sm:$0xff] }
  0xca   : > { %2017 = vmatprep.subr.bf16.mxu0 %v2501_v61  ;;  %v448_v61 = vld [vmem:[%s2791_s8 + $0x4d8] sm:$0xff] }
  0xcb   : > { %2057 = vmatpush2.bf16.msra.mxu1 %v2636_v58  ;;  %v324_v58 = vld [vmem:[%s2791_s8 + $0xf8] sm:$0xff] }
  0xcc   : > { %2058 = vmatprep.subr.bf16.mxu1 %v2629_v62  ;;  %v2446_v62 = vcombine.low %v328_v49, %v332_v50  ;;  %v2439_v63 = vcombine.high %v320_v57, %v324_v58  ;;  %v296_v18 = vld [vmem:[%s2791_s8 + $0x18] sm:$0xff] }
  0xcd   : > { %2018 = vmatpush2.bf16.msra.mxu0 %v2500_v3  ;;  %v440_v3 = vld [vmem:[%s2791_s8 + $0x498] sm:$0xff] }
  0xce   : > { %2019 = vmatprep.subr.bf16.mxu0 %v2493_v5  ;;  %v2438_v5 = vcombine.low %v320_v57, %v324_v58  ;;  %v300_v19 = vld [vmem:[%s2791_s8 + $0x38] sm:$0xff] }
  0xcf   : > { %2059 = vmatpush2.bf16.msra.mxu1 %v2628_v4  ;;  %v444_v4 = vld [vmem:[%s2791_s8 + $0x4b8] sm:$0xff]  ;;  %v2415_v25 = vcombine.high %v296_v18, %v300_v19 }
  0xd0   : > { %2060 = vmatprep.subr.bf16.mxu1 %v2621_v6  ;;  %v2559_v8 = vcombine.high %v440_v3, %v444_v4  ;;  %v416_v27 = vld [vmem:[%s2791_s8 + $0x3d8] sm:$0xff] }
  0xd1   : > { %2020 = vmatpush2.bf16.msra.mxu0 %v2492_v11  ;;  %v432_v11 = vld [vmem:[%s2791_s8 + $0x458] sm:$0xff] }
  0xd2   : > { %2021 = vmatprep.subr.bf16.mxu0 %v2485_v13  ;;  %v2430_v13 = vcombine.low %v312_v1, %v316_v2  ;;  %v420_v28 = vld [vmem:[%s2791_s8 + $0x3f8] sm:$0xff] }
  0xd3   : > { %2061 = vmatpush2.bf16.msra.mxu1 %v2620_v12  ;;  %v436_v12 = vld [vmem:[%s2791_s8 + $0x478] sm:$0xff]  ;;  %v2535_v33 = vcombine.high %v416_v27, %v420_v28 }
  0xd4   : > { %2062 = vmatprep.subr.bf16.mxu1 %v2613_v14  ;;  %v2558_v14 = vcombine.low %v440_v3, %v444_v4  ;;  %v2551_v16 = vcombine.high %v432_v11, %v436_v12  ;;  %v408_v35 = vld [vmem:[%s2791_s8 + $0x398] sm:$0xff] }
  0xd5   : > { %2022 = vmatpush2.bf16.msra.mxu0 %v2484_v21  ;;  %v424_v21 = vld [vmem:[%s2791_s8 + $0x418] sm:$0xff] }
  0xd6   : > { %2023 = vmatprep.subr.bf16.mxu0 %v2477_v23  ;;  %v2422_v23 = vcombine.low %v304_v9, %v308_v10  ;;  %v412_v36 = vld [vmem:[%s2791_s8 + $0x3b8] sm:$0xff] }
  0xd7   : > { %2063 = vmatpush2.bf16.msra.mxu1 %v2612_v22  ;;  %v428_v22 = vld [vmem:[%s2791_s8 + $0x438] sm:$0xff]  ;;  %v2527_v41 = vcombine.high %v408_v35, %v412_v36 }
  0xd8   : > { %2064 = vmatprep.subr.bf16.mxu1 %v2605_v24  ;;  %v2550_v24 = vcombine.low %v432_v11, %v436_v12  ;;  %v2543_v26 = vcombine.high %v424_v21, %v428_v22  ;;  %v400_v43 = vld [vmem:[%s2791_s8 + $0x358] sm:$0xff] }
  0xd9   : > { %2024 = vmatpush2.bf16.msra.mxu0 %v2476_v29  ;;  %v544_v29 = vld [vmem:[%s2791_s8 + $0x7d8] sm:$0xff] }
  0xda   : > { %2075 = vmatprep.subr.bf16.mxu0 %v2471_v31  ;;  %v2414_v31 = vcombine.low %v296_v18, %v300_v19  ;;  %v404_v44 = vld [vmem:[%s2791_s8 + $0x378] sm:$0xff] }
  0xdb   : > { %2065 = vmatpush2.bf16.msra.mxu1 %v2604_v30  ;;  %v548_v30 = vld [vmem:[%s2791_s8 + $0x7f8] sm:$0xff]  ;;  %v2519_v49 = vcombine.high %v400_v43, %v404_v44 }
  0xdc   : > { %2116 = vmatprep.subr.bf16.mxu1 %v2599_v32  ;;  %2026 = vmatmul.mubr.bf16.vlgmr.msra.gmra.mxu0 %v2874_v17  ;;  %v2542_v32 = vcombine.low %v424_v21, %v428_v22  ;;  %v2663_v34 = vcombine.high %v544_v29, %v548_v30  ;;  %v376_v3 = vld [vmem:[%s2791_s8 + $0x298] sm:$0xff] }
  0xdd   : > { %2076 = vmatpush1.bf16.msra.mxu0 %v2470_v37  ;;  %2107 = vmatprep.mubr.bf16.mxu0 %v2826_v59  ;;  %v452_v59 = vld [vmem:[%s2791_s8 + $0x4f8] sm:$0xff] }
  0xde   : > { %2067 = vmatmul.mubr.bf16.vlgmr.msra.gmra.mxu1 %v2878_v20  ;;  %2077 = vmatprep.subr.bf16.mxu0 %v2463_v39  ;;  %v2567_v0 = vcombine.high %v448_v61, %v452_v59  ;;  %v2566_v6 = vcombine.low %v448_v61, %v452_v59  ;;  %v536_v37 = vld [vmem:[%s2791_s8 + $0x798] sm:$0xff]  ;;  %v2534_v39 = vcombine.low %v416_v27, %v420_v28 }
  0xdf   : > { %2117 = vmatpush1.bf16.msra.mxu1 %v2598_v38  ;;  %2148 = vmatprep.mubr.bf16.mxu1 %v2828_v60  ;;  %v2574_v60 = vcombine.low %v456_v51, %v460_v52  ;;  %v540_v38 = vld [vmem:[%s2791_s8 + $0x7b8] sm:$0xff] }
  0xe0   : > { %2118 = vmatprep.subr.bf16.mxu1 %v2591_v40  ;;  %v2662_v40 = vcombine.low %v544_v29, %v548_v30  ;;  %v2655_v42 = vcombine.high %v536_v37, %v540_v38  ;;  %v392_v51 = vld [vmem:[%s2791_s8 + $0x318] sm:$0xff] }
  0xe1   : > { %2078 = vmatpush1.bf16.msra.mxu0 %v2462_v45  ;;  %v528_v45 = vld [vmem:[%s2791_s8 + $0x758] sm:$0xff] }
  0xe2   : > { %2079 = vmatprep.subr.bf16.mxu0 %v2455_v47  ;;  %v2526_v47 = vcombine.low %v408_v35, %v412_v36  ;;  %v396_v52 = vld [vmem:[%s2791_s8 + $0x338] sm:$0xff]  ;;  %v278_v36 = vld [vmem:[#allocation2] sm:$0xff] }
  0xe3   : > { %2119 = vmatpush1.bf16.msra.mxu1 %v2590_v46  ;;  %v532_v46 = vld [vmem:[%s2791_s8 + $0x778] sm:$0xff]  ;;  %v2511_v57 = vcombine.high %v392_v51, %v396_v52 }
  0xe4   : > { %2120 = vmatprep.subr.bf16.mxu1 %v2583_v48  ;;  %v2654_v48 = vcombine.low %v536_v37, %v540_v38  ;;  %v2647_v50 = vcombine.high %v528_v45, %v532_v46  ;;  %v384_v61 = vld [vmem:[%s2791_s8 + $0x2d8] sm:$0xff] }
  0xe5   : > { %2080 = vmatpush1.bf16.msra.mxu0 %v2454_v53  ;;  %v520_v53 = vld [vmem:[%s2791_s8 + $0x718] sm:$0xff] }
  0xe6   : > { %2081 = vmatprep.subr.bf16.mxu0 %v2447_v55  ;;  %v2518_v55 = vcombine.low %v400_v43, %v404_v44  ;;  %v388_v59 = vld [vmem:[%s2791_s8 + $0x2f8] sm:$0xff] }
  0xe7   : > { %2121 = vmatpush1.bf16.msra.mxu1 %v2582_v54  ;;  %v524_v54 = vld [vmem:[%s2791_s8 + $0x738] sm:$0xff]  ;;  %v2503_v1 = vcombine.high %v384_v61, %v388_v59 }
  0xe8   : > { %2122 = vmatprep.subr.bf16.mxu1 %v2575_v56  ;;  %v2646_v56 = vcombine.low %v528_v45, %v532_v46  ;;  %v2639_v58 = vcombine.high %v520_v53, %v524_v54  ;;  %v380_v4 = vld [vmem:[%s2791_s8 + $0x2b8] sm:$0xff] }
  0xe9   : > { %2082 = vmatpush1.bf16.msra.mxu0 %v2446_v62  ;;  %v512_v62 = vld [vmem:[%s2791_s8 + $0x6d8] sm:$0xff]  ;;  %v2495_v9 = vcombine.high %v376_v3, %v380_v4 }
  0xea   : > { %2083 = vmatprep.subr.bf16.mxu0 %v2439_v63  ;;  %v2510_v63 = vcombine.low %v392_v51, %v396_v52  ;;  %v368_v11 = vld [vmem:[%s2791_s8 + $0x258] sm:$0xff] }
  0xeb   : > { %2123 = vmatpush1.bf16.msra.mxu1 %v2574_v60  ;;  %v516_v60 = vld [vmem:[%s2791_s8 + $0x6f8] sm:$0xff] }
  0xec   : > { %2124 = vmatprep.subr.bf16.mxu1 %v2567_v0  ;;  %v2638_v0 = vcombine.low %v520_v53, %v524_v54  ;;  %v2631_v2 = vcombine.high %v512_v62, %v516_v60  ;;  %v372_v12 = vld [vmem:[%s2791_s8 + $0x278] sm:$0xff] }
  0xed   : > { %2084 = vmatpush1.bf16.msra.mxu0 %v2438_v5  ;;  %v504_v5 = vld [vmem:[%s2791_s8 + $0x698] sm:$0xff]  ;;  %v2487_v18 = vcombine.high %v368_v11, %v372_v12 }
  0xee   : > { %2085 = vmatprep.subr.bf16.mxu0 %v2431_v7  ;;  %v2502_v7 = vcombine.low %v384_v61, %v388_v59  ;;  %v360_v21 = vld [vmem:[%s2791_s8 + $0x218] sm:$0xff] }
  0xef   : > { %2125 = vmatpush1.bf16.msra.mxu1 %v2566_v6  ;;  %v508_v6 = vld [vmem:[%s2791_s8 + $0x6b8] sm:$0xff] }
  0xf0   : > { %2126 = vmatprep.subr.bf16.mxu1 %v2559_v8  ;;  %v2630_v8 = vcombine.low %v512_v62, %v516_v60  ;;  %v2623_v10 = vcombine.high %v504_v5, %v508_v6  ;;  %v364_v22 = vld [vmem:[%s2791_s8 + $0x238] sm:$0xff]  ;;  %v282_v60 = vld [vmem:[#allocation2 + $0x20] sm:$0xff] }
  0xf1   : > { %2086 = vmatpush1.bf16.msra.mxu0 %v2430_v13  ;;  %v496_v13 = vld [vmem:[%s2791_s8 + $0x658] sm:$0xff]  ;;  %v2479_v27 = vcombine.high %v360_v21, %v364_v22  ;;  %v2478_v29 = vcombine.low %v360_v21, %v364_v22 }
  0xf2   : > { %2087 = vmatprep.subr.bf16.mxu0 %v2423_v15  ;;  %v2494_v15 = vcombine.low %v376_v3, %v380_v4  ;;  %v279_v46 = vld [vmem:[#allocation2 + $0x18] sm:$0xff] }
  0xf3   : > { %2127 = vmatpush1.bf16.msra.mxu1 %v2558_v14  ;;  %v500_v14 = vld [vmem:[%s2791_s8 + $0x678] sm:$0xff] }
  0xf4   : > { %2128 = vmatprep.subr.bf16.mxu1 %v2551_v16  ;;  %v2622_v16 = vcombine.low %v504_v5, %v508_v6  ;;  %v2615_v19 = vcombine.high %v496_v13, %v500_v14 }
  0xf5   : > { %2088 = vmatpush1.bf16.msra.mxu0 %v2422_v23  ;;  %v488_v23 = vld [vmem:[%s2791_s8 + $0x618] sm:$0xff] }
  0xf6   : > { %2089 = vmatprep.subr.bf16.mxu0 %v2415_v25  ;;  %v2486_v25 = vcombine.low %v368_v11, %v372_v12  ;;  %v284_v12 = vld [vmem:[#allocation2 + $0x38] sm:$0xff] }
  0xf7   : > { %2129 = vmatpush1.bf16.msra.mxu1 %v2550_v24  ;;  %v492_v24 = vld [vmem:[%s2791_s8 + $0x638] sm:$0xff] }
  0xf8   : > { %2130 = vmatprep.subr.bf16.mxu1 %v2543_v26  ;;  %v2614_v26 = vcombine.low %v496_v13, %v500_v14  ;;  %v2607_v28 = vcombine.high %v488_v23, %v492_v24  ;;  %v2606_v30 = vcombine.low %v488_v23, %v492_v24 }
  0xf9   : > { %2090 = vmatpush1.bf16.msra.mxu0 %v2414_v31 }
  0xfa   : > { %2091 = vmatprep.subr.bf16.mxu0 %v2535_v33 }
  0xfb   : > { %2131 = vmatpush1.bf16.msra.mxu1 %v2542_v32  ;;  %v277_v32 = vld [vmem:[#allocation2 + $0x30] sm:$0xff] }
  0xfc   : > { %2132 = vmatprep.subr.bf16.mxu1 %v2663_v34 }
  0xfd   : > { %2092 = vmatpush2.bf16.msra.mxu0 %v2534_v39 }
  0xfe   : > { %2093 = vmatprep.subr.bf16.mxu0 %v2527_v41 }
  0xff   : > { %2133 = vmatpush2.bf16.msra.mxu1 %v2662_v40 }
 0x100   : > { %2134 = vmatprep.subr.bf16.mxu1 %v2655_v42 }
 0x101   : > { %2094 = vmatpush2.bf16.msra.mxu0 %v2526_v47 }
 0x102   : > { %2095 = vmatprep.subr.bf16.mxu0 %v2519_v49  ;;  %v280_v49 = vld [vmem:[#allocation2 + $0x10] sm:$0xff] }
 0x103   : > { %2135 = vmatpush2.bf16.msra.mxu1 %v2654_v48 }
 0x104   : > { %2136 = vmatprep.subr.bf16.mxu1 %v2647_v50 }
 0x105   : > { %2096 = vmatpush2.bf16.msra.mxu0 %v2518_v55 }
 0x106   : > { %2097 = vmatprep.subr.bf16.mxu0 %v2511_v57 }
 0x107   : > { %2137 = vmatpush2.bf16.msra.mxu1 %v2646_v56 }
 0x108   : > { %2138 = vmatprep.subr.bf16.mxu1 %v2639_v58  ;;  %v281_v58 = vld [vmem:[#allocation2 + $0x8] sm:$0xff] }
 0x109   : > { %2098 = vmatpush2.bf16.msra.mxu0 %v2510_v63 }
 0x10a   : > { %2099 = vmatprep.subr.bf16.mxu0 %v2503_v1 }
 0x10b   : > { %2139 = vmatpush2.bf16.msra.mxu1 %v2638_v0 }
 0x10c   : > { %2140 = vmatprep.subr.bf16.mxu1 %v2631_v2 }
 0x10d   : > { %2100 = vmatpush2.bf16.msra.mxu0 %v2502_v7 }
 0x10e   : > { %2101 = vmatprep.subr.bf16.mxu0 %v2495_v9 }
 0x10f   : > { %2141 = vmatpush2.bf16.msra.mxu1 %v2630_v8  ;;  %v283_v8 = vld [vmem:[#allocation2 + $0x28] sm:$0xff] }
 0x110   : > { %2142 = vmatprep.subr.bf16.mxu1 %v2623_v10 }
 0x111   : > { %2102 = vmatpush2.bf16.msra.mxu0 %v2494_v15 }
 0x112   : > { %2103 = vmatprep.subr.bf16.mxu0 %v2487_v18 }
 0x113   : > { %2143 = vmatpush2.bf16.msra.mxu1 %v2622_v16 }
 0x114   : > { %2144 = vmatprep.subr.bf16.mxu1 %v2615_v19 }
 0x115   : > { %2104 = vmatpush2.bf16.msra.mxu0 %v2486_v25 }
 0x116   : > { %2105 = vmatprep.subr.bf16.mxu0 %v2479_v27 }
 0x117   : > { %2145 = vmatpush2.bf16.msra.mxu1 %v2614_v26 }
 0x118   : > { %2146 = vmatprep.subr.bf16.mxu1 %v2607_v28 }
 0x119   : > { %2106 = vmatpush2.bf16.msra.mxu0 %v2478_v29 }
 0x11b   : > { %2147 = vmatpush2.bf16.msra.mxu1 %v2606_v30 }
 0x11c   : > { %v1863_v31 = vpop.f32.mrf.mxu0  ;;  %2108 = vmatmul.mubr.bf16.vlgmr.msra.gmra.mxu0 %v2874_v17 }
 0x11e   : > { %v1904_v33 = vpop.f32.mrf.mxu1  ;;  %2149 = vmatmul.mubr.bf16.vlgmr.msra.gmra.mxu1 %v2878_v20  ;;  %v1865_v35 = vpop.f32.mrf.mxu0 }
 0x11f   : > { %v1905_v34 = vadd.f32 %v1904_v33, %v1863_v31 }
 0x120   : > { %v1906_v37 = vpop.f32.mrf.mxu1  ;;  %v1867_v40 = vpop.f32.mrf.mxu0 }
 0x121   : > { %v2157_v38 = vadd.f32 %v1905_v34, %v277_v32  ;;  %v1907_v39 = vadd.f32 %v1906_v37, %v1865_v35 }
 0x122   : > { %v1908_v41 = vpop.f32.mrf.mxu1  ;;  %v1868_v43 = vpop.f32.mrf.mxu0 }
 0x123   : > { %2165 = vst [vmem:[#allocation2 + $0x30] sm:$0xff] %v2157_v38  ;;  %v2158_v42 = vadd.f32 %v1907_v39, %v278_v36 }
 0x124   : > { %v1909_v44 = vpop.f32.mrf.mxu1 }
 0x125   : > { %2166 = vst [vmem:[#allocation2] sm:$0xff] %v2158_v42 }
 0x15c   : > { %v1945_v45 = vpop.f32.mrf.mxu0 }
 0x15e   : > { %v1986_v17 = vpop.f32.mrf.mxu1  ;;  %v1947_v48 = vpop.f32.mrf.mxu0 }
 0x15f   : > { %v1987_v47 = vadd.f32 %v1986_v17, %v1945_v45 }
 0x160   : > { %v1988_v20 = vpop.f32.mrf.mxu1  ;;  %v1949_v52 = vpop.f32.mrf.mxu0 }
 0x161   : > { %v2159_v50 = vadd.f32 %v1987_v47, %v279_v46  ;;  %v1989_v51 = vadd.f32 %v1988_v20, %v1947_v48 }
 0x162   : > { %v1990_v53 = vpop.f32.mrf.mxu1  ;;  %v1950_v55 = vpop.f32.mrf.mxu0 }
 0x163   : > { %2167 = vst [vmem:[#allocation2 + $0x18] sm:$0xff] %v2159_v50  ;;  %v2160_v54 = vadd.f32 %v1989_v51, %v280_v49 }
 0x164   : > { %v1991_v56 = vpop.f32.mrf.mxu1 }
 0x165   : > { %2168 = vst [vmem:[#allocation2 + $0x10] sm:$0xff] %v2160_v54 }
 0x19c   : > { %v2027_v57 = vpop.f32.mrf.mxu0 }
 0x19e   : > { %v2068_v61 = vpop.f32.mrf.mxu1  ;;  %v2029_v62 = vpop.f32.mrf.mxu0 }
 0x19f   : > { %v2069_v59 = vadd.f32 %v2068_v61, %v2027_v57 }
 0x1a0   : > { %v2070_v63 = vpop.f32.mrf.mxu1  ;;  %v2031_v2 = vpop.f32.mrf.mxu0 }
 0x1a1   : > { %v2161_v0 = vadd.f32 %v2069_v59, %v281_v58  ;;  %v2071_v1 = vadd.f32 %v2070_v63, %v2029_v62 }
 0x1a2   : > { %v2072_v3 = vpop.f32.mrf.mxu1  ;;  %v2032_v5 = vpop.f32.mrf.mxu0 }
 0x1a3   : > { %2169 = vst [vmem:[#allocation2 + $0x8] sm:$0xff] %v2161_v0  ;;  %v2162_v4 = vadd.f32 %v2071_v1, %v282_v60 }
 0x1a4   : > { %v2073_v6 = vpop.f32.mrf.mxu1 }
 0x1a5   : > { %2170 = vst [vmem:[#allocation2 + $0x20] sm:$0xff] %v2162_v4 }
 0x1dc   : > { %v2109_v7 = vpop.f32.mrf.mxu0 }
 0x1de   : > { %v2150_v9 = vpop.f32.mrf.mxu1  ;;  %v2111_v11 = vpop.f32.mrf.mxu0 }
 0x1df   : > { %v2151_v10 = vadd.f32 %v2150_v9, %v2109_v7 }
 0x1e0   : > { %v2152_v13 = vpop.f32.mrf.mxu1  ;;  %v2113_v16 = vpop.f32.mrf.mxu0 }
 0x1e1   : > { %v2163_v14 = vadd.f32 %v2151_v10, %v283_v8  ;;  %v2153_v15 = vadd.f32 %v2152_v13, %v2111_v11  ;;  %2176 = sbr.rel (%p2664_p6) target bundleno = 718 (0x2ce), region = 52 }
 0x1e2   : > { %v2154_v18 = vpop.f32.mrf.mxu1  ;;  %v2114_v21 = vpop.f32.mrf.mxu0 }
 0x1e3   : > { %2171 = vst [vmem:[#allocation2 + $0x28] sm:$0xff] %v2163_v14  ;;  %v2164_v19 = vadd.f32 %v2153_v15, %v284_v12 }
 0x1e4   : > { %v2155_v22 = vpop.f32.mrf.mxu1 }
 0x1e5   : > { %2172 = vst [vmem:[#allocation2 + $0x38] sm:$0xff] %v2164_v19 }
 0x1e6   : > { %v2187_v23 = vlaneseq  ;;  %v2734_v24 = vmov 0.0   ;;  %vm2735_vm0 = vmmov 0   ;;  %v2185_v25 = vld [vmem:[%s3154_s3] sm:$0xff]  ;;  %v2177_v27 = vld [vmem:[#allocation2 + $0x30] sm:$0xff]  ;;  %v2179_v29 = vld [vmem:[#allocation2 + $0x18] sm:$0xff] }
 0x1e7   : > { %2686 = vmatprep.subr.bf16.mxu0 %v2734_v24  ;;  %2702 = vmatprep.mubr.msk.bf16.mxu0 %vm2735_vm0, %v2734_v24  ;;  %v2178_v28 = vld [vmem:[#allocation2] sm:$0xff]  ;;  %v2180_v30 = vld [vmem:[#allocation2 + $0x10] sm:$0xff]  ;;  %v2717_v31 = vld [vmem:[%s3155_s4 + $0x38] sm:$0xff]  }
 0x1e8   : > { %v2188_v26 = vshrl.u32 %v2187_v23, 7  ;;  %v2181_v32 = vld [vmem:[#allocation2 + $0x8] sm:$0xff]  ;;  %v2182_v33 = vld [vmem:[#allocation2 + $0x20] sm:$0xff]  ;;  %2687 = vmatpush3.bf16.msra.mxu0 %v2717_v31  ;;  %v2718_v47 = vld [vmem:[%s3155_s4 + $0x30] sm:$0xff]  }
 0x1e9   : > { %2688 = vmatprep.subr.bf16.mxu0 %v2734_v24  ;;  %v2719_v61 = vld [vmem:[%s3155_s4 + $0x28] sm:$0xff]   ;;  %v2720_v59 = vld [vmem:[%s3155_s4 + $0x20] sm:$0xff]   ;;  %v2721_v62 = vld [vmem:[%s3155_s4 + $0x18] sm:$0xff]  }
 0x1ea   : > { %v2183_v34 = vld [vmem:[#allocation2 + $0x28] sm:$0xff]  ;;  %v2189_v36 = vsub.s32 0, %v2188_v26  ;;  %v2193_v37 = vsub.s32 1, %v2188_v26  ;;  %v2197_v38 = vsub.s32 2, %v2188_v26  ;;  %v2201_v39 = vsub.s32 3, %v2188_v26  ;;  %v2722_v60 = vld [vmem:[%s3155_s4 + $0x10] sm:$0xff]  }
 0x1eb   : > { %v2205_v40 = vsub.s32 4, %v2188_v26  ;;  %v2209_v41 = vsub.s32 5, %v2188_v26  ;;  %v2213_v42 = vsub.s32 6, %v2188_v26  ;;  %v2217_v43 = vsub.s32 7, %v2188_v26  ;;  %v2723_v63 = vld [vmem:[%s3155_s4 + $0x8] sm:$0xff]   ;;  %v2724_v0 = vld [vmem:[%s3155_s4] sm:$0xff]  }
 0x1ec   : > { %v2184_v35 = vld [vmem:[#allocation2 + $0x38] sm:$0xff]  ;;  %v2190_v44 = vrot.slane %v2185_v25, %v2189_v36  ;;  %v2194_v45 = vrot.slane %v2185_v25, %v2193_v37  ;;  %v2198_v46 = vrot.slane %v2185_v25, %v2197_v38  ;;  %v2202_v17 = vrot.slane %v2185_v25, %v2201_v39  ;;  %2689 = vmatpush3.bf16.msra.mxu0 %v2718_v47  ;;  %v2243_v1 = vld [vmem:[%s3152_s1] sm:$0xff] }
 0x1ed   : > { %v2206_v48 = vrot.slane %v2185_v25, %v2205_v40  ;;  %v2210_v49 = vrot.slane %v2185_v25, %v2209_v41  ;;  %v2214_v20 = vrot.slane %v2185_v25, %v2213_v42  ;;  %v2218_v50 = vrot.slane %v2185_v25, %v2217_v43  ;;  %2690 = vmatprep.subr.bf16.mxu0 %v2734_v24  ;;  %v2665_v3 = vld [vmem:[%s3156_s5] ss:$0 sm:$0xff] }
 0x1ee   : > { %v2227_v51 = vadd.f32 %v2190_v44, %v2177_v27  ;;  %v2228_v52 = vadd.f32 %v2194_v45, %v2178_v28  ;;  %v2229_v53 = vadd.f32 %v2198_v46, %v2179_v29  ;;  %v2230_v54 = vadd.f32 %v2202_v17, %v2180_v30 }
 0x1ef   : > { %v2231_v55 = vadd.f32 %v2206_v48, %v2181_v32  ;;  %v2232_v56 = vadd.f32 %v2210_v49, %v2182_v33  ;;  %v2233_v57 = vadd.f32 %v2214_v20, %v2183_v34  ;;  %v2234_v58 = vadd.f32 %v2218_v50, %v2184_v35 }
 0x1f0   : > { %2235 = vst [vmem:[%s3157_s6] sm:$0xff] %v2227_v51  ;;  %2236 = vst [vmem:[%s3157_s6 + $0x8] sm:$0xff] %v2228_v52  ;;  %2691 = vmatpush3.bf16.msra.mxu0 %v2719_v61  ;;  %v2244_v2 = vpack.c.bf16 %v2243_v1, %v2243_v1 }
 0x1f1   : > { %2237 = vst [vmem:[%s3157_s6 + $0x10] sm:$0xff] %v2229_v53  ;;  %2238 = vst [vmem:[%s3157_s6 + $0x18] sm:$0xff] %v2230_v54  ;;  %2692 = vmatprep.subr.bf16.mxu0 %v2734_v24 }
 0x1f2   : > { %2239 = vst [vmem:[%s3157_s6 + $0x20] sm:$0xff] %v2231_v55  ;;  %2240 = vst [vmem:[%s3157_s6 + $0x28] sm:$0xff] %v2232_v56 }
 0x1f3   : > { %2241 = vst [vmem:[%s3157_s6 + $0x30] sm:$0xff] %v2233_v57  ;;  %2242 = vst [vmem:[%s3157_s6 + $0x38] sm:$0xff] %v2234_v58 }
 0x1f4   : > { %2693 = vmatpush3.bf16.msra.mxu0 %v2720_v59 }
 0x1f5   : > { %2694 = vmatprep.subr.bf16.mxu0 %v2734_v24 }
 0x1f8   : > { %2695 = vmatpush3.bf16.msra.mxu0 %v2721_v62 }
 0x1f9   : > { %2696 = vmatprep.subr.bf16.mxu0 %v2734_v24 }
 0x1fc   : > { %2697 = vmatpush3.bf16.msra.mxu0 %v2722_v60 }
 0x1fd   : > { %2698 = vmatprep.subr.bf16.mxu0 %v2734_v24 }
 0x200   : > { %2699 = vmatpush3.bf16.msra.mxu0 %v2723_v63 }
 0x201   : > { %2700 = vmatprep.subr.bf16.mxu0 %v2734_v24 }
 0x204   : > { %2701 = vmatpush3.bf16.msra.mxu0 %v2724_v0 }
 0x207   : > { %2703 = vmatmul.mubr.bf16.vlgmr.msra.gmra.mxu0 %v2244_v2 }
 0x2c7   : > { %v2350_v4 = vpop.f32.mrf.mxu0 }
 0x2c8   : > { %v2351_v5 = vadd.f32 %v2665_v3, %v2350_v4 }
 0x2c9   : > { %v2704_v6 = vpop.f32.mrf.mxu0 }
 0x2ca   : > { %v2356_v7 = vmax.f32 %v2351_v5, 0.0 }
 0x2cb   : > { %v2353_v8 = vpop.f32.mrf.mxu0 }
 0x2cc   : > { %2357 = vst [vmem:[%s3157_s6 + $0x40] sm:$0xff] %v2356_v7 }
 0x2cd   : > { %v2705_v9 = vpop.f32.mrf.mxu0 }
 0x2ce PF: > { %s16_s21 = sadd.s32 1, %s2731_s21  }
 0x2cf   : > { %p13_p7 = scmp.ge.s32.totalorder %s16_s21, 6  }
 0x2d1   :  { %15 = sbr.rel (!%p13_p7) target bundleno = 1 (0x1), region = 81 }

</bundles_post_ra>
